<compile_context>
chip_gen: v5e
topology: v5e:2x2
jax: 0.10.0
libtpu: 0.0.40
codegen_flags: <defaults>
</compile_context>

<pallas_src>
import functools

import jax
import jax.numpy as jnp
from jax import lax
from jax.experimental import pallas as pl
from jax.experimental.pallas import tpu as pltpu

EPS = 1e-5  # PyTorch BatchNorm2d default


def _round_up(x, m):
    return ((x + m - 1) // m) * m


def _refinement_kernel(col_ref, x_ref, w1_ref, b1_ref, w2_ref, b2_ref,
                       w3_ref, b3_ref, out_ref, buf_ref, *, H, W, Wp, Cp):
    HWp = H * Wp
    f32 = jnp.float32
    bf16 = jnp.bfloat16
    base = 2 * Wp                                # scratch row of image row 0

    # Zero only the 2*Wp-row top/bottom border bands of the shared scratch
    # (the interior is fully rewritten every step).  Kept per-step on purpose:
    # under megacore "parallel" splitting each core owns its own scratch.
    zband = jnp.zeros((2 * Wp, 3 * Cp), bf16)
    buf_ref[0:base, :] = zband
    buf_ref[(H + 2) * Wp:(H + 4) * Wp, :] = zband

    # ------------- initial: 1x1 conv (bf16 MXU) + bias + ReLU ---------------
    y0 = jnp.dot(x_ref[0], w1_ref[...], preferred_element_type=f32)
    y0 = jnp.maximum(y0 + b1_ref[...], 0.0)      # (HWp, Cp) f32
    out_ref[0] = y0                              # park the residual here

    def conv3x3(y, w_ref, b_ref, d):
        """3x3 conv, padding=d, dilation=d, (BN-folded) bias, then ReLU."""
        col = col_ref[...]                       # (HWp, Cp) lane-dense w index

        # dx = 1 (center column): aligned full-band store.
        buf_ref[base:base + HWp, Cp:2 * Cp] = y.astype(bf16)

        # dx = 0 column (left-neighbor tap): roll down by d flat rows on the
        # XLU, zero destinations whose source pixel lies in another image row
        # or the padded column gap (circular-wrap rows fall in the masked
        # set), then store 8-aligned (no masked RMW vst).
        s0 = pltpu.roll(y, shift=d, axis=0)
        s0 = jnp.where(col >= d, s0, 0.0)
        buf_ref[base:base + HWp, 0:Cp] = s0.astype(bf16)

        # dx = 2 column (right-neighbor tap): roll up by d flat rows.
        s2 = pltpu.roll(y, shift=HWp - d, axis=0)
        s2 = jnp.where(col < W - d, s2, 0.0)
        buf_ref[base:base + HWp, 2 * Cp:3 * Cp] = s2.astype(bf16)

        # Three deep-K matmuls (K = 3*Cp), one per kernel row dy, reading
        # Wp-aligned row bands of the scratch.  acc starts from dy=0 + bias.
        rb = base - d * Wp
        acc = jnp.dot(buf_ref[rb:rb + HWp, :], w_ref[0],
                      preferred_element_type=f32) + b_ref[...]
        acc = acc + jnp.dot(buf_ref[rb + d * Wp:rb + d * Wp + HWp, :], w_ref[1],
                            preferred_element_type=f32)
        acc = acc + jnp.dot(buf_ref[rb + 2 * d * Wp:rb + 2 * d * Wp + HWp, :],
                            w_ref[2], preferred_element_type=f32)
        return jnp.maximum(acc, 0.0)

    y1 = conv3x3(y0, w2_ref, b2_ref, 1)          # 3x3, pad=1, dil=1
    y2 = conv3x3(y1, w3_ref, b3_ref, 2)          # 3x3, pad=2, dil=2

    out_ref[0] = out_ref[0] + y2                 # residual add


def _fold_bn(w, b, gamma, beta, mean, var, eps=EPS):
    """Fold eval-mode BatchNorm2d into the preceding conv (OIHW weights)."""
    scale = gamma / jnp.sqrt(var + eps)
    w_f = w * scale[:, None, None, None]
    b_f = (b - mean) * scale + beta
    return w_f, b_f


def refinement_stage_block(x_nchw, p):
    """x_nchw: (N, Cin, H, W) float32 -> (N, Cout, H, W) float32."""
    N, Cin, H, W = x_nchw.shape
    Cout = p["w1"].shape[0]
    Wp = _round_up(W, 8)                 # 8-aligned flat row stride
    HWp = H * Wp
    Cin_p = _round_up(Cin, 128)
    Cp = _round_up(Cout, 128)

    # ---- activations: NCHW -> (N, H, Wp, Cin_p) zero-padded -> flat bf16 ----
    x = jnp.transpose(x_nchw, (0, 2, 3, 1))
    x = jnp.pad(x, ((0, 0), (0, 0), (0, Wp - W), (0, Cin_p - Cin)))
    x = x.reshape(N, HWp, Cin_p).astype(jnp.bfloat16)

    # ---- initial 1x1 conv: (O, I, 1, 1) -> (I_p, O_p) bf16 ------------------
    w1 = jnp.transpose(p["w1"][:, :, 0, 0], (1, 0))
    w1 = jnp.pad(w1, ((0, Cin_p - Cin), (0, Cp - Cout))).astype(jnp.bfloat16)
    b1 = jnp.pad(p["b1"], (0, Cp - Cout)).reshape(1, Cp).astype(jnp.float32)

    # ---- trunk convs: fold BN, pad channels, tap-column-major weights -------
    def prep_trunk(w, b, gamma, beta, mean, var):
        wf, bf = _fold_bn(w, b, gamma, beta, mean, var)
        wf = jnp.pad(wf, ((0, Cp - Cout), (0, Cp - Cout), (0, 0), (0, 0)))
        # OIHW -> (kh, kw, I, O) -> (3, 3*Cp, Cp): K block kw holds tap kw.
        wk = jnp.transpose(wf, (2, 3, 1, 0)).reshape(3, 3 * Cp, Cp)
        bk = jnp.pad(bf, (0, Cp - Cout)).reshape(1, Cp)
        return wk.astype(jnp.bfloat16), bk.astype(jnp.float32)

    w2, b2 = prep_trunk(p["w2"], p["b2"], p["bn2_gamma"], p["bn2_beta"],
                        p["bn2_mean"], p["bn2_var"])
    w3, b3 = prep_trunk(p["w3"], p["b3"], p["bn3_gamma"], p["bn3_beta"],
                        p["bn3_mean"], p["bn3_var"])

    # lane-dense per-flat-row image-column index map (edge / padded-gap masks)
    col = jnp.broadcast_to(jnp.arange(Wp, dtype=jnp.int32)[None, :, None],
                           (H, Wp, Cp)).reshape(HWp, Cp)

    kernel = functools.partial(_refinement_kernel, H=H, W=W, Wp=Wp, Cp=Cp)

    # VMEM budget: double-buffered blocks + weights + shared scratch + temps,
    # capped at 0.75x the chip's physical VMEM (v7x-safe).
    bf2, f4 = 2, 4
    vmem_bytes = (
        2 * HWp * Cin_p * bf2                                 # input block
        + 2 * HWp * Cp * f4                                   # output block
        + 2 * HWp * Cp * 4                                    # col-index block
        + 2 * (Cin_p * Cp + 2 * 9 * Cp * Cp) * bf2            # conv weights
        + 2 * 3 * Cp * f4                                     # biases
        + (H + 4) * Wp * 3 * Cp * bf2                         # padded scratch
        + 8 * HWp * Cp * f4                                   # f32 temporaries
        + (4 << 20)                                           # slack
    )
    try:
        vmem_cap = pltpu.get_tpu_info().vmem_capacity_bytes
    except Exception:
        vmem_cap = 64 << 20                                   # conservative
    vmem_bytes = int(min(max(vmem_bytes, 16 << 20), int(0.75 * vmem_cap)))

    out = pl.pallas_call(
        kernel,
        out_shape=jax.ShapeDtypeStruct((N, HWp, Cp), jnp.float32),
        grid_spec=pltpu.PrefetchScalarGridSpec(
            num_scalar_prefetch=0,
            grid=(N,),                               # one image per grid step
            in_specs=[
                pl.BlockSpec((HWp, Cp), lambda n: (0, 0)),           # col
                pl.BlockSpec((1, HWp, Cin_p), lambda n: (n, 0, 0)),  # x
                pl.BlockSpec((Cin_p, Cp), lambda n: (0, 0)),         # w1
                pl.BlockSpec((1, Cp), lambda n: (0, 0)),             # b1
                pl.BlockSpec((3, 3 * Cp, Cp), lambda n: (0, 0, 0)),  # w2
                pl.BlockSpec((1, Cp), lambda n: (0, 0)),             # b2
                pl.BlockSpec((3, 3 * Cp, Cp), lambda n: (0, 0, 0)),  # w3
                pl.BlockSpec((1, Cp), lambda n: (0, 0)),             # b3
            ],
            out_specs=pl.BlockSpec((1, HWp, Cp), lambda n: (n, 0, 0)),
            scratch_shapes=[
                # shared rows-padded im2col-by-columns scratch (bf16)
                pltpu.VMEM(((H + 4) * Wp, 3 * Cp), jnp.bfloat16),
            ],
        ),
        compiler_params=pltpu.CompilerParams(
            dimension_semantics=("parallel",),
            vmem_limit_bytes=vmem_bytes,
        ),
    )(col, x, w1, b1, w2, b2, w3, b3)

    out = out.reshape(N, H, Wp, Cp)[:, :, :W, :Cout]
    return jnp.transpose(out, (0, 3, 1, 2))                   # back to NCHW


# ----------------------------- pure-JAX reference ----------------------------
def ref_forward(x_nchw, p, eps=EPS):
    def conv2d(x, w, b, padding=0, dilation=1):
        y = lax.conv_general_dilated(
            x, w, window_strides=(1, 1),
            padding=((padding, padding), (padding, padding)),
            rhs_dilation=(dilation, dilation),
            dimension_numbers=("NCHW", "OIHW", "NCHW"))
        return y + b[None, :, None, None]

    def bn(x, gamma, beta, mean, var):
        inv = 1.0 / jnp.sqrt(var + eps)
        return (x - mean[None, :, None, None]) * (gamma * inv)[None, :, None, None] \
            + beta[None, :, None, None]

    y0 = jax.nn.relu(conv2d(x_nchw, p["w1"], p["b1"], padding=0))
    y1 = jax.nn.relu(bn(conv2d(y0, p["w2"], p["b2"], padding=1),
                        p["bn2_gamma"], p["bn2_beta"], p["bn2_mean"], p["bn2_var"]))
    y2 = jax.nn.relu(bn(conv2d(y1, p["w3"], p["b3"], padding=2, dilation=2),
                        p["bn3_gamma"], p["bn3_beta"], p["bn3_mean"], p["bn3_var"]))
    return y0 + y2


# ------------------------- deterministic parameter init ----------------------
def init_params(key, cin, cout):
    ks = jax.random.split(key, 14)
    p = {}
    p["w1"] = 0.3 * jax.random.normal(ks[0], (cout, cin, 1, 1), jnp.float32)
    p["b1"] = 0.1 * jax.random.normal(ks[1], (cout,), jnp.float32)
    p["w2"] = 0.2 * jax.random.normal(ks[2], (cout, cout, 3, 3), jnp.float32)
    p["b2"] = 0.1 * jax.random.normal(ks[3], (cout,), jnp.float32)
    p["bn2_gamma"] = 1.0 + 0.1 * jax.random.normal(ks[4], (cout,), jnp.float32)
    p["bn2_beta"] = 0.1 * jax.random.normal(ks[5], (cout,), jnp.float32)
    p["bn2_mean"] = 0.1 * jax.random.normal(ks[6], (cout,), jnp.float32)
    p["bn2_var"] = 0.5 + 0.5 * jnp.abs(jax.random.normal(ks[7], (cout,), jnp.float32))
    p["w3"] = 0.2 * jax.random.normal(ks[8], (cout, cout, 3, 3), jnp.float32)
    p["b3"] = 0.1 * jax.random.normal(ks[9], (cout,), jnp.float32)
    p["bn3_gamma"] = 1.0 + 0.1 * jax.random.normal(ks[10], (cout,), jnp.float32)
    p["bn3_beta"] = 0.1 * jax.random.normal(ks[11], (cout,), jnp.float32)
    p["bn3_mean"] = 0.1 * jax.random.normal(ks[12], (cout,), jnp.float32)
    p["bn3_var"] = 0.5 + 0.5 * jnp.abs(jax.random.normal(ks[13], (cout,), jnp.float32))
    return p


if __name__ == "__main__":
    key = jax.random.PRNGKey(0)
    kx, kp = jax.random.split(key)

    N, Cin, Cout, H, W = 2, 4, 8, 16, 16
    x = jax.random.normal(kx, (N, Cin, H, W), jnp.float32)
    params = init_params(kp, Cin, Cout)

    out = refinement_stage_block(x, params)
    out = jax.block_until_ready(out)

    ref = ref_forward(x, params)
    assert out.shape == ref.shape == (N, Cout, H, W)

    # bf16 matmul operands (f32 accumulation) through two stacked 3x3 convs:
    # compare against the pure-f32 reference with a bf16-appropriate tolerance.
    max_err = float(jnp.max(jnp.abs(out - ref)))
    tol = 5e-2 + 5e-2 * float(jnp.max(jnp.abs(ref)))
    if not max_err <= tol:
        raise AssertionError(
            f"Pallas kernel mismatch vs reference: max|err|={max_err} > tol={tol}")
    print("KERNEL_OK")
</pallas_src>

<mosaic_0001>
module attributes {stable_mosaic.version = 11 : i64} {
  func.func @_refinement_kernel(%arg0: i32, %arg1: memref<256x128xi32, #tpu.memory_space<vmem>>, %arg2: memref<1x256x128xbf16, #tpu.memory_space<vmem>>, %arg3: memref<128x128xbf16, #tpu.memory_space<vmem>>, %arg4: memref<1x128xf32, #tpu.memory_space<vmem>>, %arg5: memref<3x384x128xbf16, #tpu.memory_space<vmem>>, %arg6: memref<1x128xf32, #tpu.memory_space<vmem>>, %arg7: memref<3x384x128xbf16, #tpu.memory_space<vmem>>, %arg8: memref<1x128xf32, #tpu.memory_space<vmem>>, %arg9: memref<1x256x128xf32, #tpu.memory_space<vmem>>, %arg10: memref<320x384xbf16, #tpu.memory_space<vmem>>) attributes {dimension_semantics = [#tpu.dimension_semantics<parallel>], iteration_bounds = array<i64: 2>, scalar_prefetch = 0 : i64, scratch_operands = 1 : i64, tpu.core_type = #tpu.core_type<tc>, window_params = [{pipeline_mode = #tpu.pipeline_mode<synchronous>, transform_indices = @transform_0, window_bounds = array<i64: 256, 128>}, {transform_indices = @transform_1, window_bounds = array<i64: 1, 256, 128>}, {pipeline_mode = #tpu.pipeline_mode<synchronous>, transform_indices = @transform_2, window_bounds = array<i64: 128, 128>}, {pipeline_mode = #tpu.pipeline_mode<synchronous>, transform_indices = @transform_3, window_bounds = array<i64: 1, 128>}, {pipeline_mode = #tpu.pipeline_mode<synchronous>, transform_indices = @transform_4, window_bounds = array<i64: 3, 384, 128>}, {pipeline_mode = #tpu.pipeline_mode<synchronous>, transform_indices = @transform_5, window_bounds = array<i64: 1, 128>}, {pipeline_mode = #tpu.pipeline_mode<synchronous>, transform_indices = @transform_6, window_bounds = array<i64: 3, 384, 128>}, {pipeline_mode = #tpu.pipeline_mode<synchronous>, transform_indices = @transform_7, window_bounds = array<i64: 1, 128>}, {transform_indices = @transform_8, window_bounds = array<i64: 1, 256, 128>}]} {
    %cst = arith.constant 0.000000e+00 : bf16
    %0 = vector.broadcast %cst : bf16 to vector<32x384xbf16>
    %c0 = arith.constant 0 : index
    %c0_0 = arith.constant 0 : index
    %1 = vector.load %arg10[%c0, %c0_0] : memref<320x384xbf16, #tpu.memory_space<vmem>>, vector<32x384xbf16>
    tpu.vector_store %arg10[%c0, %c0_0], %0 {strides = array<i32>} : memref<320x384xbf16, #tpu.memory_space<vmem>>, vector<32x384xbf16>,
    %c288 = arith.constant 288 : index
    %c0_1 = arith.constant 0 : index
    %2 = vector.load %arg10[%c288, %c0_1] : memref<320x384xbf16, #tpu.memory_space<vmem>>, vector<32x384xbf16>
    tpu.vector_store %arg10[%c288, %c0_1], %0 {strides = array<i32>} : memref<320x384xbf16, #tpu.memory_space<vmem>>, vector<32x384xbf16>,
    %c0_2 = arith.constant 0 : index
    %c0_3 = arith.constant 0 : index
    %c0_4 = arith.constant 0 : index
    %3 = vector.load %arg2[%c0_2, %c0_3, %c0_4] : memref<1x256x128xbf16, #tpu.memory_space<vmem>>, vector<1x256x128xbf16>
    %4 = vector.shape_cast %3 : vector<1x256x128xbf16> to vector<256x128xbf16>
    %c0_5 = arith.constant 0 : index
    %c0_6 = arith.constant 0 : index
    %5 = vector.load %arg3[%c0_5, %c0_6] : memref<128x128xbf16, #tpu.memory_space<vmem>>, vector<128x128xbf16>
    %cst_7 = arith.constant dense<0.000000e+00> : vector<256x128xf32>
    %6 = tpu.matmul %4, %5, %cst_7 {dimension_numbers = #tpu.dot_dimension_numbers<[1], [0], [0], [1], [0, 0, 1, 1], [], []>} : vector<256x128xbf16>, vector<128x128xbf16>, vector<256x128xf32> -> vector<256x128xf32>
    %c0_8 = arith.constant 0 : index
    %c0_9 = arith.constant 0 : index
    %7 = vector.load %arg4[%c0_8, %c0_9] : memref<1x128xf32, #tpu.memory_space<vmem>>, vector<1x128xf32>
    %8 = vector.broadcast %7 : vector<1x128xf32> to vector<256x128xf32>
    %9 = arith.addf %6, %8 : vector<256x128xf32>
    %cst_10 = arith.constant 0.000000e+00 : f32
    %10 = vector.broadcast %cst_10 : f32 to vector<256x128xf32>
    %11 = arith.maximumf %9, %10 : vector<256x128xf32>
    %c0_11 = arith.constant 0 : index
    %c0_12 = arith.constant 0 : index
    %c0_13 = arith.constant 0 : index
    %12 = vector.load %arg9[%c0_11, %c0_12, %c0_13] : memref<1x256x128xf32, #tpu.memory_space<vmem>>, vector<1x256x128xf32>
    %13 = vector.shape_cast %12 : vector<1x256x128xf32> to vector<256x128xf32>
    %14 = vector.shape_cast %11 : vector<256x128xf32> to vector<1x256x128xf32>
    tpu.vector_store %arg9[%c0_11, %c0_12, %c0_13], %14 {strides = array<i32>} : memref<1x256x128xf32, #tpu.memory_space<vmem>>, vector<1x256x128xf32>,
    %c0_14 = arith.constant 0 : index
    %c0_15 = arith.constant 0 : index
    %15 = vector.load %arg1[%c0_14, %c0_15] : memref<256x128xi32, #tpu.memory_space<vmem>>, vector<256x128xi32>
    %16 = arith.truncf %11 : vector<256x128xf32> to vector<256x128xbf16>
    %c32 = arith.constant 32 : index
    %c128 = arith.constant 128 : index
    %17 = vector.load %arg10[%c32, %c128] : memref<320x384xbf16, #tpu.memory_space<vmem>>, vector<256x128xbf16>
    tpu.vector_store %arg10[%c32, %c128], %16 {strides = array<i32>} : memref<320x384xbf16, #tpu.memory_space<vmem>>, vector<256x128xbf16>,
    %c1_i32 = arith.constant 1 : i32
    %18 = tpu.dynamic_rotate %11 by %c1_i32 dim 0 : vector<256x128xf32>, i32 -> vector<256x128xf32>
    %c1_i32_16 = arith.constant 1 : i32
    %19 = vector.broadcast %c1_i32_16 : i32 to vector<256x128xi32>
    %20 = arith.cmpi sge, %15, %19 : vector<256x128xi32>
    %cst_17 = arith.constant 0.000000e+00 : f32
    %21 = vector.broadcast %cst_17 : f32 to vector<256x128xf32>
    %22 = arith.select %20, %18, %21 : vector<256x128xi1>, vector<256x128xf32>
    %23 = arith.truncf %22 : vector<256x128xf32> to vector<256x128xbf16>
    %c32_18 = arith.constant 32 : index
    %c0_19 = arith.constant 0 : index
    %24 = vector.load %arg10[%c32_18, %c0_19] : memref<320x384xbf16, #tpu.memory_space<vmem>>, vector<256x128xbf16>
    tpu.vector_store %arg10[%c32_18, %c0_19], %23 {strides = array<i32>} : memref<320x384xbf16, #tpu.memory_space<vmem>>, vector<256x128xbf16>,
    %c255_i32 = arith.constant 255 : i32
    %25 = tpu.dynamic_rotate %11 by %c255_i32 dim 0 : vector<256x128xf32>, i32 -> vector<256x128xf32>
    %c15_i32 = arith.constant 15 : i32
    %26 = vector.broadcast %c15_i32 : i32 to vector<256x128xi32>
    %27 = arith.cmpi slt, %15, %26 : vector<256x128xi32>
    %cst_20 = arith.constant 0.000000e+00 : f32
    %28 = vector.broadcast %cst_20 : f32 to vector<256x128xf32>
    %29 = arith.select %27, %25, %28 : vector<256x128xi1>, vector<256x128xf32>
    %30 = arith.truncf %29 : vector<256x128xf32> to vector<256x128xbf16>
    %c32_21 = arith.constant 32 : index
    %c256 = arith.constant 256 : index
    %31 = vector.load %arg10[%c32_21, %c256] : memref<320x384xbf16, #tpu.memory_space<vmem>>, vector<256x128xbf16>
    tpu.vector_store %arg10[%c32_21, %c256], %30 {strides = array<i32>} : memref<320x384xbf16, #tpu.memory_space<vmem>>, vector<256x128xbf16>,
    %c16 = arith.constant 16 : index
    %c0_22 = arith.constant 0 : index
    %32 = vector.load %arg10[%c16, %c0_22] : memref<320x384xbf16, #tpu.memory_space<vmem>>, vector<256x384xbf16>
    %c0_23 = arith.constant 0 : index
    %c0_24 = arith.constant 0 : index
    %c0_25 = arith.constant 0 : index
    %33 = vector.load %arg5[%c0_23, %c0_24, %c0_25] : memref<3x384x128xbf16, #tpu.memory_space<vmem>>, vector<1x384x128xbf16>
    %34 = vector.shape_cast %33 : vector<1x384x128xbf16> to vector<384x128xbf16>
    %cst_26 = arith.constant dense<0.000000e+00> : vector<256x128xf32>
    %35 = tpu.matmul %32, %34, %cst_26 {dimension_numbers = #tpu.dot_dimension_numbers<[1], [0], [0], [1], [0, 0, 1, 1], [], []>} : vector<256x384xbf16>, vector<384x128xbf16>, vector<256x128xf32> -> vector<256x128xf32>
    %c0_27 = arith.constant 0 : index
    %c0_28 = arith.constant 0 : index
    %36 = vector.load %arg6[%c0_27, %c0_28] : memref<1x128xf32, #tpu.memory_space<vmem>>, vector<1x128xf32>
    %37 = vector.broadcast %36 : vector<1x128xf32> to vector<256x128xf32>
    %38 = arith.addf %35, %37 : vector<256x128xf32>
    %c32_29 = arith.constant 32 : index
    %c0_30 = arith.constant 0 : index
    %39 = vector.load %arg10[%c32_29, %c0_30] : memref<320x384xbf16, #tpu.memory_space<vmem>>, vector<256x384xbf16>
    %c1 = arith.constant 1 : index
    %c0_31 = arith.constant 0 : index
    %c0_32 = arith.constant 0 : index
    %40 = vector.load %arg5[%c1, %c0_31, %c0_32] : memref<3x384x128xbf16, #tpu.memory_space<vmem>>, vector<1x384x128xbf16>
    %41 = vector.shape_cast %40 : vector<1x384x128xbf16> to vector<384x128xbf16>
    %cst_33 = arith.constant dense<0.000000e+00> : vector<256x128xf32>
    %42 = tpu.matmul %39, %41, %cst_33 {dimension_numbers = #tpu.dot_dimension_numbers<[1], [0], [0], [1], [0, 0, 1, 1], [], []>} : vector<256x384xbf16>, vector<384x128xbf16>, vector<256x128xf32> -> vector<256x128xf32>
    %43 = arith.addf %38, %42 : vector<256x128xf32>
    %c48 = arith.constant 48 : index
    %c0_34 = arith.constant 0 : index
    %44 = vector.load %arg10[%c48, %c0_34] : memref<320x384xbf16, #tpu.memory_space<vmem>>, vector<256x384xbf16>
    %c2 = arith.constant 2 : index
    %c0_35 = arith.constant 0 : index
    %c0_36 = arith.constant 0 : index
    %45 = vector.load %arg5[%c2, %c0_35, %c0_36] : memref<3x384x128xbf16, #tpu.memory_space<vmem>>, vector<1x384x128xbf16>
    %46 = vector.shape_cast %45 : vector<1x384x128xbf16> to vector<384x128xbf16>
    %cst_37 = arith.constant dense<0.000000e+00> : vector<256x128xf32>
    %47 = tpu.matmul %44, %46, %cst_37 {dimension_numbers = #tpu.dot_dimension_numbers<[1], [0], [0], [1], [0, 0, 1, 1], [], []>} : vector<256x384xbf16>, vector<384x128xbf16>, vector<256x128xf32> -> vector<256x128xf32>
    %48 = arith.addf %43, %47 : vector<256x128xf32>
    %cst_38 = arith.constant 0.000000e+00 : f32
    %49 = vector.broadcast %cst_38 : f32 to vector<256x128xf32>
    %50 = arith.maximumf %48, %49 : vector<256x128xf32>
    %c0_39 = arith.constant 0 : index
    %c0_40 = arith.constant 0 : index
    %51 = vector.load %arg1[%c0_39, %c0_40] : memref<256x128xi32, #tpu.memory_space<vmem>>, vector<256x128xi32>
    %52 = arith.truncf %50 : vector<256x128xf32> to vector<256x128xbf16>
    %c32_41 = arith.constant 32 : index
    %c128_42 = arith.constant 128 : index
    %53 = vector.load %arg10[%c32_41, %c128_42] : memref<320x384xbf16, #tpu.memory_space<vmem>>, vector<256x128xbf16>
    tpu.vector_store %arg10[%c32_41, %c128_42], %52 {strides = array<i32>} : memref<320x384xbf16, #tpu.memory_space<vmem>>, vector<256x128xbf16>,
    %c2_i32 = arith.constant 2 : i32
    %54 = tpu.dynamic_rotate %50 by %c2_i32 dim 0 : vector<256x128xf32>, i32 -> vector<256x128xf32>
    %c2_i32_43 = arith.constant 2 : i32
    %55 = vector.broadcast %c2_i32_43 : i32 to vector<256x128xi32>
    %56 = arith.cmpi sge, %51, %55 : vector<256x128xi32>
    %cst_44 = arith.constant 0.000000e+00 : f32
    %57 = vector.broadcast %cst_44 : f32 to vector<256x128xf32>
    %58 = arith.select %56, %54, %57 : vector<256x128xi1>, vector<256x128xf32>
    %59 = arith.truncf %58 : vector<256x128xf32> to vector<256x128xbf16>
    %c32_45 = arith.constant 32 : index
    %c0_46 = arith.constant 0 : index
    %60 = vector.load %arg10[%c32_45, %c0_46] : memref<320x384xbf16, #tpu.memory_space<vmem>>, vector<256x128xbf16>
    tpu.vector_store %arg10[%c32_45, %c0_46], %59 {strides = array<i32>} : memref<320x384xbf16, #tpu.memory_space<vmem>>, vector<256x128xbf16>,
    %c254_i32 = arith.constant 254 : i32
    %61 = tpu.dynamic_rotate %50 by %c254_i32 dim 0 : vector<256x128xf32>, i32 -> vector<256x128xf32>
    %c14_i32 = arith.constant 14 : i32
    %62 = vector.broadcast %c14_i32 : i32 to vector<256x128xi32>
    %63 = arith.cmpi slt, %51, %62 : vector<256x128xi32>
    %cst_47 = arith.constant 0.000000e+00 : f32
    %64 = vector.broadcast %cst_47 : f32 to vector<256x128xf32>
    %65 = arith.select %63, %61, %64 : vector<256x128xi1>, vector<256x128xf32>
    %66 = arith.truncf %65 : vector<256x128xf32> to vector<256x128xbf16>
    %c32_48 = arith.constant 32 : index
    %c256_49 = arith.constant 256 : index
    %67 = vector.load %arg10[%c32_48, %c256_49] : memref<320x384xbf16, #tpu.memory_space<vmem>>, vector<256x128xbf16>
    tpu.vector_store %arg10[%c32_48, %c256_49], %66 {strides = array<i32>} : memref<320x384xbf16, #tpu.memory_space<vmem>>, vector<256x128xbf16>,
    %c0_50 = arith.constant 0 : index
    %c0_51 = arith.constant 0 : index
    %68 = vector.load %arg10[%c0_50, %c0_51] : memref<320x384xbf16, #tpu.memory_space<vmem>>, vector<256x384xbf16>
    %c0_52 = arith.constant 0 : index
    %c0_53 = arith.constant 0 : index
    %c0_54 = arith.constant 0 : index
    %69 = vector.load %arg7[%c0_52, %c0_53, %c0_54] : memref<3x384x128xbf16, #tpu.memory_space<vmem>>, vector<1x384x128xbf16>
    %70 = vector.shape_cast %69 : vector<1x384x128xbf16> to vector<384x128xbf16>
    %cst_55 = arith.constant dense<0.000000e+00> : vector<256x128xf32>
    %71 = tpu.matmul %68, %70, %cst_55 {dimension_numbers = #tpu.dot_dimension_numbers<[1], [0], [0], [1], [0, 0, 1, 1], [], []>} : vector<256x384xbf16>, vector<384x128xbf16>, vector<256x128xf32> -> vector<256x128xf32>
    %c0_56 = arith.constant 0 : index
    %c0_57 = arith.constant 0 : index
    %72 = vector.load %arg8[%c0_56, %c0_57] : memref<1x128xf32, #tpu.memory_space<vmem>>, vector<1x128xf32>
    %73 = vector.broadcast %72 : vector<1x128xf32> to vector<256x128xf32>
    %74 = arith.addf %71, %73 : vector<256x128xf32>
    %c32_58 = arith.constant 32 : index
    %c0_59 = arith.constant 0 : index
    %75 = vector.load %arg10[%c32_58, %c0_59] : memref<320x384xbf16, #tpu.memory_space<vmem>>, vector<256x384xbf16>
    %c1_60 = arith.constant 1 : index
    %c0_61 = arith.constant 0 : index
    %c0_62 = arith.constant 0 : index
    %76 = vector.load %arg7[%c1_60, %c0_61, %c0_62] : memref<3x384x128xbf16, #tpu.memory_space<vmem>>, vector<1x384x128xbf16>
    %77 = vector.shape_cast %76 : vector<1x384x128xbf16> to vector<384x128xbf16>
    %cst_63 = arith.constant dense<0.000000e+00> : vector<256x128xf32>
    %78 = tpu.matmul %75, %77, %cst_63 {dimension_numbers = #tpu.dot_dimension_numbers<[1], [0], [0], [1], [0, 0, 1, 1], [], []>} : vector<256x384xbf16>, vector<384x128xbf16>, vector<256x128xf32> -> vector<256x128xf32>
    %79 = arith.addf %74, %78 : vector<256x128xf32>
    %c64 = arith.constant 64 : index
    %c0_64 = arith.constant 0 : index
    %80 = vector.load %arg10[%c64, %c0_64] : memref<320x384xbf16, #tpu.memory_space<vmem>>, vector<256x384xbf16>
    %c2_65 = arith.constant 2 : index
    %c0_66 = arith.constant 0 : index
    %c0_67 = arith.constant 0 : index
    %81 = vector.load %arg7[%c2_65, %c0_66, %c0_67] : memref<3x384x128xbf16, #tpu.memory_space<vmem>>, vector<1x384x128xbf16>
    %82 = vector.shape_cast %81 : vector<1x384x128xbf16> to vector<384x128xbf16>
    %cst_68 = arith.constant dense<0.000000e+00> : vector<256x128xf32>
    %83 = tpu.matmul %80, %82, %cst_68 {dimension_numbers = #tpu.dot_dimension_numbers<[1], [0], [0], [1], [0, 0, 1, 1], [], []>} : vector<256x384xbf16>, vector<384x128xbf16>, vector<256x128xf32> -> vector<256x128xf32>
    %84 = arith.addf %79, %83 : vector<256x128xf32>
    %cst_69 = arith.constant 0.000000e+00 : f32
    %85 = vector.broadcast %cst_69 : f32 to vector<256x128xf32>
    %86 = arith.maximumf %84, %85 : vector<256x128xf32>
    %c0_70 = arith.constant 0 : index
    %c0_71 = arith.constant 0 : index
    %c0_72 = arith.constant 0 : index
    %87 = vector.load %arg9[%c0_70, %c0_71, %c0_72] : memref<1x256x128xf32, #tpu.memory_space<vmem>>, vector<1x256x128xf32>
    %88 = vector.shape_cast %87 : vector<1x256x128xf32> to vector<256x128xf32>
    %89 = arith.addf %88, %86 : vector<256x128xf32>
    %c0_73 = arith.constant 0 : index
    %c0_74 = arith.constant 0 : index
    %c0_75 = arith.constant 0 : index
    %90 = vector.load %arg9[%c0_73, %c0_74, %c0_75] : memref<1x256x128xf32, #tpu.memory_space<vmem>>, vector<1x256x128xf32>
    %91 = vector.shape_cast %90 : vector<1x256x128xf32> to vector<256x128xf32>
    %92 = vector.shape_cast %89 : vector<256x128xf32> to vector<1x256x128xf32>
    tpu.vector_store %arg9[%c0_73, %c0_74, %c0_75], %92 {strides = array<i32>} : memref<1x256x128xf32, #tpu.memory_space<vmem>>, vector<1x256x128xf32>,
    return
  }
  func.func @transform_0(%arg0: i32) -> (i32, i32) {
    %c0_i32 = arith.constant 0 : i32
    %c0_i32_0 = arith.constant 0 : i32
    %c0_i32_1 = arith.constant 0 : i32
    return %c0_i32, %c0_i32_0 : i32, i32
  }
  func.func @transform_1(%arg0: i32) -> (i32, i32, i32) {
    %c0_i32 = arith.constant 0 : i32
    %c0_i32_0 = arith.constant 0 : i32
    %c0_i32_1 = arith.constant 0 : i32
    return %arg0, %c0_i32, %c0_i32_0 : i32, i32, i32
  }
  func.func @transform_2(%arg0: i32) -> (i32, i32) {
    %c0_i32 = arith.constant 0 : i32
    %c0_i32_0 = arith.constant 0 : i32
    %c0_i32_1 = arith.constant 0 : i32
    return %c0_i32, %c0_i32_0 : i32, i32
  }
  func.func @transform_3(%arg0: i32) -> (i32, i32) {
    %c0_i32 = arith.constant 0 : i32
    %c0_i32_0 = arith.constant 0 : i32
    %c0_i32_1 = arith.constant 0 : i32
    return %c0_i32, %c0_i32_0 : i32, i32
  }
  func.func @transform_4(%arg0: i32) -> (i32, i32, i32) {
    %c0_i32 = arith.constant 0 : i32
    %c0_i32_0 = arith.constant 0 : i32
    %c0_i32_1 = arith.constant 0 : i32
    %c0_i32_2 = arith.constant 0 : i32
    return %c0_i32, %c0_i32_0, %c0_i32_1 : i32, i32, i32
  }
  func.func @transform_5(%arg0: i32) -> (i32, i32) {
    %c0_i32 = arith.constant 0 : i32
    %c0_i32_0 = arith.constant 0 : i32
    %c0_i32_1 = arith.constant 0 : i32
    return %c0_i32, %c0_i32_0 : i32, i32
  }
  func.func @transform_6(%arg0: i32) -> (i32, i32, i32) {
    %c0_i32 = arith.constant 0 : i32
    %c0_i32_0 = arith.constant 0 : i32
    %c0_i32_1 = arith.constant 0 : i32
    %c0_i32_2 = arith.constant 0 : i32
    return %c0_i32, %c0_i32_0, %c0_i32_1 : i32, i32, i32
  }
  func.func @transform_7(%arg0: i32) -> (i32, i32) {
    %c0_i32 = arith.constant 0 : i32
    %c0_i32_0 = arith.constant 0 : i32
    %c0_i32_1 = arith.constant 0 : i32
    return %c0_i32, %c0_i32_0 : i32, i32
  }
  func.func @transform_8(%arg0: i32) -> (i32, i32, i32) {
    %c0_i32 = arith.constant 0 : i32
    %c0_i32_0 = arith.constant 0 : i32
    %c0_i32_1 = arith.constant 0 : i32
    return %arg0, %c0_i32, %c0_i32_0 : i32, i32, i32
  }
}

</mosaic_0001>

<bundles_post_ra>
// kernel: tpu_custom_call.1
= control target key start
LH: loop header
LB: loop body
LE: loop exit
PB: predicated region body
PF: predicated region fallthrough
CT: control target
= control target key end

     0   :  { %s11858_s0 = inlined_call_operand.hbm [shape: s32[256,128], index: 0, kind: input, shape index: {}]   ;;  %s11859_s1 = inlined_call_operand.hbm [shape: bf16[2,256,128], index: 1, kind: input, shape index: {}]   ;;  %s11860_s2 = inlined_call_operand.hbm [shape: bf16[128,128], index: 2, kind: input, shape index: {}]   ;;  %s11861_s3 = inlined_call_operand.vmem [shape: f32[1,128], index: 3, kind: input, shape index: {}]   ;;  %s11862_s4 = inlined_call_operand.hbm [shape: bf16[3,384,128], index: 4, kind: input, shape index: {}]   ;;  %s11863_s5 = inlined_call_operand.vmem [shape: f32[1,128], index: 5, kind: input, shape index: {}]   ;;  %s11864_s6 = inlined_call_operand.hbm [shape: bf16[3,384,128], index: 6, kind: input, shape index: {}]   ;;  %s11865_s7 = inlined_call_operand.vmem [shape: f32[1,128], index: 7, kind: input, shape index: {}]   ;;  %s11866_s8 = inlined_call_operand.hbm [shape: f32[2,256,128], index: 8, kind: output, shape index: {}]  }
   0x1   :  { %11875 = sst [smem:[#allocation109_spill]] %s11858_s0 }
   0x2   :  { %11876 = sst [smem:[#allocation110_spill]] %s11860_s2 }
   0x3   :  { %11877 = sst [smem:[#allocation111_spill]] %s11862_s4 }
   0x4   :  { %13 = vsyncpa [#allocation4], 0 }
   0x5   :  { %14 = vsyncpa [#allocation7], 0 }
   0x6   :  { %16 = vsyncpa [#allocation7 + $0x1], 0 }
   0x7   :  { %17 = vsyncpa [#allocation10], 0 }
   0x8   :  { %18 = vsyncpa [#allocation5], 0 }
   0x9   :  { %20 = vsyncpa [#allocation5 + $0x1], 0  ;;  %s9542_s27 = smov 0   ;;  %s9544_s28 = smov 0  }
   0xa   :  { %s9546_s29 = smov 0   ;;  %s9548_s30 = smov 0  }
   0xb LB: > { %s9563_s9 = sadd.s32 4294967295, %s9484_s30   ;;  %s6827_s10 = sadd.s32 4294967294, %s9484_s30   ;;  %s9484_s30 = sphi %s9548_s30, %s12169_s30   ;;  %s9480_s29 = sphi %s9546_s29, %s12168_s29   ;;  %s9476_s28 = sphi %s9544_s28, %s12167_s28   ;;  %s9472_s27 = sphi %s9542_s27, %s12166_s27  }
   0xc   : > { %p67_p0 = scmp.ne.s32.totalorder %s9476_s28, %s9472_s27  ;;  %p68_p1 = scmp.eq.s32.totalorder %s9563_s9, 0 }
   0xd   : > { %p217_p2 = scmp.eq.s32.totalorder %s9563_s9, 1  ;;  %p223_p3 = scmp.eq.s32.totalorder %s6827_s10, 1 }
   0xe   : > { %p9572_p4 = por %p68_p1, %p67_p0  ;;  %p6828_p5 = scmp.ge.s32.totalorder %s9484_s30, 1 }
   0xf   : > { %p9577_p6 = por %p223_p3, %p67_p0  ;;  %p230_p7 = scmp.lt.s32.totalorder %s9484_s30, 3 }
  0x10   : > { %s11880_s2 = sld [smem:[#allocation110_spill]]  ;;  %s9486_s17 = smov [#allocation8]  }
  0x11   : > { %p9585_p8 = pnand %p6828_p5, %p230_p7  ;;  %s257_s18 = sshll.u32 %s9486_s17, 4  ;;  %s258_s18 = int_to_ptr.vmem [resolvable:$true] %s257_s18 }
  0x12   : > { %s11883_s4 = sld [smem:[#allocation111_spill]]  ;;  %s11867_s23 = smov 64  }
  0x13   : > { %p9175_p9 = pneg %p9585_p8  ;;  %s11868_s24 = smov 4  }
  0x14   : > { %s9489_s25 = smov [#allocation9]   ;;  %s11884_s0 = sld [smem:[#allocation109_spill]] }
  0x15   : > { %p9593_p10 = pnand %p9175_p9, %p68_p1  ;;  %s274_s26 = sshll.u32 %s9489_s25, 4  ;;  %s275_s26 = int_to_ptr.vmem [resolvable:$true] %s274_s26 }
  0x16   : > { %s255_s15 = sshll.u32 %s11880_s2, 4  ;;  %s289_s21 = sshll.u32 %s11864_s6, 4  ;;  %s256_s15 = int_to_ptr.hbm [resolvable:$true] %s255_s15  ;;  %s290_s21 = int_to_ptr.hbm [resolvable:$true] %s289_s21 }
  0x17   : > { %9181 = dma.hbm_to_vmem [thread:$0]  (!%p9593_p10), %s256_s15, 1024, %s258_s18, [#allocation7], %s11867_s23, %s11867_s23, %s11868_s24  }
  0x18   : > { %s272_s22 = sshll.u32 %s11883_s4, 4  ;;  %s9490_s15 = smov [#allocation3]   ;;  %s273_s22 = int_to_ptr.hbm [resolvable:$true] %s272_s22 }
  0x19   : > { %9184 = dma.hbm_to_vmem [thread:$0]  (!%p9593_p10), %s273_s22, 9216, %s275_s26, [#allocation10], %s11867_s23, %s11867_s23, %s11868_s24  }
  0x1a   : > { %s241_s14 = sshll.u32 %s11884_s0, 4  ;;  %s243_s17 = sshll.u32 %s9490_s15, 4  ;;  %s242_s14 = int_to_ptr.hbm [resolvable:$true] %s241_s14  ;;  %s244_s17 = int_to_ptr.vmem [resolvable:$true] %s243_s17 }
  0x1b   : > { %s9491_s25 = smov 128   ;;  %s9492_s10 = smov 8  }
  0x1c   : > { %9178 = dma.hbm_to_vmem [thread:$0]  (!%p9593_p10), %s242_s14, 4096, %s244_s17, [#allocation4], %s9491_s25, %s9491_s25, %s9492_s10  }
  0x1d   : > { %s9493_s22 = smov [#allocation11]   ;;  %s9625_s13 = sadd.s32 1, %s9484_s30  }
  0x1e   : > { %s291_s26 = sshll.u32 %s9493_s22, 4  ;;  %s54_s15 = sadd.s32 1, %s9480_s29  ;;  %s292_s26 = int_to_ptr.vmem [resolvable:$true] %s291_s26 }
  0x1f   : > { %9187 = dma.hbm_to_vmem [thread:$0]  (!%p9593_p10), %s290_s21, 9216, %s292_s26, [#allocation10], %s11867_s23, %s11867_s23, %s11868_s24  }
  0x20   : > { %s51_s18 = ssub.s32 %s9484_s30, %s9625_s13  ;;  %p61_p12 = scmp.ne.s32.totalorder %s9480_s29, %s9476_s28 }
  0x21   : > { %p52_p13 = scmp.eq.s32.totalorder %s51_s18, 0  ;;  %p62_p0 = scmp.eq.s32.totalorder %s9484_s30, 0 }
  0x22   : > { %p9635_p3 = por %p217_p2, %p61_p12  ;;  %p9200_p7 = scmp.lt.s32.totalorder %s9484_s30, 2 }
  0x23   : > { %s9640_s17 = scalar_select %p52_p13, %s9480_s29, %s54_s15  }
  0x24   : > { %p63_p5 = por %p62_p0, %p61_p12  ;;  %s308_s19 = sand.u32 1, %s9484_s30  }
  0x25   : > { %s310_s20 = sand.u32 1, %s9480_s29   ;;  %s8673_s25 = sshll.u32 %s9484_s30, 7 }
  0x26   : > { %s6834_s21 = sshll.u32 %s310_s20, 7  ;;  %s317_s26 = scalar_lea.hbm %s11859_s1, %s8673_s25 }
  0x27   : > { %s318_s23 = sshll.u32 %s317_s26, 4  ;;  %s312_s18 = scalar_lea.vmem [#allocation6], %s6834_s21  ;;  %s319_s23 = int_to_ptr.hbm [resolvable:$true] %s318_s23 }
  0x28   : > { %s320_s24 = sshll.u32 %s312_s18, 4  ;;  %p9649_p2 = pnand %p9200_p7, %p63_p5  ;;  %s321_s24 = int_to_ptr.vmem [resolvable:$true] %s320_s24 }
  0x29   : > { %s309_s15 = scalar_lea.sflag [#allocation7], %s308_s19  ;;  %s9376_s2 = sshra.s32 %s319_s23, 4  ;;  %s9377_s2 = int_to_ptr.hbm [resolvable:$true] %s9376_s2 }
  0x2a   : > { %s9378_s4 = scalar_lea.hbm %s9377_s2, 128  ;;  %p9380_p10 = pneg %p9649_p2 }
  0x2b   : > { %p9379_p9 = scmp.ne.s32.totalorder %s9377_s2, %s9378_s4  ;;  %s9383_s21 = scalar_lea.hbm %s11859_s1, 256 }
  0x2c   : > { %p9384_p0 = scmp.lt.s32.totalorder %s9377_s2, %s11859_s1  ;;  %p9385_p5 = scmp.lt.s32.totalorder %s9383_s21, %s9378_s4 }
  0x2d   : > { %p9381_p12 = pnand %p9380_p10, %p9379_p9 }
  0x2e   : > { %p9386_p7 = por %p9385_p5, %p9384_p0 }
  0x2f   : > { %p9382_p13 = pneg %p9381_p12 }
  0x31   : > { %p9387_p11 = pnand %p9386_p7, %p9382_p13 }
  0x33   : > { %9390 = shalt.err (!%p9387_p11)
}
  0x34   : > { %s11887_s19 = smov 4   ;;  %s11888_s26 = smov 64  }
  0x35   : > { %9191 = dma.hbm_to_vmem [thread:$0]  (!%p9649_p2), %s319_s23, 2048, %s321_s24, %s309_s15, %s11888_s26, %s11888_s26, %s11887_s19  }
  0x36   : > { %332 = sbr.rel (%p9585_p8) target bundleno = 2090 (0x82a), region = 52 }
  0x3b   : > { %9451 = dma.done.wait (%p68_p1), [#allocation4], 4096  }
  0x3c   : > { %9453 = vsyncadd (%p68_p1), [#allocation4], 4294963200  ;;  %s339_s2 = sand.u32 1, %s9563_s9   ;;  %s9674_s4 = sand.u32 1, %s9476_s28  }
  0x3d   : > { %s6839_s0 = sshll.u32 %s9674_s4, 7  ;;  %s340_s18 = scalar_lea.sflag [#allocation7], %s339_s2 }
  0x3e   : > { %s9677_s20 = scalar_lea.vmem [#allocation6], %s6839_s0 }
  0x3f   : > { %9455 = dma.done.wait (%p9572_p4), %s340_s18, 2048  }
  0x40   : > { %9457 = vsyncadd (%p9572_p4), %s340_s18, 4294965248 }
  0x41   : > { %9459 = dma.done.wait (%p68_p1), [#allocation7], 1024  }
  0x42   : > { %9461 = vsyncadd (%p68_p1), [#allocation7], 4294966272 }
  0x43   : > { %9463 = dma.done.wait (%p68_p1), [#allocation10], 18432  }
  0x44   : > { %9465 = vsyncadd (%p68_p1), [#allocation10], 4294948864  ;;  %v8697_v0 = vld [vmem:[#allocation8 + $0x38] sm:$0xff]  ;;  %v8696_v1 = vld [vmem:[#allocation8 + $0x30] sm:$0xff]  ;;  %v9494_v26 = vmov 0   ;;  %s6843_s23 = sshll.u32 %s9674_s4, 8  ;;  %v886_v37 = vlaneseq }
  0x45   : > { %605 = vmatpush.bf16.msra.mxu0 %v8697_v0  ;;  %9131 = vmatpush.bf16.msra.mxu3 %v8697_v0  ;;  %v8695_v2 = vld [vmem:[#allocation8 + $0x28] sm:$0xff]  ;;  %v8694_v3 = vld [vmem:[#allocation8 + $0x20] sm:$0xff]  ;;  %v8693_v4 = vld [vmem:[#allocation8 + $0x18] sm:$0xff]  ;;  %397 = vst [vmem:[#allocation2 + $0x18] sm:$0xff] %v9494_v26  ;;  %s9737_s24 = scalar_lea.vmem [#allocation12], %s6843_s23  ;;  %s9130_s0 = sshll.u32 %s9563_s9, 8 }
  0x46   : > { %v8692_v5 = vld [vmem:[#allocation8 + $0x10] sm:$0xff]  ;;  %v8691_v6 = vld [vmem:[#allocation8 + $0x8] sm:$0xff]  ;;  %v8690_v7 = vld [vmem:[#allocation8] sm:$0xff]  ;;  %399 = vst [vmem:[#allocation2 + $0x24] sm:$0xff] %v9494_v26  ;;  %v9744_v42 = vshrl.u32 %v886_v37, 7  ;;  %s6710_s11 = scalar_lea.hbm %s11866_s8, %s9130_s0  ;;  %s6711_s16 = sshll.u32 %s9737_s24, 4  ;;  %s6712_s16 = int_to_ptr.vmem [resolvable:$true] %s6711_s16 }
  0x47   : > { %v8674_v8 = vld [vmem:[%s9677_s20] sm:$0xff]  ;;  %v8675_v10 = vld [vmem:[%s9677_s20 + $0x8] sm:$0xff]  ;;  %v8676_v12 = vld [vmem:[%s9677_s20 + $0x10] sm:$0xff]  ;;  %393 = vst [vmem:[#allocation2] sm:$0xff] %v9494_v26  ;;  %s6713_s23 = sshll.u32 %s6710_s11, 4  ;;  %s6699_s9 = scalar_lea.sflag [#allocation5], %s9674_s4  ;;  %s6714_s23 = int_to_ptr.hbm [resolvable:$true] %s6713_s23 }
  0x48   : > { %v8686_v9 = vld [vmem:[%s9677_s20 + $0x60] sm:$0xff]  ;;  %v8687_v11 = vld [vmem:[%s9677_s20 + $0x68] sm:$0xff]  ;;  %v8688_v13 = vld [vmem:[%s9677_s20 + $0x70] sm:$0xff]  ;;  %394 = vst [vmem:[#allocation2 + $0x8] sm:$0xf] %v9494_v26  ;;  %vm888_vm0 = vcmp.lt.s32.totalorder %v9744_v42, 1 }
  0x49   : > { %606 = vmatpush.bf16.msra.mxu0 %v8696_v1  ;;  %9132 = vmatpush.bf16.msra.mxu3 %v8696_v1  ;;  %v8677_v14 = vld [vmem:[%s9677_s20 + $0x18] sm:$0xff]  ;;  %v8678_v16 = vld [vmem:[%s9677_s20 + $0x20] sm:$0xff]  ;;  %v9703_v18 = vld [vmem:[#allocation9 + $0x70] sm:$0xff]  ;;  %395 = vst [vmem:[#allocation2 + $0xc] sm:$0xff] %v9494_v26  ;;  %vm1081_vm2 = vcmp.lt.s32.totalorder %v9744_v42, 7  ;;  %s9420_s15 = sshra.s32 %s6714_s23, 4  ;;  %s9421_s15 = int_to_ptr.hbm [resolvable:$true] %s9420_s15 }
  0x4a   : > { %v8689_v15 = vld [vmem:[%s9677_s20 + $0x78] sm:$0xff]  ;;  %v9706_v19 = vld [vmem:[#allocation9 + $0x68] sm:$0xff]  ;;  %v9710_v21 = vld [vmem:[#allocation9 + $0x60] sm:$0xff]  ;;  %396 = vst [vmem:[#allocation2 + $0x14] sm:$0xf] %v9494_v26  ;;  %s9422_s25 = scalar_lea.hbm %s9421_s15, 256  ;;  %p9427_p11 = scmp.lt.s32.totalorder %s9421_s15, %s11866_s8 }
  0x4b   : > { %v9700_v17 = vld [vmem:[#allocation9 + $0x78] sm:$0xff]  ;;  %v8679_v20 = vld [vmem:[%s9677_s20 + $0x28] sm:$0xff]  ;;  %v9716_v23 = vld [vmem:[#allocation9 + $0x50] sm:$0xff]  ;;  %398 = vst [vmem:[#allocation2 + $0x20] sm:$0xf] %v9494_v26  ;;  %p9423_p1 = scmp.ne.s32.totalorder %s9421_s15, %s9422_s25  ;;  %s9426_s22 = scalar_lea.hbm %s11866_s8, 512 }
  0x4c   : > { %1847 = vmatpush.bf16.msra.mxu2 %v9700_v17  ;;  %v9713_v22 = vld [vmem:[#allocation9 + $0x58] sm:$0xff]  ;;  %v8680_v24 = vld [vmem:[%s9677_s20 + $0x30] sm:$0xff]  ;;  %v9720_v25 = vld [vmem:[#allocation9 + $0x48] sm:$0xff]  ;;  %400 = vst [vmem:[#allocation2 + $0x2c] sm:$0xf] %v9494_v26  ;;  %p9428_p2 = scmp.lt.s32.totalorder %s9426_s22, %s9422_s25 }
  0x4d   : > { %607 = vmatpush.bf16.msra.mxu0 %v8695_v2  ;;  %9133 = vmatpush.bf16.msra.mxu3 %v8695_v2  ;;  %v9723_v27 = vld [vmem:[#allocation9 + $0x40] sm:$0xff]  ;;  %v8698_v28 = vld [vmem:[#allocation2 + $0x1c] sm:$0xf]  ;;  %v6944_v29 = vld [vmem:[#allocation2 + $0x24] sm:$0xf0]  ;;  %401 = vst [vmem:[#allocation2 + $0x1b0] sm:$0xff] %v9494_v26  ;;  %p9424_p4 = pnand %p9423_p1, %p9635_p3 }
  0x4e   : > { %v6947_v30 = vor.u32 %v8698_v28, %v6944_v29  ;;  %402 = vst [vmem:[#allocation2 + $0x1b8] sm:$0xf] %v9494_v26  ;;  %v8681_v31 = vld [vmem:[%s9677_s20 + $0x38] sm:$0xff]  ;;  %v9730_v32 = vld [vmem:[%s11861_s3] ss:$0 sm:$0xff]  ;;  %v8752_v44 = vld [vmem:[#allocation9 + $0x30] sm:$0xff]  ;;  %p9429_p9 = por %p9428_p2, %p9427_p11 }
  0x4f   : > { %403 = vst [vmem:[#allocation2 + $0x1bc] sm:$0xff] %v9494_v26  ;;  %v8682_v33 = vld [vmem:[%s9677_s20 + $0x40] sm:$0xff]  ;;  %v8753_v38 = vld [vmem:[#allocation9 + $0x38] sm:$0xff]  ;;  %v9751_v48 = vld [vmem:[#allocation3 + $0x8] sm:$0xff]  ;;  %p9425_p8 = pneg %p9424_p4 }
  0x50   : > { %1848 = vmatpush.bf16.msra.mxu2 %v9703_v18  ;;  %404 = vst [vmem:[#allocation2 + $0x1c4] sm:$0xf] %v9494_v26  ;;  %1758 = vmatpush.bf16.msra.mxu1 %v8753_v38  ;;  %v9749_v47 = vld [vmem:[#allocation3] sm:$0xff]  ;;  %vm922_vm1 = vcmp.ge.s32.totalorder %v9751_v48, 1  ;;  %v8751_v52 = vld [vmem:[#allocation9 + $0x28] sm:$0xff]  ;;  %vm1115_vm7 = vcmp.lt.s32.totalorder %v9751_v48, 15 }
  0x51   : > { %608 = vmatpush.bf16.msra.mxu0 %v8694_v3  ;;  %9134 = vmatpush.bf16.msra.mxu3 %v8694_v3  ;;  %405 = vst [vmem:[#allocation2 + $0x1c8] sm:$0xff] %v9494_v26  ;;  %vm1114_vm3 = vcmp.lt.s32.totalorder %v9749_v47, 15  ;;  %v782_v61 = vld [vmem:[#allocation3 + $0xc0] sm:$0xff]  ;;  %v9780_v62 = vld [vmem:[#allocation3 + $0xc8] sm:$0xff]  ;;  %p9430_p10 = pnand %p9429_p9, %p9425_p8 }
  0x52   : > { %406 = vst [vmem:[#allocation2 + $0x1d0] sm:$0xf] %v9494_v26  ;;  %v8683_v63 = vld [vmem:[%s9677_s20 + $0x48] sm:$0xff]  ;;  %vm946_vm4 = vcmp.ge.s32.totalorder %v9780_v62, 1  ;;  %vm1138_vm5 = vcmp.lt.s32.totalorder %v782_v61, 15  ;;  %vm1139_vm9 = vcmp.lt.s32.totalorder %v9780_v62, 15 }
  0x53   : > { %407 = vst [vmem:[#allocation2 + $0x1d4] sm:$0xff] %v9494_v26  ;;  %v8684_v62 = vld [vmem:[%s9677_s20 + $0x50] sm:$0xff] }
  0x54   : > { %1849 = vmatpush.bf16.msra.mxu2 %v9706_v19  ;;  %408 = vst [vmem:[#allocation2 + $0x1dc] sm:$0xf] %v9494_v26  ;;  %1759 = vmatpush.bf16.msra.mxu1 %v8752_v44 }
  0x55   : > { %609 = vmatpush.bf16.msra.mxu0 %v8693_v4  ;;  %9135 = vmatpush.bf16.msra.mxu3 %v8693_v4  ;;  %11889 = vst [vmem:[#allocation18_spill] sm:$0xff] %v9744_v42 }
  0x58   : > { %1850 = vmatpush.bf16.msra.mxu2 %v9710_v21  ;;  %1760 = vmatpush.bf16.msra.mxu1 %v8751_v52 }
  0x59   : > { %610 = vmatpush.bf16.msra.mxu0 %v8692_v5  ;;  %9136 = vmatpush.bf16.msra.mxu3 %v8692_v5  ;;  %v8750_v5 = vld [vmem:[#allocation9 + $0x20] sm:$0xff] }
  0x5c   : > { %1851 = vmatpush.bf16.msra.mxu2 %v9713_v22  ;;  %1761 = vmatpush.bf16.msra.mxu1 %v8750_v5 }
  0x5d   : > { %611 = vmatpush.bf16.msra.mxu0 %v8691_v6  ;;  %9137 = vmatpush.bf16.msra.mxu3 %v8691_v6 }
  0x60   : > { %1852 = vmatpush.bf16.msra.mxu2 %v9716_v23 }
  0x61   : > { %612 = vmatpush.bf16.msra.mxu0 %v8690_v7  ;;  %9138 = vmatpush.bf16.msra.mxu3 %v8690_v7 }
  0x64   : > { %613 = vmatmul.bf16.vlgmr.msra.gmra.mxu0 %v8674_v8  ;;  %673 = vmatmul.bf16.vlgmr.msra.gmra.mxu3 %v8686_v9 }
  0x65   : > { %1853 = vmatpush.bf16.msra.mxu2 %v9720_v25  ;;  %9139 = vmatpush.bf16.msrb.mxu3 %v8753_v38 }
  0x69   : > { %1854 = vmatpush.bf16.msra.mxu2 %v9723_v27  ;;  %9140 = vmatpush.bf16.msrb.mxu3 %v8752_v44 }
  0x6c   : > { %1855 = vmatmul.bf16.vlgmr.msra.gmra.mxu2 %v6947_v30 }
  0x6d   : > { %9141 = vmatpush.bf16.msrb.mxu3 %v8751_v52  ;;  %v8824_v52 = vld [vmem:[#allocation9 + $0xf0] sm:$0xff] }
  0x71   : > { %9142 = vmatpush.bf16.msrb.mxu3 %v8750_v5 }
  0x74   : > { %618 = vmatmul.bf16.gmra.mxu0 %v8675_v10  ;;  %678 = vmatmul.bf16.gmra.mxu3 %v8687_v11  ;;  %v9792_v10 = vld [vmem:[#allocation3 + $0x10] sm:$0xff] }
  0x75   : > { %vm923_vm6 = vcmp.ge.s32.totalorder %v9792_v10, 1  ;;  %vm1116_vm11 = vcmp.lt.s32.totalorder %v9792_v10, 15 }
  0x84   : > { %623 = vmatmul.bf16.gmra.mxu0 %v8676_v12  ;;  %683 = vmatmul.bf16.gmra.mxu3 %v8688_v13 }
  0x94   : > { %628 = vmatmul.bf16.gmra.mxu0 %v8677_v14  ;;  %688 = vmatmul.bf16.gmra.mxu3 %v8689_v15  ;;  %v8749_v15 = vld [vmem:[#allocation9 + $0x18] sm:$0xff] }
  0x95   : > { %1762 = vmatpush.bf16.msra.mxu1 %v8749_v15  ;;  %9143 = vmatpush.bf16.msrb.mxu3 %v8749_v15 }
  0xa4   : > { %633 = vmatmul.bf16.gmra.mxu0 %v8678_v16  ;;  %v8825_v16 = vld [vmem:[#allocation9 + $0xf8] sm:$0xff] }
  0xa5   : > { %2538 = vmatpush.bf16.msrb.mxu0 %v8825_v16 }
  0xa9   : > { %2539 = vmatpush.bf16.msrb.mxu0 %v8824_v52 }
  0xb4   : > { %638 = vmatmul.bf16.gmra.mxu0 %v8679_v20 }
  0xc4   : > { %643 = vmatmul.bf16.gmra.mxu0 %v8680_v24 }
  0xd4   : > { %648 = vmatmul.bf16.gmra.mxu0 %v8681_v31 }
  0xe1   : > { %v614_v34 = vpop.f32.mrf.mxu0 }
  0xe2   : > { %v615_v35 = vadd.f32 %v9730_v32, %v614_v34 }
  0xe4   : > { %v9735_v36 = vmax.f32 %v615_v35, 0.0  ;;  %653 = vmatmul.bf16.gmra.mxu0 %v8682_v33 }
  0xe6   : > { %726 = vst [vmem:[%s9737_s24] sm:$0xff] %v9735_v36  ;;  %v790_v39 = vpack.c.bf16 %v9735_v36, %v9735_v36  ;;  %v854_v51 = vrot.slane %v9735_v36, 7  ;;  %v1049_v53 = vrot.slane %v9735_v36, 1 }
  0xe7   : > { %v674_v40 = vpop.f32.mrf.mxu3 }
  0xe8   : > { %822 = vst [vmem:[#allocation2 + $0x34] sm:$0xf] %v790_v39  ;;  %v675_v41 = vadd.f32 %v9730_v32, %v674_v40  ;;  %v9827_v39 = vld [vmem:[#allocation3 + $0xd0] sm:$0xff] }
  0xe9   : > { %v616_v43 = vpop.f32.mrf.mxu0  ;;  %vm947_vm8 = vcmp.ge.s32.totalorder %v9827_v39, 1  ;;  %vm1140_vm13 = vcmp.lt.s32.totalorder %v9827_v39, 15  ;;  %v9924_v39 = vld [vmem:[#allocation3 + $0xe0] sm:$0xff] }
  0xea   : > { %v9746_v45 = vmax.f32 %v675_v41, 0.0  ;;  %v617_v46 = vadd.f32 %v9730_v32, %v616_v43 }
  0xec   : > { %750 = vst [vmem:[%s9737_s24 + $0xc0] sm:$0xff] %v9746_v45  ;;  %v814_v49 = vpack.c.bf16 %v9746_v45, %v9746_v45  ;;  %v9757_v50 = vmax.f32 %v617_v46, 0.0  ;;  %v878_v0 = vrot.slane %v9746_v45, 7  ;;  %v1073_v1 = vrot.slane %v9746_v45, 1 }
  0xee   : > { %846 = vst [vmem:[#allocation2 + $0x154] sm:$0xf] %v814_v49  ;;  %v791_v54 = vpack.c.bf16 %v9757_v50, %v9757_v50  ;;  %v855_v55 = vrot.slane %v9757_v50, 7  ;;  %v1050_v56 = vrot.slane %v9757_v50, 1 }
  0xef   : > { %727 = vst [vmem:[%s9737_s24 + $0x8] sm:$0xff] %v9757_v50  ;;  %v676_v57 = vpop.f32.mrf.mxu3  ;;  %v8701_v40 = vld [vmem:[#allocation2 + $0x34] sm:$0xf] }
  0xf0   : > { %823 = vst [vmem:[#allocation2 + $0x40] sm:$0xf] %v791_v54  ;;  %v919_v58 = vsel %vm888_vm0, %v854_v51, %v855_v55  ;;  %v1112_v59 = vsel %vm1081_vm2, %v1049_v53, %v1050_v56  ;;  %v677_v60 = vadd.f32 %v9730_v32, %v676_v57  ;;  %v8748_v50 = vld [vmem:[#allocation9 + $0x10] sm:$0xff] }
  0xf1   : > { %v954_v2 = vsel %vm922_vm1, %v919_v58, 0.0  ;;  %v1146_v3 = vsel %vm1114_vm3, %v1112_v59, 0.0  ;;  %v619_v4 = vpop.f32.mrf.mxu0  ;;  %v9840_v59 = vld [vmem:[#allocation3 + $0x18] sm:$0xff]  ;;  %1763 = vmatpush.bf16.msra.mxu1 %v8748_v50  ;;  %9144 = vmatpush.bf16.msrb.mxu3 %v8748_v50  ;;  %vm949_vm1 = vcmp.ge.s32.totalorder %v9924_v39, 1 }
  0xf2   : > { %v986_v6 = vpack.c.bf16 %v954_v2, %v954_v2  ;;  %v1178_v7 = vpack.c.bf16 %v1146_v3, %v1146_v3  ;;  %v9789_v8 = vmax.f32 %v677_v60, 0.0  ;;  %v620_v9 = vadd.f32 %v9730_v32, %v619_v4  ;;  %v8747_v2 = vld [vmem:[#allocation9 + $0x8] sm:$0xff] }
  0xf3   : > { %vm924_vm10 = vcmp.ge.s32.totalorder %v9840_v59, 1  ;;  %v8823_v3 = vld [vmem:[#allocation9 + $0xe8] sm:$0xff]  ;;  %vm1117_vm15 = vcmp.lt.s32.totalorder %v9840_v59, 15 }
  0xf4   : > { %1018 = vst [vmem:[#allocation2 + $0x3c] sm:$0xf] %v986_v6  ;;  %v815_v11 = vpack.c.bf16 %v9789_v8, %v9789_v8  ;;  %v879_v12 = vrot.slane %v9789_v8, 7  ;;  %v1074_v13 = vrot.slane %v9789_v8, 1  ;;  %v9799_v14 = vmax.f32 %v620_v9, 0.0  ;;  %658 = vmatmul.bf16.gmra.mxu0 %v8683_v63 }
  0xf5   : > { %1210 = vst [vmem:[#allocation2 + $0x38] sm:$0xf] %v1178_v7  ;;  %1764 = vmatpush.bf16.msra.mxu1 %v8747_v2  ;;  %2540 = vmatpush.bf16.msrb.mxu0 %v8823_v3 }
  0xf6   : > { %751 = vst [vmem:[%s9737_s24 + $0xc8] sm:$0xff] %v9789_v8  ;;  %v895_v20 = vsel %vm888_vm0, %v878_v0, %v879_v12  ;;  %v1088_v24 = vsel %vm1081_vm2, %v1073_v1, %v1074_v13  ;;  %v792_v26 = vpack.c.bf16 %v9799_v14, %v9799_v14  ;;  %v856_v28 = vrot.slane %v9799_v14, 7  ;;  %9145 = vmatpush.bf16.msrb.mxu3 %v8747_v2  ;;  %v6942_v2 = vld [vmem:[#allocation2 + $0x18] sm:$0xf] }
  0xf7   : > { %847 = vst [vmem:[#allocation2 + $0x160] sm:$0xf] %v815_v11  ;;  %v978_v29 = vsel %vm946_vm4, %v895_v20, 0.0  ;;  %v1170_v30 = vsel %vm1138_vm5, %v1088_v24, 0.0  ;;  %v1051_v31 = vrot.slane %v9799_v14, 1  ;;  %v679_v33 = vpop.f32.mrf.mxu3  ;;  %v9873_v24 = vld [vmem:[#allocation3 + $0xd8] sm:$0xff] }
  0xf8   : > { %v1010_v34 = vpack.c.bf16 %v978_v29, %v978_v29  ;;  %v1202_v35 = vpack.c.bf16 %v1170_v30, %v1170_v30  ;;  %728 = vst [vmem:[%s9737_s24 + $0x10] sm:$0xff] %v9799_v14  ;;  %v918_v37 = vsel %vm888_vm0, %v855_v55, %v856_v28  ;;  %v680_v38 = vadd.f32 %v9730_v32, %v679_v33  ;;  %v6956_v41 = vld [vmem:[#allocation2 + $0x3c] sm:$0xf0] }
  0xf9   : > { %824 = vst [vmem:[#allocation2 + $0x4c] sm:$0xf] %v792_v26  ;;  %v955_v43 = vsel %vm923_vm6, %v918_v37, 0.0  ;;  %v1111_v44 = vsel %vm1081_vm2, %v1050_v56, %v1051_v31  ;;  %v621_v46 = vpop.f32.mrf.mxu0  ;;  %v6959_v49 = vor.u32 %v8701_v40, %v6956_v41  ;;  %v9887_v37 = vld [vmem:[#allocation3 + $0x20] sm:$0xff]  ;;  %vm948_vm12 = vcmp.ge.s32.totalorder %v9873_v24, 1 }
  0xfa   : > { %1042 = vst [vmem:[#allocation2 + $0x15c] sm:$0xf] %v1010_v34  ;;  %v987_v54 = vpack.c.bf16 %v955_v43, %v955_v43  ;;  %v1147_v55 = vsel %vm1115_vm7, %v1111_v44, 0.0  ;;  %v9837_v57 = vmax.f32 %v680_v38, 0.0  ;;  %v622_v58 = vadd.f32 %v9730_v32, %v621_v46  ;;  %v8746_v41 = vld [vmem:[#allocation9] sm:$0xff] }
  0xfb   : > { %1234 = vst [vmem:[#allocation2 + $0x158] sm:$0xf] %v1202_v35  ;;  %v1179_v60 = vpack.c.bf16 %v1147_v55, %v1147_v55  ;;  %1860 = vmatmul.bf16.gmra.mxu2 %v6959_v49  ;;  %vm925_vm14 = vcmp.ge.s32.totalorder %v9887_v37, 1  ;;  %v8822_v43 = vld [vmem:[#allocation9 + $0xe0] sm:$0xff]  ;;  %1765 = vmatpush.bf16.msra.mxu1 %v8746_v41  ;;  %vm1141_vm3 = vcmp.lt.s32.totalorder %v9873_v24, 15  ;;  %vm1118_vm5 = vcmp.lt.s32.totalorder %v9887_v37, 15 }
  0xfc   : > { %1019 = vst [vmem:[#allocation2 + $0x48] sm:$0xf] %v987_v54  ;;  %v816_v48 = vpack.c.bf16 %v9837_v57, %v9837_v57  ;;  %v880_v56 = vrot.slane %v9837_v57, 7  ;;  %v1075_v61 = vrot.slane %v9837_v57, 1  ;;  %v9848_v63 = vmax.f32 %v622_v58, 0.0  ;;  %2541 = vmatpush.bf16.msrb.mxu0 %v8822_v43  ;;  %9146 = vmatpush.bf16.msrb.mxu3 %v8746_v41  ;;  %v8685_v24 = vld [vmem:[%s9677_s20 + $0x58] sm:$0xff] }
  0xfd   : > { %1211 = vst [vmem:[#allocation2 + $0x44] sm:$0xf] %v1179_v60  ;;  %vm1142_vm7 = vcmp.lt.s32.totalorder %v9924_v39, 15 }
  0xfe   : > { %752 = vst [vmem:[%s9737_s24 + $0xd0] sm:$0xff] %v9837_v57  ;;  %v894_v4 = vsel %vm888_vm0, %v879_v12, %v880_v56  ;;  %v1087_v5 = vsel %vm1081_vm2, %v1074_v13, %v1075_v61  ;;  %v793_v6 = vpack.c.bf16 %v9848_v63, %v9848_v63  ;;  %v857_v7 = vrot.slane %v9848_v63, 7 }
  0xff   : > { %848 = vst [vmem:[#allocation2 + $0x16c] sm:$0xf] %v816_v48  ;;  %v979_v8 = vsel %vm947_vm8, %v894_v4, 0.0  ;;  %v1171_v9 = vsel %vm1139_vm9, %v1087_v5, 0.0  ;;  %v1052_v11 = vrot.slane %v9848_v63, 1  ;;  %v681_v12 = vpop.f32.mrf.mxu3 }
 0x100   : > { %v1011_v13 = vpack.c.bf16 %v979_v8, %v979_v8  ;;  %v1203_v15 = vpack.c.bf16 %v1171_v9, %v1171_v9  ;;  %729 = vst [vmem:[%s9737_s24 + $0x18] sm:$0xff] %v9848_v63  ;;  %v917_v16 = vsel %vm888_vm0, %v856_v28, %v857_v7  ;;  %v682_v20 = vadd.f32 %v9730_v32, %v681_v12  ;;  %v8704_v52 = vld [vmem:[#allocation2 + $0x4c] sm:$0xf]  ;;  %v8699_v8 = vld [vmem:[#allocation2 + $0x20] sm:$0xf0] }
 0x101   : > { %825 = vst [vmem:[#allocation2 + $0x58] sm:$0xf] %v793_v6  ;;  %v956_v26 = vsel %vm924_vm10, %v917_v16, 0.0  ;;  %v1110_v29 = vsel %vm1081_vm2, %v1051_v31, %v1052_v11  ;;  %v624_v30 = vpop.f32.mrf.mxu0  ;;  %v8821_v16 = vld [vmem:[#allocation9 + $0xd8] sm:$0xff]  ;;  %9147 = vmatpush.bf16.msra.mxu3 %v9700_v17  ;;  %v8820_v17 = vld [vmem:[#allocation9 + $0xd0] sm:$0xff] }
 0x102   : > { %1043 = vst [vmem:[#allocation2 + $0x168] sm:$0xf] %v1011_v13  ;;  %v988_v33 = vpack.c.bf16 %v956_v26, %v956_v26  ;;  %v1148_v28 = vsel %vm1116_vm11, %v1110_v29, 0.0  ;;  %v9884_v34 = vmax.f32 %v682_v20, 0.0  ;;  %v625_v35 = vadd.f32 %v9730_v32, %v624_v30  ;;  %2542 = vmatpush.bf16.msrb.mxu0 %v8821_v16 }
 0x103   : > { %1235 = vst [vmem:[#allocation2 + $0x164] sm:$0xf] %v1203_v15  ;;  %v1180_v14 = vpack.c.bf16 %v1148_v28, %v1148_v28  ;;  %v9937_v15 = vld [vmem:[#allocation3 + $0x28] sm:$0xff]  ;;  %v6943_v20 = vor.u32 %v8699_v8, %v6942_v2 }
 0x104   : > { %1020 = vst [vmem:[#allocation2 + $0x54] sm:$0xf] %v988_v33  ;;  %v817_v31 = vpack.c.bf16 %v9884_v34, %v9884_v34  ;;  %v881_v10 = vrot.slane %v9884_v34, 7  ;;  %v1076_v38 = vrot.slane %v9884_v34, 1  ;;  %v9895_v40 = vmax.f32 %v625_v35, 0.0  ;;  %663 = vmatmul.bf16.gmra.mxu0 %v8684_v62 }
 0x105   : > { %1212 = vst [vmem:[#allocation2 + $0x50] sm:$0xf] %v1180_v14  ;;  %vm926_vm4 = vcmp.ge.s32.totalorder %v9937_v15, 1  ;;  %1766 = vmatmul.bf16.vlgmr.msra.gmra.mxu1 %v6943_v20  ;;  %9148 = vmatpush.bf16.msra.mxu3 %v9703_v18  ;;  %vm1119_vm9 = vcmp.lt.s32.totalorder %v9937_v15, 15 }
 0x106   : > { %753 = vst [vmem:[%s9737_s24 + $0xd8] sm:$0xff] %v9884_v34  ;;  %v893_v44 = vsel %vm888_vm0, %v880_v56, %v881_v10  ;;  %v1086_v46 = vsel %vm1081_vm2, %v1075_v61, %v1076_v38  ;;  %v794_v49 = vpack.c.bf16 %v9895_v40, %v9895_v40  ;;  %v858_v50 = vrot.slane %v9895_v40, 7  ;;  %2543 = vmatpush.bf16.msrb.mxu0 %v8820_v17 }
 0x107   : > { %849 = vst [vmem:[#allocation2 + $0x178] sm:$0xf] %v817_v31  ;;  %v980_v54 = vsel %vm948_vm12, %v893_v44, 0.0  ;;  %v1172_v55 = vsel %vm1140_vm13, %v1086_v46, 0.0  ;;  %v1053_v57 = vrot.slane %v9895_v40, 1  ;;  %v684_v58 = vpop.f32.mrf.mxu3  ;;  %v9976_v44 = vld [vmem:[#allocation3 + $0xe8] sm:$0xff] }
 0x108   : > { %v1012_v60 = vpack.c.bf16 %v980_v54, %v980_v54  ;;  %v1204_v48 = vpack.c.bf16 %v1172_v55, %v1172_v55  ;;  %730 = vst [vmem:[%s9737_s24 + $0x20] sm:$0xff] %v9895_v40  ;;  %v916_v56 = vsel %vm888_vm0, %v857_v7, %v858_v50  ;;  %v685_v61 = vadd.f32 %v9730_v32, %v684_v58  ;;  %v6968_v63 = vld [vmem:[#allocation2 + $0x54] sm:$0xf0]  ;;  %v8819_v54 = vld [vmem:[#allocation9 + $0xc8] sm:$0xff] }
 0x109   : > { %826 = vst [vmem:[#allocation2 + $0x64] sm:$0xf] %v794_v49  ;;  %v957_v3 = vsel %vm925_vm14, %v916_v56, 0.0  ;;  %v1109_v4 = vsel %vm1081_vm2, %v1052_v11, %v1053_v57  ;;  %v626_v5 = vpop.f32.mrf.mxu0  ;;  %v6971_v6 = vor.u32 %v8704_v52, %v6968_v63  ;;  %9149 = vmatpush.bf16.msra.mxu3 %v9706_v19  ;;  %vm950_vm6 = vcmp.ge.s32.totalorder %v9976_v44, 1  ;;  %v8818_v19 = vld [vmem:[#allocation9 + $0xc0] sm:$0xff] }
 0x10a   : > { %1044 = vst [vmem:[#allocation2 + $0x174] sm:$0xf] %v1012_v60  ;;  %v989_v7 = vpack.c.bf16 %v957_v3, %v957_v3  ;;  %v1149_v9 = vsel %vm1117_vm15, %v1109_v4, 0.0  ;;  %v9934_v12 = vmax.f32 %v685_v61, 0.0  ;;  %v627_v13 = vadd.f32 %v9730_v32, %v626_v5  ;;  %2544 = vmatpush.bf16.msrb.mxu0 %v8819_v54 }
 0x10b   : > { %1236 = vst [vmem:[#allocation2 + $0x170] sm:$0xf] %v1204_v48  ;;  %v1181_v11 = vpack.c.bf16 %v1149_v9, %v1149_v9  ;;  %1865 = vmatmul.bf16.gmra.mxu2 %v6971_v6  ;;  %v9990_v48 = vld [vmem:[#allocation3 + $0x30] sm:$0xff]  ;;  %vm1143_vm11 = vcmp.lt.s32.totalorder %v9976_v44, 15  ;;  %vm921_vm14 = vcmp.ge.s32.totalorder %v9749_v47, 1 }
 0x10c   : > { %1021 = vst [vmem:[#allocation2 + $0x60] sm:$0xf] %v989_v7  ;;  %v818_v59 = vpack.c.bf16 %v9934_v12, %v9934_v12  ;;  %v882_v62 = vrot.slane %v9934_v12, 7  ;;  %v1077_v26 = vrot.slane %v9934_v12, 1  ;;  %v9946_v29 = vmax.f32 %v627_v13, 0.0 }
 0x10d   : > { %1213 = vst [vmem:[#allocation2 + $0x5c] sm:$0xf] %v1181_v11  ;;  %vm927_vm8 = vcmp.ge.s32.totalorder %v9990_v48, 1  ;;  %9150 = vmatpush.bf16.msra.mxu3 %v9710_v21  ;;  %vm1120_vm13 = vcmp.lt.s32.totalorder %v9990_v48, 15 }
 0x10e   : > { %754 = vst [vmem:[%s9737_s24 + $0xe0] sm:$0xff] %v9934_v12  ;;  %v892_v30 = vsel %vm888_vm0, %v881_v10, %v882_v62  ;;  %v1085_v33 = vsel %vm1081_vm2, %v1076_v38, %v1077_v26  ;;  %v795_v28 = vpack.c.bf16 %v9946_v29, %v9946_v29  ;;  %v859_v35 = vrot.slane %v9946_v29, 7  ;;  %2545 = vmatpush.bf16.msrb.mxu0 %v8818_v19 }
 0x10f   : > { %850 = vst [vmem:[#allocation2 + $0x184] sm:$0xf] %v818_v59  ;;  %v981_v14 = vsel %vm949_vm1, %v892_v30, 0.0  ;;  %v1173_v31 = vsel %vm1141_vm3, %v1085_v33, 0.0  ;;  %v1054_v34 = vrot.slane %v9946_v29, 1  ;;  %v686_v10 = vpop.f32.mrf.mxu3  ;;  %v10031_v30 = vld [vmem:[#allocation3 + $0xf0] sm:$0xff] }
 0x110   : > { %v1013_v38 = vpack.c.bf16 %v981_v14, %v981_v14  ;;  %v1205_v41 = vpack.c.bf16 %v1173_v31, %v1173_v31  ;;  %731 = vst [vmem:[%s9737_s24 + $0x28] sm:$0xff] %v9946_v29  ;;  %v915_v18 = vsel %vm888_vm0, %v858_v50, %v859_v35  ;;  %v687_v43 = vadd.f32 %v9730_v32, %v686_v10  ;;  %v8707_v16 = vld [vmem:[#allocation2 + $0x64] sm:$0xf] }
 0x111   : > { %827 = vst [vmem:[#allocation2 + $0x70] sm:$0xf] %v795_v28  ;;  %v958_v46 = vsel %vm926_vm4, %v915_v18, 0.0  ;;  %v1108_v49 = vsel %vm1081_vm2, %v1053_v57, %v1054_v34  ;;  %v629_v52 = vpop.f32.mrf.mxu0  ;;  %v10034_v28 = vld [vmem:[#allocation3 + $0x38] sm:$0xff]  ;;  %9151 = vmatpush.bf16.msra.mxu3 %v9713_v22  ;;  %vm951_vm10 = vcmp.ge.s32.totalorder %v10031_v30, 1  ;;  %vm1144_vm1 = vcmp.lt.s32.totalorder %v10031_v30, 15 }
 0x112   : > { %1045 = vst [vmem:[#allocation2 + $0x180] sm:$0xf] %v1013_v38  ;;  %v990_v55 = vpack.c.bf16 %v958_v46, %v958_v46  ;;  %v1150_v50 = vsel %vm1118_vm5, %v1108_v49, 0.0  ;;  %v9987_v58 = vmax.f32 %v687_v43, 0.0  ;;  %v630_v60 = vadd.f32 %v9730_v32, %v629_v52 }
 0x113   : > { %1237 = vst [vmem:[#allocation2 + $0x17c] sm:$0xf] %v1205_v41  ;;  %v1182_v40 = vpack.c.bf16 %v1150_v50, %v1150_v50  ;;  %vm928_vm12 = vcmp.ge.s32.totalorder %v10034_v28, 1  ;;  %vm1121_vm5 = vcmp.lt.s32.totalorder %v10034_v28, 15 }
 0x114   : > { %1022 = vst [vmem:[#allocation2 + $0x6c] sm:$0xf] %v990_v55  ;;  %v819_v37 = vpack.c.bf16 %v9987_v58, %v9987_v58  ;;  %v883_v57 = vrot.slane %v9987_v58, 7  ;;  %v1078_v56 = vrot.slane %v9987_v58, 1  ;;  %v9999_v61 = vmax.f32 %v630_v60, 0.0  ;;  %668 = vmatmul.bf16.gmra.mxu0 %v8685_v24  ;;  %v789_v55 = vld [vmem:[#allocation3 + $0xf8] sm:$0xff] }
 0x115   : > { %1214 = vst [vmem:[#allocation2 + $0x68] sm:$0xf] %v1182_v40  ;;  %9152 = vmatpush.bf16.msra.mxu3 %v9716_v23  ;;  %vm952_vm15 = vcmp.ge.s32.totalorder %v789_v55, 1  ;;  %vm1145_vm3 = vcmp.lt.s32.totalorder %v789_v55, 15 }
 0x116   : > { %755 = vst [vmem:[%s9737_s24 + $0xe8] sm:$0xff] %v9987_v58  ;;  %v891_v63 = vsel %vm888_vm0, %v882_v62, %v883_v57  ;;  %v1084_v2 = vsel %vm1081_vm2, %v1077_v26, %v1078_v56  ;;  %v796_v3 = vpack.c.bf16 %v9999_v61, %v9999_v61  ;;  %v860_v4 = vrot.slane %v9999_v61, 7 }
 0x117   : > { %851 = vst [vmem:[#allocation2 + $0x190] sm:$0xf] %v819_v37  ;;  %v982_v5 = vsel %vm950_vm6, %v891_v63, 0.0  ;;  %v1174_v6 = vsel %vm1142_vm7, %v1084_v2, 0.0  ;;  %v1055_v8 = vrot.slane %v9999_v61, 1  ;;  %v689_v7 = vpop.f32.mrf.mxu3 }
 0x118   : > { %v1014_v9 = vpack.c.bf16 %v982_v5, %v982_v5  ;;  %v1206_v12 = vpack.c.bf16 %v1174_v6, %v1174_v6  ;;  %732 = vst [vmem:[%s9737_s24 + $0x30] sm:$0xff] %v9999_v61  ;;  %v914_v13 = vsel %vm888_vm0, %v859_v35, %v860_v4  ;;  %v690_v21 = vadd.f32 %v9730_v32, %v689_v7  ;;  %v6980_v11 = vld [vmem:[#allocation2 + $0x6c] sm:$0xf0] }
 0x119   : > { %828 = vst [vmem:[#allocation2 + $0x7c] sm:$0xf] %v796_v3  ;;  %v959_v39 = vsel %vm927_vm8, %v914_v13, 0.0  ;;  %v1107_v20 = vsel %vm1081_vm2, %v1054_v34, %v1055_v8  ;;  %v631_v59 = vpop.f32.mrf.mxu0  ;;  %v6983_v62 = vor.u32 %v8707_v16, %v6980_v11  ;;  %9153 = vmatpush.bf16.msra.mxu3 %v9720_v25 }
 0x11a   : > { %1046 = vst [vmem:[#allocation2 + $0x18c] sm:$0xf] %v1014_v9  ;;  %v991_v26 = vpack.c.bf16 %v959_v39, %v959_v39  ;;  %v1151_v29 = vsel %vm1119_vm9, %v1107_v20, 0.0  ;;  %v10029_v17 = vmax.f32 %v690_v21, 0.0  ;;  %v632_v33 = vadd.f32 %v9730_v32, %v631_v59 }
 0x11b   : > { %1238 = vst [vmem:[#allocation2 + $0x188] sm:$0xf] %v1206_v12  ;;  %v1183_v35 = vpack.c.bf16 %v1151_v29, %v1151_v29  ;;  %1870 = vmatmul.bf16.gmra.mxu2 %v6983_v62  ;;  %v767_v62 = vld [vmem:[#allocation3 + $0x48] sm:$0xff] }
 0x11c   : > { %1023 = vst [vmem:[#allocation2 + $0x78] sm:$0xf] %v991_v26  ;;  %v820_v15 = vpack.c.bf16 %v10029_v17, %v10029_v17  ;;  %v884_v14 = vrot.slane %v10029_v17, 7  ;;  %v1079_v31 = vrot.slane %v10029_v17, 1  ;;  %v10043_v34 = vmax.f32 %v632_v33, 0.0 }
 0x11d   : > { %1215 = vst [vmem:[#allocation2 + $0x74] sm:$0xf] %v1183_v35  ;;  %9154 = vmatpush.bf16.msra.mxu3 %v9723_v27  ;;  %vm930_vm6 = vcmp.ge.s32.totalorder %v767_v62, 1  ;;  %vm1123_vm9 = vcmp.lt.s32.totalorder %v767_v62, 15  ;;  %v7242_v62 = vld [vmem:[#allocation2 + $0x48] sm:$0xf] }
 0x11e   : > { %756 = vst [vmem:[%s9737_s24 + $0xf0] sm:$0xff] %v10029_v17  ;;  %v890_v22 = vsel %vm888_vm0, %v883_v57, %v884_v14  ;;  %v1083_v10 = vsel %vm1081_vm2, %v1078_v56, %v1079_v31  ;;  %v797_v38 = vpack.c.bf16 %v10043_v34, %v10043_v34  ;;  %v861_v41 = vrot.slane %v10043_v34, 7  ;;  %v10077_v57 = vld [vmem:[#allocation3 + $0x40] sm:$0xff] }
 0x11f   : > { %852 = vst [vmem:[#allocation2 + $0x19c] sm:$0xf] %v820_v15  ;;  %v983_v18 = vsel %vm951_vm10, %v890_v22, 0.0  ;;  %v1175_v43 = vsel %vm1143_vm11, %v1083_v10, 0.0  ;;  %v1056_v24 = vrot.slane %v10043_v34, 1  ;;  %v691_v46 = vpop.f32.mrf.mxu3  ;;  %vm929_vm4 = vcmp.ge.s32.totalorder %v10077_v57, 1 }
 0x120   : > { %v1015_v49 = vpack.c.bf16 %v983_v18, %v983_v18  ;;  %v1207_v52 = vpack.c.bf16 %v1175_v43, %v1175_v43  ;;  %733 = vst [vmem:[%s9737_s24 + $0x38] sm:$0xff] %v10043_v34  ;;  %v913_v23 = vsel %vm888_vm0, %v860_v4, %v861_v41  ;;  %v692_v54 = vadd.f32 %v9730_v32, %v691_v46  ;;  %v8710_v36 = vld [vmem:[#allocation2 + $0x7c] sm:$0xf] }
 0x121   : > { %829 = vst [vmem:[#allocation2 + $0x88] sm:$0xf] %v797_v38  ;;  %v960_v44 = vsel %vm928_vm12, %v913_v23, 0.0  ;;  %v1106_v50 = vsel %vm1081_vm2, %v1055_v8, %v1056_v24  ;;  %v634_v58 = vpop.f32.mrf.mxu0  ;;  %vm1122_vm7 = vcmp.lt.s32.totalorder %v10077_v57, 15  ;;  %v8702_v22 = vld [vmem:[#allocation2 + $0x38] sm:$0xf0] }
 0x122   : > { %1047 = vst [vmem:[#allocation2 + $0x198] sm:$0xf] %v1015_v49  ;;  %v992_v60 = vpack.c.bf16 %v960_v44, %v960_v44  ;;  %v1152_v48 = vsel %vm1120_vm13, %v1106_v50, 0.0  ;;  %v725_v40 = vmax.f32 %v692_v54, 0.0  ;;  %v635_v37 = vadd.f32 %v9730_v32, %v634_v58  ;;  %v8771_v10 = vld [vmem:[#allocation2 + $0x38] sm:$0xf0] }
 0x123   : > { %1239 = vst [vmem:[#allocation2 + $0x194] sm:$0xf] %v1207_v52  ;;  %v1184_v56 = vpack.c.bf16 %v1152_v48, %v1152_v48  ;;  %v768_v52 = vld [vmem:[#allocation3 + $0x50] sm:$0xff] }
 0x124   : > { %1024 = vst [vmem:[#allocation2 + $0x84] sm:$0xf] %v992_v60  ;;  %v821_v61 = vpack.c.bf16 %v725_v40, %v725_v40  ;;  %v885_v19 = vrot.slane %v725_v40, 7  ;;  %v1080_v63 = vrot.slane %v725_v40, 1  ;;  %v702_v2 = vmax.f32 %v635_v37, 0.0 }
 0x125   : > { %1216 = vst [vmem:[#allocation2 + $0x80] sm:$0xf] %v1184_v56  ;;  %vm931_vm8 = vcmp.ge.s32.totalorder %v768_v52, 1  ;;  %vm1124_vm11 = vcmp.lt.s32.totalorder %v768_v52, 15  ;;  %v8708_v52 = vld [vmem:[#allocation2 + $0x68] sm:$0xf0] }
 0x126   : > { %757 = vst [vmem:[%s9737_s24 + $0xf8] sm:$0xff] %v725_v40  ;;  %v889_v3 = vsel %vm888_vm0, %v884_v14, %v885_v19  ;;  %v920_v25 = vsel %vm888_vm0, %v885_v19, %v854_v51  ;;  %v1082_v4 = vsel %vm1081_vm2, %v1079_v31, %v1080_v63  ;;  %v1113_v5 = vsel %vm1081_vm2, %v1080_v63, %v1049_v53 }
 0x127   : > { %853 = vst [vmem:[#allocation2 + $0x1a8] sm:$0xf] %v821_v61  ;;  %v953_v6 = vsel %vm921_vm14, %v920_v25, 0.0  ;;  %v984_v8 = vsel %vm952_vm15, %v889_v3, 0.0  ;;  %v1176_v7 = vsel %vm1144_vm1, %v1082_v4, 0.0  ;;  %v1177_v9 = vsel %vm1145_vm3, %v1113_v5, 0.0 }
 0x128   : > { %v985_v51 = vpack.c.bf16 %v953_v6, %v953_v6  ;;  %v1016_v12 = vpack.c.bf16 %v984_v8, %v984_v8  ;;  %v1208_v13 = vpack.c.bf16 %v1176_v7, %v1176_v7  ;;  %734 = vst [vmem:[%s9737_s24 + $0x40] sm:$0xff] %v702_v2  ;;  %v6992_v53 = vld [vmem:[#allocation2 + $0x84] sm:$0xf0]  ;;  %v1209_v21 = vpack.c.bf16 %v1177_v9, %v1177_v9  ;;  %v769_v25 = vld [vmem:[#allocation3 + $0x58] sm:$0xff]  ;;  %v8705_v9 = vld [vmem:[#allocation2 + $0x50] sm:$0xf0] }
 0x129   : > { %v862_v47 = vrot.slane %v702_v2, 7  ;;  %v1057_v16 = vrot.slane %v702_v2, 1  ;;  %v636_v11 = vpop.f32.mrf.mxu0  ;;  %v6995_v39 = vor.u32 %v8710_v36, %v6992_v53  ;;  %v798_v20 = vpack.c.bf16 %v702_v2, %v702_v2 }
 0x12a   : > { %1017 = vst [vmem:[#allocation2 + $0x30] sm:$0xf] %v985_v51  ;;  %v637_v59 = vadd.f32 %v9730_v32, %v636_v11  ;;  %vm932_vm10 = vcmp.ge.s32.totalorder %v769_v25, 1  ;;  %vm1125_vm13 = vcmp.lt.s32.totalorder %v769_v25, 15 }
 0x12b   : > { %1048 = vst [vmem:[#allocation2 + $0x1a4] sm:$0xf] %v1016_v12  ;;  %v912_v27 = vsel %vm888_vm0, %v861_v41, %v862_v47  ;;  %v1105_v26 = vsel %vm1081_vm2, %v1056_v24, %v1057_v16  ;;  %1875 = vmatmul.bf16.gmra.mxu2 %v6995_v39 }
 0x12c   : > { %1240 = vst [vmem:[#allocation2 + $0x1a0] sm:$0xf] %v1208_v13  ;;  %v961_v29 = vsel %vm929_vm4, %v912_v27, 0.0  ;;  %v1153_v17 = vsel %vm1121_vm5, %v1105_v26, 0.0  ;;  %v703_v30 = vmax.f32 %v637_v59, 0.0 }
 0x12d   : > { %1241 = vst [vmem:[#allocation2 + $0x1ac] sm:$0xf] %v1209_v21  ;;  %v993_v33 = vpack.c.bf16 %v961_v29, %v961_v29  ;;  %v1185_v35 = vpack.c.bf16 %v1153_v17, %v1153_v17  ;;  %v8774_v13 = vld [vmem:[#allocation2 + $0x50] sm:$0xf0] }
 0x12e   : > { %830 = vst [vmem:[#allocation2 + $0x94] sm:$0xf] %v798_v20  ;;  %v799_v15 = vpack.c.bf16 %v703_v30, %v703_v30  ;;  %v863_v14 = vrot.slane %v703_v30, 7  ;;  %v1058_v31 = vrot.slane %v703_v30, 1  ;;  %v770_v20 = vld [vmem:[#allocation3 + $0x60] sm:$0xff]  ;;  %v7243_v27 = vor.u32 %v8774_v13, %v7242_v62 }
 0x12f   : > { %1025 = vst [vmem:[#allocation2 + $0x90] sm:$0xf] %v993_v33  ;;  %vm933_vm12 = vcmp.ge.s32.totalorder %v770_v20, 1  ;;  %vm1126_vm15 = vcmp.lt.s32.totalorder %v770_v20, 15 }
 0x130   : > { %1217 = vst [vmem:[#allocation2 + $0x8c] sm:$0xf] %v1185_v35  ;;  %v911_v34 = vsel %vm888_vm0, %v862_v47, %v863_v14  ;;  %v1104_v28 = vsel %vm1081_vm2, %v1057_v16, %v1058_v31  ;;  %v6966_v47 = vld [vmem:[#allocation2 + $0x48] sm:$0xf] }
 0x131   : > { %735 = vst [vmem:[%s9737_s24 + $0x48] sm:$0xff] %v703_v30  ;;  %v962_v38 = vsel %vm930_vm6, %v911_v34, 0.0  ;;  %v1154_v41 = vsel %vm1122_vm7, %v1104_v28, 0.0  ;;  %v639_v18 = vpop.f32.mrf.mxu0  ;;  %v6954_v43 = vld [vmem:[#allocation2 + $0x30] sm:$0xf]  ;;  %v6967_v59 = vor.u32 %v8705_v9, %v6966_v47 }
 0x132   : > { %831 = vst [vmem:[#allocation2 + $0xa0] sm:$0xf] %v799_v15  ;;  %v994_v24 = vpack.c.bf16 %v962_v38, %v962_v38  ;;  %v1186_v46 = vpack.c.bf16 %v1154_v41, %v1154_v41  ;;  %v640_v49 = vadd.f32 %v9730_v32, %v639_v18  ;;  %v6955_v23 = vor.u32 %v8702_v22, %v6954_v43  ;;  %v7230_v54 = vld [vmem:[#allocation2 + $0x30] sm:$0xf]  ;;  %v771_v18 = vld [vmem:[#allocation3 + $0x68] sm:$0xff] }
 0x133   : > { %v7231_v55 = vor.u32 %v8771_v10, %v7230_v54  ;;  %vm934_vm14 = vcmp.ge.s32.totalorder %v771_v18, 1  ;;  %vm1127_vm3 = vcmp.lt.s32.totalorder %v771_v18, 15 }
 0x134   : > { %1026 = vst [vmem:[#allocation2 + $0x9c] sm:$0xf] %v994_v24  ;;  %v704_v44 = vmax.f32 %v640_v49, 0.0  ;;  %1771 = vmatmul.bf16.gmra.mxu1 %v6955_v23 }
 0x135   : > { %1218 = vst [vmem:[#allocation2 + $0x98] sm:$0xf] %v1186_v46  ;;  %2546 = vmatmul.bf16.vlgmr.msrb.gmra.mxu0 %v7231_v55  ;;  %v8713_v61 = vld [vmem:[#allocation2 + $0x94] sm:$0xf] }
 0x136   : > { %736 = vst [vmem:[%s9737_s24 + $0x50] sm:$0xff] %v704_v44  ;;  %v800_v50 = vpack.c.bf16 %v704_v44, %v704_v44  ;;  %v864_v58 = vrot.slane %v704_v44, 7  ;;  %v1059_v60 = vrot.slane %v704_v44, 1 }
 0x138   : > { %832 = vst [vmem:[#allocation2 + $0xac] sm:$0xf] %v800_v50  ;;  %v910_v48 = vsel %vm888_vm0, %v863_v14, %v864_v58  ;;  %v1103_v40 = vsel %vm1081_vm2, %v1058_v31, %v1059_v60 }
 0x139   : > { %v963_v37 = vsel %vm931_vm8, %v910_v48, 0.0  ;;  %v1155_v57 = vsel %vm1123_vm9, %v1103_v40, 0.0  ;;  %v641_v56 = vpop.f32.mrf.mxu0  ;;  %v7004_v19 = vld [vmem:[#allocation2 + $0x9c] sm:$0xf0] }
 0x13a   : > { %v995_v63 = vpack.c.bf16 %v963_v37, %v963_v37  ;;  %v1187_v2 = vpack.c.bf16 %v1155_v57, %v1155_v57  ;;  %v642_v3 = vadd.f32 %v9730_v32, %v641_v56  ;;  %v7007_v4 = vor.u32 %v8713_v61, %v7004_v19  ;;  %v10150_v40 = vld [vmem:[%s11861_s3] ss:$0 sm:$0xff]  ;;  %v772_v57 = vld [vmem:[#allocation3 + $0x70] sm:$0xff] }
 0x13b   : > { %v7254_v61 = vld [vmem:[#allocation2 + $0x60] sm:$0xf]  ;;  %vm935_vm1 = vcmp.ge.s32.totalorder %v772_v57, 1  ;;  %vm1128_vm5 = vcmp.lt.s32.totalorder %v772_v57, 15 }
 0x13c   : > { %1027 = vst [vmem:[#allocation2 + $0xa8] sm:$0xf] %v995_v63  ;;  %v705_v5 = vmax.f32 %v642_v3, 0.0  ;;  %1880 = vmatmul.bf16.gmra.mxu2 %v7007_v4 }
 0x13d   : > { %1219 = vst [vmem:[#allocation2 + $0xa4] sm:$0xf] %v1187_v2 }
 0x13e   : > { %737 = vst [vmem:[%s9737_s24 + $0x58] sm:$0xff] %v705_v5  ;;  %v801_v6 = vpack.c.bf16 %v705_v5, %v705_v5  ;;  %v865_v8 = vrot.slane %v705_v5, 7  ;;  %v1060_v7 = vrot.slane %v705_v5, 1 }
 0x13f   : > { %v8716_v33 = vld [vmem:[#allocation2 + $0xac] sm:$0xf] }
 0x140   : > { %833 = vst [vmem:[#allocation2 + $0xb8] sm:$0xf] %v801_v6  ;;  %v909_v51 = vsel %vm888_vm0, %v864_v58, %v865_v8  ;;  %v1102_v12 = vsel %vm1081_vm2, %v1059_v60, %v1060_v7  ;;  %v6978_v58 = vld [vmem:[#allocation2 + $0x60] sm:$0xf] }
 0x141   : > { %v964_v36 = vsel %vm932_vm10, %v909_v51, 0.0  ;;  %v1156_v53 = vsel %vm1124_vm11, %v1102_v12, 0.0  ;;  %v644_v21 = vpop.f32.mrf.mxu0  ;;  %v6979_v56 = vor.u32 %v8708_v52, %v6978_v58  ;;  %v775_v58 = vld [vmem:[#allocation3 + $0x88] sm:$0xff] }
 0x142   : > { %v996_v16 = vpack.c.bf16 %v964_v36, %v964_v36  ;;  %v1188_v11 = vpack.c.bf16 %v1156_v53, %v1156_v53  ;;  %v645_v39 = vadd.f32 %v9730_v32, %v644_v21  ;;  %v773_v21 = vld [vmem:[#allocation3 + $0x78] sm:$0xff]  ;;  %vm938_vm8 = vcmp.ge.s32.totalorder %v775_v58, 1 }
 0x143   : > { %vm936_vm4 = vcmp.ge.s32.totalorder %v773_v21, 1  ;;  %vm1129_vm7 = vcmp.lt.s32.totalorder %v773_v21, 15  ;;  %vm1131_vm11 = vcmp.lt.s32.totalorder %v775_v58, 15 }
 0x144   : > { %1028 = vst [vmem:[#allocation2 + $0xb4] sm:$0xf] %v996_v16  ;;  %v706_v26 = vmax.f32 %v645_v39, 0.0  ;;  %1776 = vmatmul.bf16.gmra.mxu1 %v6967_v59  ;;  %v8833_v16 = vld [vmem:[#allocation9 + $0x138] sm:$0xff]  ;;  %v8711_v59 = vld [vmem:[#allocation2 + $0x80] sm:$0xf0] }
 0x145   : > { %1220 = vst [vmem:[#allocation2 + $0xb0] sm:$0xf] %v1188_v11  ;;  %2551 = vmatmul.bf16.gmra.mxu0 %v7243_v27  ;;  %2627 = vmatpush.bf16.msrb.mxu1 %v8833_v16  ;;  %v8832_v16 = vld [vmem:[#allocation9 + $0x130] sm:$0xff] }
 0x146   : > { %738 = vst [vmem:[%s9737_s24 + $0x60] sm:$0xff] %v706_v26  ;;  %v802_v29 = vpack.c.bf16 %v706_v26, %v706_v26  ;;  %v866_v17 = vrot.slane %v706_v26, 7  ;;  %v1061_v30 = vrot.slane %v706_v26, 1  ;;  %v8780_v26 = vld [vmem:[#allocation2 + $0x80] sm:$0xf0] }
 0x147   : > { %v7016_v35 = vld [vmem:[#allocation2 + $0xb4] sm:$0xf0] }
 0x148   : > { %834 = vst [vmem:[#allocation2 + $0xc4] sm:$0xf] %v802_v29  ;;  %v908_v15 = vsel %vm888_vm0, %v865_v8, %v866_v17  ;;  %v1101_v14 = vsel %vm1081_vm2, %v1060_v7, %v1061_v30  ;;  %v7019_v31 = vor.u32 %v8716_v33, %v7016_v35  ;;  %v6990_v33 = vld [vmem:[#allocation2 + $0x78] sm:$0xf] }
 0x149   : > { %v965_v34 = vsel %vm933_vm12, %v908_v15, 0.0  ;;  %v1157_v28 = vsel %vm1125_vm13, %v1101_v14, 0.0  ;;  %v646_v22 = vpop.f32.mrf.mxu0  ;;  %2628 = vmatpush.bf16.msrb.mxu1 %v8832_v16 }
 0x14a   : > { %v997_v10 = vpack.c.bf16 %v965_v34, %v965_v34  ;;  %v1189_v38 = vpack.c.bf16 %v1157_v28, %v1157_v28  ;;  %v647_v41 = vadd.f32 %v9730_v32, %v646_v22  ;;  %v8777_v32 = vld [vmem:[#allocation2 + $0x68] sm:$0xf0]  ;;  %v6991_v34 = vor.u32 %v8711_v59, %v6990_v33  ;;  %v7266_v28 = vld [vmem:[#allocation2 + $0x78] sm:$0xf] }
 0x14b   : > { %v7255_v19 = vor.u32 %v8777_v32, %v7254_v61  ;;  %v7267_v22 = vor.u32 %v8780_v26, %v7266_v28  ;;  %v8714_v61 = vld [vmem:[#allocation2 + $0x98] sm:$0xf0]  ;;  %v8838_v28 = vld [vmem:[#allocation9 + $0x160] sm:$0xff] }
 0x14c   : > { %1029 = vst [vmem:[#allocation2 + $0xc0] sm:$0xf] %v997_v10  ;;  %v707_v43 = vmax.f32 %v647_v41, 0.0  ;;  %1885 = vmatmul.bf16.gmra.mxu2 %v7019_v31  ;;  %v774_v31 = vld [vmem:[#allocation3 + $0x80] sm:$0xff] }
 0x14d   : > { %1221 = vst [vmem:[#allocation2 + $0xbc] sm:$0xf] %v1189_v38  ;;  %vm937_vm6 = vcmp.ge.s32.totalorder %v774_v31, 1  ;;  %vm1130_vm9 = vcmp.lt.s32.totalorder %v774_v31, 15 }
 0x14e   : > { %739 = vst [vmem:[%s9737_s24 + $0x68] sm:$0xff] %v707_v43  ;;  %v803_v24 = vpack.c.bf16 %v707_v43, %v707_v43  ;;  %v867_v46 = vrot.slane %v707_v43, 7  ;;  %v1062_v49 = vrot.slane %v707_v43, 1 }
 0x14f   : > { %v8719_v4 = vld [vmem:[#allocation2 + $0xc4] sm:$0xf] }
 0x150   : > { %835 = vst [vmem:[#allocation2 + $0xd0] sm:$0xf] %v803_v24  ;;  %v907_v23 = vsel %vm888_vm0, %v866_v17, %v867_v46  ;;  %v1100_v54 = vsel %vm1081_vm2, %v1061_v30, %v1062_v49 }
 0x151   : > { %v966_v55 = vsel %vm934_vm14, %v907_v23, 0.0  ;;  %v1158_v44 = vsel %vm1126_vm15, %v1100_v54, 0.0  ;;  %v649_v50 = vpop.f32.mrf.mxu0 }
 0x152   : > { %v998_v60 = vpack.c.bf16 %v966_v55, %v966_v55  ;;  %v1190_v48 = vpack.c.bf16 %v1158_v44, %v1158_v44  ;;  %v650_v37 = vadd.f32 %v10150_v40, %v649_v50 }
 0x154   : > { %1030 = vst [vmem:[#allocation2 + $0xcc] sm:$0xf] %v998_v60  ;;  %v708_v63 = vmax.f32 %v650_v37, 0.0  ;;  %1781 = vmatmul.bf16.gmra.mxu1 %v6979_v56  ;;  %v10171_v60 = vpop.f32.mrf.mxu2 }
 0x155   : > { %1222 = vst [vmem:[#allocation2 + $0xc8] sm:$0xf] %v1190_v48  ;;  %2556 = vmatmul.bf16.gmra.mxu0 %v7255_v19  ;;  %v8841_v19 = vld [vmem:[#allocation9 + $0x178] sm:$0xff] }
 0x156   : > { %740 = vst [vmem:[%s9737_s24 + $0x70] sm:$0xff] %v708_v63  ;;  %v804_v2 = vpack.c.bf16 %v708_v63, %v708_v63  ;;  %v868_v3 = vrot.slane %v708_v63, 7  ;;  %v1063_v25 = vrot.slane %v708_v63, 1  ;;  %2716 = vmatpush.bf16.msrb.mxu2 %v8841_v19 }
 0x157   : > { %v7028_v5 = vld [vmem:[#allocation2 + $0xcc] sm:$0xf0] }
 0x158   : > { %836 = vst [vmem:[#allocation2 + $0xdc] sm:$0xf] %v804_v2  ;;  %v906_v6 = vsel %vm888_vm0, %v867_v46, %v868_v3  ;;  %v1099_v8 = vsel %vm1081_vm2, %v1062_v49, %v1063_v25  ;;  %v7031_v7 = vor.u32 %v8719_v4, %v7028_v5 }
 0x159   : > { %v967_v9 = vsel %vm935_vm1, %v906_v6, 0.0  ;;  %v1159_v51 = vsel %vm1127_vm3, %v1099_v8, 0.0  ;;  %v651_v12 = vpop.f32.mrf.mxu0  ;;  %v7002_v6 = vld [vmem:[#allocation2 + $0x90] sm:$0xf] }
 0x15a   : > { %v999_v13 = vpack.c.bf16 %v967_v9, %v967_v9  ;;  %v1191_v36 = vpack.c.bf16 %v1159_v51, %v1159_v51  ;;  %v652_v53 = vadd.f32 %v10150_v40, %v651_v12  ;;  %v776_v51 = vld [vmem:[#allocation3 + $0x90] sm:$0xff]  ;;  %v7003_v12 = vor.u32 %v8714_v61, %v7002_v6  ;;  %v8835_v6 = vld [vmem:[#allocation9 + $0x148] sm:$0xff] }
 0x15b   : > { %vm939_vm10 = vcmp.ge.s32.totalorder %v776_v51, 1  ;;  %vm1132_vm13 = vcmp.lt.s32.totalorder %v776_v51, 15  ;;  %v8836_v61 = vld [vmem:[#allocation9 + $0x150] sm:$0xff]  ;;  %v8831_v51 = vld [vmem:[#allocation9 + $0x128] sm:$0xff] }
 0x15c   : > { %1031 = vst [vmem:[#allocation2 + $0xd8] sm:$0xf] %v999_v13  ;;  %v709_v47 = vmax.f32 %v652_v53, 0.0  ;;  %1890 = vmatmul.bf16.gmra.mxu2 %v7031_v7  ;;  %v7278_v13 = vld [vmem:[#allocation2 + $0x90] sm:$0xf]  ;;  %2629 = vmatpush.bf16.msrb.mxu1 %v8831_v51 }
 0x15d   : > { %1223 = vst [vmem:[#allocation2 + $0xd4] sm:$0xf] %v1191_v36  ;;  %v8840_v53 = vld [vmem:[#allocation9 + $0x170] sm:$0xff] }
 0x15e   : > { %741 = vst [vmem:[%s9737_s24 + $0x78] sm:$0xff] %v709_v47  ;;  %v805_v11 = vpack.c.bf16 %v709_v47, %v709_v47  ;;  %v869_v39 = vrot.slane %v709_v47, 7  ;;  %v1064_v20 = vrot.slane %v709_v47, 1  ;;  %v10179_v47 = vpop.f32.mrf.mxu2  ;;  %2717 = vmatpush.bf16.msrb.mxu2 %v8840_v53  ;;  %v8834_v53 = vld [vmem:[#allocation9 + $0x140] sm:$0xff] }
 0x15f   : > { %v8722_v43 = vld [vmem:[#allocation2 + $0xdc] sm:$0xf] }
 0x160   : > { %837 = vst [vmem:[#allocation2 + $0xe8] sm:$0xf] %v805_v11  ;;  %v905_v62 = vsel %vm888_vm0, %v868_v3, %v869_v39  ;;  %v1098_v27 = vsel %vm1081_vm2, %v1063_v25, %v1064_v20  ;;  %v8783_v3 = vld [vmem:[#allocation2 + $0x98] sm:$0xf0] }
 0x161   : > { %v968_v29 = vsel %vm936_vm4, %v905_v62, 0.0  ;;  %v1160_v17 = vsel %vm1128_vm5, %v1098_v27, 0.0  ;;  %v654_v30 = vpop.f32.mrf.mxu0  ;;  %v7279_v36 = vor.u32 %v8783_v3, %v7278_v13  ;;  %v8839_v27 = vld [vmem:[#allocation9 + $0x168] sm:$0xff] }
 0x162   : > { %v1000_v35 = vpack.c.bf16 %v968_v29, %v968_v29  ;;  %v1192_v15 = vpack.c.bf16 %v1160_v17, %v1160_v17  ;;  %v655_v14 = vadd.f32 %v10150_v40, %v654_v30  ;;  %2718 = vmatpush.bf16.msrb.mxu2 %v8839_v27 }
 0x164   : > { %1032 = vst [vmem:[#allocation2 + $0xe4] sm:$0xf] %v1000_v35  ;;  %v710_v10 = vmax.f32 %v655_v14, 0.0  ;;  %1786 = vmatmul.bf16.gmra.mxu1 %v6991_v34  ;;  %v777_v34 = vld [vmem:[#allocation3 + $0x98] sm:$0xff] }
 0x165   : > { %1224 = vst [vmem:[#allocation2 + $0xe0] sm:$0xf] %v1192_v15  ;;  %2561 = vmatmul.bf16.gmra.mxu0 %v7267_v22  ;;  %vm940_vm12 = vcmp.ge.s32.totalorder %v777_v34, 1  ;;  %vm1133_vm15 = vcmp.lt.s32.totalorder %v777_v34, 15 }
 0x166   : > { %742 = vst [vmem:[%s9737_s24 + $0x80] sm:$0xff] %v710_v10  ;;  %v806_v38 = vpack.c.bf16 %v710_v10, %v710_v10  ;;  %v870_v41 = vrot.slane %v710_v10, 7  ;;  %v1065_v18 = vrot.slane %v710_v10, 1  ;;  %2719 = vmatpush.bf16.msrb.mxu2 %v8838_v28 }
 0x167   : > { %v7040_v24 = vld [vmem:[#allocation2 + $0xe4] sm:$0xf0] }
 0x168   : > { %838 = vst [vmem:[#allocation2 + $0xf4] sm:$0xf] %v806_v38  ;;  %v904_v46 = vsel %vm888_vm0, %v869_v39, %v870_v41  ;;  %v1097_v49 = vsel %vm1081_vm2, %v1064_v20, %v1065_v18  ;;  %v7043_v52 = vor.u32 %v8722_v43, %v7040_v24  ;;  %v8717_v43 = vld [vmem:[#allocation2 + $0xb0] sm:$0xf0]  ;;  %v8837_v24 = vld [vmem:[#allocation9 + $0x158] sm:$0xff] }
 0x169   : > { %v969_v23 = vsel %vm937_vm6, %v904_v46, 0.0  ;;  %v1161_v54 = vsel %vm1129_vm7, %v1097_v49, 0.0  ;;  %v656_v32 = vpop.f32.mrf.mxu0 }
 0x16a   : > { %v1001_v55 = vpack.c.bf16 %v969_v23, %v969_v23  ;;  %v1193_v44 = vpack.c.bf16 %v1161_v54, %v1161_v54  ;;  %v657_v50 = vadd.f32 %v10150_v40, %v656_v32  ;;  %2720 = vmatpush.bf16.msrb.mxu2 %v8837_v24 }
 0x16c   : > { %1033 = vst [vmem:[#allocation2 + $0xf0] sm:$0xf] %v1001_v55  ;;  %v711_v48 = vmax.f32 %v657_v50, 0.0  ;;  %1895 = vmatmul.bf16.gmra.mxu2 %v7043_v52  ;;  %v8786_v52 = vld [vmem:[#allocation2 + $0xb0] sm:$0xf0] }
 0x16d   : > { %1225 = vst [vmem:[#allocation2 + $0xec] sm:$0xf] %v1193_v44  ;;  %v7014_v55 = vld [vmem:[#allocation2 + $0xa8] sm:$0xf] }
 0x16e   : > { %743 = vst [vmem:[%s9737_s24 + $0x88] sm:$0xff] %v711_v48  ;;  %v807_v37 = vpack.c.bf16 %v711_v48, %v711_v48  ;;  %v871_v57 = vrot.slane %v711_v48, 7  ;;  %v1066_v56 = vrot.slane %v711_v48, 1  ;;  %v778_v48 = vld [vmem:[#allocation3 + $0xa0] sm:$0xff]  ;;  %2721 = vmatpush.bf16.msrb.mxu2 %v8836_v61 }
 0x16f   : > { %v8725_v59 = vld [vmem:[#allocation2 + $0xf4] sm:$0xf]  ;;  %vm941_vm14 = vcmp.ge.s32.totalorder %v778_v48, 1  ;;  %vm1134_vm3 = vcmp.lt.s32.totalorder %v778_v48, 15 }
 0x170   : > { %839 = vst [vmem:[#allocation2 + $0x100] sm:$0xf] %v807_v37  ;;  %v903_v63 = vsel %vm888_vm0, %v870_v41, %v871_v57  ;;  %v1096_v2 = vsel %vm1081_vm2, %v1065_v18, %v1066_v56  ;;  %v7015_v37 = vor.u32 %v8717_v43, %v7014_v55 }
 0x171   : > { %v970_v25 = vsel %vm938_vm8, %v903_v63, 0.0  ;;  %v1162_v4 = vsel %vm1130_vm9, %v1096_v2, 0.0  ;;  %v659_v5 = vpop.f32.mrf.mxu0 }
 0x172   : > { %v1002_v8 = vpack.c.bf16 %v970_v25, %v970_v25  ;;  %v1194_v7 = vpack.c.bf16 %v1162_v4, %v1162_v4  ;;  %v660_v9 = vadd.f32 %v10150_v40, %v659_v5  ;;  %2722 = vmatpush.bf16.msrb.mxu2 %v8835_v6 }
 0x174   : > { %1034 = vst [vmem:[#allocation2 + $0xfc] sm:$0xf] %v1002_v8  ;;  %v712_v21 = vmax.f32 %v660_v9, 0.0  ;;  %1791 = vmatmul.bf16.gmra.mxu1 %v7003_v12 }
 0x175   : > { %1226 = vst [vmem:[#allocation2 + $0xf8] sm:$0xf] %v1194_v7  ;;  %2566 = vmatmul.bf16.gmra.mxu0 %v7279_v36 }
 0x176   : > { %744 = vst [vmem:[%s9737_s24 + $0x90] sm:$0xff] %v712_v21  ;;  %v808_v11 = vpack.c.bf16 %v712_v21, %v712_v21  ;;  %v872_v39 = vrot.slane %v712_v21, 7  ;;  %v1067_v20 = vrot.slane %v712_v21, 1  ;;  %2723 = vmatpush.bf16.msrb.mxu2 %v8834_v53 }
 0x177   : > { %v7052_v62 = vld [vmem:[#allocation2 + $0xfc] sm:$0xf0] }
 0x178   : > { %840 = vst [vmem:[#allocation2 + $0x10c] sm:$0xf] %v808_v11  ;;  %v902_v26 = vsel %vm888_vm0, %v871_v57, %v872_v39  ;;  %v1095_v29 = vsel %vm1081_vm2, %v1066_v56, %v1067_v20  ;;  %v7055_v17 = vor.u32 %v8725_v59, %v7052_v62  ;;  %v7290_v57 = vld [vmem:[#allocation2 + $0xa8] sm:$0xf] }
 0x179   : > { %v971_v30 = vsel %vm939_vm10, %v902_v26, 0.0  ;;  %v1163_v33 = vsel %vm1131_vm11, %v1095_v29, 0.0  ;;  %v661_v35 = vpop.f32.mrf.mxu0  ;;  %v7291_v56 = vor.u32 %v8786_v52, %v7290_v57  ;;  %v8720_v29 = vld [vmem:[#allocation2 + $0xc8] sm:$0xf0] }
 0x17a   : > { %v1003_v15 = vpack.c.bf16 %v971_v30, %v971_v30  ;;  %v1195_v14 = vpack.c.bf16 %v1163_v33, %v1163_v33  ;;  %v662_v31 = vadd.f32 %v10150_v40, %v661_v35  ;;  %v8789_v33 = vld [vmem:[#allocation2 + $0xc8] sm:$0xf0] }
 0x17c   : > { %1035 = vst [vmem:[#allocation2 + $0x108] sm:$0xf] %v1003_v15  ;;  %v713_v22 = vmax.f32 %v662_v31, 0.0  ;;  %1900 = vmatmul.bf16.gmra.mxu2 %v7055_v17  ;;  %v7026_v31 = vld [vmem:[#allocation2 + $0xc0] sm:$0xf] }
 0x17d   : > { %1227 = vst [vmem:[#allocation2 + $0x104] sm:$0xf] %v1195_v14 }
 0x17e   : > { %745 = vst [vmem:[%s9737_s24 + $0x98] sm:$0xff] %v713_v22  ;;  %v809_v10 = vpack.c.bf16 %v713_v22, %v713_v22  ;;  %v873_v38 = vrot.slane %v713_v22, 7  ;;  %v1068_v41 = vrot.slane %v713_v22, 1  ;;  %v10189_v18 = vpop.f32.mrf.mxu2 }
 0x17f   : > { %v8728_v4 = vld [vmem:[#allocation2 + $0x10c] sm:$0xf] }
 0x180   : > { %841 = vst [vmem:[#allocation2 + $0x118] sm:$0xf] %v809_v10  ;;  %v901_v46 = vsel %vm888_vm0, %v872_v39, %v873_v38  ;;  %v1094_v49 = vsel %vm1081_vm2, %v1067_v20, %v1068_v41  ;;  %v779_v39 = vld [vmem:[#allocation3 + $0xa8] sm:$0xff]  ;;  %v780_v10 = vld [vmem:[#allocation3 + $0xb0] sm:$0xff] }
 0x181   : > { %v972_v23 = vsel %vm940_vm12, %v901_v46, 0.0  ;;  %v1164_v54 = vsel %vm1132_vm13, %v1094_v49, 0.0  ;;  %v664_v32 = vpop.f32.mrf.mxu0  ;;  %vm942_vm1 = vcmp.ge.s32.totalorder %v779_v39, 1  ;;  %vm943_vm4 = vcmp.ge.s32.totalorder %v780_v10, 1 }
 0x182   : > { %v1004_v44 = vpack.c.bf16 %v972_v23, %v972_v23  ;;  %v1196_v50 = vpack.c.bf16 %v1164_v54, %v1164_v54  ;;  %v665_v58 = vadd.f32 %v10150_v40, %v664_v32  ;;  %vm1135_vm5 = vcmp.lt.s32.totalorder %v779_v39, 15 }
 0x183   : > { %vm1136_vm8 = vcmp.lt.s32.totalorder %v780_v10, 15 }
 0x184   : > { %1036 = vst [vmem:[#allocation2 + $0x114] sm:$0xf] %v1004_v44  ;;  %v714_v19 = vmax.f32 %v665_v58, 0.0  ;;  %1796 = vmatmul.bf16.gmra.mxu1 %v7015_v37 }
 0x185   : > { %1228 = vst [vmem:[#allocation2 + $0x110] sm:$0xf] %v1196_v50  ;;  %2571 = vmatmul.bf16.gmra.mxu0 %v7291_v56 }
 0x186   : > { %746 = vst [vmem:[%s9737_s24 + $0xa0] sm:$0xff] %v714_v19  ;;  %v810_v63 = vpack.c.bf16 %v714_v19, %v714_v19  ;;  %v874_v2 = vrot.slane %v714_v19, 7  ;;  %v1069_v3 = vrot.slane %v714_v19, 1  ;;  %v10197_v25 = vpop.f32.mrf.mxu2  ;;  %v781_v19 = vld [vmem:[#allocation3 + $0xb8] sm:$0xff] }
 0x187   : > { %v7064_v5 = vld [vmem:[#allocation2 + $0x114] sm:$0xf0]  ;;  %vm944_vm6 = vcmp.ge.s32.totalorder %v781_v19, 1  ;;  %vm1137_vm9 = vcmp.lt.s32.totalorder %v781_v19, 15 }
 0x188   : > { %842 = vst [vmem:[#allocation2 + $0x124] sm:$0xf] %v810_v63  ;;  %v900_v8 = vsel %vm888_vm0, %v873_v38, %v874_v2  ;;  %v1093_v7 = vsel %vm1081_vm2, %v1068_v41, %v1069_v3  ;;  %v7067_v9 = vor.u32 %v8728_v4, %v7064_v5  ;;  %v7027_v38 = vor.u32 %v8720_v29, %v7026_v31  ;;  %v7302_v41 = vld [vmem:[#allocation2 + $0xc0] sm:$0xf] }
 0x189   : > { %v973_v12 = vsel %vm941_vm14, %v900_v8, 0.0  ;;  %v1165_v13 = vsel %vm1133_vm15, %v1093_v7, 0.0  ;;  %v666_v36 = vpop.f32.mrf.mxu0  ;;  %v7303_v43 = vor.u32 %v8789_v33, %v7302_v41  ;;  %v8723_v8 = vld [vmem:[#allocation2 + $0xe0] sm:$0xf0] }
 0x18a   : > { %v1005_v21 = vpack.c.bf16 %v973_v12, %v973_v12  ;;  %v1197_v16 = vpack.c.bf16 %v1165_v13, %v1165_v13  ;;  %v667_v11 = vadd.f32 %v10150_v40, %v666_v36  ;;  %v8830_v7 = vld [vmem:[#allocation9 + $0x120] sm:$0xff] }
 0x18b   : > { %v8792_v36 = vld [vmem:[#allocation2 + $0xe0] sm:$0xf0]  ;;  %2630 = vmatpush.bf16.msrb.mxu1 %v8830_v7 }
 0x18c   : > { %1037 = vst [vmem:[#allocation2 + $0x120] sm:$0xf] %v1005_v21  ;;  %v715_v20 = vmax.f32 %v667_v11, 0.0  ;;  %1905 = vmatmul.bf16.gmra.mxu2 %v7067_v9  ;;  %v7038_v11 = vld [vmem:[#allocation2 + $0xd8] sm:$0xf] }
 0x18d   : > { %1229 = vst [vmem:[#allocation2 + $0x11c] sm:$0xf] %v1197_v16 }
 0x18e   : > { %747 = vst [vmem:[%s9737_s24 + $0xa8] sm:$0xff] %v715_v20  ;;  %v811_v59 = vpack.c.bf16 %v715_v20, %v715_v20  ;;  %v875_v62 = vrot.slane %v715_v20, 7  ;;  %v1070_v27 = vrot.slane %v715_v20, 1  ;;  %v10206_v26 = vpop.f32.mrf.mxu2 }
 0x18f   : > { %v8731_v54 = vld [vmem:[#allocation2 + $0x124] sm:$0xf] }
 0x190   : > { %843 = vst [vmem:[#allocation2 + $0x130] sm:$0xf] %v811_v59  ;;  %v899_v17 = vsel %vm888_vm0, %v874_v2, %v875_v62  ;;  %v1092_v30 = vsel %vm1081_vm2, %v1069_v3, %v1070_v27  ;;  %v9253_v2 = vld [vmem:[#allocation3 + $0xc0] sm:$0xff]  ;;  %v10221_v3 = vpop.f32.mrf.mxu1  ;;  %v7039_v59 = vor.u32 %v8723_v8, %v7038_v11  ;;  %v7062_v8 = vld [vmem:[#allocation2 + $0x108] sm:$0xf] }
 0x191   : > { %v974_v35 = vsel %vm942_vm1, %v899_v17, 0.0  ;;  %v1166_v15 = vsel %vm1134_vm3, %v1092_v30, 0.0  ;;  %v669_v14 = vpop.f32.mrf.mxu0  ;;  %vm945_vm7 = vcmp.ge.s32.totalorder %v9253_v2, 1  ;;  %v8772_v17 = vld [vmem:[#allocation2 + $0x40] sm:$0xf0] }
 0x192   : > { %v1006_v34 = vpack.c.bf16 %v974_v35, %v974_v35  ;;  %v1198_v28 = vpack.c.bf16 %v1166_v15, %v1166_v15  ;;  %v670_v22 = vadd.f32 %v10150_v40, %v669_v14  ;;  %v7238_v30 = vld [vmem:[#allocation2 + $0x38] sm:$0xf]  ;;  %v8729_v2 = vld [vmem:[#allocation2 + $0x110] sm:$0xf0]  ;;  %v7110_v11 = vld [vmem:[#allocation2 + $0x168] sm:$0xf] }
 0x193   : > { %v7239_v35 = vor.u32 %v8772_v17, %v7238_v30 }
 0x194   : > { %1038 = vst [vmem:[#allocation2 + $0x12c] sm:$0xf] %v1006_v34  ;;  %v716_v24 = vmax.f32 %v670_v22, 0.0  ;;  %1801 = vmatmul.bf16.gmra.mxu1 %v7027_v38  ;;  %v10248_v34 = vld [vmem:[%s11863_s5] ss:$0 sm:$0xff] }
 0x195   : > { %1230 = vst [vmem:[#allocation2 + $0x128] sm:$0xf] %v1198_v28  ;;  %2576 = vmatmul.bf16.gmra.mxu0 %v7303_v43  ;;  %v8726_v28 = vld [vmem:[#allocation2 + $0xf8] sm:$0xf0]  ;;  %v7050_v38 = vld [vmem:[#allocation2 + $0xf0] sm:$0xf] }
 0x196   : > { %748 = vst [vmem:[%s9737_s24 + $0xb0] sm:$0xff] %v716_v24  ;;  %v812_v46 = vpack.c.bf16 %v716_v24, %v716_v24  ;;  %v876_v49 = vrot.slane %v716_v24, 7  ;;  %v1071_v52 = vrot.slane %v716_v24, 1  ;;  %v10214_v23 = vpop.f32.mrf.mxu2  ;;  %v8795_v22 = vld [vmem:[#allocation2 + $0xf8] sm:$0xf0]  ;;  %v7051_v24 = vor.u32 %v8726_v28, %v7050_v38 }
 0x197   : > { %v7076_v32 = vld [vmem:[#allocation2 + $0x12c] sm:$0xf0]  ;;  %v8781_v38 = vld [vmem:[#allocation2 + $0x88] sm:$0xf0] }
 0x198   : > { %844 = vst [vmem:[#allocation2 + $0x13c] sm:$0xf] %v812_v46  ;;  %v898_v55 = vsel %vm888_vm0, %v875_v62, %v876_v49  ;;  %v1091_v44 = vsel %vm1081_vm2, %v1070_v27, %v1071_v52  ;;  %v7079_v50 = vor.u32 %v8731_v54, %v7076_v32  ;;  %v10241_v29 = vpop.f32.mrf.mxu1  ;;  %v7326_v46 = vld [vmem:[#allocation2 + $0xf0] sm:$0xf]  ;;  %v8775_v32 = vld [vmem:[#allocation2 + $0x58] sm:$0xf0] }
 0x199   : > { %v975_v58 = vsel %vm943_vm4, %v898_v55, 0.0  ;;  %v1167_v48 = vsel %vm1135_vm5, %v1091_v44, 0.0  ;;  %v671_v37 = vpop.f32.mrf.mxu0  ;;  %v8829_v55 = vld [vmem:[#allocation9 + $0x118] sm:$0xff] }
 0x19a   : > { %v1007_v57 = vpack.c.bf16 %v975_v58, %v975_v58  ;;  %v1199_v56 = vpack.c.bf16 %v1167_v48, %v1167_v48  ;;  %v672_v61 = vadd.f32 %v10150_v40, %v671_v37  ;;  %2631 = vmatpush.bf16.msrb.mxu1 %v8829_v55 }
 0x19b   : > { %v8801_v17 = vld [vmem:[#allocation2 + $0x128] sm:$0xf0] }
 0x19c   : > { %1039 = vst [vmem:[#allocation2 + $0x138] sm:$0xf] %v1007_v57  ;;  %v717_v63 = vmax.f32 %v672_v61, 0.0  ;;  %1910 = vmatmul.bf16.gmra.mxu2 %v7079_v50  ;;  %v7250_v50 = vld [vmem:[#allocation2 + $0x50] sm:$0xf] }
 0x19d   : > { %1231 = vst [vmem:[#allocation2 + $0x134] sm:$0xf] %v1199_v56  ;;  %v7251_v57 = vor.u32 %v8775_v32, %v7250_v50  ;;  %v8828_v56 = vld [vmem:[#allocation9 + $0x110] sm:$0xff]  ;;  %v8738_v61 = vld [vmem:[#allocation2 + $0x158] sm:$0xf0] }
 0x19e   : > { %749 = vst [vmem:[%s9737_s24 + $0xb8] sm:$0xff] %v717_v63  ;;  %v813_v4 = vpack.c.bf16 %v717_v63, %v717_v63  ;;  %v877_v5 = vrot.slane %v717_v63, 7  ;;  %v1072_v6 = vrot.slane %v717_v63, 1  ;;  %v10236_v13 = vpop.f32.mrf.mxu2  ;;  %2632 = vmatpush.bf16.msrb.mxu1 %v8828_v56  ;;  %v8744_v32 = vld [vmem:[#allocation2 + $0x188] sm:$0xf0] }
 0x1a0   : > { %845 = vst [vmem:[#allocation2 + $0x148] sm:$0xf] %v813_v4  ;;  %v896_v40 = vsel %vm888_vm0, %v877_v5, %v878_v0  ;;  %v897_v9 = vsel %vm888_vm0, %v876_v49, %v877_v5  ;;  %v1089_v51 = vsel %vm1081_vm2, %v1072_v6, %v1073_v1  ;;  %v1090_v12 = vsel %vm1081_vm2, %v1071_v52, %v1072_v6  ;;  %v7314_v1 = vld [vmem:[#allocation2 + $0xd8] sm:$0xf]  ;;  %v8827_v4 = vld [vmem:[#allocation9 + $0x108] sm:$0xff] }
 0x1a1   : > { %v976_v53 = vsel %vm944_vm6, %v897_v9, 0.0  ;;  %v977_v21 = vsel %vm945_vm7, %v896_v40, 0.0  ;;  %v1168_v0 = vsel %vm1136_vm8, %v1090_v12, 0.0  ;;  %v1169_v16 = vsel %vm1137_vm9, %v1089_v51, 0.0  ;;  %v8798_v5 = vld [vmem:[#allocation2 + $0x110] sm:$0xf0] }
 0x1a2   : > { %v1008_v39 = vpack.c.bf16 %v976_v53, %v976_v53  ;;  %v1009_v45 = vpack.c.bf16 %v977_v21, %v977_v21  ;;  %v1200_v20 = vpack.c.bf16 %v1168_v0, %v1168_v0  ;;  %v1201_v62 = vpack.c.bf16 %v1169_v16, %v1169_v16  ;;  %2633 = vmatpush.bf16.msrb.mxu1 %v8827_v4  ;;  %v7338_v51 = vld [vmem:[#allocation2 + $0x108] sm:$0xf]  ;;  %v8826_v12 = vld [vmem:[#allocation9 + $0x100] sm:$0xff]  ;;  %v8778_v53 = vld [vmem:[#allocation2 + $0x70] sm:$0xf0] }
 0x1a3   : > { %v7315_v27 = vor.u32 %v8792_v36, %v7314_v1  ;;  %v7086_v15 = vld [vmem:[#allocation2 + $0x138] sm:$0xf]  ;;  %v7327_v49 = vor.u32 %v8795_v22, %v7326_v46  ;;  %v7063_v9 = vor.u32 %v8729_v2, %v7062_v8  ;;  %v7339_v36 = vor.u32 %v8798_v5, %v7338_v51  ;;  %v7262_v16 = vld [vmem:[#allocation2 + $0x68] sm:$0xf]  ;;  %v7350_v22 = vld [vmem:[#allocation2 + $0x120] sm:$0xf] }
 0x1a4   : > { %1040 = vst [vmem:[#allocation2 + $0x144] sm:$0xf] %v1008_v39  ;;  %1806 = vmatmul.bf16.gmra.mxu1 %v7039_v59  ;;  %v8741_v39 = vld [vmem:[#allocation2 + $0x170] sm:$0xf0]  ;;  %v7263_v59 = vor.u32 %v8778_v53, %v7262_v16  ;;  %v7274_v46 = vld [vmem:[#allocation2 + $0x80] sm:$0xf] }
 0x1a5   : > { %1041 = vst [vmem:[#allocation2 + $0x150] sm:$0xf] %v1009_v45  ;;  %2581 = vmatmul.bf16.gmra.mxu0 %v7315_v27  ;;  %v7111_v1 = vor.u32 %v8741_v39, %v7110_v11  ;;  %v8769_v27 = vld [vmem:[#allocation9 + $0xb8] sm:$0xff]  ;;  %v8770_v2 = vld [vmem:[#allocation2 + $0x34] sm:$0xf] }
 0x1a6   : > { %1232 = vst [vmem:[#allocation2 + $0x140] sm:$0xf] %v1200_v20  ;;  %v10243_v33 = vpop.f32.mrf.mxu2  ;;  %2634 = vmatpush.bf16.msrb.mxu1 %v8826_v12  ;;  %v7362_v5 = vld [vmem:[#allocation2 + $0x138] sm:$0xf]  ;;  %v8784_v51 = vld [vmem:[#allocation2 + $0xa0] sm:$0xf0] }
 0x1a7   : > { %1233 = vst [vmem:[#allocation2 + $0x14c] sm:$0xf] %v1201_v62  ;;  %v8766_v12 = vld [vmem:[#allocation9 + $0xa0] sm:$0xff]  ;;  %v7286_v53 = vld [vmem:[#allocation2 + $0x98] sm:$0xf] }
 0x1a8   : > { %v7287_v11 = vor.u32 %v8784_v51, %v7286_v53  ;;  %v8734_v39 = vld [vmem:[#allocation2 + $0x13c] sm:$0xf] }
 0x1ab   : > { %v8735_v14 = vld [vmem:[#allocation2 + $0x140] sm:$0xf0] }
 0x1ac   : > { %2724 = vmatmul.bf16.vlgmr.msrb.gmra.mxu2 %v7239_v35  ;;  %v7087_v31 = vor.u32 %v8735_v14, %v7086_v15  ;;  %v7098_v58 = vld [vmem:[#allocation2 + $0x150] sm:$0xf]  ;;  %v7074_v35 = vld [vmem:[#allocation2 + $0x120] sm:$0xf]  ;;  %v8804_v56 = vld [vmem:[#allocation2 + $0x140] sm:$0xf0] }
 0x1ad   : > { %v7099_v19 = vor.u32 %v8738_v61, %v7098_v58  ;;  %v7363_v8 = vor.u32 %v8804_v56, %v7362_v5  ;;  %v8903_v5 = vld [vmem:[#allocation9 + $0x1e8] sm:$0xff] }
 0x1ae   : > { %1826 = vmatmul.bf16.vlgmr.msrb.gmra.mxu3 %v7087_v31  ;;  %v10253_v52 = vpop.f32.mrf.mxu2 }
 0x1af   : > { %1936 = vmatpush.bf16.msrb.mxu3 %v8769_v27 }
 0x1b1   : > { %v1772_v10 = vpop.f32.mrf.mxu1 }
 0x1b2   : > { %v1773_v41 = vadd.f32 %v10248_v34, %v1772_v10  ;;  %v10251_v43 = vpop.f32.mrf.mxu0  ;;  %v7351_v10 = vor.u32 %v8801_v17, %v7350_v22  ;;  %v7374_v17 = vld [vmem:[#allocation2 + $0x150] sm:$0xf] }
 0x1b4   : > { %1811 = vmatmul.bf16.gmra.mxu1 %v7051_v24  ;;  %v10256_v54 = vadd.f32 %v10189_v18, %v1773_v41  ;;  %v8768_v41 = vld [vmem:[#allocation9 + $0xb0] sm:$0xff] }
 0x1b5   : > { %2586 = vmatmul.bf16.gmra.mxu0 %v7327_v49  ;;  %v7122_v49 = vld [vmem:[#allocation2 + $0x180] sm:$0xf]  ;;  %1937 = vmatpush.bf16.msrb.mxu3 %v8768_v41  ;;  %v8787_v41 = vld [vmem:[#allocation2 + $0xb8] sm:$0xf0] }
 0x1b6   : > { %v10264_v18 = vpop.f32.mrf.mxu2 }
 0x1b9   : > { %v1774_v44 = vpop.f32.mrf.mxu1 }
 0x1ba   : > { %v1775_v48 = vadd.f32 %v10248_v34, %v1774_v44  ;;  %v10259_v37 = vpop.f32.mrf.mxu0  ;;  %v7275_v44 = vor.u32 %v8781_v38, %v7274_v46  ;;  %v8764_v46 = vld [vmem:[#allocation9 + $0x90] sm:$0xff] }
 0x1bc   : > { %2729 = vmatmul.bf16.gmra.mxu2 %v7251_v57  ;;  %v10262_v63 = vadd.f32 %v10197_v25, %v1775_v48  ;;  %v7123_v48 = vor.u32 %v8744_v32, %v7122_v49  ;;  %v8767_v57 = vld [vmem:[#allocation9 + $0xa8] sm:$0xff]  ;;  %v7298_v32 = vld [vmem:[#allocation2 + $0xb0] sm:$0xf] }
 0x1bd   : > { %1938 = vmatpush.bf16.msrb.mxu3 %v8767_v57  ;;  %v8904_v57 = vld [vmem:[#allocation9 + $0x1f0] sm:$0xff] }
 0x1be   : > { %1831 = vmatmul.bf16.gmra.mxu3 %v7099_v19 }
 0x1bf   : > { %v10272_v21 = vpop.f32.mrf.mxu2 }
 0x1c1   : > { %v1777_v6 = vpop.f32.mrf.mxu1  ;;  %1939 = vmatpush.bf16.msrb.mxu3 %v8766_v12 }
 0x1c2   : > { %v1778_v7 = vadd.f32 %v10248_v34, %v1777_v6  ;;  %v10267_v40 = vpop.f32.mrf.mxu0 }
 0x1c4   : > { %1816 = vmatmul.bf16.gmra.mxu1 %v7063_v9  ;;  %v10270_v25 = vadd.f32 %v10206_v26, %v1778_v7  ;;  %v8732_v26 = vld [vmem:[#allocation2 + $0x128] sm:$0xf0] }
 0x1c5   : > { %2591 = vmatmul.bf16.gmra.mxu0 %v7339_v36  ;;  %v7075_v28 = vor.u32 %v8732_v26, %v7074_v35  ;;  %v8765_v26 = vld [vmem:[#allocation9 + $0x98] sm:$0xff]  ;;  %v8773_v35 = vld [vmem:[#allocation2 + $0x4c] sm:$0xf] }
 0x1c6   : > { %1940 = vmatpush.bf16.msrb.mxu3 %v8765_v26  ;;  %v8901_v26 = vld [vmem:[#allocation9 + $0x1d8] sm:$0xff] }
 0x1c7   : > { %v10280_v15 = vpop.f32.mrf.mxu2 }
 0x1c9   : > { %v1779_v0 = vpop.f32.mrf.mxu1 }
 0x1ca   : > { %v1780_v45 = vadd.f32 %v10248_v34, %v1779_v0  ;;  %v10275_v20 = vpop.f32.mrf.mxu0  ;;  %v7088_v0 = vld [vmem:[#allocation2 + $0x144] sm:$0xf0]  ;;  %1941 = vmatpush.bf16.msrb.mxu3 %v8764_v46 }
 0x1cc   : > { %2734 = vmatmul.bf16.gmra.mxu2 %v7263_v59  ;;  %v10278_v62 = vadd.f32 %v10214_v23, %v1780_v45  ;;  %v7091_v59 = vor.u32 %v8734_v39, %v7088_v0  ;;  %v8902_v0 = vld [vmem:[#allocation9 + $0x1e0] sm:$0xff] }
 0x1ce   : > { %1836 = vmatmul.bf16.gmra.mxu3 %v7111_v1  ;;  %v7244_v1 = vld [vmem:[#allocation2 + $0x54] sm:$0xf0] }
 0x1cf   : > { %v10290_v50 = vpop.f32.mrf.mxu2  ;;  %v7247_v22 = vor.u32 %v8773_v35, %v7244_v1  ;;  %v8790_v1 = vld [vmem:[#allocation2 + $0xd0] sm:$0xf0]  ;;  %v7310_v35 = vld [vmem:[#allocation2 + $0xc8] sm:$0xf] }
 0x1d1   : > { %v1782_v30 = vpop.f32.mrf.mxu1 }
 0x1d2   : > { %v1783_v14 = vadd.f32 %v10248_v34, %v1782_v30  ;;  %v10283_v31 = vpop.f32.mrf.mxu0 }
 0x1d4   : > { %1821 = vmatmul.bf16.gmra.mxu1 %v7075_v28  ;;  %v10286_v23 = vadd.f32 %v10236_v13, %v1783_v14  ;;  %v7232_v13 = vld [vmem:[#allocation2 + $0x3c] sm:$0xf0]  ;;  %v8807_v28 = vld [vmem:[#allocation2 + $0x158] sm:$0xf0] }
 0x1d5   : > { %2596 = vmatmul.bf16.gmra.mxu0 %v7351_v10  ;;  %v7235_v6 = vor.u32 %v8770_v2, %v7232_v13  ;;  %v7375_v10 = vor.u32 %v8807_v28, %v7374_v17  ;;  %v7299_v13 = vor.u32 %v8787_v41, %v7298_v32  ;;  %v8740_v28 = vld [vmem:[#allocation2 + $0x16c] sm:$0xf] }
 0x1d6   : > { %v8899_v32 = vld [vmem:[#allocation9 + $0x1c8] sm:$0xff] }
 0x1d7   : > { %v10299_v9 = vpop.f32.mrf.mxu2 }
 0x1d9   : > { %v1784_v24 = vpop.f32.mrf.mxu1 }
 0x1da   : > { %v10288_v55 = vpop.f32.mrf.mxu0  ;;  %v1785_v58 = vadd.f32 %v10248_v34, %v1784_v24  ;;  %v8905_v24 = vld [vmem:[#allocation9 + $0x1f8] sm:$0xff] }
 0x1db   : > { %3439 = vmatpush.bf16.msra.mxu0 %v8905_v24 }
 0x1dc   : > { %2739 = vmatmul.bf16.gmra.mxu2 %v7275_v44  ;;  %v10294_v61 = vadd.f32 %v10243_v33, %v1785_v58  ;;  %v8737_v44 = vld [vmem:[#allocation2 + $0x154] sm:$0xf]  ;;  %v7100_v58 = vld [vmem:[#allocation2 + $0x15c] sm:$0xf0] }
 0x1dd   : > { %v7103_v2 = vor.u32 %v8737_v44, %v7100_v58  ;;  %v7398_v44 = vld [vmem:[#allocation2 + $0x180] sm:$0xf]  ;;  %v8813_v58 = vld [vmem:[#allocation2 + $0x188] sm:$0xf0] }
 0x1de   : > { %1841 = vmatmul.bf16.gmra.mxu3 %v7123_v48 }
 0x1df   : > { %v10307_v27 = vpop.f32.mrf.mxu2  ;;  %3440 = vmatpush.bf16.msra.mxu0 %v8904_v57 }
 0x1e1   : > { %v1787_v19 = vpop.f32.mrf.mxu1 }
 0x1e2   : > { %v10296_v4 = vpop.f32.mrf.mxu0  ;;  %v1788_v7 = vadd.f32 %v10248_v34, %v1787_v19 }
 0x1e3   : > { %3441 = vmatpush.bf16.msra.mxu0 %v8903_v5  ;;  %v8898_v5 = vld [vmem:[#allocation9 + $0x1c0] sm:$0xff] }
 0x1e4   : > { %2635 = vmatmul.bf16.vlgmr.msrb.gmra.mxu1 %v7235_v6  ;;  %v10302_v36 = vadd.f32 %v10253_v52, %v1788_v7  ;;  %v8763_v6 = vld [vmem:[#allocation9 + $0x88] sm:$0xff]  ;;  %v8810_v7 = vld [vmem:[#allocation2 + $0x170] sm:$0xf0] }
 0x1e5   : > { %2601 = vmatmul.bf16.gmra.mxu0 %v7363_v8  ;;  %v7386_v8 = vld [vmem:[#allocation2 + $0x168] sm:$0xf]  ;;  %1942 = vmatpush.bf16.msrb.mxu3 %v8763_v6  ;;  %v7399_v6 = vor.u32 %v8813_v58, %v7398_v44  ;;  %v8796_v44 = vld [vmem:[#allocation2 + $0x100] sm:$0xf0]  ;;  %v6950_v58 = vld [vmem:[#allocation2 + $0x20] sm:$0xf] }
 0x1e7   : > { %v10318_v48 = vpop.f32.mrf.mxu2  ;;  %3442 = vmatpush.bf16.msra.mxu0 %v8902_v0  ;;  %v7322_v0 = vld [vmem:[#allocation2 + $0xe0] sm:$0xf] }
 0x1e9   : > { %v1789_v33 = vpop.f32.mrf.mxu1 }
 0x1ea   : > { %v10304_v16 = vpop.f32.mrf.mxu0  ;;  %v1790_v45 = vadd.f32 %v10248_v34, %v1789_v33  ;;  %v8776_v33 = vld [vmem:[#allocation2 + $0x64] sm:$0xf] }
 0x1eb   : > { %3443 = vmatpush.bf16.msra.mxu0 %v8901_v26 }
 0x1ec   : > { %2744 = vmatmul.bf16.gmra.mxu2 %v7287_v11  ;;  %v10310_v52 = vadd.f32 %v10264_v18, %v1790_v45  ;;  %v7387_v11 = vor.u32 %v8810_v7, %v7386_v8  ;;  %v8793_v7 = vld [vmem:[#allocation2 + $0xe8] sm:$0xf0] }
 0x1ed   : > { %v7323_v26 = vor.u32 %v8793_v7, %v7322_v0  ;;  %v8896_v7 = vld [vmem:[#allocation9 + $0x1b0] sm:$0xff] }
 0x1ee   : > { %1915 = vmatmul.bf16.vlgmr.msra.gmra.mxu3 %v7091_v59 }
 0x1ef   : > { %v10326_v39 = vpop.f32.mrf.mxu2 }
 0x1f0   : > { %11890 = vst [vmem:[#allocation19_spill] sm:$0xff] %v10326_v39 }
 0x1f1   : > { %v1792_v30 = vpop.f32.mrf.mxu1 }
 0x1f2   : > { %v10312_v14 = vpop.f32.mrf.mxu0  ;;  %v1793_v38 = vadd.f32 %v10248_v34, %v1792_v30 }
 0x1f4   : > { %2640 = vmatmul.bf16.gmra.mxu1 %v7247_v22  ;;  %v10316_v49 = vadd.f32 %v10272_v21, %v1793_v38  ;;  %v7256_v21 = vld [vmem:[#allocation2 + $0x6c] sm:$0xf0]  ;;  %v7112_v22 = vld [vmem:[#allocation2 + $0x174] sm:$0xf0] }
 0x1f5   : > { %2606 = vmatmul.bf16.gmra.mxu0 %v7375_v10  ;;  %v7259_v53 = vor.u32 %v8776_v33, %v7256_v21  ;;  %v7311_v10 = vor.u32 %v8790_v1, %v7310_v35  ;;  %v8900_v38 = vld [vmem:[#allocation9 + $0x1d0] sm:$0xff]  ;;  %v7115_v24 = vor.u32 %v8740_v28, %v7112_v22  ;;  %v7280_v35 = vld [vmem:[#allocation2 + $0x9c] sm:$0xf0]  ;;  %v7410_v28 = vld [vmem:[#allocation2 + $0x198] sm:$0xf] }
 0x1f6   : > { %3444 = vmatpush.bf16.msra.mxu0 %v8900_v38  ;;  %v8816_v22 = vld [vmem:[#allocation2 + $0x1a0] sm:$0xf0]  ;;  %v8782_v38 = vld [vmem:[#allocation2 + $0x94] sm:$0xf] }
 0x1f7   : > { %v10335_v46 = vpop.f32.mrf.mxu2 }
 0x1f8   : > { %11891 = vst [vmem:[#allocation20_spill] sm:$0xff] %v10335_v46  ;;  %v8851_v46 = vld [vmem:[#allocation2 + $0x94] sm:$0xf] }
 0x1f9   : > { %v1794_v18 = vpop.f32.mrf.mxu1 }
 0x1fa   : > { %v1795_v56 = vadd.f32 %v10248_v34, %v1794_v18  ;;  %v10321_v19 = vpop.f32.mrf.mxu0  ;;  %v7268_v18 = vld [vmem:[#allocation2 + $0x84] sm:$0xf0]  ;;  %3445 = vmatpush.bf16.msra.mxu0 %v8899_v32 }
 0x1fc   : > { %2749 = vmatmul.bf16.gmra.mxu2 %v7299_v13  ;;  %v10324_v51 = vadd.f32 %v10280_v15, %v1795_v56  ;;  %v8762_v15 = vld [vmem:[#allocation9 + $0x80] sm:$0xff]  ;;  %v8897_v13 = vld [vmem:[#allocation9 + $0x1b8] sm:$0xff] }
 0x1fd   : > { %1943 = vmatpush.bf16.msrb.mxu3 %v8762_v15 }
 0x1fe   : > { %1920 = vmatmul.bf16.gmra.mxu3 %v7103_v2  ;;  %v8779_v2 = vld [vmem:[#allocation2 + $0x7c] sm:$0xf]  ;;  %3446 = vmatpush.bf16.msra.mxu0 %v8898_v5 }
 0x1ff   : > { %v7271_v21 = vor.u32 %v8779_v2, %v7268_v18  ;;  %v10343_v33 = vpop.f32.mrf.mxu2  ;;  %v7411_v18 = vor.u32 %v8816_v22, %v7410_v28  ;;  %v7334_v2 = vld [vmem:[#allocation2 + $0xf8] sm:$0xf]  ;;  %v8912_v28 = vld [vmem:[#allocation9 + $0x230] sm:$0xff] }
 0x200   : > { %11892 = vst [vmem:[#allocation21_spill] sm:$0xff] %v10343_v33  ;;  %v6986_v33 = vld [vmem:[#allocation2 + $0x68] sm:$0xf] }
 0x201   : > { %v1797_v12 = vpop.f32.mrf.mxu1  ;;  %3350 = vmatpush.bf16.msra.mxu3 %v8897_v13  ;;  %v8700_v13 = vld [vmem:[#allocation2 + $0x28] sm:$0xf0] }
 0x202   : > { %v1798_v45 = vadd.f32 %v10248_v34, %v1797_v12  ;;  %v10329_v59 = vpop.f32.mrf.mxu0  ;;  %v8913_v12 = vld [vmem:[#allocation9 + $0x238] sm:$0xff] }
 0x203   : > { %3528 = vmatpush.bf16.msra.mxu1 %v8913_v12  ;;  %v7520_v12 = vld [vmem:[#allocation2 + $0x54] sm:$0xf0] }
 0x204   : > { %2645 = vmatmul.bf16.gmra.mxu1 %v7259_v53  ;;  %v10332_v17 = vadd.f32 %v10290_v50, %v1798_v45  ;;  %v7124_v45 = vld [vmem:[#allocation2 + $0x18c] sm:$0xf0] }
 0x205   : > { %2611 = vmatmul.bf16.gmra.mxu0 %v7387_v11  ;;  %v8743_v11 = vld [vmem:[#allocation2 + $0x184] sm:$0xf]  ;;  %3351 = vmatpush.bf16.msra.mxu3 %v8896_v7 }
 0x207   : > { %3529 = vmatpush.bf16.msra.mxu1 %v8912_v28 }
 0x209   : > { %v1799_v30 = vpop.f32.mrf.mxu1 }
 0x20a   : > { %v1800_v41 = vadd.f32 %v10248_v34, %v1799_v30  ;;  %v10337_v50 = vpop.f32.mrf.mxu0  ;;  %v7127_v30 = vor.u32 %v8743_v11, %v7124_v45  ;;  %v8785_v11 = vld [vmem:[#allocation2 + $0xac] sm:$0xf] }
 0x20c   : > { %2754 = vmatmul.bf16.gmra.mxu2 %v7311_v10  ;;  %v10340_v57 = vadd.f32 %v10299_v9, %v1800_v41  ;;  %v10356_v41 = vpop.f32.mrf.mxu2 }
 0x20d   : > { %11893 = vst [vmem:[#allocation22_spill] sm:$0xff] %v10356_v41 }
 0x20e   : > { %1925 = vmatmul.bf16.gmra.mxu3 %v7115_v24  ;;  %v7283_v24 = vor.u32 %v8782_v38, %v7280_v35  ;;  %v8799_v35 = vld [vmem:[#allocation2 + $0x118] sm:$0xf0] }
 0x211   : > { %v1802_v56 = vpop.f32.mrf.mxu1 }
 0x212   : > { %v1803_v8 = vadd.f32 %v10248_v34, %v1802_v56  ;;  %v10348_v1 = vpop.f32.mrf.mxu0 }
 0x214   : > { %2650 = vmatmul.bf16.gmra.mxu1 %v7271_v21  ;;  %v10346_v53 = vadd.f32 %v10307_v27, %v1803_v8  ;;  %v7335_v21 = vor.u32 %v8796_v44, %v7334_v2  ;;  %v10362_v5 = vpop.f32.mrf.mxu2  ;;  %v7292_v8 = vld [vmem:[#allocation2 + $0xb4] sm:$0xf0]  ;;  %v8703_v44 = vld [vmem:[#allocation2 + $0x40] sm:$0xf0] }
 0x215   : > { %2616 = vmatmul.bf16.gmra.mxu0 %v7399_v6  ;;  %11895 = vst [vmem:[#allocation24_spill] sm:$0xff] %v10362_v5  ;;  %v7295_v45 = vor.u32 %v8785_v11, %v7292_v8  ;;  %v7532_v8 = vld [vmem:[#allocation2 + $0x6c] sm:$0xf0]  ;;  %v8788_v11 = vld [vmem:[#allocation2 + $0xc4] sm:$0xf] }
 0x219   : > { %v1804_v9 = vpop.f32.mrf.mxu1 }
 0x21a   : > { %v1805_v15 = vadd.f32 %v10248_v34, %v1804_v9  ;;  %v10358_v32 = vpop.f32.mrf.mxu0 }
 0x21c   : > { %2759 = vmatmul.bf16.gmra.mxu2 %v7323_v26  ;;  %v10352_v10 = vadd.f32 %v10318_v48, %v1805_v15  ;;  %v6951_v48 = vor.u32 %v8700_v13, %v6950_v58  ;;  %v8842_v26 = vld [vmem:[#allocation2 + $0x4c] sm:$0xf]  ;;  %v6962_v13 = vld [vmem:[#allocation2 + $0x38] sm:$0xf] }
 0x21d   : > { %v7523_v15 = vor.u32 %v8842_v26, %v7520_v12  ;;  %v6963_v2 = vor.u32 %v8703_v44, %v6962_v13  ;;  %v7358_v44 = vld [vmem:[#allocation2 + $0x128] sm:$0xf] }
 0x21e   : > { %1930 = vmatmul.bf16.gmra.mxu3 %v7127_v30  ;;  %v10370_v30 = vpop.f32.mrf.mxu2 }
 0x21f   : > { %11897 = vst [vmem:[#allocation26_spill] sm:$0xff] %v10370_v30 }
 0x221   : > { %v10354_v27 = vpop.f32.mrf.mxu1 }
 0x222   : > { %v10364_v6 = vpop.f32.mrf.mxu0 }
 0x224   : > { %2655 = vmatmul.bf16.gmra.mxu1 %v7283_v24 }
 0x225   : > { %2621 = vmatmul.bf16.gmra.mxu0 %v7411_v18  ;;  %v7346_v18 = vld [vmem:[#allocation2 + $0x110] sm:$0xf] }
 0x226   : > { %v7347_v58 = vor.u32 %v8799_v35, %v7346_v18  ;;  %v8802_v35 = vld [vmem:[#allocation2 + $0x130] sm:$0xf0] }
 0x229   : > { %v10360_v56 = vpop.f32.mrf.mxu1 }
 0x22a   : > { %11894 = vst [vmem:[#allocation23_spill] sm:$0xff] %v10360_v56  ;;  %v10372_v22 = vpop.f32.mrf.mxu0 }
 0x22c   : > { %2764 = vmatmul.bf16.gmra.mxu2 %v7335_v21  ;;  %v7304_v21 = vld [vmem:[#allocation2 + $0xcc] sm:$0xf0] }
 0x22d   : > { %v7307_v26 = vor.u32 %v8788_v11, %v7304_v21  ;;  %v7316_v21 = vld [vmem:[#allocation2 + $0xe4] sm:$0xf0] }
 0x22e   : > { %1944 = vmatmul.bf16.vlgmr.msrb.gmra.mxu3 %v6951_v48  ;;  %v10378_v48 = vpop.f32.mrf.mxu2  ;;  %v7544_v11 = vld [vmem:[#allocation2 + $0x84] sm:$0xf0] }
 0x22f   : > { %11899 = vst [vmem:[#allocation28_spill] sm:$0xff] %v10378_v48  ;;  %v6974_v48 = vld [vmem:[#allocation2 + $0x50] sm:$0xf] }
 0x231   : > { %v10366_v9 = vpop.f32.mrf.mxu1  ;;  %v10368_v0 = vpop.f32.mrf.mxu3 }
 0x232   : > { %11896 = vst [vmem:[#allocation25_spill] sm:$0xff] %v10366_v9 }
 0x234   : > { %2660 = vmatmul.bf16.gmra.mxu1 %v7295_v45  ;;  %v10384_v45 = vpop.f32.mrf.mxu0 }
 0x235   : > { %3447 = vmatmul.bf16.vlgmr.msra.gmra.mxu0 %v7523_v15  ;;  %11901 = vst [vmem:[#allocation30_spill] sm:$0xff] %v10384_v45  ;;  %v8845_v15 = vld [vmem:[#allocation2 + $0x64] sm:$0xf] }
 0x236   : > { %v7535_v42 = vor.u32 %v8845_v15, %v7532_v8  ;;  %v10390_v13 = vpop.f32.mrf.mxu2  ;;  %v8895_v8 = vld [vmem:[#allocation9 + $0x1a8] sm:$0xff]  ;;  %v8791_v15 = vld [vmem:[#allocation2 + $0xdc] sm:$0xf] }
 0x237   : > { %11903 = vst [vmem:[#allocation32_spill] sm:$0xff] %v10390_v13  ;;  %3352 = vmatpush.bf16.msra.mxu3 %v8895_v8 }
 0x239   : > { %v10374_v38 = vpop.f32.mrf.mxu1  ;;  %v10376_v24 = vpop.f32.mrf.mxu3 }
 0x23a   : > { %11898 = vst [vmem:[#allocation27_spill] sm:$0xff] %v10374_v38 }
 0x23c   : > { %2769 = vmatmul.bf16.gmra.mxu2 %v7347_v58  ;;  %v8706_v58 = vld [vmem:[#allocation2 + $0x58] sm:$0xf0]  ;;  %v10392_v30 = vpop.f32.mrf.mxu0 }
 0x23d   : > { %11904 = vst [vmem:[#allocation33_spill] sm:$0xff] %v10392_v30  ;;  %v6975_v5 = vor.u32 %v8706_v58, %v6974_v48  ;;  %v8805_v48 = vld [vmem:[#allocation2 + $0x148] sm:$0xf0] }
 0x23e   : > { %1949 = vmatmul.bf16.gmra.mxu3 %v6963_v2  ;;  %v7359_v2 = vor.u32 %v8802_v35, %v7358_v44  ;;  %v2725_v13 = vpop.f32.mrf.mxu2  ;;  %v7370_v44 = vld [vmem:[#allocation2 + $0x140] sm:$0xf] }
 0x23f   : > { %v7371_v38 = vor.u32 %v8805_v48, %v7370_v44 }
 0x241   : > { %v10380_v7 = vpop.f32.mrf.mxu1  ;;  %v10382_v12 = vpop.f32.mrf.mxu3 }
 0x242   : > { %11900 = vst [vmem:[#allocation29_spill] sm:$0xff] %v10380_v7  ;;  %v8848_v7 = vld [vmem:[#allocation2 + $0x7c] sm:$0xf] }
 0x243   : > { %v7547_v41 = vor.u32 %v8848_v7, %v7544_v11  ;;  %v7328_v7 = vld [vmem:[#allocation2 + $0xfc] sm:$0xf0] }
 0x244   : > { %2665 = vmatmul.bf16.gmra.mxu1 %v7307_v26  ;;  %v10398_v35 = vpop.f32.mrf.mxu0 }
 0x245   : > { %3452 = vmatmul.bf16.gmra.mxu0 %v7535_v42  ;;  %11906 = vst [vmem:[#allocation35_spill] sm:$0xff] %v10398_v35  ;;  %v8794_v35 = vld [vmem:[#allocation2 + $0xf4] sm:$0xf] }
 0x246   : > { %v2727_v8 = vpop.f32.mrf.mxu2  ;;  %v7331_v9 = vor.u32 %v8794_v35, %v7328_v7 }
 0x249   : > { %v10386_v28 = vpop.f32.mrf.mxu1  ;;  %v10388_v18 = vpop.f32.mrf.mxu3 }
 0x24a   : > { %11902 = vst [vmem:[#allocation31_spill] sm:$0xff] %v10386_v28  ;;  %v7319_v28 = vor.u32 %v8791_v15, %v7316_v21 }
 0x24c   : > { %2774 = vmatmul.bf16.gmra.mxu2 %v7359_v2 }
 0x24e   : > { %1954 = vmatmul.bf16.gmra.mxu3 %v6975_v5  ;;  %v8911_v5 = vld [vmem:[#allocation9 + $0x228] sm:$0xff] }
 0x24f   : > { %3530 = vmatpush.bf16.msra.mxu1 %v8911_v5 }
 0x251   : > { %v10394_v42 = vpop.f32.mrf.mxu1  ;;  %v10396_v26 = vpop.f32.mrf.mxu3 }
 0x252   : > { %11905 = vst [vmem:[#allocation34_spill] sm:$0xff] %v10394_v42  ;;  %v8709_v42 = vld [vmem:[#allocation2 + $0x70] sm:$0xf0] }
 0x253   : > { %v6987_v21 = vor.u32 %v8709_v42, %v6986_v33  ;;  %v7382_v33 = vld [vmem:[#allocation2 + $0x158] sm:$0xf]  ;;  %v2730_v42 = vpop.f32.mrf.mxu2 }
 0x254   : > { %2670 = vmatmul.bf16.gmra.mxu1 %v7319_v28  ;;  %v10404_v28 = vpop.f32.mrf.mxu0 }
 0x255   : > { %3457 = vmatmul.bf16.gmra.mxu0 %v7547_v41  ;;  %11908 = vst [vmem:[#allocation37_spill] sm:$0xff] %v10404_v28  ;;  %v7556_v41 = vld [vmem:[#allocation2 + $0x9c] sm:$0xf0] }
 0x256   : > { %v7559_v30 = vor.u32 %v8851_v46, %v7556_v41 }
 0x259   : > { %v10400_v58 = vpop.f32.mrf.mxu1  ;;  %v10402_v2 = vpop.f32.mrf.mxu3 }
 0x25a   : > { %11907 = vst [vmem:[#allocation36_spill] sm:$0xff] %v10400_v58 }
 0x25c   : > { %2779 = vmatmul.bf16.gmra.mxu2 %v7371_v38  ;;  %v8808_v38 = vld [vmem:[#allocation2 + $0x160] sm:$0xf0]  ;;  %v10413_v28 = vpop.f32.mrf.mxu0 }
 0x25d   : > { %11909 = vst [vmem:[#allocation38_spill] sm:$0xff] %v10413_v28  ;;  %v7383_v39 = vor.u32 %v8808_v38, %v7382_v33  ;;  %v2732_v28 = vpop.f32.mrf.mxu2 }
 0x25e   : > { %1959 = vmatmul.bf16.gmra.mxu3 %v6987_v21  ;;  %v8712_v21 = vld [vmem:[#allocation2 + $0x88] sm:$0xf0] }
 0x261   : > { %v10406_v11 = vpop.f32.mrf.mxu3  ;;  %v2636_v15 = vpop.f32.mrf.mxu1 }
 0x262   : > { %v2637_v58 = vadd.f32 %v2636_v15, %v10251_v43  ;;  %v6998_v43 = vld [vmem:[#allocation2 + $0x80] sm:$0xf]  ;;  %v8797_v15 = vld [vmem:[#allocation2 + $0x10c] sm:$0xf] }
 0x263   : > { %v6999_v46 = vor.u32 %v8712_v21, %v6998_v43  ;;  %v8910_v21 = vld [vmem:[#allocation9 + $0x220] sm:$0xff]  ;;  %v1830_v43 = vadd.f32 %v10248_v34, %v10376_v24  ;;  %v1833_v24 = vadd.f32 %v10248_v34, %v10382_v12  ;;  %v1835_v12 = vadd.f32 %v10248_v34, %v10388_v18 }
 0x264   : > { %v10409_v5 = vadd.f32 %v2725_v13, %v2637_v58  ;;  %2675 = vmatmul.bf16.gmra.mxu1 %v7331_v9  ;;  %v7340_v9 = vld [vmem:[#allocation2 + $0x114] sm:$0xf0]  ;;  %v1828_v13 = vadd.f32 %v10248_v34, %v10368_v0  ;;  %v10423_v33 = vpop.f32.mrf.mxu0  ;;  %v7394_v0 = vld [vmem:[#allocation2 + $0x170] sm:$0xf]  ;;  %v1838_v18 = vadd.f32 %v10248_v34, %v10396_v26  ;;  %v7418_v26 = vld [vmem:[#allocation2 + $0x1a0] sm:$0xf] }
 0x265   : > { %3462 = vmatmul.bf16.gmra.mxu0 %v7559_v30  ;;  %v8894_v30 = vld [vmem:[#allocation9 + $0x1a0] sm:$0xff]  ;;  %v7568_v58 = vld [vmem:[#allocation2 + $0xb4] sm:$0xf0]  ;;  %3531 = vmatpush.bf16.msra.mxu1 %v8910_v21 }
 0x266   : > { %3353 = vmatpush.bf16.msra.mxu3 %v8894_v30 }
 0x269   : > { %v10411_v44 = vpop.f32.mrf.mxu3  ;;  %v2638_v48 = vpop.f32.mrf.mxu1 }
 0x26a   : > { %v2639_v56 = vadd.f32 %v2638_v48, %v10259_v37  ;;  %v8811_v48 = vld [vmem:[#allocation2 + $0x178] sm:$0xf0] }
 0x26c   : > { %v10416_v35 = vadd.f32 %v2727_v8, %v2639_v56  ;;  %2784 = vmatmul.bf16.gmra.mxu2 %v7383_v39  ;;  %v7343_v56 = vor.u32 %v8797_v15, %v7340_v9  ;;  %v8854_v8 = vld [vmem:[#allocation2 + $0xac] sm:$0xf] }
 0x26d   : > { %v7571_v39 = vor.u32 %v8854_v8, %v7568_v58  ;;  %v7395_v58 = vor.u32 %v8811_v48, %v7394_v0  ;;  %v7580_v8 = vld [vmem:[#allocation2 + $0xcc] sm:$0xf0] }
 0x26e   : > { %1964 = vmatmul.bf16.gmra.mxu3 %v6999_v46 }
 0x271   : > { %v1916_v7 = vpop.f32.mrf.mxu3  ;;  %v2641_v41 = vpop.f32.mrf.mxu1 }
 0x272   : > { %v10420_v45 = vadd.f32 %v1916_v7, %v1828_v13  ;;  %v2642_v37 = vadd.f32 %v2641_v41, %v10267_v40  ;;  %v8715_v13 = vld [vmem:[#allocation2 + $0xa0] sm:$0xf0]  ;;  %v7010_v7 = vld [vmem:[#allocation2 + $0x98] sm:$0xf] }
 0x273   : > { %v7011_v15 = vor.u32 %v8715_v13, %v7010_v7 }
 0x274   : > { %v10425_v38 = vadd.f32 %v2730_v42, %v2642_v37  ;;  %2680 = vmatmul.bf16.gmra.mxu1 %v7343_v56  ;;  %v2735_v42 = vpop.f32.mrf.mxu2  ;;  %v10434_v37 = vpop.f32.mrf.mxu0  ;;  %v7352_v56 = vld [vmem:[#allocation2 + $0x12c] sm:$0xf0] }
 0x275   : > { %3467 = vmatmul.bf16.gmra.mxu0 %v7571_v39 }
 0x279   : > { %v1918_v46 = vpop.f32.mrf.mxu3  ;;  %v2643_v30 = vpop.f32.mrf.mxu1 }
 0x27a   : > { %v10429_v40 = vadd.f32 %v1918_v46, %v1830_v43  ;;  %v2644_v9 = vadd.f32 %v2643_v30, %v10275_v20  ;;  %v8800_v43 = vld [vmem:[#allocation2 + $0x124] sm:$0xf] }
 0x27b   : > { %v7355_v0 = vor.u32 %v8800_v43, %v7352_v56  ;;  %v7364_v43 = vld [vmem:[#allocation2 + $0x144] sm:$0xf0] }
 0x27c   : > { %11910 = vst [vmem:[#allocation39_spill] sm:$0xff] %v10429_v40  ;;  %v10432_v41 = vadd.f32 %v2732_v28, %v2644_v9  ;;  %2789 = vmatmul.bf16.gmra.mxu2 %v7395_v58  ;;  %v8857_v28 = vld [vmem:[#allocation2 + $0xc4] sm:$0xf]  ;;  %v2737_v13 = vpop.f32.mrf.mxu2  ;;  %v7406_v9 = vld [vmem:[#allocation2 + $0x188] sm:$0xf]  ;;  %v10445_v7 = vpop.f32.mrf.mxu0 }
 0x27d   : > { %v7583_v48 = vor.u32 %v8857_v28, %v7580_v8  ;;  %v8814_v58 = vld [vmem:[#allocation2 + $0x190] sm:$0xf0]  ;;  %v7592_v28 = vld [vmem:[#allocation2 + $0xe4] sm:$0xf0] }
 0x27e   : > { %1969 = vmatmul.bf16.gmra.mxu3 %v7011_v15  ;;  %v7407_v56 = vor.u32 %v8814_v58, %v7406_v9  ;;  %v8860_v58 = vld [vmem:[#allocation2 + $0xdc] sm:$0xf] }
 0x281   : > { %v1921_v39 = vpop.f32.mrf.mxu3  ;;  %v2646_v21 = vpop.f32.mrf.mxu1 }
 0x282   : > { %v10438_v46 = vadd.f32 %v1921_v39, %v1833_v24  ;;  %v2647_v20 = vadd.f32 %v2646_v21, %v10283_v31  ;;  %v8718_v39 = vld [vmem:[#allocation2 + $0xb8] sm:$0xf0] }
 0x284   : > { %11911 = vst [vmem:[#allocation40_spill] sm:$0xff] %v10438_v46  ;;  %v10441_v30 = vadd.f32 %v2735_v42, %v2647_v20  ;;  %2685 = vmatmul.bf16.gmra.mxu1 %v7355_v0  ;;  %v7022_v42 = vld [vmem:[#allocation2 + $0xb0] sm:$0xf]  ;;  %v8893_v20 = vld [vmem:[#allocation9 + $0x198] sm:$0xff]  ;;  %v2740_v0 = vpop.f32.mrf.mxu2 }
 0x285   : > { %3472 = vmatmul.bf16.gmra.mxu0 %v7583_v48  ;;  %v7023_v21 = vor.u32 %v8718_v39, %v7022_v42  ;;  %3354 = vmatpush.bf16.msra.mxu3 %v8893_v20  ;;  %v1840_v42 = vadd.f32 %v10248_v34, %v10402_v2  ;;  %v7376_v2 = vld [vmem:[#allocation2 + $0x15c] sm:$0xf0] }
 0x289   : > { %v1923_v15 = vpop.f32.mrf.mxu3  ;;  %v2648_v24 = vpop.f32.mrf.mxu1 }
 0x28a   : > { %v10447_v46 = vadd.f32 %v1923_v15, %v1835_v12  ;;  %v2649_v31 = vadd.f32 %v2648_v24, %v10288_v55  ;;  %v8803_v12 = vld [vmem:[#allocation2 + $0x13c] sm:$0xf]  ;;  %v10454_v15 = vpop.f32.mrf.mxu0  ;;  %v7595_v24 = vor.u32 %v8860_v58, %v7592_v28  ;;  %v7604_v58 = vld [vmem:[#allocation2 + $0xfc] sm:$0xf0] }
 0x28b   : > { %v7367_v9 = vor.u32 %v8803_v12, %v7364_v43 }
 0x28c   : > { %11912 = vst [vmem:[#allocation41_spill] sm:$0xff] %v10447_v46  ;;  %v10450_v8 = vadd.f32 %v2737_v13, %v2649_v31  ;;  %2794 = vmatmul.bf16.gmra.mxu2 %v7407_v56  ;;  %v8817_v31 = vld [vmem:[#allocation2 + $0x1a8] sm:$0xf0]  ;;  %v8909_v56 = vld [vmem:[#allocation9 + $0x218] sm:$0xff]  ;;  %v8721_v46 = vld [vmem:[#allocation2 + $0xd0] sm:$0xf0]  ;;  %v2742_v43 = vpop.f32.mrf.mxu2 }
 0x28d   : > { %3532 = vmatpush.bf16.msra.mxu1 %v8909_v56 }
 0x28e   : > { %1974 = vmatmul.bf16.gmra.mxu3 %v7023_v21 }
 0x291   : > { %v1926_v48 = vpop.f32.mrf.mxu3  ;;  %v2651_v40 = vpop.f32.mrf.mxu1 }
 0x292   : > { %v10456_v55 = vadd.f32 %v1926_v48, %v1838_v18  ;;  %v2652_v13 = vadd.f32 %v2651_v40, %v10296_v4  ;;  %v7419_v40 = vor.u32 %v8817_v31, %v7418_v26  ;;  %v10466_v28 = vpop.f32.mrf.mxu0  ;;  %v8863_v31 = vld [vmem:[#allocation2 + $0xf4] sm:$0xf] }
 0x294   : > { %v10459_v39 = vadd.f32 %v2740_v0, %v2652_v13  ;;  %2690 = vmatmul.bf16.gmra.mxu1 %v7367_v9  ;;  %v7034_v0 = vld [vmem:[#allocation2 + $0xc8] sm:$0xf]  ;;  %v8806_v13 = vld [vmem:[#allocation2 + $0x154] sm:$0xf]  ;;  %v1843_v9 = vadd.f32 %v10248_v34, %v10406_v11  ;;  %v8724_v11 = vld [vmem:[#allocation2 + $0xe8] sm:$0xf0] }
 0x295   : > { %3477 = vmatmul.bf16.gmra.mxu0 %v7595_v24  ;;  %v7035_v12 = vor.u32 %v8721_v46, %v7034_v0  ;;  %v7379_v26 = vor.u32 %v8806_v13, %v7376_v2  ;;  %v1845_v46 = vadd.f32 %v10248_v34, %v10411_v44  ;;  %v1768_v0 = vadd.f32 %v10248_v34, %v10221_v3  ;;  %v8809_v13 = vld [vmem:[#allocation2 + $0x16c] sm:$0xf]  ;;  %v7388_v2 = vld [vmem:[#allocation2 + $0x174] sm:$0xf0] }
 0x296   : > { %v7616_v44 = vld [vmem:[#allocation2 + $0x114] sm:$0xf0]  ;;  %v1770_v3 = vadd.f32 %v10248_v34, %v10241_v29  ;;  %v8812_v34 = vld [vmem:[#allocation2 + $0x184] sm:$0xf] }
 0x299   : > { %v1928_v21 = vpop.f32.mrf.mxu3  ;;  %v2653_v20 = vpop.f32.mrf.mxu1 }
 0x29a   : > { %v10463_v18 = vadd.f32 %v1928_v21, %v1840_v42  ;;  %v2654_v4 = vadd.f32 %v2653_v20, %v10304_v16  ;;  %v7607_v42 = vor.u32 %v8863_v31, %v7604_v58  ;;  %v10476_v21 = vpop.f32.mrf.mxu0 }
 0x29c   : > { %v10468_v48 = vadd.f32 %v2742_v43, %v2654_v4  ;;  %2799 = vmatmul.bf16.gmra.mxu2 %v7419_v40  ;;  %v7046_v43 = vld [vmem:[#allocation2 + $0xe0] sm:$0xf] }
 0x29e   : > { %1979 = vmatmul.bf16.gmra.mxu3 %v7035_v12  ;;  %v7047_v12 = vor.u32 %v8724_v11, %v7046_v43  ;;  %v8908_v43 = vld [vmem:[#allocation9 + $0x210] sm:$0xff] }
 0x29f   : > { %3533 = vmatpush.bf16.msra.mxu1 %v8908_v43 }
 0x2a1   : > { %v1931_v24 = vpop.f32.mrf.mxu3  ;;  %v10472_v56 = vpop.f32.mrf.mxu1 }
 0x2a2   : > { %v10474_v16 = vadd.f32 %v1931_v24, %v1843_v9  ;;  %v8892_v9 = vld [vmem:[#allocation9 + $0x190] sm:$0xff]  ;;  %v10486_v58 = vpop.f32.mrf.mxu0  ;;  %v1857_v24 = vadd.f32 %v10171_v60, %v1768_v0  ;;  %v1859_v60 = vadd.f32 %v10179_v47, %v1770_v3  ;;  %v8869_v3 = vld [vmem:[#allocation2 + $0x124] sm:$0xf] }
 0x2a3   : > { %3355 = vmatpush.bf16.msra.mxu3 %v8892_v9 }
 0x2a4   : > { %11913 = vst [vmem:[#allocation42_spill] sm:$0xff] %v10474_v16  ;;  %2695 = vmatmul.bf16.gmra.mxu1 %v7379_v26  ;;  %v8727_v16 = vld [vmem:[#allocation2 + $0x100] sm:$0xf0] }
 0x2a5   : > { %3482 = vmatmul.bf16.gmra.mxu0 %v7607_v42 }
 0x2a9   : > { %v1933_v20 = vpop.f32.mrf.mxu3  ;;  %v10480_v4 = vpop.f32.mrf.mxu1 }
 0x2aa   : > { %v10482_v40 = vadd.f32 %v1933_v20, %v1845_v46  ;;  %v7391_v46 = vor.u32 %v8809_v13, %v7388_v2  ;;  %v8866_v20 = vld [vmem:[#allocation2 + $0x10c] sm:$0xf]  ;;  %v10499_v9 = vpop.f32.mrf.mxu0  ;;  %v7058_v2 = vld [vmem:[#allocation2 + $0xf8] sm:$0xf] }
 0x2ab   : > { %v7059_v29 = vor.u32 %v8727_v16, %v7058_v2  ;;  %v8906_v16 = vld [vmem:[#allocation9 + $0x200] sm:$0xff]  ;;  %v8730_v2 = vld [vmem:[#allocation2 + $0x118] sm:$0xf0] }
 0x2ac   : > { %11914 = vst [vmem:[#allocation43_spill] sm:$0xff] %v10482_v40  ;;  %v7619_v40 = vor.u32 %v8866_v20, %v7616_v44  ;;  %v7628_v44 = vld [vmem:[#allocation2 + $0x12c] sm:$0xf0] }
 0x2ad   : > { %v7631_v43 = vor.u32 %v8869_v3, %v7628_v44 }
 0x2ae   : > { %1984 = vmatmul.bf16.gmra.mxu3 %v7047_v12 }
 0x2b1   : > { %v1945_v26 = vpop.f32.mrf.mxu3  ;;  %v10489_v31 = vpop.f32.mrf.mxu1 }
 0x2b2   : > { %v1946_v42 = vadd.f32 %v1945_v26, %v1857_v24 }
 0x2b4   : > { %v10494_v11 = vadd.f32 %v10409_v5, %v1946_v42  ;;  %2700 = vmatmul.bf16.gmra.mxu1 %v7391_v46  ;;  %v7400_v5 = vld [vmem:[#allocation2 + $0x18c] sm:$0xf0]  ;;  %v10506_v42 = vpop.f32.mrf.mxu2 }
 0x2b5   : > { %3487 = vmatmul.bf16.gmra.mxu0 %v7619_v40  ;;  %v8907_v40 = vld [vmem:[#allocation9 + $0x208] sm:$0xff]  ;;  %v7403_v20 = vor.u32 %v8812_v34, %v7400_v5 }
 0x2b6   : > { %11915 = vst [vmem:[#allocation44_spill] sm:$0xff] %v10494_v11  ;;  %3534 = vmatpush.bf16.msra.mxu1 %v8907_v40  ;;  %v7070_v40 = vld [vmem:[#allocation2 + $0x110] sm:$0xf] }
 0x2b7   : > { %v7071_v5 = vor.u32 %v8730_v2, %v7070_v40 }
 0x2b9   : > { %v1947_v0 = vpop.f32.mrf.mxu3  ;;  %v10497_v12 = vpop.f32.mrf.mxu1 }
 0x2ba   : > { %v1948_v13 = vadd.f32 %v1947_v0, %v1859_v60  ;;  %v10509_v60 = vpop.f32.mrf.mxu0  ;;  %3535 = vmatpush.bf16.msra.mxu1 %v8906_v16 }
 0x2bc   : > { %v10502_v24 = vadd.f32 %v10416_v35, %v1948_v13 }
 0x2be   : > { %11916 = vst [vmem:[#allocation45_spill] sm:$0xff] %v10502_v24  ;;  %1989 = vmatmul.bf16.gmra.mxu3 %v7059_v29  ;;  %v7082_v24 = vld [vmem:[#allocation2 + $0x128] sm:$0xf] }
 0x2c1   : > { %v1950_v26 = vpop.f32.mrf.mxu3  ;;  %v10504_v47 = vpop.f32.mrf.mxu1 }
 0x2c2   : > { %v1951_v46 = vadd.f32 %v1950_v26, %v10256_v54  ;;  %v10517_v54 = vpop.f32.mrf.mxu2  ;;  %v10522_v44 = vpop.f32.mrf.mxu0  ;;  %v7412_v26 = vld [vmem:[#allocation2 + $0x1a4] sm:$0xf0] }
 0x2c4   : > { %v10512_v35 = vadd.f32 %v10425_v38, %v1951_v46  ;;  %2705 = vmatmul.bf16.gmra.mxu1 %v7403_v20  ;;  %v8815_v38 = vld [vmem:[#allocation2 + $0x19c] sm:$0xf]  ;;  %v8891_v46 = vld [vmem:[#allocation9 + $0x188] sm:$0xff] }
 0x2c5   : > { %3492 = vmatmul.bf16.gmra.mxu0 %v7631_v43  ;;  %v7640_v20 = vld [vmem:[#allocation2 + $0x144] sm:$0xf0]  ;;  %3356 = vmatpush.bf16.msra.mxu3 %v8891_v46  ;;  %v7415_v16 = vor.u32 %v8815_v38, %v7412_v26 }
 0x2c6   : > { %11917 = vst [vmem:[#allocation46_spill] sm:$0xff] %v10512_v35 }
 0x2c9   : > { %v1952_v0 = vpop.f32.mrf.mxu3  ;;  %v10514_v13 = vpop.f32.mrf.mxu1 }
 0x2ca   : > { %v1953_v29 = vadd.f32 %v1952_v0, %v10262_v63  ;;  %v8872_v0 = vld [vmem:[#allocation2 + $0x13c] sm:$0xf]  ;;  %v10530_v2 = vpop.f32.mrf.mxu2 }
 0x2cb   : > { %v7643_v35 = vor.u32 %v8872_v0, %v7640_v20  ;;  %v7652_v20 = vld [vmem:[#allocation2 + $0x15c] sm:$0xf0] }
 0x2cc   : > { %v10520_v34 = vadd.f32 %v10432_v41, %v1953_v29  ;;  %v10532_v29 = vpop.f32.mrf.mxu0 }
 0x2cd   : > { %11920 = vst [vmem:[#allocation49_spill] sm:$0xff] %v10532_v29 }
 0x2ce   : > { %11918 = vst [vmem:[#allocation47_spill] sm:$0xff] %v10520_v34  ;;  %1994 = vmatmul.bf16.gmra.mxu3 %v7071_v5  ;;  %v8733_v34 = vld [vmem:[#allocation2 + $0x130] sm:$0xf0] }
 0x2cf   : > { %v7083_v38 = vor.u32 %v8733_v34, %v7082_v24 }
 0x2d1   : > { %v1955_v3 = vpop.f32.mrf.mxu3  ;;  %v10524_v43 = vpop.f32.mrf.mxu1 }
 0x2d2   : > { %v1956_v63 = vadd.f32 %v1955_v3, %v10270_v25  ;;  %v10540_v26 = vpop.f32.mrf.mxu2 }
 0x2d4   : > { %v10528_v41 = vadd.f32 %v10441_v30, %v1956_v63  ;;  %2710 = vmatmul.bf16.gmra.mxu1 %v7415_v16  ;;  %v8844_v30 = vld [vmem:[#allocation2 + $0x58] sm:$0xf0]  ;;  %v7526_v16 = vld [vmem:[#allocation2 + $0x50] sm:$0xf]  ;;  %v10544_v0 = vpop.f32.mrf.mxu0 }
 0x2d5   : > { %3497 = vmatmul.bf16.gmra.mxu0 %v7643_v35  ;;  %v8875_v35 = vld [vmem:[#allocation2 + $0x154] sm:$0xf] }
 0x2d6   : > { %11919 = vst [vmem:[#allocation48_spill] sm:$0xff] %v10528_v41 }
 0x2d9   : > { %v1957_v40 = vpop.f32.mrf.mxu3  ;;  %v10534_v5 = vpop.f32.mrf.mxu1 }
 0x2da   : > { %v1958_v46 = vadd.f32 %v1957_v40, %v10278_v62  ;;  %v7527_v62 = vor.u32 %v8844_v30, %v7526_v16  ;;  %v7655_v40 = vor.u32 %v8875_v35, %v7652_v20  ;;  %v8890_v35 = vld [vmem:[#allocation9 + $0x180] sm:$0xff]  ;;  %v8878_v20 = vld [vmem:[#allocation2 + $0x16c] sm:$0xf] }
 0x2db   : > { %3357 = vmatpush.bf16.msra.mxu3 %v8890_v35  ;;  %v7106_v35 = vld [vmem:[#allocation2 + $0x158] sm:$0xf] }
 0x2dc   : > { %v10538_v25 = vadd.f32 %v10450_v8, %v1958_v46  ;;  %v7094_v46 = vld [vmem:[#allocation2 + $0x140] sm:$0xf]  ;;  %v10555_v29 = vpop.f32.mrf.mxu0 }
 0x2de   : > { %11921 = vst [vmem:[#allocation50_spill] sm:$0xff] %v10538_v25  ;;  %1999 = vmatmul.bf16.gmra.mxu3 %v7083_v38  ;;  %v8736_v38 = vld [vmem:[#allocation2 + $0x148] sm:$0xf0]  ;;  %v10552_v25 = vpop.f32.mrf.mxu2 }
 0x2df   : > { %v7095_v30 = vor.u32 %v8736_v38, %v7094_v46 }
 0x2e1   : > { %v1960_v3 = vpop.f32.mrf.mxu3  ;;  %v10542_v63 = vpop.f32.mrf.mxu1 }
 0x2e2   : > { %v1961_v41 = vadd.f32 %v1960_v3, %v10286_v23  ;;  %v7664_v3 = vld [vmem:[#allocation2 + $0x174] sm:$0xf0] }
 0x2e4   : > { %v10548_v8 = vadd.f32 %v10459_v39, %v1961_v41  ;;  %3536 = vmatmul.bf16.vlgmr.msra.gmra.mxu1 %v7527_v62  ;;  %v2657_v39 = vadd.f32 %v10472_v56, %v10312_v14  ;;  %v8847_v41 = vld [vmem:[#allocation2 + $0x70] sm:$0xf0]  ;;  %v2659_v14 = vadd.f32 %v10480_v4, %v10321_v19  ;;  %v10572_v56 = vpop.f32.mrf.mxu0  ;;  %v8850_v19 = vld [vmem:[#allocation2 + $0x88] sm:$0xf0] }
 0x2e5   : > { %3502 = vmatmul.bf16.gmra.mxu0 %v7655_v40  ;;  %v7538_v40 = vld [vmem:[#allocation2 + $0x68] sm:$0xf] }
 0x2e6   : > { %v10566_v46 = vpop.f32.mrf.mxu2 }
 0x2e9   : > { %v1962_v24 = vpop.f32.mrf.mxu3  ;;  %v10550_v34 = vpop.f32.mrf.mxu1 }
 0x2ea   : > { %v1963_v11 = vadd.f32 %v1962_v24, %v10294_v61  ;;  %v2746_v61 = vadd.f32 %v10506_v42, %v2657_v39  ;;  %v8739_v42 = vld [vmem:[#allocation2 + $0x160] sm:$0xf0] }
 0x2ec   : > { %v10558_v23 = vadd.f32 %v10468_v48, %v1963_v11  ;;  %v7539_v48 = vor.u32 %v8847_v41, %v7538_v40  ;;  %v7667_v11 = vor.u32 %v8878_v20, %v7664_v3  ;;  %v7107_v20 = vor.u32 %v8739_v42, %v7106_v35  ;;  %v10582_v4 = vpop.f32.mrf.mxu0  ;;  %v8881_v40 = vld [vmem:[#allocation2 + $0x184] sm:$0xf] }
 0x2ee   : > { %11922 = vst [vmem:[#allocation51_spill] sm:$0xff] %v10558_v23  ;;  %2004 = vmatmul.bf16.gmra.mxu3 %v7095_v30  ;;  %v2760_v3 = vpop.f32.mrf.mxu2 }
 0x2f1   : > { %v1965_v16 = vpop.f32.mrf.mxu3  ;;  %v10562_v62 = vpop.f32.mrf.mxu1 }
 0x2f2   : > { %v1966_v24 = vadd.f32 %v1965_v16, %v10302_v36  ;;  %v2748_v36 = vadd.f32 %v10517_v54, %v2659_v14  ;;  %v2662_v16 = vadd.f32 %v10489_v31, %v10329_v59  ;;  %v2664_v59 = vadd.f32 %v10497_v12, %v10337_v50  ;;  %v8853_v50 = vld [vmem:[#allocation2 + $0xa0] sm:$0xf0]  ;;  %v8884_v12 = vld [vmem:[#allocation2 + $0x19c] sm:$0xf] }
 0x2f4   : > { %v10568_v38 = vadd.f32 %v2746_v61, %v1966_v24  ;;  %3541 = vmatmul.bf16.gmra.mxu1 %v7539_v48  ;;  %v7676_v61 = vld [vmem:[#allocation2 + $0x18c] sm:$0xf0]  ;;  %v2751_v54 = vadd.f32 %v10530_v2, %v2662_v16 }
 0x2f5   : > { %3507 = vmatmul.bf16.gmra.mxu0 %v7667_v11  ;;  %v7550_v11 = vld [vmem:[#allocation2 + $0x80] sm:$0xf] }
 0x2f6   : > { %v7551_v14 = vor.u32 %v8850_v19, %v7550_v11  ;;  %v2762_v31 = vpop.f32.mrf.mxu2  ;;  %v7562_v11 = vld [vmem:[#allocation2 + $0x98] sm:$0xf] }
 0x2f9   : > { %v1967_v30 = vpop.f32.mrf.mxu3  ;;  %v10574_v23 = vpop.f32.mrf.mxu1 }
 0x2fa   : > { %v1968_v39 = vadd.f32 %v1967_v30, %v10310_v52  ;;  %v7679_v30 = vor.u32 %v8881_v40, %v7676_v61  ;;  %v2667_v40 = vadd.f32 %v10504_v47, %v10348_v1  ;;  %v7688_v61 = vld [vmem:[#allocation2 + $0x1a4] sm:$0xf0]  ;;  %v2669_v1 = vadd.f32 %v10514_v13, %v10358_v32  ;;  %v7574_v32 = vld [vmem:[#allocation2 + $0xb0] sm:$0xf] }
 0x2fc   : > { %v10578_v41 = vadd.f32 %v2748_v36, %v1968_v39  ;;  %v7118_v39 = vld [vmem:[#allocation2 + $0x170] sm:$0xf] }
 0x2fe   : > { %11923 = vst [vmem:[#allocation52_spill] sm:$0xff] %v10578_v41  ;;  %2009 = vmatmul.bf16.gmra.mxu3 %v7107_v20  ;;  %v8742_v20 = vld [vmem:[#allocation2 + $0x178] sm:$0xf0]  ;;  %v2753_v41 = vadd.f32 %v10540_v26, %v2664_v59 }
 0x2ff   : > { %v7119_v19 = vor.u32 %v8742_v20, %v7118_v39  ;;  %v8745_v39 = vld [vmem:[#allocation2 + $0x190] sm:$0xf0] }
 0x301   : > { %v1970_v24 = vpop.f32.mrf.mxu3  ;;  %v10584_v48 = vpop.f32.mrf.mxu1 }
 0x302   : > { %v1971_v52 = vadd.f32 %v1970_v24, %v10316_v49  ;;  %v10596_v49 = vpop.f32.mrf.mxu0 }
 0x304   : > { %v10588_v35 = vadd.f32 %v2751_v54, %v1971_v52  ;;  %3546 = vmatmul.bf16.gmra.mxu1 %v7551_v14  ;;  %v2765_v54 = vpop.f32.mrf.mxu2  ;;  %v2756_v52 = vadd.f32 %v10552_v25, %v2667_v40  ;;  %v2758_v25 = vadd.f32 %v10566_v46, %v2669_v1  ;;  %v7518_v1 = vld [vmem:[#allocation2 + $0x48] sm:$0xf] }
 0x305   : > { %3512 = vmatmul.bf16.gmra.mxu0 %v7679_v30 }
 0x309   : > { %v1972_v42 = vpop.f32.mrf.mxu3  ;;  %v10592_v36 = vpop.f32.mrf.mxu1 }
 0x30a   : > { %v1973_v2 = vadd.f32 %v1972_v42, %v10324_v51  ;;  %v7563_v51 = vor.u32 %v8853_v50, %v7562_v11  ;;  %v10608_v59 = vpop.f32.mrf.mxu0  ;;  %v7130_v42 = vld [vmem:[#allocation2 + $0x188] sm:$0xf]  ;;  %v2672_v50 = vadd.f32 %v10524_v43, %v10364_v6 }
 0x30c   : > { %v10598_v16 = vadd.f32 %v2753_v41, %v1973_v2  ;;  %v7691_v41 = vor.u32 %v8884_v12, %v7688_v61  ;;  %v2767_v20 = vpop.f32.mrf.mxu2  ;;  %v8856_v12 = vld [vmem:[#allocation2 + $0xb8] sm:$0xf0]  ;;  %v2761_v13 = vadd.f32 %v2760_v3, %v2672_v50 }
 0x30d   : > { %v7575_v11 = vor.u32 %v8856_v12, %v7574_v32  ;;  %v7586_v12 = vld [vmem:[#allocation2 + $0xc8] sm:$0xf] }
 0x30e   : > { %2014 = vmatmul.bf16.gmra.mxu3 %v7119_v19  ;;  %v7131_v19 = vor.u32 %v8745_v39, %v7130_v42 }
 0x311   : > { %v1975_v24 = vpop.f32.mrf.mxu3  ;;  %v10604_v14 = vpop.f32.mrf.mxu1 }
 0x312   : > { %v1976_v26 = vadd.f32 %v1975_v24, %v10332_v17  ;;  %v10639_v39 = vpop.f32.mrf.mxu0 }
 0x314   : > { %v10606_v30 = vadd.f32 %v2756_v52, %v1976_v26  ;;  %3551 = vmatmul.bf16.gmra.mxu1 %v7563_v51  ;;  %v2674_v52 = vadd.f32 %v10534_v5, %v10372_v22  ;;  %v11924_v22 = vld [vmem:[#allocation30_spill] sm:$0xff] }
 0x315   : > { %3517 = vmatmul.bf16.gmra.mxu0 %v7691_v41  ;;  %v8843_v41 = vld [vmem:[#allocation2 + $0x50] sm:$0xf0]  ;;  %v2677_v5 = vadd.f32 %v10542_v63, %v11924_v22  ;;  %v11927_v63 = vld [vmem:[#allocation33_spill] sm:$0xff] }
 0x316   : > { %v2763_v6 = vadd.f32 %v2762_v31, %v2674_v52  ;;  %v7519_v42 = vor.u32 %v8843_v41, %v7518_v1  ;;  %v8859_v31 = vld [vmem:[#allocation2 + $0xd0] sm:$0xf0]  ;;  %v2679_v52 = vadd.f32 %v10550_v34, %v11927_v63  ;;  %v8846_v1 = vld [vmem:[#allocation2 + $0x68] sm:$0xf0] }
 0x317   : > { %v11928_v41 = vld [vmem:[#allocation20_spill] sm:$0xff] }
 0x319   : > { %v1977_v47 = vpop.f32.mrf.mxu3  ;;  %v10616_v40 = vpop.f32.mrf.mxu1 }
 0x31a   : > { %v1978_v17 = vadd.f32 %v1977_v47, %v10340_v57  ;;  %v2770_v57 = vpop.f32.mrf.mxu2 }
 0x31c   : > { %v10614_v2 = vadd.f32 %v2758_v25, %v1978_v17  ;;  %v11925_v25 = vld [vmem:[#allocation19_spill] sm:$0xff] }
 0x31e   : > { %2019 = vmatmul.bf16.gmra.mxu3 %v7131_v19 }
 0x321   : > { %v1980_v61 = vpop.f32.mrf.mxu3  ;;  %v10625_v26 = vpop.f32.mrf.mxu1 }
 0x322   : > { %v1981_v24 = vadd.f32 %v1980_v61, %v10346_v53  ;;  %v10631_v53 = vld [vmem:[%s11863_s5] ss:$0 sm:$0xff]  ;;  %v2766_v61 = vadd.f32 %v2765_v54, %v2677_v5 }
 0x323   : > { %v1808_v3 = vadd.f32 %v10631_v53, %v10354_v27  ;;  %v7587_v27 = vor.u32 %v8859_v31, %v7586_v12  ;;  %v7530_v5 = vld [vmem:[#allocation2 + $0x60] sm:$0xf]  ;;  %v11929_v31 = vld [vmem:[#allocation25_spill] sm:$0xff]  ;;  %v11930_v12 = vld [vmem:[#allocation35_spill] sm:$0xff] }
 0x324   : > { %v10621_v46 = vadd.f32 %v2761_v13, %v1981_v24  ;;  %3556 = vmatmul.bf16.gmra.mxu1 %v7575_v11  ;;  %v11926_v13 = vld [vmem:[#allocation23_spill] sm:$0xff]  ;;  %v2682_v34 = vadd.f32 %v10562_v62, %v11930_v12  ;;  %v11934_v62 = vld [vmem:[#allocation37_spill] sm:$0xff] }
 0x325   : > { %v1897_v17 = vadd.f32 %v11925_v25, %v1808_v3  ;;  %v1810_v24 = vadd.f32 %v10631_v53, %v11926_v13  ;;  %v1813_v25 = vadd.f32 %v10631_v53, %v11929_v31  ;;  %v11935_v31 = vld [vmem:[#allocation22_spill] sm:$0xff] }
 0x329   : > { %v1982_v51 = vpop.f32.mrf.mxu3  ;;  %v10642_v19 = vpop.f32.mrf.mxu1 }
 0x32a   : > { %v1983_v43 = vadd.f32 %v1982_v51, %v10352_v10  ;;  %v2772_v10 = vpop.f32.mrf.mxu2  ;;  %v10650_v51 = vpop.f32.mrf.mxu0 }
 0x32c   : > { %v10635_v47 = vadd.f32 %v2763_v6, %v1983_v43  ;;  %v1899_v6 = vadd.f32 %v11928_v41, %v1810_v24  ;;  %v7598_v24 = vld [vmem:[#allocation2 + $0xe0] sm:$0xf] }
 0x32e   : > { %3358 = vmatmul.bf16.vlgmr.msra.gmra.mxu3 %v7519_v42  ;;  %v2768_v42 = vadd.f32 %v2767_v20, %v2679_v52  ;;  %v2771_v20 = vadd.f32 %v2770_v57, %v2682_v34  ;;  %v8849_v57 = vld [vmem:[#allocation2 + $0x80] sm:$0xf0] }
 0x331   : > { %v1985_v50 = vpop.f32.mrf.mxu3  ;;  %v10653_v22 = vpop.f32.mrf.mxu1 }
 0x332   : > { %v1986_v32 = vadd.f32 %v1985_v50, %v1897_v17  ;;  %v2775_v3 = vpop.f32.mrf.mxu2  ;;  %v7531_v50 = vor.u32 %v8846_v1, %v7530_v5  ;;  %v10662_v63 = vpop.f32.mrf.mxu0  ;;  %v2684_v5 = vadd.f32 %v10574_v23, %v11934_v62  ;;  %v11939_v62 = vld [vmem:[#allocation24_spill] sm:$0xff] }
 0x334   : > { %v10646_v11 = vadd.f32 %v2766_v61, %v1986_v32  ;;  %3561 = vmatmul.bf16.gmra.mxu1 %v7587_v27  ;;  %v8862_v61 = vld [vmem:[#allocation2 + $0xe8] sm:$0xf0]  ;;  %v11931_v32 = vld [vmem:[#allocation21_spill] sm:$0xff]  ;;  %v2773_v12 = vadd.f32 %v2772_v10, %v2684_v5 }
 0x335   : > { %v1902_v27 = vadd.f32 %v11931_v32, %v1813_v25  ;;  %v7599_v41 = vor.u32 %v8862_v61, %v7598_v24  ;;  %v7542_v32 = vld [vmem:[#allocation2 + $0x78] sm:$0xf] }
 0x336   : > { %v11936_v61 = vld [vmem:[#allocation29_spill] sm:$0xff] }
 0x339   : > { %v1987_v43 = vpop.f32.mrf.mxu3  ;;  %v10668_v1 = vpop.f32.mrf.mxu1 }
 0x33a   : > { %v1988_v54 = vadd.f32 %v1987_v43, %v1899_v6  ;;  %v11932_v6 = vld [vmem:[#allocation27_spill] sm:$0xff] }
 0x33b   : > { %v1815_v43 = vadd.f32 %v10631_v53, %v11932_v6 }
 0x33c   : > { %v10657_v17 = vadd.f32 %v2768_v42, %v1988_v54  ;;  %v2777_v42 = vpop.f32.mrf.mxu2 }
 0x33d   : > { %v1904_v25 = vadd.f32 %v11935_v31, %v1815_v43  ;;  %v8865_v43 = vld [vmem:[#allocation2 + $0x100] sm:$0xf0]  ;;  %v7610_v31 = vld [vmem:[#allocation2 + $0xf8] sm:$0xf] }
 0x33e   : > { %3363 = vmatmul.bf16.gmra.mxu3 %v7531_v50 }
 0x341   : > { %v1990_v13 = vpop.f32.mrf.mxu3  ;;  %v10681_v23 = vpop.f32.mrf.mxu1 }
 0x342   : > { %v1991_v52 = vadd.f32 %v1990_v13, %v1902_v27  ;;  %v1818_v27 = vadd.f32 %v10631_v53, %v11936_v61  ;;  %v10675_v13 = vpop.f32.mrf.mxu0  ;;  %v7611_v61 = vor.u32 %v8865_v43, %v7610_v31 }
 0x344   : > { %v10666_v54 = vadd.f32 %v2771_v20, %v1991_v52  ;;  %3566 = vmatmul.bf16.gmra.mxu1 %v7599_v41  ;;  %v7543_v20 = vor.u32 %v8849_v57, %v7542_v32  ;;  %v2780_v52 = vpop.f32.mrf.mxu2  ;;  %v11938_v41 = vld [vmem:[#allocation38_spill] sm:$0xff]  ;;  %v1907_v10 = vadd.f32 %v11939_v62, %v1818_v27 }
 0x345   : > { %v2687_v6 = vadd.f32 %v10584_v48, %v11938_v41  ;;  %v2689_v48 = vadd.f32 %v10592_v36, %v10423_v33  ;;  %v8868_v33 = vld [vmem:[#allocation2 + $0x118] sm:$0xf0] }
 0x346   : > { %11933 = vst [vmem:[#allocation30_spill] sm:$0xff] %v10666_v54  ;;  %v11940_v54 = vld [vmem:[#allocation31_spill] sm:$0xff] }
 0x349   : > { %v1992_v50 = vpop.f32.mrf.mxu3  ;;  %v10693_v27 = vpop.f32.mrf.mxu1 }
 0x34a   : > { %v1993_v34 = vadd.f32 %v1992_v50, %v1904_v25  ;;  %v2776_v25 = vadd.f32 %v2775_v3, %v2687_v6  ;;  %v10688_v57 = vpop.f32.mrf.mxu0  ;;  %v8852_v3 = vld [vmem:[#allocation2 + $0x98] sm:$0xf0]  ;;  %v2778_v6 = vadd.f32 %v2777_v42, %v2689_v48 }
 0x34c   : > { %v10677_v24 = vadd.f32 %v2773_v12, %v1993_v34  ;;  %v1820_v12 = vadd.f32 %v10631_v53, %v11940_v54  ;;  %v2782_v32 = vpop.f32.mrf.mxu2 }
 0x34e   : > { %11937 = vst [vmem:[#allocation19_spill] sm:$0xff] %v10677_v24  ;;  %3368 = vmatmul.bf16.gmra.mxu3 %v7543_v20  ;;  %v11942_v20 = vld [vmem:[#allocation26_spill] sm:$0xff] }
 0x34f   : > { %v1909_v41 = vadd.f32 %v11942_v20, %v1820_v12 }
 0x351   : > { %v1995_v5 = vpop.f32.mrf.mxu3  ;;  %v10704_v24 = vpop.f32.mrf.mxu1 }
 0x352   : > { %v1996_v50 = vadd.f32 %v1995_v5, %v1907_v10  ;;  %v7554_v10 = vld [vmem:[#allocation2 + $0x90] sm:$0xf]  ;;  %v11943_v5 = vld [vmem:[#allocation34_spill] sm:$0xff]  ;;  %v10701_v36 = vpop.f32.mrf.mxu0 }
 0x353   : > { %v1823_v54 = vadd.f32 %v10631_v53, %v11943_v5 }
 0x354   : > { %v10686_v34 = vadd.f32 %v2776_v25, %v1996_v50  ;;  %3571 = vmatmul.bf16.gmra.mxu1 %v7611_v61  ;;  %v7555_v25 = vor.u32 %v8852_v3, %v7554_v10  ;;  %v2692_v50 = vadd.f32 %v10604_v14, %v10434_v37  ;;  %v11944_v61 = vld [vmem:[#allocation28_spill] sm:$0xff]  ;;  %v2785_v42 = vpop.f32.mrf.mxu2  ;;  %v2694_v37 = vadd.f32 %v10616_v40, %v10445_v7 }
 0x355   : > { %v1912_v12 = vadd.f32 %v11944_v61, %v1823_v54  ;;  %v11946_v14 = vld [vmem:[#allocation32_spill] sm:$0xff] }
 0x356   : > { %11941 = vst [vmem:[#allocation23_spill] sm:$0xff] %v10686_v34  ;;  %v7622_v34 = vld [vmem:[#allocation2 + $0x110] sm:$0xf]  ;;  %v2781_v48 = vadd.f32 %v2780_v52, %v2692_v50  ;;  %v8855_v54 = vld [vmem:[#allocation2 + $0xb0] sm:$0xf0]  ;;  %v2783_v52 = vadd.f32 %v2782_v32, %v2694_v37 }
 0x357   : > { %v8871_v7 = vld [vmem:[#allocation2 + $0x130] sm:$0xf0] }
 0x359   : > { %v1997_v62 = vpop.f32.mrf.mxu3 }
 0x35a   : > { %v1998_v43 = vadd.f32 %v1997_v62, %v1909_v41  ;;  %v7623_v62 = vor.u32 %v8868_v33, %v7622_v34  ;;  %v7566_v34 = vld [vmem:[#allocation2 + $0xa8] sm:$0xf] }
 0x35c   : > { %v10697_v31 = vadd.f32 %v2778_v6, %v1998_v43  ;;  %v11945_v6 = vld [vmem:[#allocation36_spill] sm:$0xff]  ;;  %v2787_v33 = vpop.f32.mrf.mxu2 }
 0x35d   : > { %v1825_v3 = vadd.f32 %v10631_v53, %v11945_v6  ;;  %v10717_v53 = vpop.f32.mrf.mxu1 }
 0x35e   : > { %3373 = vmatmul.bf16.gmra.mxu3 %v7555_v25  ;;  %v10713_v25 = vpop.f32.mrf.mxu0 }
 0x35f   : > { %v1914_v10 = vadd.f32 %v11946_v14, %v1825_v3  ;;  %v2699_v14 = vadd.f32 %v10642_v19, %v10466_v28  ;;  %v8984_v28 = vld [vmem:[#allocation11 + $0xb0] sm:$0xff]  ;;  %v7646_v19 = vld [vmem:[#allocation2 + $0x140] sm:$0xf] }
 0x361   : > { %v2000_v20 = vpop.f32.mrf.mxu3 }
 0x362   : > { %v2001_v41 = vadd.f32 %v2000_v20, %v1912_v12  ;;  %v7567_v12 = vor.u32 %v8855_v54, %v7566_v34  ;;  %v2697_v20 = vadd.f32 %v10625_v26, %v10454_v15  ;;  %v8858_v26 = vld [vmem:[#allocation2 + $0xc8] sm:$0xf0]  ;;  %v8985_v34 = vld [vmem:[#allocation11 + $0xb8] sm:$0xff] }
 0x363   : > { %v11947_v54 = vld [vmem:[#allocation39_spill] sm:$0xff]  ;;  %4857 = vmatpush.bf16.msrb.mxu0 %v8985_v34  ;;  %v11949_v34 = vld [vmem:[#allocation41_spill] sm:$0xff] }
 0x364   : > { %v10708_v43 = vadd.f32 %v2781_v48, %v2001_v41  ;;  %3576 = vmatmul.bf16.gmra.mxu1 %v7623_v62  ;;  %v7634_v48 = vld [vmem:[#allocation2 + $0x128] sm:$0xf]  ;;  %v2786_v41 = vadd.f32 %v2785_v42, %v2697_v20  ;;  %v2790_v37 = vpop.f32.mrf.mxu2  ;;  %v7578_v42 = vld [vmem:[#allocation2 + $0xc0] sm:$0xf]  ;;  %v2702_v20 = vadd.f32 %v10653_v22, %v10476_v21  ;;  %v2704_v21 = vadd.f32 %v10668_v1, %v10486_v58  ;;  %v8981_v1 = vld [vmem:[#allocation11 + $0x98] sm:$0xff] }
 0x365   : > { %v7635_v6 = vor.u32 %v8871_v7, %v7634_v48  ;;  %v8874_v7 = vld [vmem:[#allocation2 + $0x148] sm:$0xf0]  ;;  %v8982_v22 = vld [vmem:[#allocation11 + $0xa0] sm:$0xff] }
 0x366   : > { %v10722_v32 = vpop.f32.mrf.mxu0  ;;  %v7700_v58 = vld [vmem:[#allocation2 + $0x1bc] sm:$0xf0] }
 0x367   : > { %4858 = vmatpush.bf16.msrb.mxu0 %v8984_v28 }
 0x369   : > { %v2002_v5 = vpop.f32.mrf.mxu3 }
 0x36a   : > { %v2003_v50 = vadd.f32 %v2002_v5, %v1914_v10  ;;  %v10728_v10 = vpop.f32.mrf.mxu1  ;;  %v2788_v5 = vadd.f32 %v2787_v33, %v2699_v14  ;;  %v7647_v14 = vor.u32 %v8874_v7, %v7646_v19  ;;  %v7590_v19 = vld [vmem:[#allocation2 + $0xd8] sm:$0xf] }
 0x36c   : > { %v10715_v61 = vadd.f32 %v2783_v52, %v2003_v50 }
 0x36e   : > { %3378 = vmatmul.bf16.gmra.mxu3 %v7567_v12  ;;  %v10733_v12 = vpop.f32.mrf.mxu0 }
 0x371   : > { %v2005_v40 = vpop.f32.mrf.mxu3 }
 0x372   : > { %v2006_v62 = vadd.f32 %v2005_v40, %v10420_v45  ;;  %v7579_v45 = vor.u32 %v8858_v26, %v7578_v42  ;;  %v2792_v40 = vpop.f32.mrf.mxu2  ;;  %v10737_v48 = vpop.f32.mrf.mxu1  ;;  %v8969_v26 = vld [vmem:[#allocation11 + $0x38] sm:$0xff]  ;;  %v8861_v42 = vld [vmem:[#allocation2 + $0xe0] sm:$0xf0] }
 0x373   : > { %4679 = vmatpush.bf16.msra.mxu2 %v8969_v26  ;;  %v8877_v26 = vld [vmem:[#allocation2 + $0x160] sm:$0xf0] }
 0x374   : > { %v10724_v3 = vadd.f32 %v2786_v41, %v2006_v62  ;;  %3581 = vmatmul.bf16.gmra.mxu1 %v7635_v6  ;;  %v2791_v41 = vadd.f32 %v2790_v37, %v2702_v20  ;;  %v11948_v62 = vld [vmem:[#allocation40_spill] sm:$0xff] }
 0x379   : > { %v2007_v15 = vpop.f32.mrf.mxu3 }
 0x37a   : > { %v2008_v52 = vadd.f32 %v2007_v15, %v11947_v54  ;;  %v10744_v54 = vpop.f32.mrf.mxu0  ;;  %v2795_v37 = vpop.f32.mrf.mxu2 }
 0x37b   : > { %v10747_v28 = vpop.f32.mrf.mxu1 }
 0x37c   : > { %v10731_v50 = vadd.f32 %v2788_v5, %v2008_v52  ;;  %v8983_v5 = vld [vmem:[#allocation11 + $0xa8] sm:$0xff] }
 0x37d   : > { %4859 = vmatpush.bf16.msrb.mxu0 %v8983_v5 }
 0x37e   : > { %3383 = vmatmul.bf16.gmra.mxu3 %v7579_v45  ;;  %v2793_v45 = vadd.f32 %v2792_v40, %v2704_v21  ;;  %v7658_v40 = vld [vmem:[#allocation2 + $0x158] sm:$0xf] }
 0x381   : > { %v2010_v33 = vpop.f32.mrf.mxu3  ;;  %4860 = vmatpush.bf16.msrb.mxu0 %v8982_v22 }
 0x382   : > { %v2011_v6 = vadd.f32 %v2010_v33, %v11948_v62  ;;  %v7591_v33 = vor.u32 %v8861_v42, %v7590_v19  ;;  %v10753_v21 = vpop.f32.mrf.mxu0  ;;  %v7659_v42 = vor.u32 %v8877_v26, %v7658_v40  ;;  %v8864_v19 = vld [vmem:[#allocation2 + $0xf8] sm:$0xf0]  ;;  %v8978_v40 = vld [vmem:[#allocation11 + $0x80] sm:$0xff] }
 0x383   : > { %v8880_v26 = vld [vmem:[#allocation2 + $0x178] sm:$0xf0] }
 0x384   : > { %v10740_v15 = vadd.f32 %v2791_v41, %v2011_v6  ;;  %3586 = vmatmul.bf16.gmra.mxu1 %v7647_v14  ;;  %v8887_v41 = vld [vmem:[#allocation2 + $0x1b4] sm:$0xf]  ;;  %v2707_v6 = vadd.f32 %v10681_v23, %v10499_v9  ;;  %v2709_v9 = vadd.f32 %v10693_v27, %v10509_v60  ;;  %v7670_v27 = vld [vmem:[#allocation2 + $0x170] sm:$0xf] }
 0x385   : > { %v7703_v62 = vor.u32 %v8887_v41, %v7700_v58  ;;  %4861 = vmatpush.bf16.msrb.mxu0 %v8981_v1  ;;  %v8980_v14 = vld [vmem:[#allocation11 + $0x90] sm:$0xff] }
 0x386   : > { %v2796_v22 = vadd.f32 %v2795_v37, %v2707_v6  ;;  %v7602_v58 = vld [vmem:[#allocation2 + $0xf0] sm:$0xf] }
 0x387   : > { %3522 = vmatmul.bf16.gmra.mxu0 %v7703_v62  ;;  %v7603_v1 = vor.u32 %v8864_v19, %v7602_v58  ;;  %v8979_v62 = vld [vmem:[#allocation11 + $0x88] sm:$0xff] }
 0x388   : > { %v7814_v58 = vld [vmem:[#allocation2 + $0x8] sm:$0xf] }
 0x389   : > { %v2012_v52 = vpop.f32.mrf.mxu3  ;;  %4862 = vmatpush.bf16.msrb.mxu0 %v8980_v14  ;;  %v2712_v14 = vadd.f32 %v10704_v24, %v10522_v44 }
 0x38a   : > { %v2013_v20 = vadd.f32 %v2012_v52, %v11949_v34  ;;  %v10763_v37 = vpop.f32.mrf.mxu0 }
 0x38c   : > { %v10749_v7 = vadd.f32 %v2793_v45, %v2013_v20  ;;  %v2797_v45 = vpop.f32.mrf.mxu2  ;;  %v10758_v20 = vpop.f32.mrf.mxu1 }
 0x38d   : > { %4863 = vmatpush.bf16.msrb.mxu0 %v8979_v62 }
 0x38e   : > { %3388 = vmatmul.bf16.gmra.mxu3 %v7591_v33  ;;  %v2798_v33 = vadd.f32 %v2797_v45, %v2709_v9 }
 0x391   : > { %v2015_v5 = vpop.f32.mrf.mxu3  ;;  %4864 = vmatpush.bf16.msrb.mxu0 %v8978_v40  ;;  %v7614_v40 = vld [vmem:[#allocation2 + $0x108] sm:$0xf] }
 0x392   : > { %v2016_v52 = vadd.f32 %v2015_v5, %v10456_v55  ;;  %v10774_v9 = vpop.f32.mrf.mxu0 }
 0x394   : > { %v10756_v34 = vadd.f32 %v2796_v22, %v2016_v52  ;;  %3591 = vmatmul.bf16.gmra.mxu1 %v7659_v42  ;;  %v2800_v6 = vpop.f32.mrf.mxu2  ;;  %v10769_v60 = vpop.f32.mrf.mxu1  ;;  %v11952_v22 = vld [vmem:[#allocation42_spill] sm:$0xff]  ;;  %v7671_v42 = vor.u32 %v8880_v26, %v7670_v27 }
 0x396   : > { %11950 = vst [vmem:[#allocation33_spill] sm:$0xff] %v10756_v34 }
 0x399   : > { %v2017_v23 = vpop.f32.mrf.mxu3 }
 0x39a   : > { %v2018_v41 = vadd.f32 %v2017_v23, %v10463_v18  ;;  %v2801_v18 = vadd.f32 %v2800_v6, %v2712_v14  ;;  %v11954_v23 = vld [vmem:[#allocation49_spill] sm:$0xff]  ;;  %v11955_v6 = vld [vmem:[#allocation43_spill] sm:$0xff] }
 0x39b   : > { %v2714_v44 = vadd.f32 %v10717_v53, %v11954_v23  ;;  %v10783_v53 = vpop.f32.mrf.mxu0 }
 0x39c   : > { %v10765_v55 = vadd.f32 %v2798_v33, %v2018_v41  ;;  %v2802_v24 = vpop.f32.mrf.mxu2  ;;  %v10778_v19 = vpop.f32.mrf.mxu1  ;;  %v8867_v41 = vld [vmem:[#allocation2 + $0x110] sm:$0xf0] }
 0x39d   : > { %v2803_v62 = vadd.f32 %v2802_v24, %v2714_v44  ;;  %v11957_v24 = vld [vmem:[#allocation44_spill] sm:$0xff] }
 0x39e   : > { %11951 = vst [vmem:[#allocation20_spill] sm:$0xff] %v10765_v55  ;;  %3393 = vmatmul.bf16.gmra.mxu3 %v7603_v1  ;;  %v8916_v1 = vld [vmem:[#allocation2 + $0x10] sm:$0xf0] }
 0x39f   : > { %v7815_v27 = vor.u32 %v8916_v1, %v7814_v58  ;;  %v8870_v1 = vld [vmem:[#allocation2 + $0x128] sm:$0xf0] }
 0x3a1   : > { %v2020_v5 = vpop.f32.mrf.mxu3  ;;  %4865 = vmatmul.bf16.vlgmr.msrb.gmra.mxu0 %v7815_v27 }
 0x3a2   : > { %v2021_v52 = vadd.f32 %v2020_v5, %v11952_v22  ;;  %v7615_v5 = vor.u32 %v8867_v41, %v7614_v40  ;;  %v8883_v22 = vld [vmem:[#allocation2 + $0x190] sm:$0xf0]  ;;  %v7626_v40 = vld [vmem:[#allocation2 + $0x120] sm:$0xf] }
 0x3a4   : > { %v10772_v45 = vadd.f32 %v2801_v18, %v2021_v52  ;;  %3596 = vmatmul.bf16.gmra.mxu1 %v7671_v42  ;;  %v7682_v18 = vld [vmem:[#allocation2 + $0x188] sm:$0xf]  ;;  %v8968_v42 = vld [vmem:[#allocation11 + $0x30] sm:$0xff]  ;;  %v10786_v55 = vpop.f32.mrf.mxu1 }
 0x3a5   : > { %4680 = vmatpush.bf16.msra.mxu2 %v8968_v42  ;;  %v8886_v42 = vld [vmem:[#allocation2 + $0x1a8] sm:$0xf0] }
 0x3a6   : > { %11953 = vst [vmem:[#allocation25_spill] sm:$0xff] %v10772_v45  ;;  %v7683_v45 = vor.u32 %v8883_v22, %v7682_v18  ;;  %v3682_v22 = vld [vmem:[#allocation3 + $0x8] sm:$0xff] }
 0x3a7   : > { %vm3843_vm2 = vcmp.ge.s32.totalorder %v3682_v22, 2  ;;  %vm4036_vm13 = vcmp.lt.s32.totalorder %v3682_v22, 14 }
 0x3a9   : > { %v2022_v33 = vpop.f32.mrf.mxu3 }
 0x3aa   : > { %v2023_v14 = vadd.f32 %v2022_v33, %v11955_v6  ;;  %v8919_v6 = vld [vmem:[#allocation2 + $0x28] sm:$0xf0] }
 0x3ac   : > { %v10781_v26 = vadd.f32 %v2803_v62, %v2023_v14  ;;  %v7826_v62 = vld [vmem:[#allocation2 + $0x20] sm:$0xf]  ;;  %v10792_v14 = vpop.f32.mrf.mxu0  ;;  %v10798_v18 = vpop.f32.mrf.mxu1 }
 0x3ae   : > { %11956 = vst [vmem:[#allocation35_spill] sm:$0xff] %v10781_v26  ;;  %3398 = vmatmul.bf16.gmra.mxu3 %v7615_v5  ;;  %v7827_v5 = vor.u32 %v8919_v6, %v7826_v62  ;;  %v11960_v26 = vld [vmem:[#allocation18_spill] sm:$0xff] }
 0x3af   : > { %vm3809_vm0 = vcmp.lt.s32.totalorder %v11960_v26, 2  ;;  %vm4002_vm10 = vcmp.lt.s32.totalorder %v11960_v26, 6 }
 0x3b1   : > { %v3359_v52 = vpop.f32.mrf.mxu3  ;;  %4870 = vmatmul.bf16.gmra.mxu0 %v7827_v5 }
 0x3b2   : > { %v3449_v23 = vadd.f32 %v10544_v0, %v3359_v52  ;;  %v7694_v52 = vld [vmem:[#allocation2 + $0x1a0] sm:$0xf] }
 0x3b4   : > { %v3538_v44 = vadd.f32 %v10728_v10, %v3449_v23  ;;  %3601 = vmatmul.bf16.gmra.mxu1 %v7683_v45  ;;  %v7627_v45 = vor.u32 %v8870_v1, %v7626_v40  ;;  %v11959_v23 = vld [vmem:[#allocation45_spill] sm:$0xff]  ;;  %v10806_v40 = vpop.f32.mrf.mxu0 }
 0x3b6   : > { %v3617_v33 = vadd.f32 %v3538_v44, %v11957_v24  ;;  %v3681_v24 = vld [vmem:[#allocation3] sm:$0xff] }
 0x3b7   : > { %vm4035_vm11 = vcmp.lt.s32.totalorder %v3681_v24, 14 }
 0x3b8   : > { %v10790_v41 = vmax.f32 %v3617_v33, 0.0 }
 0x3b9   : > { %v3361_v58 = vpop.f32.mrf.mxu3 }
 0x3ba   : > { %11958 = vst [vmem:[#allocation21_spill] sm:$0xff] %v10790_v41  ;;  %v3713_v0 = vpack.c.bf16 %v10790_v41, %v10790_v41  ;;  %v3451_v27 = vadd.f32 %v10555_v29, %v3361_v58  ;;  %v7695_v29 = vor.u32 %v8886_v42, %v7694_v52  ;;  %v11871_v58 = vrot.slane %v10790_v41, 6 }
 0x3bc   : > { %3745 = vst [vmem:[#allocation2 + $0x34] sm:$0xf] %v3713_v0  ;;  %v3540_v10 = vadd.f32 %v10737_v48, %v3451_v27  ;;  %v11872_v48 = vrot.slane %v10790_v41, 2 }
 0x3be   : > { %v3618_v44 = vadd.f32 %v3540_v10, %v11959_v23  ;;  %3403 = vmatmul.bf16.gmra.mxu3 %v7627_v45 }
 0x3c0   : > { %v3650_v33 = vmax.f32 %v3618_v44, 0.0  ;;  %v11961_v44 = vld [vmem:[#allocation46_spill] sm:$0xff] }
 0x3c1   : > { %v3364_v1 = vpop.f32.mrf.mxu3 }
 0x3c2   : > { %v3714_v62 = vpack.c.bf16 %v3650_v33, %v3650_v33  ;;  %v3778_v6 = vrot.slane %v3650_v33, 6  ;;  %v3971_v0 = vrot.slane %v3650_v33, 2  ;;  %v3454_v27 = vadd.f32 %v10572_v56, %v3364_v1  ;;  %v3683_v33 = vld [vmem:[#allocation3 + $0x10] sm:$0xff]  ;;  %v10819_v1 = vpop.f32.mrf.mxu1 }
 0x3c3   : > { %vm3844_vm12 = vcmp.ge.s32.totalorder %v3683_v33, 2  ;;  %vm4037_vm15 = vcmp.lt.s32.totalorder %v3683_v33, 14 }
 0x3c4   : > { %3746 = vst [vmem:[#allocation2 + $0x40] sm:$0xf] %v3714_v62  ;;  %v3840_v5 = vsel %vm3809_vm0, %v11871_v58, %v3778_v6  ;;  %v4033_v10 = vsel %vm4002_vm10, %v11872_v48, %v3971_v0  ;;  %v3543_v45 = vadd.f32 %v10747_v28, %v3454_v27  ;;  %3606 = vmatmul.bf16.gmra.mxu1 %v7695_v29  ;;  %v8873_v48 = vld [vmem:[#allocation2 + $0x140] sm:$0xf0] }
 0x3c5   : > { %v3875_v52 = vsel %vm3843_vm2, %v3840_v5, 0.0  ;;  %v4067_v42 = vsel %vm4035_vm11, %v4033_v10, 0.0  ;;  %v7638_v5 = vld [vmem:[#allocation2 + $0x138] sm:$0xf] }
 0x3c6   : > { %v3907_v56 = vpack.c.bf16 %v3875_v52, %v3875_v52  ;;  %v4099_v23 = vpack.c.bf16 %v4067_v42, %v4067_v42  ;;  %v3619_v24 = vadd.f32 %v3543_v45, %v11961_v44  ;;  %v7639_v42 = vor.u32 %v8873_v48, %v7638_v5 }
 0x3c8   : > { %3939 = vst [vmem:[#allocation2 + $0x3c] sm:$0xf] %v3907_v56  ;;  %v3651_v62 = vmax.f32 %v3619_v24, 0.0 }
 0x3c9   : > { %4131 = vst [vmem:[#allocation2 + $0x38] sm:$0xf] %v4099_v23  ;;  %v3366_v58 = vpop.f32.mrf.mxu3  ;;  %v10827_v23 = vpop.f32.mrf.mxu0 }
 0x3ca   : > { %v3715_v41 = vpack.c.bf16 %v3651_v62, %v3651_v62  ;;  %v3779_v28 = vrot.slane %v3651_v62, 6  ;;  %v3972_v29 = vrot.slane %v3651_v62, 2  ;;  %v3456_v27 = vadd.f32 %v10582_v4, %v3366_v58  ;;  %v11962_v62 = vld [vmem:[#allocation47_spill] sm:$0xff]  ;;  %v3684_v4 = vld [vmem:[#allocation3 + $0x18] sm:$0xff]  ;;  %v10830_v58 = vpop.f32.mrf.mxu1 }
 0x3cb   : > { %vm3845_vm14 = vcmp.ge.s32.totalorder %v3684_v4, 2  ;;  %vm4038_vm3 = vcmp.lt.s32.totalorder %v3684_v4, 14 }
 0x3cc   : > { %3747 = vst [vmem:[#allocation2 + $0x4c] sm:$0xf] %v3715_v41  ;;  %v3839_v10 = vsel %vm3809_vm0, %v3778_v6, %v3779_v28  ;;  %v4032_v45 = vsel %vm4002_vm10, %v3971_v0, %v3972_v29  ;;  %v3545_v52 = vadd.f32 %v10758_v20, %v3456_v27  ;;  %v8967_v20 = vld [vmem:[#allocation11 + $0x28] sm:$0xff] }
 0x3cd   : > { %v3876_v56 = vsel %vm3844_vm12, %v3839_v10, 0.0  ;;  %v4068_v22 = vsel %vm4036_vm13, %v4032_v45, 0.0  ;;  %4681 = vmatpush.bf16.msra.mxu2 %v8967_v20  ;;  %v7650_v20 = vld [vmem:[#allocation2 + $0x150] sm:$0xf] }
 0x3ce   : > { %v3908_v44 = vpack.c.bf16 %v3876_v56, %v3876_v56  ;;  %v4100_v24 = vpack.c.bf16 %v4068_v22, %v4068_v22  ;;  %v3620_v34 = vadd.f32 %v3545_v52, %v11962_v62  ;;  %3408 = vmatmul.bf16.gmra.mxu3 %v7639_v42  ;;  %v11963_v22 = vld [vmem:[#allocation48_spill] sm:$0xff] }
 0x3d0   : > { %3940 = vst [vmem:[#allocation2 + $0x48] sm:$0xf] %v3908_v44  ;;  %v3652_v41 = vmax.f32 %v3620_v34, 0.0  ;;  %v7838_v62 = vld [vmem:[#allocation2 + $0x38] sm:$0xf] }
 0x3d1   : > { %4132 = vst [vmem:[#allocation2 + $0x44] sm:$0xf] %v4100_v24  ;;  %v3369_v6 = vpop.f32.mrf.mxu3  ;;  %v3685_v24 = vld [vmem:[#allocation3 + $0x20] sm:$0xff] }
 0x3d2   : > { %v3716_v48 = vpack.c.bf16 %v3652_v41, %v3652_v41  ;;  %v3780_v0 = vrot.slane %v3652_v41, 6  ;;  %v3973_v27 = vrot.slane %v3652_v41, 2  ;;  %v3459_v5 = vadd.f32 %v10596_v49, %v3369_v6  ;;  %v10839_v41 = vpop.f32.mrf.mxu0 }
 0x3d3   : > { %vm3846_vm1 = vcmp.ge.s32.totalorder %v3685_v24, 2  ;;  %vm4039_vm5 = vcmp.lt.s32.totalorder %v3685_v24, 14 }
 0x3d4   : > { %3748 = vst [vmem:[#allocation2 + $0x58] sm:$0xf] %v3716_v48  ;;  %v3838_v10 = vsel %vm3809_vm0, %v3779_v28, %v3780_v0  ;;  %v4031_v34 = vsel %vm4002_vm10, %v3972_v29, %v3973_v27  ;;  %v3548_v45 = vadd.f32 %v10769_v60, %v3459_v5 }
 0x3d5   : > { %v3877_v52 = vsel %vm3845_vm14, %v3838_v10, 0.0  ;;  %v4069_v42 = vsel %vm4037_vm15, %v4031_v34, 0.0  ;;  %v10842_v34 = vpop.f32.mrf.mxu1 }
 0x3d6   : > { %v3909_v33 = vpack.c.bf16 %v3877_v52, %v3877_v52  ;;  %v4101_v56 = vpack.c.bf16 %v4069_v42, %v4069_v42  ;;  %v3621_v44 = vadd.f32 %v3548_v45, %v11963_v22  ;;  %v8876_v45 = vld [vmem:[#allocation2 + $0x158] sm:$0xf0] }
 0x3d8   : > { %3941 = vst [vmem:[#allocation2 + $0x54] sm:$0xf] %v3909_v33  ;;  %v3653_v49 = vmax.f32 %v3621_v44, 0.0  ;;  %v8922_v6 = vld [vmem:[#allocation2 + $0x40] sm:$0xf0] }
 0x3d9   : > { %4133 = vst [vmem:[#allocation2 + $0x50] sm:$0xf] %v4101_v56  ;;  %v3371_v28 = vpop.f32.mrf.mxu3  ;;  %v7839_v29 = vor.u32 %v8922_v6, %v7838_v62  ;;  %v7651_v56 = vor.u32 %v8876_v45, %v7650_v20 }
 0x3da   : > { %v3717_v60 = vpack.c.bf16 %v3653_v49, %v3653_v49  ;;  %v3781_v48 = vrot.slane %v3653_v49, 6  ;;  %v3974_v5 = vrot.slane %v3653_v49, 2  ;;  %v3461_v10 = vadd.f32 %v10608_v59, %v3371_v28  ;;  %v11964_v49 = vld [vmem:[#allocation50_spill] sm:$0xff]  ;;  %v3686_v28 = vld [vmem:[#allocation3 + $0x28] sm:$0xff] }
 0x3db   : > { %4875 = vmatmul.bf16.gmra.mxu0 %v7839_v29  ;;  %vm3847_vm4 = vcmp.ge.s32.totalorder %v3686_v28, 2  ;;  %vm4040_vm7 = vcmp.lt.s32.totalorder %v3686_v28, 14 }
 0x3dc   : > { %3749 = vst [vmem:[#allocation2 + $0x64] sm:$0xf] %v3717_v60  ;;  %v3837_v52 = vsel %vm3809_vm0, %v3780_v0, %v3781_v48  ;;  %v4030_v42 = vsel %vm4002_vm10, %v3973_v27, %v3974_v5  ;;  %v3550_v33 = vadd.f32 %v10778_v19, %v3461_v10  ;;  %v10852_v27 = vpop.f32.mrf.mxu0 }
 0x3dd   : > { %v3878_v22 = vsel %vm3846_vm1, %v3837_v52, 0.0  ;;  %v4070_v44 = vsel %vm4038_vm3, %v4030_v42, 0.0  ;;  %v10860_v42 = vpop.f32.mrf.mxu1 }
 0x3de   : > { %v3910_v62 = vpack.c.bf16 %v3878_v22, %v3878_v22  ;;  %v4102_v59 = vpack.c.bf16 %v4070_v44, %v4070_v44  ;;  %v3622_v6 = vadd.f32 %v3550_v33, %v11964_v49  ;;  %3413 = vmatmul.bf16.gmra.mxu3 %v7651_v56 }
 0x3e0   : > { %3942 = vst [vmem:[#allocation2 + $0x60] sm:$0xf] %v3910_v62  ;;  %v3654_v29 = vmax.f32 %v3622_v6, 0.0  ;;  %v3687_v62 = vld [vmem:[#allocation3 + $0x30] sm:$0xff] }
 0x3e1   : > { %4134 = vst [vmem:[#allocation2 + $0x5c] sm:$0xf] %v4102_v59  ;;  %v3374_v0 = vpop.f32.mrf.mxu3  ;;  %v7850_v59 = vld [vmem:[#allocation2 + $0x50] sm:$0xf]  ;;  %vm3848_vm6 = vcmp.ge.s32.totalorder %v3687_v62, 2  ;;  %vm4041_vm9 = vcmp.lt.s32.totalorder %v3687_v62, 14 }
 0x3e2   : > { %v3718_v19 = vpack.c.bf16 %v3654_v29, %v3654_v29  ;;  %v3782_v20 = vrot.slane %v3654_v29, 6  ;;  %v3975_v60 = vrot.slane %v3654_v29, 2  ;;  %v3464_v4 = vadd.f32 %v10639_v39, %v3374_v0  ;;  %v7662_v39 = vld [vmem:[#allocation2 + $0x168] sm:$0xf] }
 0x3e4   : > { %3750 = vst [vmem:[#allocation2 + $0x70] sm:$0xf] %v3718_v19  ;;  %v3836_v10 = vsel %vm3809_vm0, %v3781_v48, %v3782_v20  ;;  %v4029_v45 = vsel %vm4002_vm10, %v3974_v5, %v3975_v60  ;;  %v3553_v52 = vadd.f32 %v10786_v55, %v3464_v4  ;;  %v8879_v55 = vld [vmem:[#allocation2 + $0x170] sm:$0xf0] }
 0x3e5   : > { %v3879_v24 = vsel %vm3847_vm4, %v3836_v10, 0.0  ;;  %v4071_v33 = vsel %vm4039_vm5, %v4029_v45, 0.0  ;;  %v10864_v10 = vpop.f32.mrf.mxu0 }
 0x3e6   : > { %v3911_v56 = vpack.c.bf16 %v3879_v24, %v3879_v24  ;;  %v4103_v22 = vpack.c.bf16 %v4071_v33, %v4071_v33  ;;  %v3623_v44 = vadd.f32 %v3553_v52, %v10548_v8  ;;  %v7663_v24 = vor.u32 %v8879_v55, %v7662_v39 }
 0x3e8   : > { %3943 = vst [vmem:[#allocation2 + $0x6c] sm:$0xf] %v3911_v56  ;;  %v3655_v49 = vmax.f32 %v3623_v44, 0.0  ;;  %v8925_v6 = vld [vmem:[#allocation2 + $0x58] sm:$0xf0] }
 0x3e9   : > { %4135 = vst [vmem:[#allocation2 + $0x68] sm:$0xf] %v4103_v22  ;;  %v3376_v48 = vpop.f32.mrf.mxu3  ;;  %v7851_v5 = vor.u32 %v8925_v6, %v7850_v59  ;;  %v10874_v6 = vpop.f32.mrf.mxu1 }
 0x3ea   : > { %v3719_v29 = vpack.c.bf16 %v3655_v49, %v3655_v49  ;;  %v3783_v0 = vrot.slane %v3655_v49, 6  ;;  %v3976_v19 = vrot.slane %v3655_v49, 2  ;;  %v3466_v4 = vadd.f32 %v10650_v51, %v3376_v48  ;;  %v11965_v51 = vld [vmem:[#allocation51_spill] sm:$0xff]  ;;  %v3688_v49 = vld [vmem:[#allocation3 + $0x38] sm:$0xff] }
 0x3eb   : > { %4880 = vmatmul.bf16.gmra.mxu0 %v7851_v5  ;;  %vm3849_vm8 = vcmp.ge.s32.totalorder %v3688_v49, 2  ;;  %vm4042_vm11 = vcmp.lt.s32.totalorder %v3688_v49, 14 }
 0x3ec   : > { %3751 = vst [vmem:[#allocation2 + $0x7c] sm:$0xf] %v3719_v29  ;;  %v3835_v8 = vsel %vm3809_vm0, %v3782_v20, %v3783_v0  ;;  %v4028_v45 = vsel %vm4002_vm10, %v3975_v60, %v3976_v19  ;;  %v3555_v52 = vadd.f32 %v10798_v18, %v3466_v4  ;;  %v8966_v18 = vld [vmem:[#allocation11 + $0x20] sm:$0xff] }
 0x3ed   : > { %v3880_v33 = vsel %vm3848_vm6, %v3835_v8, 0.0  ;;  %v4072_v56 = vsel %vm4040_vm7, %v4028_v45, 0.0  ;;  %4682 = vmatpush.bf16.msra.mxu2 %v8966_v18  ;;  %v10882_v62 = vpop.f32.mrf.mxu0 }
 0x3ee   : > { %v3912_v22 = vpack.c.bf16 %v3880_v33, %v3880_v33  ;;  %v4104_v44 = vpack.c.bf16 %v4072_v56, %v4072_v56  ;;  %v3624_v59 = vadd.f32 %v3555_v52, %v11965_v51  ;;  %3418 = vmatmul.bf16.gmra.mxu3 %v7663_v24  ;;  %v3689_v56 = vld [vmem:[#allocation3 + $0x40] sm:$0xff] }
 0x3ef   : > { %vm3850_vm2 = vcmp.ge.s32.totalorder %v3689_v56, 2  ;;  %vm4043_vm13 = vcmp.lt.s32.totalorder %v3689_v56, 14 }
 0x3f0   : > { %3944 = vst [vmem:[#allocation2 + $0x78] sm:$0xf] %v3912_v22  ;;  %v3656_v20 = vmax.f32 %v3624_v59, 0.0  ;;  %v7674_v22 = vld [vmem:[#allocation2 + $0x180] sm:$0xf] }
 0x3f1   : > { %4136 = vst [vmem:[#allocation2 + $0x74] sm:$0xf] %v4104_v44  ;;  %v3379_v60 = vpop.f32.mrf.mxu3  ;;  %v8882_v44 = vld [vmem:[#allocation2 + $0x188] sm:$0xf0]  ;;  %v10885_v59 = vpop.f32.mrf.mxu1 }
 0x3f2   : > { %v3720_v39 = vpack.c.bf16 %v3656_v20, %v3656_v20  ;;  %v3784_v48 = vrot.slane %v3656_v20, 6  ;;  %v3977_v5 = vrot.slane %v3656_v20, 2  ;;  %v3469_v28 = vadd.f32 %v10662_v63, %v3379_v60  ;;  %v7862_v63 = vld [vmem:[#allocation2 + $0x68] sm:$0xf]  ;;  %v8977_v20 = vld [vmem:[#allocation11 + $0x78] sm:$0xff] }
 0x3f3   : > { %4768 = vmatpush.bf16.msrb.mxu3 %v8977_v20 }
 0x3f4   : > { %3752 = vst [vmem:[#allocation2 + $0x88] sm:$0xf] %v3720_v39  ;;  %v3834_v55 = vsel %vm3809_vm0, %v3783_v0, %v3784_v48  ;;  %v4027_v29 = vsel %vm4002_vm10, %v3976_v19, %v3977_v5  ;;  %v3558_v4 = vadd.f32 %v10819_v1, %v3469_v28 }
 0x3f5   : > { %v3881_v8 = vsel %vm3849_vm8, %v3834_v55, 0.0  ;;  %v4073_v45 = vsel %vm4041_vm9, %v4027_v29, 0.0 }
 0x3f6   : > { %v3913_v52 = vpack.c.bf16 %v3881_v8, %v3881_v8  ;;  %v4105_v24 = vpack.c.bf16 %v4073_v45, %v4073_v45  ;;  %v3625_v33 = vadd.f32 %v3558_v4, %v10568_v38  ;;  %v7675_v4 = vor.u32 %v8882_v44, %v7674_v22 }
 0x3f8   : > { %3945 = vst [vmem:[#allocation2 + $0x84] sm:$0xf] %v3913_v52  ;;  %v3657_v51 = vmax.f32 %v3625_v33, 0.0  ;;  %v8928_v0 = vld [vmem:[#allocation2 + $0x70] sm:$0xf0] }
 0x3f9   : > { %4137 = vst [vmem:[#allocation2 + $0x80] sm:$0xf] %v4105_v24  ;;  %v3381_v1 = vpop.f32.mrf.mxu3  ;;  %v7863_v19 = vor.u32 %v8928_v0, %v7862_v63  ;;  %v11966_v33 = vld [vmem:[#allocation52_spill] sm:$0xff]  ;;  %v3690_v63 = vld [vmem:[#allocation3 + $0x48] sm:$0xff] }
 0x3fa   : > { %v3721_v60 = vpack.c.bf16 %v3657_v51, %v3657_v51  ;;  %v3785_v18 = vrot.slane %v3657_v51, 6  ;;  %v3978_v39 = vrot.slane %v3657_v51, 2  ;;  %v3471_v38 = vadd.f32 %v10675_v13, %v3381_v1  ;;  %v10896_v51 = vpop.f32.mrf.mxu0  ;;  %v10899_v1 = vpop.f32.mrf.mxu1 }
 0x3fb   : > { %4885 = vmatmul.bf16.gmra.mxu0 %v7863_v19  ;;  %vm3851_vm12 = vcmp.ge.s32.totalorder %v3690_v63, 2  ;;  %v8975_v19 = vld [vmem:[#allocation11 + $0x68] sm:$0xff]  ;;  %vm4044_vm15 = vcmp.lt.s32.totalorder %v3690_v63, 14 }
 0x3fc   : > { %3753 = vst [vmem:[#allocation2 + $0x94] sm:$0xf] %v3721_v60  ;;  %v3833_v28 = vsel %vm3809_vm0, %v3784_v48, %v3785_v18  ;;  %v4026_v55 = vsel %vm4002_vm10, %v3977_v5, %v3978_v39  ;;  %v3560_v29 = vadd.f32 %v10830_v58, %v3471_v38  ;;  %v8976_v58 = vld [vmem:[#allocation11 + $0x70] sm:$0xff] }
 0x3fd   : > { %v3882_v8 = vsel %vm3850_vm2, %v3833_v28, 0.0  ;;  %v4074_v45 = vsel %vm4042_vm11, %v4026_v55, 0.0  ;;  %4769 = vmatpush.bf16.msrb.mxu3 %v8976_v58 }
 0x3fe   : > { %v3914_v52 = vpack.c.bf16 %v3882_v8, %v3882_v8  ;;  %v4106_v24 = vpack.c.bf16 %v4074_v45, %v4074_v45  ;;  %v3626_v13 = vadd.f32 %v3560_v29, %v11966_v33  ;;  %3423 = vmatmul.bf16.gmra.mxu3 %v7675_v4  ;;  %v7686_v45 = vld [vmem:[#allocation2 + $0x198] sm:$0xf] }
 0x400   : > { %3946 = vst [vmem:[#allocation2 + $0x90] sm:$0xf] %v3914_v52  ;;  %v3658_v48 = vmax.f32 %v3626_v13, 0.0  ;;  %v7874_v8 = vld [vmem:[#allocation2 + $0x80] sm:$0xf] }
 0x401   : > { %4138 = vst [vmem:[#allocation2 + $0x8c] sm:$0xf] %v4106_v24  ;;  %v3384_v5 = vpop.f32.mrf.mxu3  ;;  %v8885_v52 = vld [vmem:[#allocation2 + $0x1a0] sm:$0xf0]  ;;  %4770 = vmatpush.bf16.msrb.mxu3 %v8975_v19 }
 0x402   : > { %v3722_v22 = vpack.c.bf16 %v3658_v48, %v3658_v48  ;;  %v3786_v44 = vrot.slane %v3658_v48, 6  ;;  %v3979_v0 = vrot.slane %v3658_v48, 2  ;;  %v3474_v49 = vadd.f32 %v10688_v57, %v3384_v5  ;;  %v3691_v57 = vld [vmem:[#allocation3 + $0x50] sm:$0xff]  ;;  %v10907_v13 = vpop.f32.mrf.mxu0  ;;  %v8889_v19 = vld [vmem:[#allocation2 + $0x1c0] sm:$0xf0] }
 0x403   : > { %vm3852_vm14 = vcmp.ge.s32.totalorder %v3691_v57, 2  ;;  %vm4045_vm3 = vcmp.lt.s32.totalorder %v3691_v57, 14 }
 0x404   : > { %3754 = vst [vmem:[#allocation2 + $0xa0] sm:$0xf] %v3722_v22  ;;  %v3832_v20 = vsel %vm3809_vm0, %v3785_v18, %v3786_v44  ;;  %v4025_v60 = vsel %vm4002_vm10, %v3978_v39, %v3979_v0  ;;  %v3563_v56 = vadd.f32 %v10842_v34, %v3474_v49  ;;  %v8974_v34 = vld [vmem:[#allocation11 + $0x60] sm:$0xff]  ;;  %v7706_v22 = vld [vmem:[#allocation2 + $0x1b8] sm:$0xf]  ;;  %v7687_v49 = vor.u32 %v8885_v52, %v7686_v45 }
 0x405   : > { %v3883_v38 = vsel %vm3851_vm12, %v3832_v20, 0.0  ;;  %v4075_v28 = vsel %vm4043_vm13, %v4025_v60, 0.0  ;;  %4771 = vmatpush.bf16.msrb.mxu3 %v8974_v34  ;;  %v8973_v20 = vld [vmem:[#allocation11 + $0x58] sm:$0xff] }
 0x406   : > { %v3915_v55 = vpack.c.bf16 %v3883_v38, %v3883_v38  ;;  %v4107_v29 = vpack.c.bf16 %v4075_v28, %v4075_v28  ;;  %v3627_v4 = vadd.f32 %v3563_v56, %v10588_v35  ;;  %v7707_v28 = vor.u32 %v8889_v19, %v7706_v22  ;;  %v3692_v52 = vld [vmem:[#allocation3 + $0x58] sm:$0xff] }
 0x407   : > { %vm3853_vm1 = vcmp.ge.s32.totalorder %v3692_v52, 2  ;;  %vm4046_vm5 = vcmp.lt.s32.totalorder %v3692_v52, 14 }
 0x408   : > { %3947 = vst [vmem:[#allocation2 + $0x9c] sm:$0xf] %v3915_v55  ;;  %v3659_v24 = vmax.f32 %v3627_v4, 0.0  ;;  %v8931_v33 = vld [vmem:[#allocation2 + $0x88] sm:$0xf0]  ;;  %v10915_v55 = vpop.f32.mrf.mxu1  ;;  %3611 = vmatmul.bf16.gmra.mxu1 %v7707_v28 }
 0x409   : > { %4139 = vst [vmem:[#allocation2 + $0x98] sm:$0xf] %v4107_v29  ;;  %v3386_v18 = vpop.f32.mrf.mxu3  ;;  %v7875_v39 = vor.u32 %v8931_v33, %v7874_v8  ;;  %4772 = vmatpush.bf16.msrb.mxu3 %v8973_v20  ;;  %v8888_v28 = vld [vmem:[#allocation2 + $0x1b8] sm:$0xf0] }
 0x40a   : > { %v3723_v48 = vpack.c.bf16 %v3659_v24, %v3659_v24  ;;  %v3787_v5 = vrot.slane %v3659_v24, 6  ;;  %v3980_v58 = vrot.slane %v3659_v24, 2  ;;  %v3476_v35 = vadd.f32 %v10701_v36, %v3386_v18  ;;  %v8972_v24 = vld [vmem:[#allocation11 + $0x50] sm:$0xff]  ;;  %v10921_v34 = vpop.f32.mrf.mxu0 }
 0x40b   : > { %4890 = vmatmul.bf16.gmra.mxu0 %v7875_v39 }
 0x40c   : > { %3755 = vst [vmem:[#allocation2 + $0xac] sm:$0xf] %v3723_v48  ;;  %v3831_v60 = vsel %vm3809_vm0, %v3786_v44, %v3787_v5  ;;  %v4024_v56 = vsel %vm4002_vm10, %v3979_v0, %v3980_v58  ;;  %v3565_v38 = vadd.f32 %v10860_v42, %v3476_v35  ;;  %v8965_v0 = vld [vmem:[#allocation11 + $0x18] sm:$0xff] }
 0x40d   : > { %v3884_v36 = vsel %vm3852_vm14, %v3831_v60, 0.0  ;;  %v4076_v29 = vsel %vm4044_vm15, %v4024_v56, 0.0  ;;  %4683 = vmatpush.bf16.msra.mxu2 %v8965_v0  ;;  %4773 = vmatpush.bf16.msrb.mxu3 %v8972_v24  ;;  %v3693_v56 = vld [vmem:[#allocation3 + $0x60] sm:$0xff] }
 0x40e   : > { %v3916_v4 = vpack.c.bf16 %v3884_v36, %v3884_v36  ;;  %v4108_v8 = vpack.c.bf16 %v4076_v29, %v4076_v29  ;;  %v3628_v45 = vadd.f32 %v3565_v38, %v10598_v16  ;;  %3428 = vmatmul.bf16.gmra.mxu3 %v7687_v49  ;;  %v8971_v16 = vld [vmem:[#allocation11 + $0x48] sm:$0xff]  ;;  %v7698_v38 = vld [vmem:[#allocation2 + $0x1b0] sm:$0xf]  ;;  %vm3854_vm4 = vcmp.ge.s32.totalorder %v3693_v56, 2 }
 0x40f   : > { %vm4047_vm7 = vcmp.lt.s32.totalorder %v3693_v56, 14 }
 0x410   : > { %3948 = vst [vmem:[#allocation2 + $0xa8] sm:$0xf] %v3916_v4  ;;  %v3660_v44 = vmax.f32 %v3628_v45, 0.0  ;;  %v10931_v36 = vpop.f32.mrf.mxu1  ;;  %v7886_v29 = vld [vmem:[#allocation2 + $0x98] sm:$0xf]  ;;  %v7699_v4 = vor.u32 %v8888_v28, %v7698_v38 }
 0x411   : > { %4140 = vst [vmem:[#allocation2 + $0xa4] sm:$0xf] %v4108_v8  ;;  %v3389_v42 = vpop.f32.mrf.mxu3  ;;  %4774 = vmatpush.bf16.msrb.mxu3 %v8971_v16  ;;  %v8970_v8 = vld [vmem:[#allocation11 + $0x40] sm:$0xff] }
 0x412   : > { %v3724_v33 = vpack.c.bf16 %v3660_v44, %v3660_v44  ;;  %v3788_v18 = vrot.slane %v3660_v44, 6  ;;  %v3981_v63 = vrot.slane %v3660_v44, 2  ;;  %v3479_v39 = vadd.f32 %v10713_v25, %v3389_v42 }
 0x414   : > { %3756 = vst [vmem:[#allocation2 + $0xb8] sm:$0xf] %v3724_v33  ;;  %v3830_v48 = vsel %vm3809_vm0, %v3787_v5, %v3788_v18  ;;  %v4023_v35 = vsel %vm4002_vm10, %v3980_v58, %v3981_v63  ;;  %v3568_v22 = vadd.f32 %v10874_v6, %v3479_v39  ;;  %v10939_v39 = vpop.f32.mrf.mxu0 }
 0x415   : > { %v3885_v49 = vsel %vm3853_vm1, %v3830_v48, 0.0  ;;  %v4077_v19 = vsel %vm4045_vm3, %v4023_v35, 0.0  ;;  %4775 = vmatpush.bf16.msrb.mxu3 %v8970_v8 }
 0x416   : > { %v3917_v20 = vpack.c.bf16 %v3885_v49, %v3885_v49  ;;  %v4109_v25 = vpack.c.bf16 %v4077_v19, %v4077_v19  ;;  %v3629_v60 = vadd.f32 %v3568_v22, %v10606_v30  ;;  %v3694_v49 = vld [vmem:[#allocation3 + $0x68] sm:$0xff] }
 0x417   : > { %vm3855_vm6 = vcmp.ge.s32.totalorder %v3694_v49, 2  ;;  %vm4048_vm9 = vcmp.lt.s32.totalorder %v3694_v49, 14 }
 0x418   : > { %3949 = vst [vmem:[#allocation2 + $0xb4] sm:$0xf] %v3917_v20  ;;  %v3661_v5 = vmax.f32 %v3629_v60, 0.0  ;;  %v8934_v58 = vld [vmem:[#allocation2 + $0xa0] sm:$0xf0] }
 0x419   : > { %4141 = vst [vmem:[#allocation2 + $0xb0] sm:$0xf] %v4109_v25  ;;  %v3391_v6 = vpop.f32.mrf.mxu3  ;;  %v7887_v57 = vor.u32 %v8934_v58, %v7886_v29 }
 0x41a   : > { %v3725_v45 = vpack.c.bf16 %v3661_v5, %v3661_v5  ;;  %v3789_v44 = vrot.slane %v3661_v5, 6  ;;  %v3982_v30 = vrot.slane %v3661_v5, 2  ;;  %v3481_v42 = vadd.f32 %v10722_v32, %v3391_v6  ;;  %v3695_v6 = vld [vmem:[#allocation3 + $0x70] sm:$0xff] }
 0x41b   : > { %4895 = vmatmul.bf16.gmra.mxu0 %v7887_v57  ;;  %v8914_v57 = vld [vmem:[#allocation2 + $0x4] sm:$0xf]  ;;  %vm3856_vm8 = vcmp.ge.s32.totalorder %v3695_v6, 2  ;;  %vm4049_vm11 = vcmp.lt.s32.totalorder %v3695_v6, 14 }
 0x41c   : > { %3757 = vst [vmem:[#allocation2 + $0xc4] sm:$0xf] %v3725_v45  ;;  %v3829_v0 = vsel %vm3809_vm0, %v3788_v18, %v3789_v44  ;;  %v4022_v24 = vsel %vm4002_vm10, %v3981_v63, %v3982_v30  ;;  %v3570_v33 = vadd.f32 %v10885_v59, %v3481_v42  ;;  %v10944_v18 = vpop.f32.mrf.mxu1  ;;  %v10953_v8 = vpop.f32.mrf.mxu0 }
 0x41d   : > { %v3886_v16 = vsel %vm3854_vm4, %v3829_v0, 0.0  ;;  %v4078_v48 = vsel %vm4046_vm5, %v4022_v24, 0.0 }
 0x41e   : > { %v3918_v35 = vpack.c.bf16 %v3886_v16, %v3886_v16  ;;  %v4110_v22 = vpack.c.bf16 %v4078_v48, %v4078_v48  ;;  %v3630_v32 = vadd.f32 %v3570_v33, %v10614_v2  ;;  %3433 = vmatmul.bf16.gmra.mxu3 %v7699_v4  ;;  %v7808_v4 = vld [vmem:[#allocation2 + $0xc] sm:$0xf0] }
 0x41f   : > { %v7811_v42 = vor.u32 %v8914_v57, %v7808_v4 }
 0x420   : > { %3950 = vst [vmem:[#allocation2 + $0xc0] sm:$0xf] %v3918_v35  ;;  %v3662_v19 = vmax.f32 %v3630_v32, 0.0 }
 0x421   : > { %4142 = vst [vmem:[#allocation2 + $0xbc] sm:$0xf] %v4110_v22  ;;  %v3394_v59 = vpop.f32.mrf.mxu3 }
 0x422   : > { %v3726_v63 = vpack.c.bf16 %v3662_v19, %v3662_v19  ;;  %v3790_v20 = vrot.slane %v3662_v19, 6  ;;  %v3983_v25 = vrot.slane %v3662_v19, 2  ;;  %v3484_v52 = vadd.f32 %v10733_v12, %v3394_v59  ;;  %v7898_v12 = vld [vmem:[#allocation2 + $0xb0] sm:$0xf] }
 0x424   : > { %3758 = vst [vmem:[#allocation2 + $0xd0] sm:$0xf] %v3726_v63  ;;  %v3828_v60 = vsel %vm3809_vm0, %v3789_v44, %v3790_v20  ;;  %v4021_v2 = vsel %vm4002_vm10, %v3982_v30, %v3983_v25  ;;  %v3573_v38 = vadd.f32 %v10899_v1, %v3484_v52  ;;  %v10956_v16 = vpop.f32.mrf.mxu1  ;;  %v3696_v52 = vld [vmem:[#allocation3 + $0x78] sm:$0xff] }
 0x425   : > { %v3887_v28 = vsel %vm3855_vm6, %v3828_v60, 0.0  ;;  %v4079_v29 = vsel %vm4047_vm7, %v4021_v2, 0.0  ;;  %v10964_v60 = vpop.f32.mrf.mxu0  ;;  %vm3857_vm2 = vcmp.ge.s32.totalorder %v3696_v52, 2  ;;  %v8964_v2 = vld [vmem:[#allocation11 + $0x10] sm:$0xff]  ;;  %vm4050_vm13 = vcmp.lt.s32.totalorder %v3696_v52, 14 }
 0x426   : > { %v3919_v5 = vpack.c.bf16 %v3887_v28, %v3887_v28  ;;  %v4111_v58 = vpack.c.bf16 %v4079_v29, %v4079_v29  ;;  %v3631_v56 = vadd.f32 %v3573_v38, %v10621_v46  ;;  %4684 = vmatpush.bf16.msra.mxu2 %v8964_v2 }
 0x428   : > { %3951 = vst [vmem:[#allocation2 + $0xcc] sm:$0xf] %v3919_v5  ;;  %v3663_v45 = vmax.f32 %v3631_v56, 0.0  ;;  %v8937_v44 = vld [vmem:[#allocation2 + $0xb8] sm:$0xf0] }
 0x429   : > { %4143 = vst [vmem:[#allocation2 + $0xc8] sm:$0xf] %v4111_v58  ;;  %v3396_v30 = vpop.f32.mrf.mxu3  ;;  %v7899_v1 = vor.u32 %v8937_v44, %v7898_v12  ;;  %v7820_v44 = vld [vmem:[#allocation2 + $0x24] sm:$0xf0] }
 0x42a   : > { %v3727_v0 = vpack.c.bf16 %v3663_v45, %v3663_v45  ;;  %v3791_v24 = vrot.slane %v3663_v45, 6  ;;  %v3984_v33 = vrot.slane %v3663_v45, 2  ;;  %v3486_v46 = vadd.f32 %v10744_v54, %v3396_v30  ;;  %v3697_v45 = vld [vmem:[#allocation3 + $0x80] sm:$0xff] }
 0x42b   : > { %4900 = vmatmul.bf16.gmra.mxu0 %v7899_v1  ;;  %vm3858_vm12 = vcmp.ge.s32.totalorder %v3697_v45, 2  ;;  %vm4051_vm15 = vcmp.lt.s32.totalorder %v3697_v45, 14 }
 0x42c   : > { %3759 = vst [vmem:[#allocation2 + $0xdc] sm:$0xf] %v3727_v0  ;;  %v3827_v48 = vsel %vm3809_vm0, %v3790_v20, %v3791_v24  ;;  %v4020_v35 = vsel %vm4002_vm10, %v3983_v25, %v3984_v33  ;;  %v3575_v22 = vadd.f32 %v10915_v55, %v3486_v46  ;;  %v10972_v58 = vpop.f32.mrf.mxu1 }
 0x42d   : > { %v3888_v32 = vsel %vm3856_vm8, %v3827_v48, 0.0  ;;  %v4080_v49 = vsel %vm4048_vm9, %v4020_v35, 0.0 }
 0x42e   : > { %v3920_v19 = vpack.c.bf16 %v3888_v32, %v3888_v32  ;;  %v4112_v59 = vpack.c.bf16 %v4080_v49, %v4080_v49  ;;  %v3632_v63 = vadd.f32 %v3575_v22, %v10635_v47  ;;  %4776 = vmatmul.bf16.vlgmr.msrb.gmra.mxu3 %v7811_v42  ;;  %v10976_v22 = vpop.f32.mrf.mxu0 }
 0x42f   : > { %11967 = vst [vmem:[#allocation27_spill] sm:$0xff] %v10976_v22 }
 0x430   : > { %3952 = vst [vmem:[#allocation2 + $0xd8] sm:$0xf] %v3920_v19  ;;  %v3664_v54 = vmax.f32 %v3632_v63, 0.0  ;;  %v7910_v30 = vld [vmem:[#allocation2 + $0xc8] sm:$0xf] }
 0x431   : > { %4144 = vst [vmem:[#allocation2 + $0xd4] sm:$0xf] %v4112_v59  ;;  %v3399_v20 = vpop.f32.mrf.mxu3 }
 0x432   : > { %v3728_v25 = vpack.c.bf16 %v3664_v54, %v3664_v54  ;;  %v3792_v38 = vrot.slane %v3664_v54, 6  ;;  %v3985_v55 = vrot.slane %v3664_v54, 2  ;;  %v3489_v28 = vadd.f32 %v10753_v21, %v3399_v20  ;;  %v8917_v21 = vld [vmem:[#allocation2 + $0x1c] sm:$0xf]  ;;  %v3698_v20 = vld [vmem:[#allocation3 + $0x88] sm:$0xff] }
 0x433   : > { %vm3859_vm14 = vcmp.ge.s32.totalorder %v3698_v20, 2  ;;  %vm4052_vm3 = vcmp.lt.s32.totalorder %v3698_v20, 14  ;;  %v8941_v26 = vld [vmem:[#allocation2 + $0xdc] sm:$0xf] }
 0x434   : > { %3760 = vst [vmem:[#allocation2 + $0xe8] sm:$0xf] %v3728_v25  ;;  %v3826_v47 = vsel %vm3809_vm0, %v3791_v24, %v3792_v38  ;;  %v4019_v29 = vsel %vm4002_vm10, %v3984_v33, %v3985_v55  ;;  %v3578_v5 = vadd.f32 %v10931_v36, %v3489_v28  ;;  %v7823_v24 = vor.u32 %v8917_v21, %v7820_v44  ;;  %v3699_v21 = vld [vmem:[#allocation3 + $0x90] sm:$0xff] }
 0x435   : > { %v3889_v56 = vsel %vm3857_vm2, %v3826_v47, 0.0  ;;  %v4081_v6 = vsel %vm4049_vm11, %v4019_v29, 0.0  ;;  %vm3860_vm1 = vcmp.ge.s32.totalorder %v3699_v21, 2  ;;  %vm4053_vm5 = vcmp.lt.s32.totalorder %v3699_v21, 14  ;;  %v11971_v21 = vld [vmem:[#allocation23_spill] sm:$0xff] }
 0x436   : > { %v3921_v57 = vpack.c.bf16 %v3889_v56, %v3889_v56  ;;  %v4113_v4 = vpack.c.bf16 %v4081_v6, %v4081_v6  ;;  %v3633_v12 = vadd.f32 %v3578_v5, %v10646_v11  ;;  %v10992_v5 = vpop.f32.mrf.mxu0 }
 0x438   : > { %3953 = vst [vmem:[#allocation2 + $0xe4] sm:$0xf] %v3921_v57  ;;  %v3665_v1 = vmax.f32 %v3633_v12, 0.0  ;;  %v8940_v42 = vld [vmem:[#allocation2 + $0xd0] sm:$0xf0]  ;;  %v11968_v12 = vld [vmem:[#allocation30_spill] sm:$0xff] }
 0x439   : > { %4145 = vst [vmem:[#allocation2 + $0xe0] sm:$0xf] %v4113_v4  ;;  %v3401_v0 = vpop.f32.mrf.mxu3  ;;  %v7911_v36 = vor.u32 %v8940_v42, %v7910_v30 }
 0x43a   : > { %v3729_v33 = vpack.c.bf16 %v3665_v1, %v3665_v1  ;;  %v3793_v46 = vrot.slane %v3665_v1, 6  ;;  %v3986_v48 = vrot.slane %v3665_v1, 2  ;;  %v3491_v35 = vadd.f32 %v10763_v37, %v3401_v0  ;;  %v10984_v37 = vpop.f32.mrf.mxu1  ;;  %v7832_v0 = vld [vmem:[#allocation2 + $0x3c] sm:$0xf0] }
 0x43b   : > { %4905 = vmatmul.bf16.gmra.mxu0 %v7911_v36 }
 0x43c   : > { %3761 = vst [vmem:[#allocation2 + $0xf4] sm:$0xf] %v3729_v33  ;;  %v3825_v11 = vsel %vm3809_vm0, %v3792_v38, %v3793_v46  ;;  %v4018_v32 = vsel %vm4002_vm10, %v3985_v55, %v3986_v48  ;;  %v3580_v49 = vadd.f32 %v10944_v18, %v3491_v35 }
 0x43d   : > { %v3890_v19 = vsel %vm3858_vm12, %v3825_v11, 0.0  ;;  %v4082_v59 = vsel %vm4050_vm13, %v4018_v32, 0.0 }
 0x43e   : > { %v3922_v63 = vpack.c.bf16 %v3890_v19, %v3890_v19  ;;  %v4114_v52 = vpack.c.bf16 %v4082_v59, %v4082_v59  ;;  %v3634_v54 = vadd.f32 %v3580_v49, %v10657_v17  ;;  %4781 = vmatmul.bf16.gmra.mxu3 %v7823_v24 }
 0x440   : > { %3954 = vst [vmem:[#allocation2 + $0xf0] sm:$0xf] %v3922_v63  ;;  %v3666_v2 = vmax.f32 %v3634_v54, 0.0  ;;  %v7922_v44 = vld [vmem:[#allocation2 + $0xe0] sm:$0xf]  ;;  %v11969_v54 = vld [vmem:[#allocation19_spill] sm:$0xff] }
 0x441   : > { %4146 = vst [vmem:[#allocation2 + $0xec] sm:$0xf] %v4114_v52  ;;  %v3404_v25 = vpop.f32.mrf.mxu3 }
 0x442   : > { %v3730_v38 = vpack.c.bf16 %v3666_v2, %v3666_v2  ;;  %v3794_v55 = vrot.slane %v3666_v2, 6  ;;  %v3987_v28 = vrot.slane %v3666_v2, 2  ;;  %v3494_v18 = vadd.f32 %v10774_v9, %v3404_v25  ;;  %v10995_v1 = vpop.f32.mrf.mxu1  ;;  %v3700_v2 = vld [vmem:[#allocation3 + $0x98] sm:$0xff]  ;;  %v11006_v25 = vpop.f32.mrf.mxu0 }
 0x443   : > { %11970 = vst [vmem:[#allocation37_spill] sm:$0xff] %v11006_v25  ;;  %vm3861_vm4 = vcmp.ge.s32.totalorder %v3700_v2, 2  ;;  %vm4054_vm7 = vcmp.lt.s32.totalorder %v3700_v2, 14  ;;  %v8994_v25 = vld [vmem:[#allocation2 + $0x70] sm:$0xf0] }
 0x444   : > { %3762 = vst [vmem:[#allocation2 + $0x100] sm:$0xf] %v3730_v38  ;;  %v3824_v47 = vsel %vm3809_vm0, %v3793_v46, %v3794_v55  ;;  %v4017_v17 = vsel %vm4002_vm10, %v3986_v48, %v3987_v28  ;;  %v3583_v29 = vadd.f32 %v10956_v16, %v3494_v18  ;;  %v8920_v48 = vld [vmem:[#allocation2 + $0x34] sm:$0xf] }
 0x445   : > { %v3891_v56 = vsel %vm3859_vm14, %v3824_v47, 0.0  ;;  %v4083_v6 = vsel %vm4051_vm15, %v4017_v17, 0.0  ;;  %v7835_v49 = vor.u32 %v8920_v48, %v7832_v0 }
 0x446   : > { %v3923_v57 = vpack.c.bf16 %v3891_v56, %v3891_v56  ;;  %v4115_v4 = vpack.c.bf16 %v4083_v6, %v4083_v6  ;;  %v3635_v45 = vadd.f32 %v3583_v29, %v11968_v12 }
 0x448   : > { %3955 = vst [vmem:[#allocation2 + $0xfc] sm:$0xf] %v3923_v57  ;;  %v3667_v9 = vmax.f32 %v3635_v45, 0.0  ;;  %v8943_v30 = vld [vmem:[#allocation2 + $0xe8] sm:$0xf0] }
 0x449   : > { %4147 = vst [vmem:[#allocation2 + $0xf8] sm:$0xf] %v4115_v4  ;;  %v3406_v42 = vpop.f32.mrf.mxu3  ;;  %v7923_v16 = vor.u32 %v8943_v30, %v7922_v44 }
 0x44a   : > { %v3731_v36 = vpack.c.bf16 %v3667_v9, %v3667_v9  ;;  %v3795_v24 = vrot.slane %v3667_v9, 6  ;;  %v3988_v33 = vrot.slane %v3667_v9, 2  ;;  %v3496_v46 = vadd.f32 %v10783_v53, %v3406_v42  ;;  %v3592_v17 = vpop.f32.mrf.mxu1  ;;  %v3701_v9 = vld [vmem:[#allocation3 + $0xa0] sm:$0xff] }
 0x44b   : > { %4910 = vmatmul.bf16.gmra.mxu0 %v7923_v16  ;;  %vm3862_vm6 = vcmp.ge.s32.totalorder %v3701_v9, 2  ;;  %vm4055_vm9 = vcmp.lt.s32.totalorder %v3701_v9, 14 }
 0x44c   : > { %3763 = vst [vmem:[#allocation2 + $0x10c] sm:$0xf] %v3731_v36  ;;  %v3823_v35 = vsel %vm3809_vm0, %v3794_v55, %v3795_v24  ;;  %v4016_v11 = vsel %vm4002_vm10, %v3987_v28, %v3988_v33  ;;  %v3585_v32 = vadd.f32 %v10972_v58, %v3496_v46  ;;  %v8963_v58 = vld [vmem:[#allocation11 + $0x8] sm:$0xff] }
 0x44d   : > { %v3892_v19 = vsel %vm3860_vm1, %v3823_v35, 0.0  ;;  %v4084_v59 = vsel %vm4052_vm3, %v4016_v11, 0.0  ;;  %4685 = vmatpush.bf16.msra.mxu2 %v8963_v58  ;;  %v8923_v35 = vld [vmem:[#allocation2 + $0x4c] sm:$0xf] }
 0x44e   : > { %v3924_v63 = vpack.c.bf16 %v3892_v19, %v3892_v19  ;;  %v4116_v52 = vpack.c.bf16 %v4084_v59, %v4084_v59  ;;  %v3636_v53 = vadd.f32 %v3585_v32, %v11969_v54  ;;  %4786 = vmatmul.bf16.gmra.mxu3 %v7835_v49 }
 0x450   : > { %3956 = vst [vmem:[#allocation2 + $0x108] sm:$0xf] %v3924_v63  ;;  %v3668_v38 = vmax.f32 %v3636_v53, 0.0  ;;  %v7934_v30 = vld [vmem:[#allocation2 + $0xf8] sm:$0xf] }
 0x451   : > { %4148 = vst [vmem:[#allocation2 + $0x104] sm:$0xf] %v4116_v52  ;;  %v3409_v55 = vpop.f32.mrf.mxu3 }
 0x452   : > { %v3732_v28 = vpack.c.bf16 %v3668_v38, %v3668_v38  ;;  %v3796_v18 = vrot.slane %v3668_v38, 6  ;;  %v3989_v47 = vrot.slane %v3668_v38, 2  ;;  %v3499_v20 = vadd.f32 %v10792_v14, %v3409_v55  ;;  %v3594_v59 = vpop.f32.mrf.mxu1  ;;  %v3702_v38 = vld [vmem:[#allocation3 + $0xa8] sm:$0xff] }
 0x453   : > { %vm3863_vm8 = vcmp.ge.s32.totalorder %v3702_v38, 2  ;;  %vm4056_vm11 = vcmp.lt.s32.totalorder %v3702_v38, 14 }
 0x454   : > { %3764 = vst [vmem:[#allocation2 + $0x118] sm:$0xf] %v3732_v28  ;;  %v3822_v29 = vsel %vm3809_vm0, %v3795_v24, %v3796_v18  ;;  %v4015_v56 = vsel %vm4002_vm10, %v3988_v33, %v3989_v47  ;;  %v3588_v6 = vadd.f32 %v10984_v37, %v3499_v20  ;;  %v7844_v24 = vld [vmem:[#allocation2 + $0x54] sm:$0xf0] }
 0x455   : > { %v3893_v57 = vsel %vm3861_vm4, %v3822_v29, 0.0  ;;  %v4085_v4 = vsel %vm4053_vm5, %v4015_v56, 0.0  ;;  %v7847_v19 = vor.u32 %v8923_v35, %v7844_v24 }
 0x456   : > { %v3925_v12 = vpack.c.bf16 %v3893_v57, %v3893_v57  ;;  %v4117_v45 = vpack.c.bf16 %v4085_v4, %v4085_v4  ;;  %v3637_v44 = vadd.f32 %v3588_v6, %v11971_v21 }
 0x458   : > { %3957 = vst [vmem:[#allocation2 + $0x114] sm:$0xf] %v3925_v12  ;;  %v3669_v14 = vmax.f32 %v3637_v44, 0.0  ;;  %v11015_v42 = vpop.f32.mrf.mxu0  ;;  %v8946_v16 = vld [vmem:[#allocation2 + $0x100] sm:$0xf0] }
 0x459   : > { %4149 = vst [vmem:[#allocation2 + $0x110] sm:$0xf] %v4117_v45  ;;  %v3411_v0 = vpop.f32.mrf.mxu3  ;;  %v7935_v36 = vor.u32 %v8946_v16, %v7934_v30  ;;  %v3703_v45 = vld [vmem:[#allocation3 + $0xb0] sm:$0xff] }
 0x45a   : > { %v3733_v37 = vpack.c.bf16 %v3669_v14, %v3669_v14  ;;  %v3797_v33 = vrot.slane %v3669_v14, 6  ;;  %v3990_v46 = vrot.slane %v3669_v14, 2  ;;  %v3501_v48 = vadd.f32 %v10806_v40, %v3411_v0  ;;  %v3597_v21 = vpop.f32.mrf.mxu1 }
 0x45b   : > { %4915 = vmatmul.bf16.gmra.mxu0 %v7935_v36  ;;  %vm3864_vm2 = vcmp.ge.s32.totalorder %v3703_v45, 2  ;;  %vm4057_vm13 = vcmp.lt.s32.totalorder %v3703_v45, 14 }
 0x45c   : > { %3765 = vst [vmem:[#allocation2 + $0x124] sm:$0xf] %v3733_v37  ;;  %v3821_v11 = vsel %vm3809_vm0, %v3796_v18, %v3797_v33  ;;  %v4014_v32 = vsel %vm4002_vm10, %v3989_v47, %v3990_v46  ;;  %v3590_v49 = vadd.f32 %v10995_v1, %v3501_v48 }
 0x45d   : > { %v3894_v63 = vsel %vm3862_vm6, %v3821_v11, 0.0  ;;  %v4086_v52 = vsel %vm4054_vm7, %v4014_v32, 0.0 }
 0x45e   : > { %v3926_v54 = vpack.c.bf16 %v3894_v63, %v3894_v63  ;;  %v4118_v53 = vpack.c.bf16 %v4086_v52, %v4086_v52  ;;  %v3638_v40 = vadd.f32 %v3590_v49, %v10697_v31  ;;  %4791 = vmatmul.bf16.gmra.mxu3 %v7847_v19 }
 0x460   : > { %3958 = vst [vmem:[#allocation2 + $0x120] sm:$0xf] %v3926_v54  ;;  %v3670_v55 = vmax.f32 %v3638_v40, 0.0  ;;  %v11026_v58 = vpop.f32.mrf.mxu0  ;;  %v7946_v44 = vld [vmem:[#allocation2 + $0x110] sm:$0xf]  ;;  %v8962_v40 = vld [vmem:[#allocation11] sm:$0xff] }
 0x461   : > { %4150 = vst [vmem:[#allocation2 + $0x11c] sm:$0xf] %v4118_v53  ;;  %v3414_v1 = vpop.f32.mrf.mxu3  ;;  %4686 = vmatpush.bf16.msra.mxu2 %v8962_v40 }
 0x462   : > { %v3734_v28 = vpack.c.bf16 %v3670_v55, %v3670_v55  ;;  %v3798_v18 = vrot.slane %v3670_v55, 6  ;;  %v3991_v47 = vrot.slane %v3670_v55, 2  ;;  %v3504_v2 = vadd.f32 %v10827_v23, %v3414_v1  ;;  %v3599_v54 = vpop.f32.mrf.mxu1 }
 0x464   : > { %3766 = vst [vmem:[#allocation2 + $0x130] sm:$0xf] %v3734_v28  ;;  %v3820_v20 = vsel %vm3809_vm0, %v3797_v33, %v3798_v18  ;;  %v4013_v31 = vsel %vm4002_vm10, %v3990_v46, %v3991_v47  ;;  %v3593_v29 = vadd.f32 %v3592_v17, %v3504_v2  ;;  %v7856_v17 = vld [vmem:[#allocation2 + $0x6c] sm:$0xf0] }
 0x465   : > { %v3895_v56 = vsel %vm3863_vm8, %v3820_v20, 0.0  ;;  %v4087_v6 = vsel %vm4055_vm9, %v4013_v31, 0.0 }
 0x466   : > { %v3927_v57 = vpack.c.bf16 %v3895_v56, %v3895_v56  ;;  %v4119_v4 = vpack.c.bf16 %v4087_v6, %v4087_v6  ;;  %v3639_v12 = vadd.f32 %v3593_v29, %v10708_v43  ;;  %v8926_v43 = vld [vmem:[#allocation2 + $0x64] sm:$0xf] }
 0x467   : > { %v7859_v35 = vor.u32 %v8926_v43, %v7856_v17  ;;  %v3705_v6 = vld [vmem:[#allocation3 + $0xc0] sm:$0xff]  ;;  %v8929_v17 = vld [vmem:[#allocation2 + $0x7c] sm:$0xf] }
 0x468   : > { %3959 = vst [vmem:[#allocation2 + $0x12c] sm:$0xf] %v3927_v57  ;;  %v3671_v9 = vmax.f32 %v3639_v12, 0.0  ;;  %v8949_v23 = vld [vmem:[#allocation2 + $0x118] sm:$0xf0]  ;;  %v11034_v30 = vpop.f32.mrf.mxu0  ;;  %vm3866_vm14 = vcmp.ge.s32.totalorder %v3705_v6, 2 }
 0x469   : > { %4151 = vst [vmem:[#allocation2 + $0x128] sm:$0xf] %v4119_v4  ;;  %v3416_v14 = vpop.f32.mrf.mxu3  ;;  %v7947_v16 = vor.u32 %v8949_v23, %v7946_v44  ;;  %v7868_v44 = vld [vmem:[#allocation2 + $0x84] sm:$0xf0]  ;;  %vm4059_vm3 = vcmp.lt.s32.totalorder %v3705_v6, 14 }
 0x46a   : > { %v3735_v0 = vpack.c.bf16 %v3671_v9, %v3671_v9  ;;  %v3799_v36 = vrot.slane %v3671_v9, 6  ;;  %v3992_v24 = vrot.slane %v3671_v9, 2  ;;  %v3506_v37 = vadd.f32 %v10839_v41, %v3416_v14  ;;  %v3704_v41 = vld [vmem:[#allocation3 + $0xb8] sm:$0xff]  ;;  %v8915_v6 = vld [vmem:[#allocation2 + $0x8] sm:$0xf0] }
 0x46b   : > { %4920 = vmatmul.bf16.gmra.mxu0 %v7947_v16  ;;  %vm3865_vm12 = vcmp.ge.s32.totalorder %v3704_v41, 2  ;;  %vm4058_vm15 = vcmp.lt.s32.totalorder %v3704_v41, 14  ;;  %v3602_v16 = vpop.f32.mrf.mxu1 }
 0x46c   : > { %3767 = vst [vmem:[#allocation2 + $0x13c] sm:$0xf] %v3735_v0  ;;  %v3819_v33 = vsel %vm3809_vm0, %v3798_v18, %v3799_v36  ;;  %v4012_v46 = vsel %vm4002_vm10, %v3991_v47, %v3992_v24  ;;  %v3595_v48 = vadd.f32 %v3594_v59, %v3506_v37 }
 0x46d   : > { %v3896_v11 = vsel %vm3864_vm2, %v3819_v33, 0.0  ;;  %v4088_v32 = vsel %vm4056_vm11, %v4012_v46, 0.0 }
 0x46e   : > { %v3928_v49 = vpack.c.bf16 %v3896_v11, %v3896_v11  ;;  %v4120_v19 = vpack.c.bf16 %v4088_v32, %v4088_v32  ;;  %v3640_v63 = vadd.f32 %v3595_v48, %v10715_v61  ;;  %4796 = vmatmul.bf16.gmra.mxu3 %v7859_v35  ;;  %v3706_v35 = vld [vmem:[#allocation3 + $0xc8] sm:$0xff] }
 0x46f   : > { %vm3867_vm1 = vcmp.ge.s32.totalorder %v3706_v35, 2  ;;  %vm4060_vm5 = vcmp.lt.s32.totalorder %v3706_v35, 14  ;;  %v9041_v35 = vld [vmem:[#allocation11 + $0xf8] sm:$0xff] }
 0x470   : > { %3960 = vst [vmem:[#allocation2 + $0x138] sm:$0xf] %v3928_v49  ;;  %v3672_v52 = vmax.f32 %v3640_v63, 0.0  ;;  %v11045_v28 = vpop.f32.mrf.mxu0  ;;  %v7958_v57 = vld [vmem:[#allocation2 + $0x128] sm:$0xf]  ;;  %5459 = vmatpush.bf16.msrb.mxu1 %v9041_v35 }
 0x471   : > { %4152 = vst [vmem:[#allocation2 + $0x134] sm:$0xf] %v4120_v19  ;;  %v3419_v53 = vpop.f32.mrf.mxu3 }
 0x472   : > { %v3736_v59 = vpack.c.bf16 %v3672_v52, %v3672_v52  ;;  %v3800_v55 = vrot.slane %v3672_v52, 6  ;;  %v3993_v1 = vrot.slane %v3672_v52, 2  ;;  %v3509_v38 = vadd.f32 %v10852_v27, %v3419_v53  ;;  %v11067_v53 = vld [vmem:[#allocation3 + $0xd0] sm:$0xff] }
 0x473   : > { %v3604_v40 = vpop.f32.mrf.mxu1  ;;  %vm3868_vm4 = vcmp.ge.s32.totalorder %v11067_v53, 2  ;;  %vm4061_vm7 = vcmp.lt.s32.totalorder %v11067_v53, 14 }
 0x474   : > { %3768 = vst [vmem:[#allocation2 + $0x148] sm:$0xf] %v3736_v59  ;;  %v3818_v61 = vsel %vm3809_vm0, %v3799_v36, %v3800_v55  ;;  %v4011_v18 = vsel %vm4002_vm10, %v3992_v24, %v3993_v1  ;;  %v3598_v47 = vadd.f32 %v3597_v21, %v3509_v38  ;;  %v7871_v24 = vor.u32 %v8929_v17, %v7868_v44 }
 0x475   : > { %v3897_v2 = vsel %vm3865_vm12, %v3818_v61, 0.0  ;;  %v4089_v20 = vsel %vm4057_vm13, %v4011_v18, 0.0 }
 0x476   : > { %v3929_v31 = vpack.c.bf16 %v3897_v2, %v3897_v2  ;;  %v4121_v29 = vpack.c.bf16 %v4089_v20, %v4089_v20  ;;  %v3641_v56 = vadd.f32 %v3598_v47, %v10724_v3  ;;  %v7880_v47 = vld [vmem:[#allocation2 + $0x9c] sm:$0xf0] }
 0x478   : > { %3961 = vst [vmem:[#allocation2 + $0x144] sm:$0xf] %v3929_v31  ;;  %v3673_v27 = vmax.f32 %v3641_v56, 0.0  ;;  %v8952_v4 = vld [vmem:[#allocation2 + $0x130] sm:$0xf0]  ;;  %v11059_v33 = vpop.f32.mrf.mxu0 }
 0x479   : > { %4153 = vst [vmem:[#allocation2 + $0x140] sm:$0xf] %v4121_v29  ;;  %v3421_v12 = vpop.f32.mrf.mxu3  ;;  %v7959_v45 = vor.u32 %v8952_v4, %v7958_v57  ;;  %v7806_v56 = vld [vmem:[#allocation2] sm:$0xf] }
 0x47a   : > { %v3737_v9 = vpack.c.bf16 %v3673_v27, %v3673_v27  ;;  %v3801_v23 = vrot.slane %v3673_v27, 6  ;;  %v3994_v21 = vrot.slane %v3673_v27, 2  ;;  %v3511_v14 = vadd.f32 %v10864_v10, %v3421_v12  ;;  %v8932_v12 = vld [vmem:[#allocation2 + $0x94] sm:$0xf] }
 0x47b   : > { %4925 = vmatmul.bf16.gmra.mxu0 %v7959_v45  ;;  %v9113_v45 = vld [vmem:[#allocation11 + $0x1b8] sm:$0xff]  ;;  %v7883_v44 = vor.u32 %v8932_v12, %v7880_v47 }
 0x47c   : > { %3769 = vst [vmem:[#allocation2 + $0x154] sm:$0xf] %v3737_v9  ;;  %v3817_v3 = vsel %vm3809_vm0, %v3800_v55, %v3801_v23  ;;  %v4010_v0 = vsel %vm4002_vm10, %v3993_v1, %v3994_v21  ;;  %v3600_v36 = vadd.f32 %v3599_v54, %v3511_v14  ;;  %v7807_v9 = vor.u32 %v8915_v6, %v7806_v56  ;;  %v7892_v47 = vld [vmem:[#allocation2 + $0xb4] sm:$0xf0] }
 0x47d   : > { %v3898_v37 = vsel %vm3866_vm14, %v3817_v3, 0.0  ;;  %v4090_v43 = vsel %vm4058_vm15, %v4010_v0, 0.0  ;;  %6271 = vmatpush.bf16.msra.mxu0 %v9113_v45  ;;  %v11081_v3 = vld [vmem:[#allocation3 + $0xd8] sm:$0xff] }
 0x47e   : > { %v3930_v46 = vpack.c.bf16 %v3898_v37, %v3898_v37  ;;  %v4122_v10 = vpack.c.bf16 %v4090_v43, %v4090_v43  ;;  %v3642_v48 = vadd.f32 %v3600_v36, %v10731_v50  ;;  %4801 = vmatmul.bf16.gmra.mxu3 %v7871_v24  ;;  %4687 = vmatmul.bf16.vlgmr.msra.gmra.mxu2 %v7807_v9  ;;  %v3607_v37 = vpop.f32.mrf.mxu1  ;;  %vm3869_vm6 = vcmp.ge.s32.totalorder %v11081_v3, 2  ;;  %v7818_v45 = vld [vmem:[#allocation2 + $0x18] sm:$0xf]  ;;  %v9039_v9 = vld [vmem:[#allocation11 + $0xe8] sm:$0xff] }
 0x47f   : > { %vm4062_vm9 = vcmp.lt.s32.totalorder %v11081_v3, 14 }
 0x480   : > { %3962 = vst [vmem:[#allocation2 + $0x150] sm:$0xf] %v3930_v46  ;;  %v3674_v11 = vmax.f32 %v3642_v48, 0.0  ;;  %v11070_v18 = vpop.f32.mrf.mxu0  ;;  %v9049_v48 = vld [vmem:[#allocation11 + $0x138] sm:$0xff] }
 0x481   : > { %4154 = vst [vmem:[#allocation2 + $0x14c] sm:$0xf] %v4122_v10  ;;  %v3424_v32 = vpop.f32.mrf.mxu3  ;;  %5548 = vmatpush.bf16.msrb.mxu2 %v9049_v48  ;;  %v9108_v48 = vld [vmem:[#allocation11 + $0x190] sm:$0xff] }
 0x482   : > { %v3738_v49 = vpack.c.bf16 %v3674_v11, %v3674_v11  ;;  %v3802_v19 = vrot.slane %v3674_v11, 6  ;;  %v3995_v63 = vrot.slane %v3674_v11, 2  ;;  %v3514_v41 = vadd.f32 %v10882_v62, %v3424_v32  ;;  %v7970_v62 = vld [vmem:[#allocation2 + $0x140] sm:$0xf]  ;;  %v9111_v11 = vld [vmem:[#allocation11 + $0x1a8] sm:$0xff] }
 0x484   : > { %3770 = vst [vmem:[#allocation2 + $0x160] sm:$0xf] %v3738_v49  ;;  %v3816_v52 = vsel %vm3809_vm0, %v3801_v23, %v3802_v19  ;;  %v4009_v50 = vsel %vm4002_vm10, %v3994_v21, %v3995_v63  ;;  %v3603_v54 = vadd.f32 %v3602_v16, %v3514_v41  ;;  %v9112_v16 = vld [vmem:[#allocation11 + $0x1b0] sm:$0xff] }
 0x485   : > { %v3899_v59 = vsel %vm3867_vm1, %v3816_v52, 0.0  ;;  %v4091_v55 = vsel %vm4059_vm3, %v4009_v50, 0.0  ;;  %6272 = vmatpush.bf16.msra.mxu0 %v9112_v16 }
 0x486   : > { %v3931_v1 = vpack.c.bf16 %v3899_v59, %v3899_v59  ;;  %v4123_v38 = vpack.c.bf16 %v4091_v55, %v4091_v55  ;;  %v3643_v61 = vadd.f32 %v3603_v54, %v10740_v15  ;;  %v9110_v54 = vld [vmem:[#allocation11 + $0x1a0] sm:$0xff] }
 0x488   : > { %3963 = vst [vmem:[#allocation2 + $0x15c] sm:$0xf] %v3931_v1  ;;  %v3675_v2 = vmax.f32 %v3643_v61, 0.0  ;;  %v8955_v20 = vld [vmem:[#allocation2 + $0x148] sm:$0xf0]  ;;  %v11085_v46 = vpop.f32.mrf.mxu0  ;;  %v11972_v1 = vld [vmem:[#allocation33_spill] sm:$0xff] }
 0x489   : > { %4155 = vst [vmem:[#allocation2 + $0x158] sm:$0xf] %v4123_v38  ;;  %v3426_v31 = vpop.f32.mrf.mxu3  ;;  %v7971_v29 = vor.u32 %v8955_v20, %v7970_v62  ;;  %6273 = vmatpush.bf16.msra.mxu0 %v9111_v11  ;;  %v11098_v61 = vld [vmem:[#allocation3 + $0xe0] sm:$0xff] }
 0x48a   : > { %v3739_v57 = vpack.c.bf16 %v3675_v2, %v3675_v2  ;;  %v3803_v27 = vrot.slane %v3675_v2, 6  ;;  %v3996_v4 = vrot.slane %v3675_v2, 2  ;;  %v3516_v15 = vadd.f32 %v10896_v51, %v3426_v31  ;;  %v3609_v31 = vpop.f32.mrf.mxu1 }
 0x48b   : > { %4930 = vmatmul.bf16.gmra.mxu0 %v7971_v29  ;;  %vm3870_vm8 = vcmp.ge.s32.totalorder %v11098_v61, 2  ;;  %vm4063_vm11 = vcmp.lt.s32.totalorder %v11098_v61, 14 }
 0x48c   : > { %3771 = vst [vmem:[#allocation2 + $0x16c] sm:$0xf] %v3739_v57  ;;  %v3815_v23 = vsel %vm3809_vm0, %v3802_v19, %v3803_v27  ;;  %v4008_v21 = vsel %vm4002_vm10, %v3995_v63, %v3996_v4  ;;  %v3605_v14 = vadd.f32 %v3604_v40, %v3516_v15  ;;  %v9040_v63 = vld [vmem:[#allocation11 + $0xf0] sm:$0xff] }
 0x48d   : > { %v3900_v17 = vsel %vm3868_vm4, %v3815_v23, 0.0  ;;  %v4092_v51 = vsel %vm4060_vm5, %v4008_v21, 0.0  ;;  %5460 = vmatpush.bf16.msrb.mxu1 %v9040_v63  ;;  %6274 = vmatpush.bf16.msra.mxu0 %v9110_v54 }
 0x48e   : > { %v3932_v0 = vpack.c.bf16 %v3900_v17, %v3900_v17  ;;  %v4124_v36 = vpack.c.bf16 %v4092_v51, %v4092_v51  ;;  %v3644_v24 = vadd.f32 %v3605_v14, %v10749_v7  ;;  %4806 = vmatmul.bf16.gmra.mxu3 %v7883_v44  ;;  %v8918_v44 = vld [vmem:[#allocation2 + $0x20] sm:$0xf0]  ;;  %v9109_v17 = vld [vmem:[#allocation11 + $0x198] sm:$0xff] }
 0x48f   : > { %v7819_v16 = vor.u32 %v8918_v44, %v7818_v45  ;;  %v8938_v44 = vld [vmem:[#allocation2 + $0xc4] sm:$0xf] }
 0x490   : > { %3964 = vst [vmem:[#allocation2 + $0x168] sm:$0xf] %v3932_v0  ;;  %v3676_v43 = vmax.f32 %v3644_v24, 0.0  ;;  %v7982_v62 = vld [vmem:[#allocation2 + $0x158] sm:$0xf]  ;;  %v11103_v15 = vpop.f32.mrf.mxu0  ;;  %v9038_v0 = vld [vmem:[#allocation11 + $0xe0] sm:$0xff] }
 0x491   : > { %4156 = vst [vmem:[#allocation2 + $0x164] sm:$0xf] %v4124_v36  ;;  %v3429_v10 = vpop.f32.mrf.mxu3  ;;  %5461 = vmatpush.bf16.msrb.mxu1 %v9039_v9  ;;  %4692 = vmatmul.bf16.gmra.mxu2 %v7819_v16 }
 0x492   : > { %v3740_v32 = vpack.c.bf16 %v3676_v43, %v3676_v43  ;;  %v3804_v49 = vrot.slane %v3676_v43, 6  ;;  %v3997_v19 = vrot.slane %v3676_v43, 2  ;;  %v3519_v7 = vadd.f32 %v10907_v13, %v3429_v10  ;;  %v11114_v10 = vld [vmem:[#allocation3 + $0xe8] sm:$0xff]  ;;  %6275 = vmatpush.bf16.msra.mxu0 %v9109_v17  ;;  %v3612_v3 = vpop.f32.mrf.mxu1 }
 0x493   : > { %vm3871_vm2 = vcmp.ge.s32.totalorder %v11114_v10, 2  ;;  %vm4064_vm13 = vcmp.lt.s32.totalorder %v11114_v10, 14 }
 0x494   : > { %3772 = vst [vmem:[#allocation2 + $0x178] sm:$0xf] %v3740_v32  ;;  %v3814_v41 = vsel %vm3809_vm0, %v3803_v27, %v3804_v49  ;;  %v4007_v52 = vsel %vm4002_vm10, %v3996_v4, %v3997_v19  ;;  %v3608_v50 = vadd.f32 %v3607_v37, %v3519_v7  ;;  %v8935_v4 = vld [vmem:[#allocation2 + $0xac] sm:$0xf]  ;;  %v11973_v37 = vld [vmem:[#allocation20_spill] sm:$0xff]  ;;  %v9037_v32 = vld [vmem:[#allocation11 + $0xd8] sm:$0xff] }
 0x495   : > { %v3901_v40 = vsel %vm3869_vm6, %v3814_v41, 0.0  ;;  %v4093_v59 = vsel %vm4061_vm7, %v4007_v52, 0.0  ;;  %v7895_v12 = vor.u32 %v8935_v4, %v7892_v47  ;;  %5462 = vmatpush.bf16.msrb.mxu1 %v9038_v0  ;;  %v9048_v41 = vld [vmem:[#allocation11 + $0x130] sm:$0xff]  ;;  %v9107_v52 = vld [vmem:[#allocation11 + $0x188] sm:$0xff] }
 0x496   : > { %v3933_v13 = vpack.c.bf16 %v3901_v40, %v3901_v40  ;;  %v4125_v55 = vpack.c.bf16 %v4093_v59, %v4093_v59  ;;  %v3645_v38 = vadd.f32 %v3608_v50, %v11972_v1  ;;  %6276 = vmatpush.bf16.msra.mxu0 %v9108_v48  ;;  %5549 = vmatpush.bf16.msrb.mxu2 %v9048_v41 }
 0x498   : > { %3965 = vst [vmem:[#allocation2 + $0x174] sm:$0xf] %v3933_v13  ;;  %v3677_v2 = vmax.f32 %v3645_v38, 0.0  ;;  %v8958_v20 = vld [vmem:[#allocation2 + $0x160] sm:$0xf0]  ;;  %v11123_v59 = vpop.f32.mrf.mxu0 }
 0x499   : > { %4157 = vst [vmem:[#allocation2 + $0x170] sm:$0xf] %v4125_v55  ;;  %v3431_v53 = vpop.f32.mrf.mxu3  ;;  %v7983_v29 = vor.u32 %v8958_v20, %v7982_v62  ;;  %5463 = vmatpush.bf16.msrb.mxu1 %v9037_v32  ;;  %v9036_v55 = vld [vmem:[#allocation11 + $0xd0] sm:$0xff]  ;;  %v11975_v62 = vld [vmem:[#allocation25_spill] sm:$0xff] }
 0x49a   : > { %v3741_v56 = vpack.c.bf16 %v3677_v2, %v3677_v2  ;;  %v3805_v6 = vrot.slane %v3677_v2, 6  ;;  %v3998_v57 = vrot.slane %v3677_v2, 2  ;;  %v3521_v27 = vadd.f32 %v10921_v34, %v3431_v53  ;;  %11974 = vst [vmem:[#allocation22_spill] sm:$0xff] %v11123_v59  ;;  %v3711_v2 = vld [vmem:[#allocation3 + $0xf0] sm:$0xff]  ;;  %6277 = vmatpush.bf16.msra.mxu0 %v9107_v52  ;;  %v3614_v9 = vpop.f32.mrf.mxu1 }
 0x49b   : > { %4935 = vmatmul.bf16.gmra.mxu0 %v7983_v29  ;;  %vm3872_vm12 = vcmp.ge.s32.totalorder %v3711_v2, 2  ;;  %vm4065_vm1 = vcmp.lt.s32.totalorder %v3711_v2, 14  ;;  %v8382_v2 = vld [vmem:[#allocation2 + $0x60] sm:$0xf] }
 0x49c   : > { %3773 = vst [vmem:[#allocation2 + $0x184] sm:$0xf] %v3741_v56  ;;  %v3813_v23 = vsel %vm3809_vm0, %v3804_v49, %v3805_v6  ;;  %v4006_v21 = vsel %vm4002_vm10, %v3997_v19, %v3998_v57  ;;  %v3610_v14 = vadd.f32 %v3609_v31, %v3521_v27  ;;  %v7904_v31 = vld [vmem:[#allocation2 + $0xcc] sm:$0xf0]  ;;  %v9106_v56 = vld [vmem:[#allocation11 + $0x180] sm:$0xff] }
 0x49d   : > { %v3902_v34 = vsel %vm3870_vm8, %v3813_v23, 0.0  ;;  %v4094_v51 = vsel %vm4062_vm9, %v4006_v21, 0.0  ;;  %5464 = vmatpush.bf16.msrb.mxu1 %v9036_v55  ;;  %v7907_v23 = vor.u32 %v8938_v44, %v7904_v31  ;;  %v9047_v44 = vld [vmem:[#allocation11 + $0x128] sm:$0xff] }
 0x49e   : > { %v3934_v36 = vpack.c.bf16 %v3902_v34, %v3902_v34  ;;  %v4126_v24 = vpack.c.bf16 %v4094_v51, %v4094_v51  ;;  %v3646_v43 = vadd.f32 %v3610_v14, %v11973_v37  ;;  %4811 = vmatmul.bf16.gmra.mxu3 %v7895_v12  ;;  %6278 = vmatpush.bf16.msra.mxu0 %v9106_v56  ;;  %v3712_v37 = vld [vmem:[#allocation3 + $0xf8] sm:$0xff] }
 0x49f   : > { %vm3873_vm15 = vcmp.ge.s32.totalorder %v3712_v37, 2  ;;  %vm4066_vm3 = vcmp.lt.s32.totalorder %v3712_v37, 14  ;;  %5550 = vmatpush.bf16.msrb.mxu2 %v9047_v44  ;;  %v8106_v37 = vld [vmem:[#allocation2 + $0x48] sm:$0xf] }
 0x4a0   : > { %3966 = vst [vmem:[#allocation2 + $0x180] sm:$0xf] %v3934_v36  ;;  %v3678_v35 = vmax.f32 %v3646_v43, 0.0  ;;  %v7994_v20 = vld [vmem:[#allocation2 + $0x170] sm:$0xf]  ;;  %v11976_v36 = vld [vmem:[#allocation35_spill] sm:$0xff]  ;;  %v11140_v43 = vpop.f32.mrf.mxu0 }
 0x4a1   : > { %4158 = vst [vmem:[#allocation2 + $0x17c] sm:$0xf] %v4126_v24  ;;  %v3434_v11 = vpop.f32.mrf.mxu3 }
 0x4a2   : > { %v3742_v49 = vpack.c.bf16 %v3678_v35, %v3678_v35  ;;  %v3806_v19 = vrot.slane %v3678_v35, 6  ;;  %v3999_v7 = vrot.slane %v3678_v35, 2  ;;  %v3524_v63 = vadd.f32 %v10939_v39, %v3434_v11  ;;  %11977 = vst [vmem:[#allocation29_spill] sm:$0xff] %v11140_v43  ;;  %v9255_v35 = vld [vmem:[#allocation3] sm:$0xff]  ;;  %v8396_v43 = vld [vmem:[#allocation2 + $0x84] sm:$0xf0] }
 0x4a3   : > { %vm3842_vm14 = vcmp.ge.s32.totalorder %v9255_v35, 2 }
 0x4a4   : > { %3774 = vst [vmem:[#allocation2 + $0x190] sm:$0xf] %v3742_v49  ;;  %v3812_v50 = vsel %vm3809_vm0, %v3805_v6, %v3806_v19  ;;  %v4005_v54 = vsel %vm4002_vm10, %v3998_v57, %v3999_v7  ;;  %v3613_v40 = vadd.f32 %v3612_v3, %v3524_v63  ;;  %v9035_v57 = vld [vmem:[#allocation11 + $0xc8] sm:$0xff] }
 0x4a5   : > { %v3903_v13 = vsel %vm3871_vm2, %v3812_v50, 0.0  ;;  %v4095_v39 = vsel %vm4063_vm11, %v4005_v54, 0.0  ;;  %5465 = vmatpush.bf16.msrb.mxu1 %v9035_v57 }
 0x4a6   : > { %v3935_v1 = vpack.c.bf16 %v3903_v13, %v3903_v13  ;;  %v4127_v38 = vpack.c.bf16 %v4095_v39, %v4095_v39  ;;  %v3647_v47 = vadd.f32 %v3613_v40, %v11975_v62  ;;  %v9059_v62 = vld [vmem:[#allocation2 + $0x68] sm:$0xf0] }
 0x4a8   : > { %3967 = vst [vmem:[#allocation2 + $0x18c] sm:$0xf] %v3935_v1  ;;  %v3679_v53 = vmax.f32 %v3647_v47, 0.0  ;;  %v8961_v29 = vld [vmem:[#allocation2 + $0x178] sm:$0xf0] }
 0x4a9   : > { %4159 = vst [vmem:[#allocation2 + $0x188] sm:$0xf] %v4127_v38  ;;  %v3436_v61 = vpop.f32.mrf.mxu3  ;;  %v7995_v6 = vor.u32 %v8961_v29, %v7994_v20  ;;  %v11156_v20 = vpop.f32.mrf.mxu0  ;;  %v7916_v29 = vld [vmem:[#allocation2 + $0xe4] sm:$0xf0] }
 0x4aa   : > { %v3743_v27 = vpack.c.bf16 %v3679_v53, %v3679_v53  ;;  %v3807_v4 = vrot.slane %v3679_v53, 6  ;;  %v4000_v12 = vrot.slane %v3679_v53, 2  ;;  %v3526_v45 = vadd.f32 %v10953_v8, %v3436_v61  ;;  %v9034_v8 = vld [vmem:[#allocation11 + $0xc0] sm:$0xff]  ;;  %11981 = vst [vmem:[#allocation38_spill] sm:$0xff] %v11156_v20  ;;  %v8921_v61 = vld [vmem:[#allocation2 + $0x38] sm:$0xf0] }
 0x4ab   : > { %4940 = vmatmul.bf16.gmra.mxu0 %v7995_v6  ;;  %5466 = vmatpush.bf16.msrb.mxu1 %v9034_v8  ;;  %v8383_v53 = vor.u32 %v9059_v62, %v8382_v2  ;;  %v7919_v56 = vor.u32 %v8941_v26, %v7916_v29  ;;  %v9046_v62 = vld [vmem:[#allocation11 + $0x120] sm:$0xff]  ;;  %v8418_v2 = vld [vmem:[#allocation2 + $0xa8] sm:$0xf]  ;;  %v7952_v26 = vld [vmem:[#allocation2 + $0x12c] sm:$0xf0] }
 0x4ac   : > { %3775 = vst [vmem:[#allocation2 + $0x19c] sm:$0xf] %v3743_v27  ;;  %v3811_v21 = vsel %vm3809_vm0, %v3806_v19, %v3807_v4  ;;  %v4004_v14 = vsel %vm4002_vm10, %v3999_v7, %v4000_v12  ;;  %v3615_v16 = vadd.f32 %v3614_v9, %v3526_v45  ;;  %v11978_v19 = vld [vmem:[#allocation21_spill] sm:$0xff]  ;;  %5551 = vmatpush.bf16.msrb.mxu2 %v9046_v62  ;;  %v9052_v62 = vld [vmem:[#allocation11 + $0x150] sm:$0xff] }
 0x4ad   : > { %v3904_v17 = vsel %vm3872_vm12, %v3811_v21, 0.0  ;;  %v4096_v34 = vsel %vm4064_vm13, %v4004_v14, 0.0  ;;  %v11979_v7 = vrot.slane %v11978_v19, 6  ;;  %v11980_v52 = vrot.slane %v11978_v19, 2  ;;  %v8987_v27 = vld [vmem:[#allocation2 + $0x38] sm:$0xf0] }
 0x4ae   : > { %v3936_v51 = vpack.c.bf16 %v3904_v17, %v3904_v17  ;;  %v4128_v0 = vpack.c.bf16 %v4096_v34, %v4096_v34  ;;  %v3648_v24 = vadd.f32 %v3615_v16, %v11976_v36  ;;  %4816 = vmatmul.bf16.gmra.mxu3 %v7907_v23  ;;  %v9062_v23 = vld [vmem:[#allocation2 + $0x80] sm:$0xf0]  ;;  %v8394_v21 = vld [vmem:[#allocation2 + $0x78] sm:$0xf]  ;;  %v7928_v17 = vld [vmem:[#allocation2 + $0xfc] sm:$0xf0] }
 0x4af   : > { %v8395_v16 = vor.u32 %v9062_v23, %v8394_v21  ;;  %v8944_v34 = vld [vmem:[#allocation2 + $0xf4] sm:$0xf]  ;;  %v9057_v21 = vld [vmem:[#allocation11 + $0x178] sm:$0xff] }
 0x4b0   : > { %3968 = vst [vmem:[#allocation2 + $0x198] sm:$0xf] %v3936_v51  ;;  %v3680_v48 = vmax.f32 %v3648_v24, 0.0  ;;  %v7931_v8 = vor.u32 %v8944_v34, %v7928_v17  ;;  %v8990_v36 = vld [vmem:[#allocation2 + $0x50] sm:$0xf0]  ;;  %5637 = vmatpush.bf16.msra.mxu3 %v9057_v21 }
 0x4b1   : > { %4160 = vst [vmem:[#allocation2 + $0x194] sm:$0xf] %v4128_v0  ;;  %v11142_v3 = vpop.f32.mrf.mxu3  ;;  %v11162_v9 = vpop.f32.mrf.mxu0  ;;  %v8924_v0 = vld [vmem:[#allocation2 + $0x50] sm:$0xf0]  ;;  %v7842_v24 = vld [vmem:[#allocation2 + $0x48] sm:$0xf]  ;;  %v8107_v35 = vor.u32 %v8990_v36, %v8106_v37 }
 0x4b2   : > { %v3744_v10 = vpack.c.bf16 %v3680_v48, %v3680_v48  ;;  %v3808_v11 = vrot.slane %v3680_v48, 6  ;;  %v4001_v32 = vrot.slane %v3680_v48, 2  ;;  %11983 = vst [vmem:[#allocation31_spill] sm:$0xff] %v11162_v9  ;;  %v7843_v48 = vor.u32 %v8924_v0, %v7842_v24  ;;  %v9056_v17 = vld [vmem:[#allocation11 + $0x170] sm:$0xff]  ;;  %v8430_v0 = vld [vmem:[#allocation2 + $0xc0] sm:$0xf] }
 0x4b3   : > { %v9055_v36 = vld [vmem:[#allocation11 + $0x168] sm:$0xff] }
 0x4b4   : > { %3776 = vst [vmem:[#allocation2 + $0x1a8] sm:$0xf] %v3744_v10  ;;  %v3810_v49 = vsel %vm3809_vm0, %v3807_v4, %v3808_v11  ;;  %v3841_v63 = vsel %vm3809_vm0, %v3808_v11, %v11979_v7  ;;  %v4003_v41 = vsel %vm4002_vm10, %v4000_v12, %v4001_v32  ;;  %v4034_v50 = vsel %vm4002_vm10, %v4001_v32, %v11980_v52  ;;  %v9065_v11 = vld [vmem:[#allocation2 + $0x98] sm:$0xf0]  ;;  %v7890_v21 = vld [vmem:[#allocation2 + $0xa8] sm:$0xf] }
 0x4b5   : > { %v3874_v54 = vsel %vm3842_vm14, %v3841_v63, 0.0  ;;  %v3905_v40 = vsel %vm3873_vm15, %v3810_v49, 0.0  ;;  %v4097_v13 = vsel %vm4065_vm1, %v4003_v41, 0.0  ;;  %v4098_v39 = vsel %vm4066_vm3, %v4034_v50, 0.0  ;;  %v8406_v49 = vld [vmem:[#allocation2 + $0x90] sm:$0xf]  ;;  %5638 = vmatpush.bf16.msra.mxu3 %v9056_v17 }
 0x4b6   : > { %v3906_v55 = vpack.c.bf16 %v3874_v54, %v3874_v54  ;;  %v3937_v1 = vpack.c.bf16 %v3905_v40, %v3905_v40  ;;  %v4129_v38 = vpack.c.bf16 %v4097_v13, %v4097_v13  ;;  %v4130_v47 = vpack.c.bf16 %v4098_v39, %v4098_v39  ;;  %v7940_v63 = vld [vmem:[#allocation2 + $0x114] sm:$0xf0]  ;;  %v8947_v41 = vld [vmem:[#allocation2 + $0x10c] sm:$0xf]  ;;  %v7854_v40 = vld [vmem:[#allocation2 + $0x60] sm:$0xf] }
 0x4b7   : > { %v8407_v7 = vor.u32 %v9065_v11, %v8406_v49  ;;  %v7943_v52 = vor.u32 %v8947_v41, %v7940_v63  ;;  %v8927_v50 = vld [vmem:[#allocation2 + $0x68] sm:$0xf0]  ;;  %v8118_v13 = vld [vmem:[#allocation2 + $0x60] sm:$0xf]  ;;  %v8999_v63 = vld [vmem:[#allocation2 + $0x98] sm:$0xf0] }
 0x4b8   : > { %3938 = vst [vmem:[#allocation2 + $0x30] sm:$0xf] %v3906_v55  ;;  %v8993_v54 = vld [vmem:[#allocation2 + $0x68] sm:$0xf0]  ;;  %v7855_v39 = vor.u32 %v8927_v50, %v7854_v40  ;;  %v9054_v11 = vld [vmem:[#allocation11 + $0x160] sm:$0xff] }
 0x4b9   : > { %3969 = vst [vmem:[#allocation2 + $0x1a4] sm:$0xf] %v3937_v1  ;;  %v11158_v31 = vpop.f32.mrf.mxu3  ;;  %v11166_v51 = vpop.f32.mrf.mxu0  ;;  %v8119_v55 = vor.u32 %v8993_v54, %v8118_v13  ;;  %5639 = vmatpush.bf16.msra.mxu3 %v9055_v36  ;;  %v8142_v50 = vld [vmem:[#allocation2 + $0x90] sm:$0xf]  ;;  %v9053_v13 = vld [vmem:[#allocation11 + $0x158] sm:$0xff] }
 0x4ba   : > { %11982 = vst [vmem:[#allocation24_spill] sm:$0xff] %v11158_v31  ;;  %v8143_v40 = vor.u32 %v8999_v63, %v8142_v50  ;;  %v8154_v17 = vld [vmem:[#allocation2 + $0xa8] sm:$0xf]  ;;  %v8959_v63 = vld [vmem:[#allocation2 + $0x16c] sm:$0xf] }
 0x4bb   : > { %4161 = vst [vmem:[#allocation2 + $0x1a0] sm:$0xf] %v4129_v38  ;;  %6279 = vmatmul.bf16.vlgmr.msra.gmra.mxu0 %v8383_v53 }
 0x4bc   : > { %4162 = vst [vmem:[#allocation2 + $0x1ac] sm:$0xf] %v4130_v47  ;;  %v9068_v47 = vld [vmem:[#allocation2 + $0xb0] sm:$0xf0] }
 0x4bd   : > { %11985 = vst [vmem:[#allocation34_spill] sm:$0xff] %v11166_v51  ;;  %v8419_v29 = vor.u32 %v9068_v47, %v8418_v2  ;;  %5640 = vmatpush.bf16.msra.mxu3 %v9054_v11  ;;  %v9074_v47 = vld [vmem:[#allocation2 + $0xe0] sm:$0xf0]  ;;  %v8442_v2 = vld [vmem:[#allocation2 + $0xd8] sm:$0xf]  ;;  %v9116_v51 = vld [vmem:[#allocation11 + $0x1d0] sm:$0xff] }
 0x4be   : > { %4821 = vmatmul.bf16.gmra.mxu3 %v7919_v56 }
 0x4bf   : > { %v7830_v6 = vld [vmem:[#allocation2 + $0x30] sm:$0xf] }
 0x4c0   : > { %v8094_v57 = vld [vmem:[#allocation2 + $0x30] sm:$0xf]  ;;  %v7831_v4 = vor.u32 %v8921_v61, %v7830_v6  ;;  %v8950_v61 = vld [vmem:[#allocation2 + $0x124] sm:$0xf] }
 0x4c1   : > { %v8095_v12 = vor.u32 %v8987_v27, %v8094_v57  ;;  %v11160_v45 = vpop.f32.mrf.mxu3  ;;  %v11170_v32 = vpop.f32.mrf.mxu0  ;;  %v7955_v6 = vor.u32 %v8950_v61, %v7952_v26  ;;  %v8930_v57 = vld [vmem:[#allocation2 + $0x80] sm:$0xf0]  ;;  %5641 = vmatpush.bf16.msra.mxu3 %v9053_v13 }
 0x4c2   : > { %4697 = vmatmul.bf16.gmra.mxu2 %v7831_v4  ;;  %11986 = vst [vmem:[#allocation28_spill] sm:$0xff] %v11170_v32  ;;  %v8996_v27 = vld [vmem:[#allocation2 + $0x80] sm:$0xf0]  ;;  %v7866_v4 = vld [vmem:[#allocation2 + $0x78] sm:$0xf] }
 0x4c3   : > { %5467 = vmatmul.bf16.vlgmr.msrb.gmra.mxu1 %v8095_v12  ;;  %v8130_v12 = vld [vmem:[#allocation2 + $0x78] sm:$0xf]  ;;  %v7867_v44 = vor.u32 %v8930_v57, %v7866_v4  ;;  %v7976_v57 = vld [vmem:[#allocation2 + $0x15c] sm:$0xf0]  ;;  %v7986_v32 = vld [vmem:[#allocation2 + $0x168] sm:$0xf] }
 0x4c4   : > { %v8131_v23 = vor.u32 %v8996_v27, %v8130_v12  ;;  %v8956_v27 = vld [vmem:[#allocation2 + $0x154] sm:$0xf]  ;;  %v9050_v4 = vld [vmem:[#allocation11 + $0x140] sm:$0xff] }
 0x4c5   : > { %5642 = vmatpush.bf16.msra.mxu3 %v9052_v62  ;;  %v7979_v12 = vor.u32 %v8956_v27, %v7976_v57  ;;  %v8166_v62 = vld [vmem:[#allocation2 + $0xc0] sm:$0xf]  ;;  %v9080_v57 = vld [vmem:[#allocation2 + $0x110] sm:$0xf0] }
 0x4c9   : > { %v11164_v14 = vpop.f32.mrf.mxu3  ;;  %v11174_v1 = vpop.f32.mrf.mxu0 }
 0x4ca   : > { %11984 = vst [vmem:[#allocation26_spill] sm:$0xff] %v11164_v14  ;;  %v8126_v14 = vld [vmem:[#allocation2 + $0x68] sm:$0xf] }
 0x4cb   : > { %6284 = vmatmul.bf16.gmra.mxu0 %v8395_v16  ;;  %11987 = vst [vmem:[#allocation36_spill] sm:$0xff] %v11174_v1 }
 0x4ce   : > { %4826 = vmatmul.bf16.gmra.mxu3 %v7931_v8  ;;  %v9071_v8 = vld [vmem:[#allocation2 + $0xc8] sm:$0xf0] }
 0x4cf   : > { %v8431_v37 = vor.u32 %v9071_v8, %v8430_v0 }
 0x4d1   : > { %v11168_v10 = vpop.f32.mrf.mxu3  ;;  %v11180_v56 = vpop.f32.mrf.mxu0 }
 0x4d2   : > { %4702 = vmatmul.bf16.gmra.mxu2 %v7843_v48  ;;  %11988 = vst [vmem:[#allocation32_spill] sm:$0xff] %v11180_v56  ;;  %v7964_v48 = vld [vmem:[#allocation2 + $0x144] sm:$0xf0] }
 0x4d3   : > { %5472 = vmatmul.bf16.gmra.mxu1 %v8107_v35  ;;  %v8953_v35 = vld [vmem:[#allocation2 + $0x13c] sm:$0xf] }
 0x4d4   : > { %v7967_v49 = vor.u32 %v8953_v35, %v7964_v48  ;;  %v9077_v48 = vld [vmem:[#allocation2 + $0xf8] sm:$0xf0]  ;;  %v8454_v35 = vld [vmem:[#allocation2 + $0xf0] sm:$0xf] }
 0x4d5   : > { %v8455_v11 = vor.u32 %v9077_v48, %v8454_v35  ;;  %v7914_v35 = vld [vmem:[#allocation2 + $0xd8] sm:$0xf] }
 0x4d9   : > { %v11172_v19 = vpop.f32.mrf.mxu3  ;;  %v11184_v34 = vpop.f32.mrf.mxu0 }
 0x4da   : > { %11989 = vst [vmem:[#allocation39_spill] sm:$0xff] %v11184_v34 }
 0x4db   : > { %6289 = vmatmul.bf16.gmra.mxu0 %v8407_v7  ;;  %v8933_v7 = vld [vmem:[#allocation2 + $0x98] sm:$0xf0] }
 0x4de   : > { %4831 = vmatmul.bf16.gmra.mxu3 %v7943_v52  ;;  %v7878_v52 = vld [vmem:[#allocation2 + $0x90] sm:$0xf] }
 0x4df   : > { %v7879_v54 = vor.u32 %v8933_v7, %v7878_v52 }
 0x4e1   : > { %v11176_v38 = vpop.f32.mrf.mxu3  ;;  %v11188_v41 = vpop.f32.mrf.mxu0 }
 0x4e2   : > { %4707 = vmatmul.bf16.gmra.mxu2 %v7855_v39  ;;  %11990 = vst [vmem:[#allocation40_spill] sm:$0xff] %v11188_v41 }
 0x4e3   : > { %5477 = vmatmul.bf16.gmra.mxu1 %v8119_v55  ;;  %v9045_v55 = vld [vmem:[#allocation11 + $0x118] sm:$0xff] }
 0x4e4   : > { %5552 = vmatpush.bf16.msrb.mxu2 %v9045_v55  ;;  %v7902_v55 = vld [vmem:[#allocation2 + $0xc0] sm:$0xf] }
 0x4e9   : > { %v11178_v53 = vpop.f32.mrf.mxu3  ;;  %v11192_v26 = vpop.f32.mrf.mxu0 }
 0x4ea   : > { %11991 = vst [vmem:[#allocation41_spill] sm:$0xff] %v11192_v26  ;;  %v8150_v26 = vld [vmem:[#allocation2 + $0x98] sm:$0xf] }
 0x4eb   : > { %6294 = vmatmul.bf16.gmra.mxu0 %v8419_v29  ;;  %v9051_v29 = vld [vmem:[#allocation11 + $0x148] sm:$0xff] }
 0x4ec   : > { %5643 = vmatpush.bf16.msra.mxu3 %v9051_v29  ;;  %v9044_v29 = vld [vmem:[#allocation11 + $0x110] sm:$0xff] }
 0x4ed   : > { %5553 = vmatpush.bf16.msrb.mxu2 %v9044_v29 }
 0x4ee   : > { %4836 = vmatmul.bf16.gmra.mxu3 %v7955_v6  ;;  %v8443_v6 = vor.u32 %v9074_v47, %v8442_v2 }
 0x4f0   : > { %5644 = vmatpush.bf16.msra.mxu3 %v9050_v4  ;;  %v8466_v4 = vld [vmem:[#allocation2 + $0x108] sm:$0xf] }
 0x4f1   : > { %v11182_v16 = vpop.f32.mrf.mxu3 }
 0x4f2   : > { %4712 = vmatmul.bf16.gmra.mxu2 %v7867_v44  ;;  %v8936_v44 = vld [vmem:[#allocation2 + $0xb0] sm:$0xf0] }
 0x4f3   : > { %5482 = vmatmul.bf16.gmra.mxu1 %v8131_v23  ;;  %v9002_v23 = vld [vmem:[#allocation2 + $0xb0] sm:$0xf0]  ;;  %v7891_v8 = vor.u32 %v8936_v44, %v7890_v21  ;;  %v8467_v44 = vor.u32 %v9080_v57, %v8466_v4  ;;  %v8102_v21 = vld [vmem:[#allocation2 + $0x38] sm:$0xf]  ;;  %v8114_v57 = vld [vmem:[#allocation2 + $0x50] sm:$0xf] }
 0x4f4   : > { %v8155_v0 = vor.u32 %v9002_v23, %v8154_v17  ;;  %v8988_v23 = vld [vmem:[#allocation2 + $0x40] sm:$0xf0] }
 0x4f5   : > { %v8103_v17 = vor.u32 %v8988_v23, %v8102_v21  ;;  %v8945_v23 = vld [vmem:[#allocation2 + $0xf8] sm:$0xf0] }
 0x4f6   : > { %v9011_v21 = vld [vmem:[#allocation2 + $0xf8] sm:$0xf0] }
 0x4f9   : > { %v11186_v24 = vpop.f32.mrf.mxu3 }
 0x4fb   : > { %6299 = vmatmul.bf16.gmra.mxu0 %v8431_v37  ;;  %v11198_v37 = vpop.f32.mrf.mxu0 }
 0x4fc   : > { %11993 = vst [vmem:[#allocation49_spill] sm:$0xff] %v11198_v37 }
 0x4fe   : > { %4841 = vmatmul.bf16.gmra.mxu3 %v7967_v49  ;;  %v7988_v49 = vld [vmem:[#allocation2 + $0x174] sm:$0xf0] }
 0x4ff   : > { %v7991_v52 = vor.u32 %v8959_v63, %v7988_v49 }
 0x501   : > { %v11190_v39 = vpop.f32.mrf.mxu3  ;;  %v11204_v13 = vpop.f32.mrf.mxu2 }
 0x502   : > { %4717 = vmatmul.bf16.gmra.mxu2 %v7879_v54  ;;  %v8939_v54 = vld [vmem:[#allocation2 + $0xc8] sm:$0xf0] }
 0x503   : > { %5487 = vmatmul.bf16.gmra.mxu1 %v8143_v40  ;;  %v11202_v50 = vpop.f32.mrf.mxu0  ;;  %v9005_v40 = vld [vmem:[#allocation2 + $0xc8] sm:$0xf0]  ;;  %v7903_v47 = vor.u32 %v8939_v54, %v7902_v55 }
 0x504   : > { %11995 = vst [vmem:[#allocation44_spill] sm:$0xff] %v11202_v50  ;;  %v8167_v2 = vor.u32 %v9005_v40, %v8166_v62  ;;  %v9083_v40 = vld [vmem:[#allocation2 + $0x128] sm:$0xf0]  ;;  %v8478_v62 = vld [vmem:[#allocation2 + $0x120] sm:$0xf] }
 0x505   : > { %v9000_v50 = vld [vmem:[#allocation2 + $0xa0] sm:$0xf0] }
 0x509   : > { %v11194_v61 = vpop.f32.mrf.mxu3 }
 0x50b   : > { %6304 = vmatmul.bf16.gmra.mxu0 %v8443_v6  ;;  %v11208_v27 = vpop.f32.mrf.mxu0 }
 0x50c   : > { %11997 = vst [vmem:[#allocation18_spill] sm:$0xff] %v11208_v27 }
 0x50e   : > { %4846 = vmatmul.bf16.gmra.mxu3 %v7979_v12  ;;  %v11210_v12 = vpop.f32.mrf.mxu2 }
 0x50f   : > { %11998 = vst [vmem:[#allocation46_spill] sm:$0xff] %v11210_v12 }
 0x511   : > { %v11196_v36 = vpop.f32.mrf.mxu3 }
 0x512   : > { %11992 = vst [vmem:[#allocation42_spill] sm:$0xff] %v11196_v36  ;;  %4722 = vmatmul.bf16.gmra.mxu2 %v7891_v8  ;;  %v8942_v8 = vld [vmem:[#allocation2 + $0xe0] sm:$0xf0]  ;;  %v9079_v36 = vld [vmem:[#allocation2 + $0x10c] sm:$0xf] }
 0x513   : > { %5492 = vmatmul.bf16.gmra.mxu1 %v8155_v0  ;;  %v9008_v0 = vld [vmem:[#allocation2 + $0xe0] sm:$0xf0]  ;;  %v7915_v49 = vor.u32 %v8942_v8, %v7914_v35  ;;  %v7926_v8 = vld [vmem:[#allocation2 + $0xf0] sm:$0xf] }
 0x514   : > { %v7927_v35 = vor.u32 %v8945_v23, %v7926_v8 }
 0x516   : > { %v11216_v54 = vpop.f32.mrf.mxu2 }
 0x519   : > { %v11200_v7 = vpop.f32.mrf.mxu3 }
 0x51a   : > { %11994 = vst [vmem:[#allocation43_spill] sm:$0xff] %v11200_v7  ;;  %v8432_v7 = vld [vmem:[#allocation2 + $0xcc] sm:$0xf0] }
 0x51b   : > { %6309 = vmatmul.bf16.gmra.mxu0 %v8455_v11  ;;  %v8178_v11 = vld [vmem:[#allocation2 + $0xd8] sm:$0xf] }
 0x51c   : > { %v8179_v63 = vor.u32 %v9008_v0, %v8178_v11  ;;  %v8190_v0 = vld [vmem:[#allocation2 + $0xf0] sm:$0xf] }
 0x51d   : > { %v8191_v11 = vor.u32 %v9011_v21, %v8190_v0  ;;  %v8127_v21 = vor.u32 %v8994_v25, %v8126_v14  ;;  %v8948_v0 = vld [vmem:[#allocation2 + $0x110] sm:$0xf0]  ;;  %v9089_v25 = vld [vmem:[#allocation2 + $0x158] sm:$0xf0] }
 0x51e   : > { %4851 = vmatmul.bf16.gmra.mxu3 %v7991_v52  ;;  %v11214_v52 = vpop.f32.mrf.mxu0 }
 0x51f   : > { %12000 = vst [vmem:[#allocation48_spill] sm:$0xff] %v11214_v52 }
 0x521   : > { %v11206_v6 = vpop.f32.mrf.mxu3 }
 0x522   : > { %4727 = vmatmul.bf16.gmra.mxu2 %v7903_v47  ;;  %11996 = vst [vmem:[#allocation45_spill] sm:$0xff] %v11206_v6  ;;  %v8479_v47 = vor.u32 %v9083_v40, %v8478_v62  ;;  %v8384_v6 = vld [vmem:[#allocation2 + $0x6c] sm:$0xf0] }
 0x523   : > { %5497 = vmatmul.bf16.gmra.mxu1 %v8167_v2  ;;  %v8991_v2 = vld [vmem:[#allocation2 + $0x58] sm:$0xf0] }
 0x524   : > { %v8115_v4 = vor.u32 %v8991_v2, %v8114_v57  ;;  %v8490_v57 = vld [vmem:[#allocation2 + $0x138] sm:$0xf] }
 0x526   : > { %v11220_v29 = vpop.f32.mrf.mxu0 }
 0x527   : > { %12002 = vst [vmem:[#allocation51_spill] sm:$0xff] %v11220_v29  ;;  %v8138_v29 = vld [vmem:[#allocation2 + $0x80] sm:$0xf] }
 0x529   : > { %v11212_v48 = vpop.f32.mrf.mxu3 }
 0x52a   : > { %11999 = vst [vmem:[#allocation47_spill] sm:$0xff] %v11212_v48  ;;  %v9128_v48 = vld [vmem:[#allocation11 + $0x230] sm:$0xff] }
 0x52b   : > { %6314 = vmatmul.bf16.gmra.mxu0 %v8467_v44  ;;  %v11222_v44 = vpop.f32.mrf.mxu2 }
 0x52c   : > { %12003 = vst [vmem:[#allocation52_spill] sm:$0xff] %v11222_v44  ;;  %v7938_v44 = vld [vmem:[#allocation2 + $0x108] sm:$0xf] }
 0x52d   : > { %v7939_v22 = vor.u32 %v8948_v0, %v7938_v44  ;;  %v8951_v44 = vld [vmem:[#allocation2 + $0x128] sm:$0xf0]  ;;  %v8214_v0 = vld [vmem:[#allocation2 + $0x120] sm:$0xf] }
 0x52e   : > { %5645 = vmatmul.bf16.vlgmr.msra.gmra.mxu3 %v8103_v17  ;;  %v11228_v40 = vpop.f32.mrf.mxu0 }
 0x52f   : > { %12005 = vst [vmem:[#allocation19_spill] sm:$0xff] %v11228_v40  ;;  %v8202_v40 = vld [vmem:[#allocation2 + $0x108] sm:$0xf] }
 0x531   : > { %v11218_v55 = vpop.f32.mrf.mxu3 }
 0x532   : > { %4732 = vmatmul.bf16.gmra.mxu2 %v7915_v49  ;;  %12001 = vst [vmem:[#allocation50_spill] sm:$0xff] %v11218_v55 }
 0x533   : > { %5502 = vmatmul.bf16.gmra.mxu1 %v8179_v63  ;;  %v9043_v63 = vld [vmem:[#allocation11 + $0x108] sm:$0xff] }
 0x534   : > { %5554 = vmatpush.bf16.msrb.mxu2 %v9043_v63 }
 0x539   : > { %v11226_v49 = vpop.f32.mrf.mxu3 }
 0x53a   : > { %12004 = vst [vmem:[#allocation30_spill] sm:$0xff] %v11226_v49 }
 0x53b   : > { %6319 = vmatmul.bf16.gmra.mxu0 %v8479_v47  ;;  %v9086_v47 = vld [vmem:[#allocation2 + $0x140] sm:$0xf0] }
 0x53e   : > { %5650 = vmatmul.bf16.gmra.mxu3 %v8115_v4  ;;  %v8491_v4 = vor.u32 %v9086_v47, %v8490_v57 }
 0x540   : > { %v11224_v17 = vpop.f32.mrf.mxu1 }
 0x541   : > { %v11234_v23 = vpop.f32.mrf.mxu3 }
 0x542   : > { %4737 = vmatmul.bf16.gmra.mxu2 %v7927_v35  ;;  %12007 = vst [vmem:[#allocation33_spill] sm:$0xff] %v11234_v23  ;;  %v9014_v35 = vld [vmem:[#allocation2 + $0x110] sm:$0xf0] }
 0x543   : > { %5507 = vmatmul.bf16.gmra.mxu1 %v8191_v11  ;;  %v11238_v11 = vpop.f32.mrf.mxu0  ;;  %v8203_v31 = vor.u32 %v9014_v35, %v8202_v40  ;;  %v7950_v40 = vld [vmem:[#allocation2 + $0x120] sm:$0xf]  ;;  %v9006_v23 = vld [vmem:[#allocation2 + $0xd0] sm:$0xf0] }
 0x544   : > { %12008 = vst [vmem:[#allocation20_spill] sm:$0xff] %v11238_v11  ;;  %v8997_v11 = vld [vmem:[#allocation2 + $0x88] sm:$0xf0] }
 0x545   : > { %v11230_v62 = vpop.f32.mrf.mxu2  ;;  %v8139_v12 = vor.u32 %v8997_v11, %v8138_v29  ;;  %v9092_v11 = vld [vmem:[#allocation2 + $0x170] sm:$0xf0] }
 0x548   : > { %v11232_v2 = vpop.f32.mrf.mxu1 }
 0x549   : > { %12006 = vst [vmem:[#allocation23_spill] sm:$0xff] %v11232_v2  ;;  %v11244_v57 = vpop.f32.mrf.mxu3 }
 0x54a   : > { %12009 = vst [vmem:[#allocation25_spill] sm:$0xff] %v11244_v57 }
 0x54b   : > { %6324 = vmatmul.bf16.gmra.mxu0 %v8491_v4  ;;  %v8502_v4 = vld [vmem:[#allocation2 + $0x150] sm:$0xf]  ;;  %v11248_v2 = vpop.f32.mrf.mxu0 }
 0x54c   : > { %12011 = vst [vmem:[#allocation21_spill] sm:$0xff] %v11248_v2 }
 0x54d   : > { %v11236_v8 = vpop.f32.mrf.mxu2 }
 0x54e   : > { %5655 = vmatmul.bf16.gmra.mxu3 %v8127_v21  ;;  %v8503_v21 = vor.u32 %v9089_v25, %v8502_v4  ;;  %v9042_v25 = vld [vmem:[#allocation11 + $0x100] sm:$0xff] }
 0x54f   : > { %5555 = vmatpush.bf16.msrb.mxu2 %v9042_v25  ;;  %v8226_v25 = vld [vmem:[#allocation2 + $0x138] sm:$0xf] }
 0x550   : > { %v11240_v63 = vpop.f32.mrf.mxu1 }
 0x551   : > { %v11254_v35 = vpop.f32.mrf.mxu3 }
 0x552   : > { %4742 = vmatmul.bf16.gmra.mxu2 %v7939_v22  ;;  %v9017_v22 = vld [vmem:[#allocation2 + $0x128] sm:$0xf0]  ;;  %12012 = vst [vmem:[#allocation53_spill] sm:$0xff] %v11254_v35 }
 0x553   : > { %5512 = vmatmul.bf16.gmra.mxu1 %v8203_v31  ;;  %v8215_v27 = vor.u32 %v9017_v22, %v8214_v0  ;;  %v11256_v4 = vpop.f32.mrf.mxu0  ;;  %v7962_v0 = vld [vmem:[#allocation2 + $0x138] sm:$0xf] }
 0x554   : > { %12013 = vst [vmem:[#allocation54_spill] sm:$0xff] %v11256_v4 }
 0x555   : > { %v11242_v47 = vpop.f32.mrf.mxu2 }
 0x558   : > { %v11246_v14 = vpop.f32.mrf.mxu1 }
 0x559   : > { %12010 = vst [vmem:[#allocation35_spill] sm:$0xff] %v11246_v14  ;;  %v7951_v14 = vor.u32 %v8951_v44, %v7950_v40  ;;  %v11262_v37 = vpop.f32.mrf.mxu3  ;;  %v8151_v44 = vor.u32 %v9000_v50, %v8150_v26  ;;  %v9020_v40 = vld [vmem:[#allocation2 + $0x140] sm:$0xf0]  ;;  %v9095_v26 = vld [vmem:[#allocation2 + $0x188] sm:$0xf0] }
 0x55a   : > { %12014 = vst [vmem:[#allocation55_spill] sm:$0xff] %v11262_v37  ;;  %v8227_v34 = vor.u32 %v9020_v40, %v8226_v25  ;;  %v9003_v37 = vld [vmem:[#allocation2 + $0xb8] sm:$0xf0]  ;;  %v7974_v40 = vld [vmem:[#allocation2 + $0x150] sm:$0xf] }
 0x55b   : > { %6329 = vmatmul.bf16.gmra.mxu0 %v8503_v21  ;;  %v11264_v22 = vpop.f32.mrf.mxu0 }
 0x55c   : > { %12015 = vst [vmem:[#allocation56_spill] sm:$0xff] %v11264_v22 }
 0x55d   : > { %v11250_v52 = vpop.f32.mrf.mxu2 }
 0x55e   : > { %5660 = vmatmul.bf16.gmra.mxu3 %v8139_v12  ;;  %v8514_v12 = vld [vmem:[#allocation2 + $0x168] sm:$0xf] }
 0x55f   : > { %v8515_v2 = vor.u32 %v9092_v11, %v8514_v12  ;;  %v8526_v12 = vld [vmem:[#allocation2 + $0x180] sm:$0xf] }
 0x560   : > { %v11252_v31 = vpop.f32.mrf.mxu1  ;;  %v8527_v22 = vor.u32 %v9095_v26, %v8526_v12  ;;  %v9129_v26 = vld [vmem:[#allocation11 + $0x238] sm:$0xff] }
 0x561   : > { %v11270_v11 = vpop.f32.mrf.mxu3  ;;  %v9121_v12 = vld [vmem:[#allocation11 + $0x1f8] sm:$0xff]  ;;  %6449 = vmatpush.bf16.msra.mxu2 %v9129_v26  ;;  %v8960_v26 = vld [vmem:[#allocation2 + $0x170] sm:$0xf0] }
 0x562   : > { %4747 = vmatmul.bf16.gmra.mxu2 %v7951_v14  ;;  %v8954_v14 = vld [vmem:[#allocation2 + $0x140] sm:$0xf0]  ;;  %12016 = vst [vmem:[#allocation57_spill] sm:$0xff] %v11270_v11  ;;  %6360 = vmatpush.bf16.msra.mxu1 %v9121_v12  ;;  %v9026_v12 = vld [vmem:[#allocation2 + $0x170] sm:$0xf0]  ;;  %v7987_v49 = vor.u32 %v8960_v26, %v7986_v32 }
 0x563   : > { %5517 = vmatmul.bf16.gmra.mxu1 %v8215_v27  ;;  %v7963_v41 = vor.u32 %v8954_v14, %v7962_v0  ;;  %v11274_v50 = vpop.f32.mrf.mxu0  ;;  %v8957_v14 = vld [vmem:[#allocation2 + $0x158] sm:$0xf0]  ;;  %v8238_v0 = vld [vmem:[#allocation2 + $0x150] sm:$0xf]  ;;  %v8096_v26 = vld [vmem:[#allocation2 + $0x3c] sm:$0xf0] }
 0x564   : > { %12017 = vst [vmem:[#allocation58_spill] sm:$0xff] %v11274_v50  ;;  %v7975_v25 = vor.u32 %v8957_v14, %v7974_v40  ;;  %v9120_v14 = vld [vmem:[#allocation11 + $0x1f0] sm:$0xff]  ;;  %v8174_v40 = vld [vmem:[#allocation2 + $0xc8] sm:$0xf] }
 0x565   : > { %v11258_v29 = vpop.f32.mrf.mxu2  ;;  %6450 = vmatpush.bf16.msra.mxu2 %v9128_v48 }
 0x566   : > { %6361 = vmatpush.bf16.msra.mxu1 %v9120_v14 }
 0x568   : > { %v11260_v21 = vpop.f32.mrf.mxu1 }
 0x56b   : > { %6334 = vmatmul.bf16.gmra.mxu0 %v8515_v2  ;;  %v11282_v50 = vpop.f32.mrf.mxu0 }
 0x56c   : > { %12019 = vst [vmem:[#allocation60_spill] sm:$0xff] %v11282_v50 }
 0x56d   : > { %v11266_v27 = vpop.f32.mrf.mxu2 }
 0x56e   : > { %5665 = vmatmul.bf16.gmra.mxu3 %v8151_v44  ;;  %v8162_v44 = vld [vmem:[#allocation2 + $0xb0] sm:$0xf] }
 0x56f   : > { %v8163_v56 = vor.u32 %v9003_v37, %v8162_v44  ;;  %v9098_v44 = vld [vmem:[#allocation2 + $0x1a0] sm:$0xf0] }
 0x570   : > { %v11268_v4 = vpop.f32.mrf.mxu1 }
 0x572   : > { %4752 = vmatmul.bf16.gmra.mxu2 %v7963_v41  ;;  %v9023_v41 = vld [vmem:[#allocation2 + $0x158] sm:$0xf0] }
 0x573   : > { %5522 = vmatmul.bf16.gmra.mxu1 %v8227_v34  ;;  %v11280_v34 = vpop.f32.mrf.mxu3  ;;  %v8239_v11 = vor.u32 %v9023_v41, %v8238_v0  ;;  %v11290_v41 = vpop.f32.mrf.mxu0  ;;  %v9119_v0 = vld [vmem:[#allocation11 + $0x1e8] sm:$0xff] }
 0x574   : > { %12018 = vst [vmem:[#allocation59_spill] sm:$0xff] %v11280_v34  ;;  %6362 = vmatpush.bf16.msra.mxu1 %v9119_v0 }
 0x575   : > { %v11272_v2 = vpop.f32.mrf.mxu2  ;;  %12022 = vst [vmem:[#allocation63_spill] sm:$0xff] %v11290_v41  ;;  %v9009_v41 = vld [vmem:[#allocation2 + $0xe8] sm:$0xf0] }
 0x578   : > { %v11276_v35 = vpop.f32.mrf.mxu1 }
 0x57b   : > { %6339 = vmatmul.bf16.gmra.mxu0 %v8527_v22  ;;  %v11288_v1 = vpop.f32.mrf.mxu3 }
 0x57c   : > { %12021 = vst [vmem:[#allocation62_spill] sm:$0xff] %v11288_v1  ;;  %v8250_v1 = vld [vmem:[#allocation2 + $0x168] sm:$0xf] }
 0x57d   : > { %v11278_v57 = vpop.f32.mrf.mxu2 }
 0x57e   : > { %5670 = vmatmul.bf16.gmra.mxu3 %v8163_v56  ;;  %v8538_v56 = vld [vmem:[#allocation2 + $0x198] sm:$0xf] }
 0x57f   : > { %v8539_v34 = vor.u32 %v9098_v44, %v8538_v56  ;;  %v8251_v44 = vor.u32 %v9026_v12, %v8250_v1  ;;  %v9115_v1 = vld [vmem:[#allocation11 + $0x1c8] sm:$0xff]  ;;  %v8262_v12 = vld [vmem:[#allocation2 + $0x180] sm:$0xf] }
 0x580   : > { %v11284_v22 = vpop.f32.mrf.mxu1 }
 0x582   : > { %4757 = vmatmul.bf16.gmra.mxu2 %v7975_v25 }
 0x583   : > { %5527 = vmatmul.bf16.gmra.mxu1 %v8239_v11  ;;  %v8175_v11 = vor.u32 %v9006_v23, %v8174_v40  ;;  %v11296_v56 = vpop.f32.mrf.mxu3  ;;  %v9117_v23 = vld [vmem:[#allocation11 + $0x1d8] sm:$0xff] }
 0x584   : > { %12024 = vst [vmem:[#allocation65_spill] sm:$0xff] %v11296_v56 }
 0x585   : > { %v11286_v37 = vpop.f32.mrf.mxu2 }
 0x586   : > { %12020 = vst [vmem:[#allocation61_spill] sm:$0xff] %v11286_v37 }
 0x588   : > { %v11294_v50 = vpop.f32.mrf.mxu1 }
 0x58b   : > { %6344 = vmatmul.bf16.gmra.mxu0 %v8539_v34  ;;  %v9118_v34 = vld [vmem:[#allocation11 + $0x1e0] sm:$0xff]  ;;  %v11302_v55 = vpop.f32.mrf.mxu3 }
 0x58c   : > { %6363 = vmatpush.bf16.msra.mxu1 %v9118_v34  ;;  %12026 = vst [vmem:[#allocation67_spill] sm:$0xff] %v11302_v55  ;;  %v8198_v55 = vld [vmem:[#allocation2 + $0xf8] sm:$0xf] }
 0x58d   : > { %v11292_v25 = vpop.f32.mrf.mxu2 }
 0x58e   : > { %12023 = vst [vmem:[#allocation64_spill] sm:$0xff] %v11292_v25  ;;  %5675 = vmatmul.bf16.gmra.mxu3 %v8175_v11  ;;  %v8186_v11 = vld [vmem:[#allocation2 + $0xe0] sm:$0xf] }
 0x58f   : > { %v8187_v32 = vor.u32 %v9009_v41, %v8186_v11  ;;  %v9012_v11 = vld [vmem:[#allocation2 + $0x100] sm:$0xf0]  ;;  %v8456_v25 = vld [vmem:[#allocation2 + $0xfc] sm:$0xf0] }
 0x590   : > { %v11300_v40 = vpop.f32.mrf.mxu1  ;;  %6364 = vmatpush.bf16.msra.mxu1 %v9117_v23  ;;  %v9114_v23 = vld [vmem:[#allocation11 + $0x1c0] sm:$0xff] }
 0x592   : > { %4762 = vmatmul.bf16.gmra.mxu2 %v7987_v49  ;;  %v9029_v49 = vld [vmem:[#allocation2 + $0x188] sm:$0xf0] }
 0x593   : > { %5532 = vmatmul.bf16.gmra.mxu1 %v8251_v44  ;;  %v8986_v44 = vld [vmem:[#allocation2 + $0x34] sm:$0xf]  ;;  %v8263_v34 = vor.u32 %v9029_v49, %v8262_v12  ;;  %v11310_v41 = vpop.f32.mrf.mxu3  ;;  %v8274_v12 = vld [vmem:[#allocation2 + $0x198] sm:$0xf] }
 0x594   : > { %6365 = vmatpush.bf16.msra.mxu1 %v9116_v51  ;;  %v8099_v56 = vor.u32 %v8986_v44, %v8096_v26  ;;  %12029 = vst [vmem:[#allocation70_spill] sm:$0xff] %v11310_v41  ;;  %v8108_v26 = vld [vmem:[#allocation2 + $0x54] sm:$0xf0] }
 0x595   : > { %v11298_v14 = vpop.f32.mrf.mxu2 }
 0x596   : > { %12025 = vst [vmem:[#allocation66_spill] sm:$0xff] %v11298_v14  ;;  %v8992_v14 = vld [vmem:[#allocation2 + $0x64] sm:$0xf] }
 0x598   : > { %6366 = vmatpush.bf16.msra.mxu1 %v9115_v1  ;;  %v11306_v9 = vpop.f32.mrf.mxu1  ;;  %v9032_v1 = vld [vmem:[#allocation2 + $0x1a0] sm:$0xf0] }
 0x59b   : > { %v11316_v44 = vpop.f32.mrf.mxu3 }
 0x59c   : > { %6367 = vmatpush.bf16.msra.mxu1 %v9114_v23  ;;  %12032 = vst [vmem:[#allocation73_spill] sm:$0xff] %v11316_v44  ;;  %v9058_v44 = vld [vmem:[#allocation2 + $0x64] sm:$0xf] }
 0x59d   : > { %v11304_v0 = vpop.f32.mrf.mxu2 }
 0x59e   : > { %12027 = vst [vmem:[#allocation68_spill] sm:$0xff] %v11304_v0  ;;  %5680 = vmatmul.bf16.gmra.mxu3 %v8187_v32  ;;  %v8199_v0 = vor.u32 %v9012_v11, %v8198_v55  ;;  %v8210_v55 = vld [vmem:[#allocation2 + $0x110] sm:$0xf] }
 0x5a0   : > { %v11312_v32 = vpop.f32.mrf.mxu1 }
 0x5a1   : > { %12030 = vst [vmem:[#allocation71_spill] sm:$0xff] %v11312_v32 }
 0x5a2   : > { %5556 = vmatmul.bf16.vlgmr.msrb.gmra.mxu2 %v8099_v56  ;;  %v8989_v56 = vld [vmem:[#allocation2 + $0x4c] sm:$0xf] }
 0x5a3   : > { %5537 = vmatmul.bf16.gmra.mxu1 %v8263_v34  ;;  %v8275_v34 = vor.u32 %v9032_v1, %v8274_v12  ;;  %v8111_v48 = vor.u32 %v8989_v56, %v8108_v26  ;;  %v11322_v20 = vpop.f32.mrf.mxu3  ;;  %v8387_v12 = vor.u32 %v9058_v44, %v8384_v6  ;;  %v9127_v56 = vld [vmem:[#allocation11 + $0x228] sm:$0xff]  ;;  %v8995_v6 = vld [vmem:[#allocation2 + $0x7c] sm:$0xf] }
 0x5a4   : > { %12035 = vst [vmem:[#allocation76_spill] sm:$0xff] %v11322_v20  ;;  %6451 = vmatpush.bf16.msra.mxu2 %v9127_v56  ;;  %v8222_v20 = vld [vmem:[#allocation2 + $0x128] sm:$0xf] }
 0x5a5   : > { %v11308_v51 = vpop.f32.mrf.mxu2 }
 0x5a6   : > { %12028 = vst [vmem:[#allocation69_spill] sm:$0xff] %v11308_v51  ;;  %v9015_v51 = vld [vmem:[#allocation2 + $0x118] sm:$0xf0] }
 0x5a7   : > { %v8211_v11 = vor.u32 %v9015_v51, %v8210_v55  ;;  %v9018_v51 = vld [vmem:[#allocation2 + $0x130] sm:$0xf0] }
 0x5a8   : > { %v11320_v41 = vpop.f32.mrf.mxu1 }
 0x5a9   : > { %12034 = vst [vmem:[#allocation75_spill] sm:$0xff] %v11320_v41  ;;  %v8444_v41 = vld [vmem:[#allocation2 + $0xe4] sm:$0xf0] }
 0x5ad   : > { %v11314_v49 = vpop.f32.mrf.mxu2 }
 0x5ae   : > { %12031 = vst [vmem:[#allocation72_spill] sm:$0xff] %v11314_v49  ;;  %5685 = vmatmul.bf16.gmra.mxu3 %v8199_v0  ;;  %v8120_v0 = vld [vmem:[#allocation2 + $0x6c] sm:$0xf0] }
 0x5af   : > { %v8123_v26 = vor.u32 %v8992_v14, %v8120_v0  ;;  %v9061_v14 = vld [vmem:[#allocation2 + $0x7c] sm:$0xf] }
 0x5b0   : > { %v11326_v1 = vpop.f32.mrf.mxu1  ;;  %v8399_v0 = vor.u32 %v9061_v14, %v8396_v43  ;;  %v9064_v43 = vld [vmem:[#allocation2 + $0x94] sm:$0xf] }
 0x5b1   : > { %12037 = vst [vmem:[#allocation78_spill] sm:$0xff] %v11326_v1 }
 0x5b2   : > { %5561 = vmatmul.bf16.gmra.mxu2 %v8111_v48 }
 0x5b3   : > { %5542 = vmatmul.bf16.gmra.mxu1 %v8275_v34  ;;  %v11328_v34 = vpop.f32.mrf.mxu3 }
 0x5b4   : > { %12038 = vst [vmem:[#allocation79_spill] sm:$0xff] %v11328_v34 }
 0x5b5   : > { %v11318_v23 = vpop.f32.mrf.mxu2 }
 0x5b6   : > { %12033 = vst [vmem:[#allocation74_spill] sm:$0xff] %v11318_v23  ;;  %v8132_v23 = vld [vmem:[#allocation2 + $0x84] sm:$0xf0] }
 0x5b7   : > { %v8135_v44 = vor.u32 %v8995_v6, %v8132_v23  ;;  %v8998_v23 = vld [vmem:[#allocation2 + $0x94] sm:$0xf] }
 0x5b8   : > { %v11332_v55 = vpop.f32.mrf.mxu1 }
 0x5b9   : > { %12040 = vst [vmem:[#allocation81_spill] sm:$0xff] %v11332_v55  ;;  %v8156_v55 = vld [vmem:[#allocation2 + $0xb4] sm:$0xf0] }
 0x5bb   : > { %v11336_v1 = vpop.f32.mrf.mxu3 }
 0x5bc   : > { %12042 = vst [vmem:[#allocation83_spill] sm:$0xff] %v11336_v1  ;;  %v8408_v1 = vld [vmem:[#allocation2 + $0x9c] sm:$0xf0] }
 0x5bd   : > { %v11324_v49 = vpop.f32.mrf.mxu2  ;;  %v8411_v14 = vor.u32 %v9064_v43, %v8408_v1  ;;  %v9001_v1 = vld [vmem:[#allocation2 + $0xac] sm:$0xf] }
 0x5be   : > { %12036 = vst [vmem:[#allocation77_spill] sm:$0xff] %v11324_v49  ;;  %5690 = vmatmul.bf16.gmra.mxu3 %v8211_v11  ;;  %v8223_v49 = vor.u32 %v9018_v51, %v8222_v20  ;;  %v9021_v20 = vld [vmem:[#allocation2 + $0x148] sm:$0xf0]  ;;  %v8234_v51 = vld [vmem:[#allocation2 + $0x140] sm:$0xf]  ;;  %v8159_v43 = vor.u32 %v9001_v1, %v8156_v55 }
 0x5bf   : > { %v8235_v34 = vor.u32 %v9021_v20, %v8234_v51  ;;  %v9024_v51 = vld [vmem:[#allocation2 + $0x160] sm:$0xf0] }
 0x5c0   : > { %v9004_v55 = vld [vmem:[#allocation2 + $0xc4] sm:$0xf] }
 0x5c2   : > { %5566 = vmatmul.bf16.gmra.mxu2 %v8123_v26  ;;  %v11338_v26 = vpop.f32.mrf.mxu1 }
 0x5c3   : > { %6368 = vmatmul.bf16.vlgmr.msra.gmra.mxu1 %v8387_v12  ;;  %12043 = vst [vmem:[#allocation84_spill] sm:$0xff] %v11338_v26  ;;  %v11342_v56 = vpop.f32.mrf.mxu3 }
 0x5c5   : > { %v11330_v48 = vpop.f32.mrf.mxu2 }
 0x5c6   : > { %12039 = vst [vmem:[#allocation80_spill] sm:$0xff] %v11330_v48  ;;  %v8144_v48 = vld [vmem:[#allocation2 + $0x9c] sm:$0xf0] }
 0x5c7   : > { %v8147_v6 = vor.u32 %v8998_v23, %v8144_v48  ;;  %v8420_v48 = vld [vmem:[#allocation2 + $0xb4] sm:$0xf0]  ;;  %v9067_v23 = vld [vmem:[#allocation2 + $0xac] sm:$0xf] }
 0x5cd   : > { %v11334_v11 = vpop.f32.mrf.mxu2 }
 0x5ce   : > { %12041 = vst [vmem:[#allocation82_spill] sm:$0xff] %v11334_v11  ;;  %5695 = vmatmul.bf16.gmra.mxu3 %v8223_v49  ;;  %v11346_v49 = vpop.f32.mrf.mxu1 }
 0x5cf   : > { %12046 = vst [vmem:[#allocation87_spill] sm:$0xff] %v11346_v49 }
 0x5d2   : > { %5571 = vmatmul.bf16.gmra.mxu2 %v8135_v44  ;;  %v11348_v44 = vpop.f32.mrf.mxu3 }
 0x5d3   : > { %6373 = vmatmul.bf16.gmra.mxu1 %v8399_v0  ;;  %12047 = vst [vmem:[#allocation88_spill] sm:$0xff] %v11348_v44  ;;  %v9126_v0 = vld [vmem:[#allocation11 + $0x220] sm:$0xff] }
 0x5d4   : > { %6452 = vmatpush.bf16.msra.mxu2 %v9126_v0 }
 0x5d5   : > { %v11340_v12 = vpop.f32.mrf.mxu2 }
 0x5d6   : > { %12044 = vst [vmem:[#allocation85_spill] sm:$0xff] %v11340_v12  ;;  %v11352_v20 = vpop.f32.mrf.mxu1 }
 0x5d7   : > { %12049 = vst [vmem:[#allocation90_spill] sm:$0xff] %v11352_v20  ;;  %v8258_v20 = vld [vmem:[#allocation2 + $0x170] sm:$0xf] }
 0x5da   : > { %v11354_v26 = vpop.f32.mrf.mxu3 }
 0x5dd   : > { %v11344_v11 = vpop.f32.mrf.mxu2 }
 0x5de   : > { %12045 = vst [vmem:[#allocation86_spill] sm:$0xff] %v11344_v11  ;;  %5700 = vmatmul.bf16.gmra.mxu3 %v8235_v34  ;;  %v8246_v11 = vld [vmem:[#allocation2 + $0x158] sm:$0xf] }
 0x5df   : > { %v8247_v49 = vor.u32 %v9024_v51, %v8246_v11 }
 0x5e2   : > { %5576 = vmatmul.bf16.gmra.mxu2 %v8147_v6  ;;  %v8423_v6 = vor.u32 %v9067_v23, %v8420_v48  ;;  %v11362_v44 = vpop.f32.mrf.mxu3  ;;  %v9070_v48 = vld [vmem:[#allocation2 + $0xc4] sm:$0xf] }
 0x5e3   : > { %6378 = vmatmul.bf16.gmra.mxu1 %v8411_v14  ;;  %v11358_v14 = vpop.f32.mrf.mxu1  ;;  %12053 = vst [vmem:[#allocation94_spill] sm:$0xff] %v11362_v44 }
 0x5e4   : > { %12051 = vst [vmem:[#allocation92_spill] sm:$0xff] %v11358_v14  ;;  %v8180_v14 = vld [vmem:[#allocation2 + $0xe4] sm:$0xf0] }
 0x5e5   : > { %v11350_v12 = vpop.f32.mrf.mxu2 }
 0x5e6   : > { %12048 = vst [vmem:[#allocation89_spill] sm:$0xff] %v11350_v12  ;;  %v9027_v12 = vld [vmem:[#allocation2 + $0x178] sm:$0xf0] }
 0x5e7   : > { %v8259_v51 = vor.u32 %v9027_v12, %v8258_v20  ;;  %v9030_v12 = vld [vmem:[#allocation2 + $0x190] sm:$0xf0] }
 0x5ea   : > { %v11368_v1 = vpop.f32.mrf.mxu3 }
 0x5eb   : > { %v11364_v11 = vpop.f32.mrf.mxu1 }
 0x5ec   : > { %12054 = vst [vmem:[#allocation95_spill] sm:$0xff] %v11364_v11 }
 0x5ed   : > { %v11356_v34 = vpop.f32.mrf.mxu2 }
 0x5ee   : > { %12050 = vst [vmem:[#allocation91_spill] sm:$0xff] %v11356_v34  ;;  %5705 = vmatmul.bf16.gmra.mxu3 %v8247_v49  ;;  %v8168_v49 = vld [vmem:[#allocation2 + $0xcc] sm:$0xf0] }
 0x5ef   : > { %v8171_v23 = vor.u32 %v9004_v55, %v8168_v49  ;;  %v9007_v49 = vld [vmem:[#allocation2 + $0xdc] sm:$0xf] }
 0x5f2   : > { %5581 = vmatmul.bf16.gmra.mxu2 %v8159_v43  ;;  %v8435_v43 = vor.u32 %v9070_v48, %v8432_v7  ;;  %v11374_v20 = vpop.f32.mrf.mxu3  ;;  %v9073_v7 = vld [vmem:[#allocation2 + $0xdc] sm:$0xf]  ;;  %v8183_v48 = vor.u32 %v9007_v49, %v8180_v14  ;;  %v9010_v14 = vld [vmem:[#allocation2 + $0xf4] sm:$0xf] }
 0x5f3   : > { %6383 = vmatmul.bf16.gmra.mxu1 %v8423_v6  ;;  %v9125_v6 = vld [vmem:[#allocation11 + $0x218] sm:$0xff] }
 0x5f4   : > { %6453 = vmatpush.bf16.msra.mxu2 %v9125_v6 }
 0x5f5   : > { %v11360_v0 = vpop.f32.mrf.mxu2 }
 0x5f6   : > { %12052 = vst [vmem:[#allocation93_spill] sm:$0xff] %v11360_v0  ;;  %v11372_v0 = vpop.f32.mrf.mxu1 }
 0x5f7   : > { %12057 = vst [vmem:[#allocation98_spill] sm:$0xff] %v11372_v0  ;;  %v9033_v0 = vld [vmem:[#allocation2 + $0x1a8] sm:$0xf0] }
 0x5fd   : > { %v11366_v34 = vpop.f32.mrf.mxu2 }
 0x5fe   : > { %12055 = vst [vmem:[#allocation96_spill] sm:$0xff] %v11366_v34  ;;  %5710 = vmatmul.bf16.gmra.mxu3 %v8259_v51  ;;  %v8270_v34 = vld [vmem:[#allocation2 + $0x188] sm:$0xf]  ;;  %v11378_v55 = vpop.f32.mrf.mxu1 }
 0x5ff   : > { %v8271_v11 = vor.u32 %v9030_v12, %v8270_v34  ;;  %12059 = vst [vmem:[#allocation100_spill] sm:$0xff] %v11378_v55  ;;  %v9013_v55 = vld [vmem:[#allocation2 + $0x10c] sm:$0xf] }
 0x602   : > { %5586 = vmatmul.bf16.gmra.mxu2 %v8171_v23  ;;  %v8447_v23 = vor.u32 %v9073_v7, %v8444_v41  ;;  %v9076_v41 = vld [vmem:[#allocation2 + $0xf4] sm:$0xf] }
 0x603   : > { %6388 = vmatmul.bf16.gmra.mxu1 %v8435_v43  ;;  %v11380_v43 = vpop.f32.mrf.mxu3  ;;  %v8459_v7 = vor.u32 %v9076_v41, %v8456_v25 }
 0x605   : > { %v11370_v44 = vpop.f32.mrf.mxu2 }
 0x606   : > { %12056 = vst [vmem:[#allocation97_spill] sm:$0xff] %v11370_v44  ;;  %v8282_v44 = vld [vmem:[#allocation2 + $0x1a0] sm:$0xf]  ;;  %v11384_v34 = vpop.f32.mrf.mxu1 }
 0x607   : > { %12061 = vst [vmem:[#allocation102_spill] sm:$0xff] %v11384_v34  ;;  %v8283_v12 = vor.u32 %v9033_v0, %v8282_v44  ;;  %v8204_v44 = vld [vmem:[#allocation2 + $0x114] sm:$0xf0] }
 0x608   : > { %v8468_v0 = vld [vmem:[#allocation2 + $0x114] sm:$0xf0] }
 0x609   : > { %v8471_v32 = vor.u32 %v9079_v36, %v8468_v0 }
 0x60b   : > { %v11388_v59 = vpop.f32.mrf.mxu3 }
 0x60d   : > { %v11376_v51 = vpop.f32.mrf.mxu2 }
 0x60e   : > { %12058 = vst [vmem:[#allocation99_spill] sm:$0xff] %v11376_v51  ;;  %5715 = vmatmul.bf16.gmra.mxu3 %v8271_v11  ;;  %v8192_v11 = vld [vmem:[#allocation2 + $0xfc] sm:$0xf0] }
 0x60f   : > { %v8195_v49 = vor.u32 %v9010_v14, %v8192_v11  ;;  %v11401_v14 = vld [vmem:[%s11865_s7] ss:$0 sm:$0xff] }
 0x612   : > { %5591 = vmatmul.bf16.gmra.mxu2 %v8183_v48  ;;  %v9124_v48 = vld [vmem:[#allocation11 + $0x210] sm:$0xff] }
 0x613   : > { %6393 = vmatmul.bf16.gmra.mxu1 %v8447_v23  ;;  %v11390_v23 = vpop.f32.mrf.mxu1  ;;  %6454 = vmatpush.bf16.msra.mxu2 %v9124_v48  ;;  %v4689_v48 = vadd.f32 %v11401_v14, %v11204_v13 }
 0x614   : > { %12063 = vst [vmem:[#allocation104_spill] sm:$0xff] %v11390_v23 }
 0x615   : > { %v11382_v6 = vpop.f32.mrf.mxu2 }
 0x616   : > { %12060 = vst [vmem:[#allocation101_spill] sm:$0xff] %v11382_v6 }
 0x61d   : > { %v11386_v51 = vpop.f32.mrf.mxu2 }
 0x61e   : > { %12062 = vst [vmem:[#allocation103_spill] sm:$0xff] %v11386_v51  ;;  %5720 = vmatmul.bf16.gmra.mxu3 %v8283_v12  ;;  %v11394_v51 = vpop.f32.mrf.mxu1  ;;  %v8207_v12 = vor.u32 %v9013_v55, %v8204_v44  ;;  %v9082_v55 = vld [vmem:[#allocation2 + $0x124] sm:$0xf] }
 0x61f   : > { %12065 = vst [vmem:[#allocation106_spill] sm:$0xff] %v11394_v51 }
 0x622   : > { %5596 = vmatmul.bf16.gmra.mxu2 %v8195_v49  ;;  %v8216_v49 = vld [vmem:[#allocation2 + $0x12c] sm:$0xf0] }
 0x623   : > { %6398 = vmatmul.bf16.gmra.mxu1 %v8459_v7  ;;  %v8480_v7 = vld [vmem:[#allocation2 + $0x12c] sm:$0xf0] }
 0x624   : > { %v8483_v44 = vor.u32 %v9082_v55, %v8480_v7  ;;  %v9019_v7 = vld [vmem:[#allocation2 + $0x13c] sm:$0xf] }
 0x625   : > { %v5557_v6 = vpop.f32.mrf.mxu2  ;;  %v9085_v55 = vld [vmem:[#allocation2 + $0x13c] sm:$0xf] }
 0x626   : > { %v11396_v11 = vpop.f32.mrf.mxu1 }
 0x627   : > { %12066 = vst [vmem:[#allocation107_spill] sm:$0xff] %v11396_v11  ;;  %v4778_v11 = vadd.f32 %v11142_v3, %v4689_v48 }
 0x629   : > { %v4867_v23 = vadd.f32 %v10964_v60, %v4778_v11 }
 0x62d   : > { %v11392_v34 = vpop.f32.mrf.mxu2 }
 0x62e   : > { %12064 = vst [vmem:[#allocation105_spill] sm:$0xff] %v11392_v34  ;;  %v9016_v34 = vld [vmem:[#allocation2 + $0x124] sm:$0xf]  ;;  %v11408_v0 = vpop.f32.mrf.mxu1 }
 0x62f   : > { %v8219_v36 = vor.u32 %v9016_v34, %v8216_v49  ;;  %v8228_v49 = vld [vmem:[#allocation2 + $0x144] sm:$0xf0] }
 0x632   : > { %5601 = vmatmul.bf16.gmra.mxu2 %v8207_v12  ;;  %v9123_v12 = vld [vmem:[#allocation11 + $0x208] sm:$0xff] }
 0x633   : > { %6403 = vmatmul.bf16.gmra.mxu1 %v8471_v32  ;;  %v5558_v32 = vadd.f32 %v5557_v6, %v11224_v17  ;;  %6455 = vmatpush.bf16.msra.mxu2 %v9123_v12  ;;  %v8492_v17 = vld [vmem:[#allocation2 + $0x144] sm:$0xf0]  ;;  %v4694_v6 = vadd.f32 %v11401_v14, %v11216_v54  ;;  %v11427_v54 = vpop.f32.mrf.mxu3  ;;  %v8240_v12 = vld [vmem:[#allocation2 + $0x15c] sm:$0xf0] }
 0x634   : > { %v8495_v3 = vor.u32 %v9085_v55, %v8492_v17  ;;  %v9088_v17 = vld [vmem:[#allocation2 + $0x154] sm:$0xf] }
 0x635   : > { %v5562_v25 = vpop.f32.mrf.mxu2  ;;  %v4783_v60 = vadd.f32 %v11160_v45, %v4694_v6 }
 0x636   : > { %v11415_v37 = vpop.f32.mrf.mxu1  ;;  %v5563_v48 = vadd.f32 %v5562_v25, %v11240_v63  ;;  %v4699_v63 = vadd.f32 %v11401_v14, %v11230_v62  ;;  %v9022_v25 = vld [vmem:[#allocation2 + $0x154] sm:$0xf] }
 0x638   : > { %v4788_v55 = vadd.f32 %v11168_v10, %v4699_v63  ;;  %v8516_v63 = vld [vmem:[#allocation2 + $0x174] sm:$0xf0] }
 0x63a   : > { %v4877_v62 = vadd.f32 %v11015_v42, %v4788_v55  ;;  %v4704_v42 = vadd.f32 %v11401_v14, %v11242_v47 }
 0x63d   : > { %v11403_v41 = vpop.f32.mrf.mxu2 }
 0x63e   : > { %12067 = vst [vmem:[#allocation108_spill] sm:$0xff] %v11403_v41  ;;  %v5647_v41 = vadd.f32 %v11342_v56, %v5558_v32  ;;  %v5652_v56 = vadd.f32 %v11354_v26, %v5563_v48  ;;  %v11422_v11 = vpop.f32.mrf.mxu1  ;;  %v8243_v26 = vor.u32 %v9022_v25, %v8240_v12 }
 0x640   : > { %v11413_v13 = vadd.f32 %v5647_v41, %v4867_v23  ;;  %v4872_v41 = vadd.f32 %v10992_v5, %v4783_v60  ;;  %v9122_v5 = vld [vmem:[#allocation11 + $0x200] sm:$0xff]  ;;  %v4701_v60 = vadd.f32 %v11401_v14, %v11236_v8  ;;  %v9025_v8 = vld [vmem:[#allocation2 + $0x16c] sm:$0xf] }
 0x641   : > { %6456 = vmatpush.bf16.msra.mxu2 %v9122_v5  ;;  %v4706_v5 = vadd.f32 %v11401_v14, %v11250_v52  ;;  %v9028_v52 = vld [vmem:[#allocation2 + $0x184] sm:$0xf] }
 0x642   : > { %5606 = vmatmul.bf16.gmra.mxu2 %v8219_v36  ;;  %v8231_v36 = vor.u32 %v9019_v7, %v8228_v49  ;;  %v8504_v49 = vld [vmem:[#allocation2 + $0x15c] sm:$0xf0] }
 0x643   : > { %6408 = vmatmul.bf16.gmra.mxu1 %v8483_v44  ;;  %v11425_v44 = vadd.f32 %v5652_v56, %v4872_v41  ;;  %v8507_v6 = vor.u32 %v9088_v17, %v8504_v49  ;;  %v8252_v49 = vld [vmem:[#allocation2 + $0x174] sm:$0xf0]  ;;  %v9091_v17 = vld [vmem:[#allocation2 + $0x16c] sm:$0xf] }
 0x645   : > { %v5567_v51 = vpop.f32.mrf.mxu2 }
 0x646   : > { %v11431_v45 = vpop.f32.mrf.mxu1  ;;  %v5568_v7 = vadd.f32 %v5567_v51, %v11252_v31  ;;  %v4790_v51 = vadd.f32 %v11172_v19, %v4701_v60  ;;  %v4793_v19 = vadd.f32 %v11176_v38, %v4704_v42  ;;  %v8264_v60 = vld [vmem:[#allocation2 + $0x18c] sm:$0xf0] }
 0x648   : > { %v4882_v47 = vadd.f32 %v11034_v30, %v4793_v19  ;;  %v4709_v30 = vadd.f32 %v11401_v14, %v11258_v29  ;;  %v4711_v29 = vadd.f32 %v11401_v14, %v11266_v27  ;;  %v8540_v19 = vld [vmem:[#allocation2 + $0x1a4] sm:$0xf0]  ;;  %v9097_v27 = vld [vmem:[#allocation2 + $0x19c] sm:$0xf] }
 0x64d   : > { %v5569_v34 = vpop.f32.mrf.mxu2 }
 0x64e   : > { %v5570_v56 = vadd.f32 %v5569_v34, %v11260_v21  ;;  %v11442_v31 = vpop.f32.mrf.mxu1  ;;  %v8255_v21 = vor.u32 %v9025_v8, %v8252_v49  ;;  %v8519_v34 = vor.u32 %v9091_v17, %v8516_v63  ;;  %v8267_v49 = vor.u32 %v9028_v52, %v8264_v60 }
 0x650   : > { %v5659_v10 = vadd.f32 %v11374_v20, %v5570_v56  ;;  %v8528_v56 = vld [vmem:[#allocation2 + $0x18c] sm:$0xf0] }
 0x652   : > { %5611 = vmatmul.bf16.gmra.mxu2 %v8231_v36  ;;  %v5668_v36 = vpop.f32.mrf.mxu3 }
 0x653   : > { %6413 = vmatmul.bf16.gmra.mxu1 %v8495_v3  ;;  %v5657_v3 = vadd.f32 %v11368_v1, %v5568_v7  ;;  %v4879_v1 = vadd.f32 %v11026_v58, %v4790_v51 }
 0x655   : > { %v5572_v23 = vpop.f32.mrf.mxu2  ;;  %v11440_v41 = vadd.f32 %v5657_v3, %v4877_v62 }
 0x656   : > { %v11453_v20 = vpop.f32.mrf.mxu1 }
 0x65a   : > { %v5671_v25 = vpop.f32.mrf.mxu3 }
 0x65d   : > { %v5574_v32 = vpop.f32.mrf.mxu2 }
 0x65e   : > { %v5575_v3 = vadd.f32 %v5574_v32, %v11276_v35  ;;  %v11464_v51 = vpop.f32.mrf.mxu1 }
 0x660   : > { %v5664_v62 = vadd.f32 %v11388_v59, %v5575_v3  ;;  %v4798_v59 = vadd.f32 %v11182_v16, %v4709_v30  ;;  %v9060_v30 = vld [vmem:[#allocation2 + $0x70] sm:$0xf0] }
 0x662   : > { %5616 = vmatmul.bf16.gmra.mxu2 %v8243_v26  ;;  %v5573_v26 = vadd.f32 %v5572_v23, %v11268_v4  ;;  %v5673_v55 = vpop.f32.mrf.mxu3  ;;  %v4795_v23 = vadd.f32 %v11178_v53, %v4706_v5  ;;  %v8543_v5 = vor.u32 %v9097_v27, %v8540_v19 }
 0x663   : > { %6418 = vmatmul.bf16.gmra.mxu1 %v8507_v6  ;;  %v11450_v6 = vadd.f32 %v5659_v10, %v4879_v1  ;;  %v9094_v10 = vld [vmem:[#allocation2 + $0x184] sm:$0xf] }
 0x664   : > { %v5662_v58 = vadd.f32 %v11380_v43, %v5573_v26  ;;  %v4884_v43 = vadd.f32 %v11045_v28, %v4795_v23  ;;  %v8531_v35 = vor.u32 %v9094_v10, %v8528_v56  ;;  %v4887_v28 = vadd.f32 %v11059_v33, %v4798_v59  ;;  %v8276_v26 = vld [vmem:[#allocation2 + $0x1a4] sm:$0xf0] }
 0x665   : > { %v5577_v48 = vpop.f32.mrf.mxu2  ;;  %v4714_v33 = vadd.f32 %v11401_v14, %v11272_v2  ;;  %v4716_v2 = vadd.f32 %v11401_v14, %v11278_v57  ;;  %v8390_v10 = vld [vmem:[#allocation2 + $0x68] sm:$0xf] }
 0x666   : > { %v11460_v4 = vadd.f32 %v5662_v58, %v4882_v47  ;;  %v5578_v32 = vadd.f32 %v5577_v48, %v11284_v22  ;;  %v11470_v63 = vadd.f32 %v5664_v62, %v4884_v43  ;;  %v11477_v8 = vpop.f32.mrf.mxu1  ;;  %v4800_v48 = vadd.f32 %v11186_v24, %v4711_v29  ;;  %v9031_v58 = vld [vmem:[#allocation2 + $0x19c] sm:$0xf]  ;;  %v12073_v29 = vld [vmem:[#allocation75_spill] sm:$0xff] }
 0x667   : > { %v8279_v47 = vor.u32 %v9031_v58, %v8276_v26  ;;  %v4803_v24 = vadd.f32 %v11190_v39, %v4714_v33  ;;  %v12068_v39 = vld [vmem:[#allocation61_spill] sm:$0xff]  ;;  %v9063_v33 = vld [vmem:[#allocation2 + $0x88] sm:$0xf0] }
 0x668   : > { %v5667_v1 = vadd.f32 %v11427_v54, %v5578_v32  ;;  %v4889_v54 = vadd.f32 %v11070_v18, %v4800_v48  ;;  %v12075_v58 = vld [vmem:[#allocation29_spill] sm:$0xff] }
 0x669   : > { %v4892_v18 = vadd.f32 %v11085_v46, %v4803_v24  ;;  %v8391_v46 = vor.u32 %v9060_v30, %v8390_v10  ;;  %v12077_v24 = vld [vmem:[#allocation78_spill] sm:$0xff] }
 0x66a   : > { %v5676_v53 = vpop.f32.mrf.mxu3  ;;  %v11480_v22 = vadd.f32 %v5667_v1, %v4887_v28  ;;  %v12072_v28 = vld [vmem:[#allocation64_spill] sm:$0xff] }
 0x66d   : > { %v5579_v12 = vpop.f32.mrf.mxu2 }
 0x66e   : > { %v5580_v17 = vadd.f32 %v5579_v12, %v11294_v50  ;;  %v11489_v3 = vpop.f32.mrf.mxu1 }
 0x672   : > { %5621 = vmatmul.bf16.gmra.mxu2 %v8255_v21  ;;  %v5678_v21 = vpop.f32.mrf.mxu3 }
 0x673   : > { %6423 = vmatmul.bf16.gmra.mxu1 %v8519_v34  ;;  %v5669_v34 = vadd.f32 %v5668_v36, %v5580_v17 }
 0x675   : > { %v5582_v7 = vpop.f32.mrf.mxu2  ;;  %v11487_v12 = vadd.f32 %v5669_v34, %v4889_v54  ;;  %v12074_v34 = vld [vmem:[#allocation43_spill] sm:$0xff] }
 0x676   : > { %v5583_v50 = vadd.f32 %v5582_v7, %v11300_v40  ;;  %v4805_v40 = vadd.f32 %v11194_v61, %v4716_v2 }
 0x678   : > { %v5672_v36 = vadd.f32 %v5671_v25, %v5583_v50  ;;  %v4894_v52 = vadd.f32 %v11103_v15, %v4805_v40  ;;  %v4719_v25 = vadd.f32 %v11401_v14, %v12068_v39  ;;  %v4721_v15 = vadd.f32 %v11401_v14, %v12072_v28 }
 0x67a   : > { %v5681_v62 = vpop.f32.mrf.mxu3  ;;  %v11496_v56 = vadd.f32 %v5672_v36, %v4892_v18  ;;  %v4810_v26 = vadd.f32 %v12074_v34, %v4721_v15  ;;  %v8414_v15 = vld [vmem:[#allocation2 + $0x98] sm:$0xf] }
 0x67c   : > { %v4899_v27 = vadd.f32 %v12075_v58, %v4810_v26 }
 0x67d   : > { %v5584_v38 = vpop.f32.mrf.mxu2 }
 0x67e   : > { %v5585_v60 = vadd.f32 %v5584_v38, %v11306_v9  ;;  %v12070_v9 = vld [vmem:[#allocation42_spill] sm:$0xff] }
 0x67f   : > { %v4808_v38 = vadd.f32 %v12070_v9, %v4719_v25  ;;  %v12081_v25 = vld [vmem:[#allocation81_spill] sm:$0xff] }
 0x680   : > { %v5674_v7 = vadd.f32 %v5673_v55, %v5585_v60  ;;  %v12071_v55 = vld [vmem:[#allocation22_spill] sm:$0xff] }
 0x681   : > { %v4897_v1 = vadd.f32 %v12071_v55, %v4808_v38  ;;  %v9066_v38 = vld [vmem:[#allocation2 + $0xa0] sm:$0xf0] }
 0x682   : > { %5626 = vmatmul.bf16.gmra.mxu2 %v8267_v49  ;;  %v5683_v49 = vpop.f32.mrf.mxu3  ;;  %v11503_v32 = vadd.f32 %v5674_v7, %v4894_v52  ;;  %v12080_v52 = vld [vmem:[#allocation68_spill] sm:$0xff] }
 0x683   : > { %6428 = vmatmul.bf16.gmra.mxu1 %v8531_v35  ;;  %v12069_v35 = vld [vmem:[#allocation71_spill] sm:$0xff]  ;;  %v4726_v39 = vadd.f32 %v11401_v14, %v12080_v52 }
 0x685   : > { %v5587_v42 = vpop.f32.mrf.mxu2 }
 0x686   : > { %v5588_v57 = vadd.f32 %v5587_v42, %v12069_v35  ;;  %v12082_v35 = vld [vmem:[#allocation47_spill] sm:$0xff] }
 0x688   : > { %v5677_v59 = vadd.f32 %v5676_v53, %v5588_v57  ;;  %v4815_v57 = vadd.f32 %v12082_v35, %v4726_v39  ;;  %v12092_v39 = vld [vmem:[#allocation74_spill] sm:$0xff] }
 0x689   : > { %v12093_v35 = vld [vmem:[#allocation90_spill] sm:$0xff] }
 0x68a   : > { %v11510_v48 = vadd.f32 %v5677_v59, %v4897_v1  ;;  %v5686_v19 = vpop.f32.mrf.mxu3  ;;  %v12083_v59 = vld [vmem:[#allocation31_spill] sm:$0xff]  ;;  %v12084_v1 = vld [vmem:[#allocation69_spill] sm:$0xff] }
 0x68b   : > { %v4904_v55 = vadd.f32 %v12083_v59, %v4815_v57 }
 0x68d   : > { %v5589_v16 = vpop.f32.mrf.mxu2 }
 0x68e   : > { %v5590_v17 = vadd.f32 %v5589_v16, %v12073_v29  ;;  %v12078_v16 = vld [vmem:[#allocation45_spill] sm:$0xff]  ;;  %v8415_v29 = vor.u32 %v9066_v38, %v8414_v15 }
 0x68f   : > { %v12096_v15 = vld [vmem:[#allocation77_spill] sm:$0xff] }
 0x690   : > { %v5679_v42 = vadd.f32 %v5678_v21, %v5590_v17  ;;  %v12079_v21 = vld [vmem:[#allocation38_spill] sm:$0xff]  ;;  %v12085_v17 = vld [vmem:[#allocation84_spill] sm:$0xff] }
 0x692   : > { %5631 = vmatmul.bf16.gmra.mxu2 %v8279_v47  ;;  %v12076_v47 = vld [vmem:[#allocation66_spill] sm:$0xff]  ;;  %v11517_v18 = vadd.f32 %v5679_v42, %v4899_v27  ;;  %v5688_v60 = vpop.f32.mrf.mxu3 }
 0x693   : > { %6433 = vmatmul.bf16.gmra.mxu1 %v8543_v5  ;;  %v4724_v53 = vadd.f32 %v11401_v14, %v12076_v47  ;;  %v8402_v5 = vld [vmem:[#allocation2 + $0x80] sm:$0xf]  ;;  %v12088_v47 = vld [vmem:[#allocation72_spill] sm:$0xff] }
 0x694   : > { %v8403_v50 = vor.u32 %v9063_v33, %v8402_v5 }
 0x695   : > { %v5592_v23 = vpop.f32.mrf.mxu2  ;;  %v4813_v2 = vadd.f32 %v12078_v16, %v4724_v53  ;;  %v4731_v53 = vadd.f32 %v11401_v14, %v12088_v47  ;;  %v12090_v16 = vld [vmem:[#allocation30_spill] sm:$0xff]  ;;  %v9072_v47 = vld [vmem:[#allocation2 + $0xd0] sm:$0xf0] }
 0x696   : > { %v5593_v36 = vadd.f32 %v5592_v23, %v12077_v24 }
 0x697   : > { %v4902_v30 = vadd.f32 %v12079_v21, %v4813_v2  ;;  %v4820_v2 = vadd.f32 %v12090_v16, %v4731_v53  ;;  %v9069_v21 = vld [vmem:[#allocation2 + $0xb8] sm:$0xf0]  ;;  %v12099_v53 = vld [vmem:[#allocation32_spill] sm:$0xff]  ;;  %v8438_v16 = vld [vmem:[#allocation2 + $0xc8] sm:$0xf] }
 0x698   : > { %v5682_v40 = vadd.f32 %v5681_v62, %v5593_v36  ;;  %v4729_v62 = vadd.f32 %v11401_v14, %v12084_v1 }
 0x69a   : > { %v5691_v28 = vpop.f32.mrf.mxu3 }
 0x69d   : > { %v5594_v43 = vpop.f32.mrf.mxu2 }
 0x69e   : > { %v5595_v10 = vadd.f32 %v5594_v43, %v12081_v25  ;;  %v12086_v43 = vld [vmem:[#allocation50_spill] sm:$0xff]  ;;  %v8426_v25 = vld [vmem:[#allocation2 + $0xb0] sm:$0xf] }
 0x69f   : > { %v4818_v42 = vadd.f32 %v12086_v43, %v4729_v62 }
 0x6a0   : > { %v5684_v23 = vadd.f32 %v5683_v49, %v5595_v10  ;;  %v12087_v49 = vld [vmem:[#allocation34_spill] sm:$0xff]  ;;  %v8427_v10 = vor.u32 %v9069_v21, %v8426_v25  ;;  %v12103_v25 = vld [vmem:[#allocation39_spill] sm:$0xff] }
 0x6a1   : > { %v4907_v27 = vadd.f32 %v12087_v49, %v4818_v42  ;;  %v12098_v42 = vld [vmem:[#allocation25_spill] sm:$0xff] }
 0x6a2   : > { %6457 = vmatmul.bf16.vlgmr.msra.gmra.mxu2 %v8391_v46  ;;  %v11524_v46 = vadd.f32 %v5682_v40, %v4902_v30  ;;  %v11531_v26 = vadd.f32 %v5684_v23, %v4904_v55  ;;  %v5693_v5 = vpop.f32.mrf.mxu3  ;;  %v12091_v30 = vld [vmem:[#allocation28_spill] sm:$0xff] }
 0x6a3   : > { %v4909_v52 = vadd.f32 %v12091_v30, %v4820_v2  ;;  %v8439_v2 = vor.u32 %v9072_v47, %v8438_v16 }
 0x6a5   : > { %v5597_v61 = vpop.f32.mrf.mxu2 }
 0x6a6   : > { %v5598_v34 = vadd.f32 %v5597_v61, %v12085_v17  ;;  %v12097_v17 = vld [vmem:[#allocation92_spill] sm:$0xff] }
 0x6a8   : > { %v5687_v33 = vadd.f32 %v5686_v19, %v5598_v34  ;;  %v4734_v19 = vadd.f32 %v11401_v14, %v12092_v39 }
 0x6aa   : > { %v11538_v36 = vadd.f32 %v5687_v33, %v4907_v27  ;;  %v5696_v59 = vpop.f32.mrf.mxu3 }
 0x6ad   : > { %v5599_v54 = vpop.f32.mrf.mxu2 }
 0x6b2   : > { %6462 = vmatmul.bf16.gmra.mxu2 %v8403_v50  ;;  %v12089_v50 = vld [vmem:[#allocation87_spill] sm:$0xff] }
 0x6b3   : > { %v5600_v24 = vadd.f32 %v5599_v54, %v12089_v50  ;;  %v12094_v54 = vld [vmem:[#allocation33_spill] sm:$0xff] }
 0x6b4   : > { %v4823_v38 = vadd.f32 %v12094_v54, %v4734_v19  ;;  %v12105_v54 = vld [vmem:[#allocation98_spill] sm:$0xff] }
 0x6b5   : > { %v5602_v7 = vpop.f32.mrf.mxu2  ;;  %v5689_v61 = vadd.f32 %v5688_v60, %v5600_v24  ;;  %v12095_v60 = vld [vmem:[#allocation36_spill] sm:$0xff] }
 0x6b6   : > { %v5603_v57 = vadd.f32 %v5602_v7, %v12093_v35  ;;  %v4912_v62 = vadd.f32 %v12095_v60, %v4823_v38  ;;  %v5698_v7 = vpop.f32.mrf.mxu3  ;;  %v12100_v24 = vld [vmem:[#allocation80_spill] sm:$0xff]  ;;  %v12106_v60 = vld [vmem:[#allocation55_spill] sm:$0xff] }
 0x6b7   : > { %v11545_v23 = vadd.f32 %v5689_v61, %v4909_v52  ;;  %v12101_v61 = vld [vmem:[#allocation95_spill] sm:$0xff] }
 0x6b8   : > { %v5692_v55 = vadd.f32 %v5691_v28, %v5603_v57  ;;  %v4739_v28 = vadd.f32 %v11401_v14, %v12100_v24 }
 0x6ba   : > { %v11552_v43 = vadd.f32 %v5692_v55, %v4912_v62 }
 0x6bd   : > { %v5604_v9 = vpop.f32.mrf.mxu2 }
 0x6be   : > { %v5605_v34 = vadd.f32 %v5604_v9, %v12097_v17  ;;  %v12102_v9 = vld [vmem:[#allocation53_spill] sm:$0xff]  ;;  %v5701_v57 = vpop.f32.mrf.mxu3  ;;  %v12107_v17 = vld [vmem:[#allocation40_spill] sm:$0xff] }
 0x6bf   : > { %v4828_v52 = vadd.f32 %v12102_v9, %v4739_v28 }
 0x6c0   : > { %v5694_v49 = vadd.f32 %v5693_v5, %v5605_v34 }
 0x6c1   : > { %v4917_v5 = vadd.f32 %v12103_v25, %v4828_v52  ;;  %v12113_v52 = vld [vmem:[#allocation102_spill] sm:$0xff] }
 0x6c2   : > { %6467 = vmatmul.bf16.gmra.mxu2 %v8415_v29  ;;  %v4736_v29 = vadd.f32 %v11401_v14, %v12096_v15 }
 0x6c4   : > { %v4825_v33 = vadd.f32 %v12098_v42, %v4736_v29  ;;  %v9075_v29 = vld [vmem:[#allocation2 + $0xe8] sm:$0xf0]  ;;  %v12108_v42 = vld [vmem:[#allocation85_spill] sm:$0xff] }
 0x6c5   : > { %v5607_v58 = vpop.f32.mrf.mxu2 }
 0x6c6   : > { %v4914_v50 = vadd.f32 %v12099_v53, %v4825_v33  ;;  %v5608_v21 = vadd.f32 %v5607_v58, %v12101_v61  ;;  %v8450_v33 = vld [vmem:[#allocation2 + $0xe0] sm:$0xf]  ;;  %v5703_v47 = vpop.f32.mrf.mxu3  ;;  %v12109_v53 = vld [vmem:[#allocation100_spill] sm:$0xff] }
 0x6c8   : > { %v11559_v30 = vadd.f32 %v5694_v49, %v4914_v50  ;;  %v5697_v39 = vadd.f32 %v5696_v59, %v5608_v21  ;;  %v4744_v59 = vadd.f32 %v11401_v14, %v12108_v42  ;;  %v8451_v49 = vor.u32 %v9075_v29, %v8450_v33  ;;  %v12112_v21 = vld [vmem:[#allocation86_spill] sm:$0xff]  ;;  %v8462_v29 = vld [vmem:[#allocation2 + $0xf8] sm:$0xf] }
 0x6c9   : > { %v4746_v9 = vadd.f32 %v11401_v14, %v12112_v21 }
 0x6ca   : > { %v11566_v55 = vadd.f32 %v5697_v39, %v4917_v5  ;;  %v12114_v5 = vld [vmem:[#allocation59_spill] sm:$0xff] }
 0x6cd   : > { %v5609_v40 = vpop.f32.mrf.mxu2 }
 0x6ce   : > { %v5610_v38 = vadd.f32 %v5609_v40, %v12105_v54  ;;  %v12110_v40 = vld [vmem:[#allocation57_spill] sm:$0xff] }
 0x6cf   : > { %v4833_v28 = vadd.f32 %v12110_v40, %v4744_v59 }
 0x6d0   : > { %v5699_v58 = vadd.f32 %v5698_v7, %v5610_v38  ;;  %v12111_v7 = vld [vmem:[#allocation41_spill] sm:$0xff]  ;;  %v9078_v38 = vld [vmem:[#allocation2 + $0x100] sm:$0xf0] }
 0x6d1   : > { %v4922_v61 = vadd.f32 %v12111_v7, %v4833_v28  ;;  %v12120_v28 = vld [vmem:[#allocation91_spill] sm:$0xff]  ;;  %v12121_v7 = vld [vmem:[#allocation106_spill] sm:$0xff] }
 0x6d2   : > { %6472 = vmatmul.bf16.gmra.mxu2 %v8427_v10  ;;  %v12104_v10 = vld [vmem:[#allocation82_spill] sm:$0xff] }
 0x6d3   : > { %v4741_v35 = vadd.f32 %v11401_v14, %v12104_v10  ;;  %v4835_v10 = vadd.f32 %v12114_v5, %v4746_v9  ;;  %v12123_v9 = vld [vmem:[#allocation65_spill] sm:$0xff] }
 0x6d5   : > { %v5612_v1 = vpop.f32.mrf.mxu2  ;;  %v4830_v62 = vadd.f32 %v12106_v60, %v4741_v35  ;;  %v5706_v35 = vpop.f32.mrf.mxu3  ;;  %v12115_v60 = vld [vmem:[#allocation49_spill] sm:$0xff] }
 0x6d6   : > { %v5613_v50 = vadd.f32 %v5612_v1, %v12109_v53 }
 0x6d7   : > { %v4919_v34 = vadd.f32 %v12107_v17, %v4830_v62  ;;  %v4924_v62 = vadd.f32 %v12115_v60, %v4835_v10  ;;  %v8463_v17 = vor.u32 %v9078_v38, %v8462_v29 }
 0x6d8   : > { %v5702_v16 = vadd.f32 %v5701_v57, %v5613_v50 }
 0x6d9   : > { %v11573_v24 = vadd.f32 %v5699_v58, %v4919_v34  ;;  %v12116_v58 = vld [vmem:[#allocation89_spill] sm:$0xff]  ;;  %v12117_v34 = vld [vmem:[#allocation104_spill] sm:$0xff] }
 0x6da   : > { %v11580_v25 = vadd.f32 %v5702_v16, %v4922_v61  ;;  %v4749_v57 = vadd.f32 %v11401_v14, %v12116_v58  ;;  %v4751_v16 = vadd.f32 %v11401_v14, %v12120_v28  ;;  %v12129_v28 = vld [vmem:[#allocation48_spill] sm:$0xff] }
 0x6dd   : > { %v5614_v27 = vpop.f32.mrf.mxu2 }
 0x6de   : > { %v5615_v39 = vadd.f32 %v5614_v27, %v12113_v52  ;;  %v12118_v27 = vld [vmem:[#allocation62_spill] sm:$0xff]  ;;  %v4840_v52 = vadd.f32 %v12123_v9, %v4751_v16 }
 0x6df   : > { %v4838_v33 = vadd.f32 %v12118_v27, %v4749_v57 }
 0x6e0   : > { %v5704_v1 = vadd.f32 %v5703_v47, %v5615_v39  ;;  %v12119_v47 = vld [vmem:[#allocation44_spill] sm:$0xff]  ;;  %v11599_v39 = vpop.f32.mrf.mxu1 }
 0x6e1   : > { %v4927_v40 = vadd.f32 %v12119_v47, %v4838_v33 }
 0x6e2   : > { %6477 = vmatmul.bf16.gmra.mxu2 %v8439_v2  ;;  %v11587_v59 = vadd.f32 %v5704_v1, %v4924_v62  ;;  %v9081_v1 = vld [vmem:[#allocation2 + $0x118] sm:$0xf0]  ;;  %v8474_v62 = vld [vmem:[#allocation2 + $0x110] sm:$0xf] }
 0x6e3   : > { %v8475_v58 = vor.u32 %v9081_v1, %v8474_v62 }
 0x6e5   : > { %v5617_v19 = vpop.f32.mrf.mxu2 }
 0x6e6   : > { %v5618_v42 = vadd.f32 %v5617_v19, %v12117_v34  ;;  %v11597_v19 = vpop.f32.mrf.mxu0 }
 0x6e8   : > { %v5707_v53 = vadd.f32 %v5706_v35, %v5618_v42  ;;  %v12124_v35 = vld [vmem:[#allocation18_spill] sm:$0xff]  ;;  %v12127_v42 = vld [vmem:[#allocation107_spill] sm:$0xff]  ;;  %v11611_v33 = vpop.f32.mrf.mxu1 }
 0x6e9   : > { %v4929_v38 = vadd.f32 %v12124_v35, %v4840_v52  ;;  %v9084_v52 = vld [vmem:[#allocation2 + $0x130] sm:$0xf0]  ;;  %v8486_v35 = vld [vmem:[#allocation2 + $0x128] sm:$0xf] }
 0x6ea   : > { %v11594_v21 = vadd.f32 %v5707_v53, %v4927_v40 }
 0x6ec   : > { %12122 = vst [vmem:[#allocation61_spill] sm:$0xff] %v11594_v21  ;;  %v12142_v21 = vld [vmem:[#allocation27_spill] sm:$0xff] }
 0x6ed   : > { %v5619_v15 = vpop.f32.mrf.mxu2 }
 0x6ee   : > { %v5620_v61 = vadd.f32 %v5619_v15, %v12121_v7  ;;  %v12126_v15 = vld [vmem:[#allocation93_spill] sm:$0xff]  ;;  %v11608_v34 = vpop.f32.mrf.mxu0  ;;  %v12130_v7 = vld [vmem:[#allocation96_spill] sm:$0xff] }
 0x6ef   : > { %v4754_v29 = vadd.f32 %v11401_v14, %v12126_v15 }
 0x6f0   : > { %v11625_v15 = vpop.f32.mrf.mxu1 }
 0x6f2   : > { %6482 = vmatmul.bf16.gmra.mxu2 %v8451_v49  ;;  %v5708_v49 = vpop.f32.mrf.mxu3 }
 0x6f3   : > { %v5709_v5 = vadd.f32 %v5708_v49, %v5620_v61  ;;  %v12128_v49 = vld [vmem:[#allocation67_spill] sm:$0xff]  ;;  %v4756_v61 = vadd.f32 %v11401_v14, %v12130_v7 }
 0x6f4   : > { %v4843_v53 = vadd.f32 %v12128_v49, %v4754_v29  ;;  %v12133_v29 = vld [vmem:[#allocation46_spill] sm:$0xff]  ;;  %v12134_v49 = vld [vmem:[#allocation51_spill] sm:$0xff] }
 0x6f5   : > { %v5622_v2 = vpop.f32.mrf.mxu2  ;;  %v11602_v57 = vadd.f32 %v5709_v5, %v4929_v38  ;;  %v12132_v38 = vld [vmem:[#allocation70_spill] sm:$0xff]  ;;  %v12137_v7 = vld [vmem:[#allocation23_spill] sm:$0xff] }
 0x6f6   : > { %v5623_v27 = vadd.f32 %v5622_v2, %v12127_v42  ;;  %v4932_v16 = vadd.f32 %v12129_v28, %v4843_v53  ;;  %v11622_v2 = vpop.f32.mrf.mxu0  ;;  %v4845_v62 = vadd.f32 %v12132_v38, %v4756_v61  ;;  %v4691_v42 = vadd.f32 %v11401_v14, %v12133_v29  ;;  %v12135_v28 = vld [vmem:[#allocation97_spill] sm:$0xff]  ;;  %v12139_v38 = vld [vmem:[#allocation24_spill] sm:$0xff] }
 0x6f7   : > { %12125 = vst [vmem:[#allocation71_spill] sm:$0xff] %v11602_v57  ;;  %v12138_v61 = vld [vmem:[#allocation105_spill] sm:$0xff] }
 0x6f8   : > { %v4934_v53 = vadd.f32 %v12134_v49, %v4845_v62  ;;  %v12140_v29 = vld [vmem:[#allocation73_spill] sm:$0xff] }
 0x6fa   : > { %v5711_v60 = vpop.f32.mrf.mxu3 }
 0x6fb   : > { %v5712_v40 = vadd.f32 %v5711_v60, %v5623_v27 }
 0x6fd   : > { %v5624_v54 = vpop.f32.mrf.mxu2  ;;  %v11620_v1 = vadd.f32 %v5712_v40, %v4932_v16 }
 0x6fe   : > { %v5625_v5 = vadd.f32 %v5624_v54, %v11408_v0  ;;  %v4759_v0 = vadd.f32 %v11401_v14, %v12135_v28  ;;  %v12136_v54 = vld [vmem:[#allocation56_spill] sm:$0xff]  ;;  %v11642_v28 = vpop.f32.mrf.mxu0 }
 0x6ff   : > { %12131 = vst [vmem:[#allocation42_spill] sm:$0xff] %v11620_v1  ;;  %v6370_v40 = vadd.f32 %v11453_v20, %v12136_v54  ;;  %v12141_v1 = vld [vmem:[#allocation88_spill] sm:$0xff] }
 0x700   : > { %v4848_v62 = vadd.f32 %v12140_v29, %v4759_v0  ;;  %v12145_v0 = vld [vmem:[#allocation58_spill] sm:$0xff] }
 0x702   : > { %6487 = vmatmul.bf16.gmra.mxu2 %v8463_v17  ;;  %v5713_v47 = vpop.f32.mrf.mxu3 }
 0x703   : > { %v5714_v60 = vadd.f32 %v5713_v47, %v5625_v5 }
 0x705   : > { %v5627_v50 = vpop.f32.mrf.mxu2 }
 0x706   : > { %v5628_v47 = vadd.f32 %v5627_v50, %v11415_v37  ;;  %v6602_v37 = vld [vmem:[%s9737_s24] sm:$0xff]  ;;  %v12143_v50 = vld [vmem:[#allocation19_spill] sm:$0xff] }
 0x70a   : > { %v5716_v27 = vpop.f32.mrf.mxu3 }
 0x70b   : > { %v5717_v54 = vadd.f32 %v5716_v27, %v5628_v47 }
 0x70d   : > { %v5629_v10 = vpop.f32.mrf.mxu2 }
 0x70e   : > { %v5630_v27 = vadd.f32 %v5629_v10, %v11422_v11  ;;  %v12148_v11 = vld [vmem:[#allocation20_spill] sm:$0xff] }
 0x712   : > { %6492 = vmatmul.bf16.gmra.mxu2 %v8475_v58  ;;  %v8487_v58 = vor.u32 %v9084_v52, %v8486_v35  ;;  %v5560_v52 = vadd.f32 %v12138_v61, %v12137_v7  ;;  %v11637_v35 = vadd.f32 %v5714_v60, %v4934_v53  ;;  %v11646_v61 = vpop.f32.mrf.mxu1  ;;  %v4937_v60 = vadd.f32 %v12143_v50, %v4848_v62  ;;  %v12144_v53 = vld [vmem:[#allocation99_spill] sm:$0xff] }
 0x714   : > { %v5649_v20 = vadd.f32 %v12141_v1, %v5560_v52  ;;  %v9087_v1 = vld [vmem:[#allocation2 + $0x148] sm:$0xf0]  ;;  %v11656_v47 = vadd.f32 %v5717_v54, %v4937_v60 }
 0x715   : > { %v11606_v17 = vpop.f32.mrf.mxu2 }
 0x71d   : > { %v11617_v9 = vpop.f32.mrf.mxu2 }
 0x722   : > { %6497 = vmatmul.bf16.gmra.mxu2 %v8487_v58  ;;  %v4780_v58 = vadd.f32 %v12139_v38, %v4691_v42  ;;  %v4761_v42 = vadd.f32 %v11401_v14, %v12144_v53  ;;  %v8498_v38 = vld [vmem:[#allocation2 + $0x140] sm:$0xf]  ;;  %v6603_v53 = vld [vmem:[%s9737_s24 + $0x8] sm:$0xff] }
 0x724   : > { %v4869_v7 = vadd.f32 %v12142_v21, %v4780_v58  ;;  %v12146_v58 = vld [vmem:[#allocation76_spill] sm:$0xff] }
 0x725   : > { %v6458_v16 = vpop.f32.mrf.mxu2  ;;  %v4850_v29 = vadd.f32 %v12146_v58, %v4761_v42 }
 0x726   : > { %v6459_v5 = vadd.f32 %v6458_v16, %v6370_v40  ;;  %v5718_v16 = vpop.f32.mrf.mxu3  ;;  %v5727_v21 = vadd.f32 %v5649_v20, %v4869_v7  ;;  %v12149_v20 = vld [vmem:[#allocation101_spill] sm:$0xff]  ;;  %v12150_v7 = vld [vmem:[#allocation60_spill] sm:$0xff] }
 0x727   : > { %v5719_v50 = vadd.f32 %v5718_v16, %v5630_v27  ;;  %v4939_v10 = vadd.f32 %v12148_v11, %v4850_v29  ;;  %v4764_v54 = vadd.f32 %v11401_v14, %v12149_v20  ;;  %v6375_v60 = vadd.f32 %v11477_v8, %v12150_v7  ;;  %v12151_v16 = vld [vmem:[#allocation35_spill] sm:$0xff]  ;;  %v12156_v20 = vld [vmem:[#allocation37_spill] sm:$0xff] }
 0x728   : > { %v6538_v49 = vadd.f32 %v6459_v5, %v11413_v13  ;;  %v6372_v13 = vadd.f32 %v11464_v51, %v12145_v0  ;;  %v11662_v0 = vpop.f32.mrf.mxu0  ;;  %v5633_v27 = vadd.f32 %v11606_v17, %v11431_v45  ;;  %v12157_v45 = vld [vmem:[#allocation21_spill] sm:$0xff] }
 0x72a   : > { %v6570_v57 = vmax.f32 %v6538_v49, 0.0  ;;  %v8499_v49 = vor.u32 %v9087_v1, %v8498_v38  ;;  %v12153_v38 = vld [vmem:[#allocation26_spill] sm:$0xff] }
 0x72c   : > { %v6634_v40 = vadd.f32 %v6602_v37, %v6570_v57  ;;  %v12147_v57 = vld [vmem:[#allocation52_spill] sm:$0xff] }
 0x72d   : > { %v6460_v5 = vpop.f32.mrf.mxu2  ;;  %v4696_v37 = vadd.f32 %v11401_v14, %v12147_v57 }
 0x72e   : > { %6666 = vst [vmem:[%s9737_s24] sm:$0xff] %v6634_v40  ;;  %v6461_v52 = vadd.f32 %v6460_v5, %v6372_v13  ;;  %v11669_v13 = vpop.f32.mrf.mxu1  ;;  %v12152_v5 = vld [vmem:[#allocation108_spill] sm:$0xff]  ;;  %v5721_v29 = vpop.f32.mrf.mxu3 }
 0x72f   : > { %v5565_v1 = vadd.f32 %v12152_v5, %v12151_v16  ;;  %v4785_v58 = vadd.f32 %v12153_v38, %v4696_v37  ;;  %v6604_v16 = vld [vmem:[%s9737_s24 + $0x10] sm:$0xff]  ;;  %v5635_v5 = vadd.f32 %v11617_v9, %v11442_v31  ;;  %v12161_v31 = vld [vmem:[#allocation54_spill] sm:$0xff] }
 0x730   : > { %v6539_v62 = vadd.f32 %v6461_v52, %v5727_v21  ;;  %v11676_v52 = vadd.f32 %v5719_v50, %v4939_v10  ;;  %v12159_v10 = vld [vmem:[#allocation63_spill] sm:$0xff] }
 0x731   : > { %v4874_v7 = vadd.f32 %v12156_v20, %v4785_v58  ;;  %v6377_v37 = vadd.f32 %v11489_v3, %v12159_v10  ;;  %v12160_v58 = vld [vmem:[#allocation83_spill] sm:$0xff]  ;;  %v6606_v10 = vld [vmem:[%s9737_s24 + $0x20] sm:$0xff] }
 0x732   : > { %v6571_v51 = vmax.f32 %v6539_v62, 0.0  ;;  %6502 = vmatmul.bf16.gmra.mxu2 %v8499_v49  ;;  %v12154_v62 = vld [vmem:[#allocation79_spill] sm:$0xff] }
 0x733   : > { %v4853_v8 = vadd.f32 %v12154_v62, %v4764_v54  ;;  %v9090_v54 = vld [vmem:[#allocation2 + $0x160] sm:$0xf0] }
 0x734   : > { %v6635_v42 = vadd.f32 %v6603_v53, %v6571_v51  ;;  %v12155_v51 = vld [vmem:[#allocation94_spill] sm:$0xff]  ;;  %v5722_v53 = vadd.f32 %v5721_v29, %v5633_v27 }
 0x735   : > { %v6463_v40 = vpop.f32.mrf.mxu2  ;;  %v5654_v57 = vadd.f32 %v12155_v51, %v5565_v1  ;;  %v4942_v17 = vadd.f32 %v12157_v45, %v4853_v8 }
 0x736   : > { %6667 = vst [vmem:[%s9737_s24 + $0x8] sm:$0xff] %v6635_v42  ;;  %v6464_v21 = vadd.f32 %v6463_v40, %v6375_v60  ;;  %v12158_v60 = vld [vmem:[#allocation103_spill] sm:$0xff]  ;;  %v11696_v38 = vpop.f32.mrf.mxu1  ;;  %v5723_v8 = vpop.f32.mrf.mxu3 }
 0x737   : > { %v4766_v50 = vadd.f32 %v11401_v14, %v12158_v60  ;;  %v5729_v1 = vadd.f32 %v5654_v57, %v4874_v7  ;;  %v8510_v14 = vld [vmem:[#allocation2 + $0x158] sm:$0xf]  ;;  %v6380_v57 = vadd.f32 %v11599_v39, %v11597_v19  ;;  %v9093_v39 = vld [vmem:[#allocation2 + $0x178] sm:$0xf0] }
 0x738   : > { %v6540_v49 = vadd.f32 %v6464_v21, %v11425_v44  ;;  %v11689_v44 = vpop.f32.mrf.mxu0  ;;  %v11694_v21 = vadd.f32 %v5722_v53, %v4942_v17  ;;  %v8511_v62 = vor.u32 %v9090_v54, %v8510_v14  ;;  %v8522_v54 = vld [vmem:[#allocation2 + $0x170] sm:$0xf] }
 0x739   : > { %v4855_v3 = vadd.f32 %v12160_v58, %v4766_v50  ;;  %v6607_v58 = vld [vmem:[%s9737_s24 + $0x28] sm:$0xff] }
 0x73a   : > { %v6572_v11 = vmax.f32 %v6540_v49, 0.0  ;;  %v5724_v49 = vadd.f32 %v5723_v8, %v5635_v5  ;;  %v6608_v8 = vld [vmem:[%s9737_s24 + $0x30] sm:$0xff] }
 0x73b   : > { %v4944_v9 = vadd.f32 %v12161_v31, %v4855_v3 }
 0x73c   : > { %v6636_v42 = vadd.f32 %v6604_v16, %v6572_v11  ;;  %v6605_v11 = vld [vmem:[%s9737_s24 + $0x18] sm:$0xff] }
 0x73d   : > { %v6465_v40 = vpop.f32.mrf.mxu2  ;;  %v11704_v16 = vadd.f32 %v5724_v49, %v4944_v9 }
 0x73e   : > { %6668 = vst [vmem:[%s9737_s24 + $0x10] sm:$0xff] %v6636_v42  ;;  %v6466_v27 = vadd.f32 %v6465_v40, %v6377_v37  ;;  %v11709_v60 = vpop.f32.mrf.mxu1  ;;  %v6382_v37 = vadd.f32 %v11611_v33, %v11608_v34  ;;  %v6385_v34 = vadd.f32 %v11625_v15, %v11622_v2  ;;  %v9096_v2 = vld [vmem:[#allocation2 + $0x190] sm:$0xf0] }
 0x740   : > { %v6541_v29 = vadd.f32 %v6466_v27, %v5729_v1  ;;  %v11706_v45 = vpop.f32.mrf.mxu0  ;;  %v8523_v1 = vor.u32 %v9093_v39, %v8522_v54  ;;  %v9100_v39 = vld [vmem:[#allocation2 + $0x1b4] sm:$0xf] }
 0x742   : > { %v6573_v51 = vmax.f32 %v6541_v29, 0.0  ;;  %6507 = vmatmul.bf16.gmra.mxu2 %v8511_v62 }
 0x744   : > { %v6637_v53 = vadd.f32 %v6605_v11, %v6573_v51  ;;  %v6387_v51 = vadd.f32 %v11646_v61, %v11642_v28 }
 0x745   : > { %v6468_v20 = vpop.f32.mrf.mxu2 }
 0x746   : > { %6669 = vst [vmem:[%s9737_s24 + $0x18] sm:$0xff] %v6637_v53  ;;  %v6469_v7 = vadd.f32 %v6468_v20, %v6380_v57  ;;  %v11718_v14 = vpop.f32.mrf.mxu1  ;;  %v8534_v57 = vld [vmem:[#allocation2 + $0x188] sm:$0xf] }
 0x748   : > { %v6542_v17 = vadd.f32 %v6469_v7, %v11440_v41  ;;  %v11716_v41 = vpop.f32.mrf.mxu0  ;;  %v6609_v7 = vld [vmem:[%s9737_s24 + $0x38] sm:$0xff] }
 0x74a   : > { %v6574_v50 = vmax.f32 %v6542_v17, 0.0  ;;  %v6390_v17 = vadd.f32 %v11669_v13, %v11662_v0  ;;  %v6610_v13 = vld [vmem:[%s9737_s24 + $0x40] sm:$0xff] }
 0x74c   : > { %v6638_v42 = vadd.f32 %v6606_v10, %v6574_v50 }
 0x74d   : > { %v6470_v19 = vpop.f32.mrf.mxu2 }
 0x74e   : > { %6670 = vst [vmem:[%s9737_s24 + $0x20] sm:$0xff] %v6638_v42  ;;  %v6471_v40 = vadd.f32 %v6470_v19, %v6382_v37  ;;  %v11730_v31 = vpop.f32.mrf.mxu1  ;;  %v8550_v37 = vld [vmem:[#allocation2 + $0x1b0] sm:$0xf]  ;;  %v9101_v42 = vld [vmem:[#allocation2 + $0x1b8] sm:$0xf0] }
 0x750   : > { %v6543_v5 = vadd.f32 %v6471_v40, %v11450_v6  ;;  %v11726_v49 = vpop.f32.mrf.mxu0  ;;  %v8552_v40 = vld [vmem:[#allocation2 + $0x1bc] sm:$0xf0] }
 0x752   : > { %v6575_v27 = vmax.f32 %v6543_v5, 0.0  ;;  %6512 = vmatmul.bf16.gmra.mxu2 %v8523_v1  ;;  %v8555_v5 = vor.u32 %v9100_v39, %v8552_v40  ;;  %v6392_v1 = vadd.f32 %v11696_v38, %v11689_v44 }
 0x754   : > { %v6639_v33 = vadd.f32 %v6607_v58, %v6575_v27  ;;  %6438 = vmatmul.bf16.gmra.mxu1 %v8555_v5 }
 0x755   : > { %v6473_v3 = vpop.f32.mrf.mxu2 }
 0x756   : > { %6671 = vst [vmem:[%s9737_s24 + $0x28] sm:$0xff] %v6639_v33  ;;  %v6474_v29 = vadd.f32 %v6473_v3, %v6385_v34  ;;  %v11740_v19 = vpop.f32.mrf.mxu1  ;;  %v8546_v34 = vld [vmem:[#allocation2 + $0x1a0] sm:$0xf]  ;;  %v9099_v33 = vld [vmem:[#allocation2 + $0x1a8] sm:$0xf0] }
 0x758   : > { %v6544_v62 = vadd.f32 %v6474_v29, %v11460_v4  ;;  %v8535_v4 = vor.u32 %v9096_v2, %v8534_v57  ;;  %v11737_v61 = vpop.f32.mrf.mxu0  ;;  %v8562_v2 = vld [vmem:[#allocation2 + $0x1c8] sm:$0xf] }
 0x75a   : > { %v6576_v6 = vmax.f32 %v6544_v62, 0.0 }
 0x75c   : > { %v6640_v11 = vadd.f32 %v6608_v8, %v6576_v6 }
 0x75d   : > { %v6475_v9 = vpop.f32.mrf.mxu2 }
 0x75e   : > { %6672 = vst [vmem:[%s9737_s24 + $0x30] sm:$0xff] %v6640_v11  ;;  %v6476_v15 = vadd.f32 %v6475_v9, %v6387_v51  ;;  %v6404_v6 = vpop.f32.mrf.mxu1  ;;  %v6611_v51 = vld [vmem:[%s9737_s24 + $0x48] sm:$0xff]  ;;  %v6395_v11 = vadd.f32 %v11709_v60, %v11706_v45  ;;  %v6612_v60 = vld [vmem:[%s9737_s24 + $0x50] sm:$0xff] }
 0x760   : > { %v6545_v53 = vadd.f32 %v6476_v15, %v11470_v63  ;;  %v8551_v63 = vor.u32 %v9101_v42, %v8550_v37  ;;  %v6315_v29 = vpop.f32.mrf.mxu0  ;;  %v9104_v15 = vld [vmem:[#allocation2 + $0x1d0] sm:$0xf0] }
 0x761   : > { %v8563_v57 = vor.u32 %v9104_v15, %v8562_v2 }
 0x762   : > { %v6577_v20 = vmax.f32 %v6545_v53, 0.0  ;;  %6517 = vmatmul.bf16.gmra.mxu2 %v8535_v4  ;;  %6349 = vmatmul.bf16.gmra.mxu0 %v8551_v63  ;;  %v9103_v53 = vld [vmem:[#allocation2 + $0x1cc] sm:$0xf]  ;;  %v8564_v4 = vld [vmem:[#allocation2 + $0x1d4] sm:$0xf0] }
 0x764   : > { %v6641_v50 = vadd.f32 %v6609_v7, %v6577_v20  ;;  %v8567_v20 = vor.u32 %v9103_v53, %v8564_v4  ;;  %v6616_v4 = vld [vmem:[%s9737_s24 + $0x70] sm:$0xff] }
 0x765   : > { %v6478_v28 = vpop.f32.mrf.mxu2 }
 0x766   : > { %6673 = vst [vmem:[%s9737_s24 + $0x38] sm:$0xff] %v6641_v50  ;;  %v6479_v10 = vadd.f32 %v6478_v28, %v6390_v17  ;;  %6443 = vmatmul.bf16.gmra.mxu1 %v8567_v20  ;;  %v6406_v45 = vpop.f32.mrf.mxu1  ;;  %v8558_v50 = vld [vmem:[#allocation2 + $0x1b8] sm:$0xf]  ;;  %v9102_v28 = vld [vmem:[#allocation2 + $0x1c0] sm:$0xf0] }
 0x768   : > { %v6546_v54 = vadd.f32 %v6479_v10, %v11480_v22  ;;  %v8547_v22 = vor.u32 %v9099_v33, %v8546_v34  ;;  %v6317_v7 = vpop.f32.mrf.mxu0  ;;  %v6397_v10 = vadd.f32 %v11718_v14, %v11716_v41  ;;  %v6614_v34 = vld [vmem:[%s9737_s24 + $0x60] sm:$0xff]  ;;  %v8570_v33 = vld [vmem:[#allocation2 + $0x1d0] sm:$0xf] }
 0x76a   : > { %v6578_v0 = vmax.f32 %v6546_v54, 0.0  ;;  %v6613_v54 = vld [vmem:[%s9737_s24 + $0x58] sm:$0xff] }
 0x76c   : > { %v6642_v27 = vadd.f32 %v6610_v13, %v6578_v0  ;;  %v6400_v0 = vadd.f32 %v11730_v31, %v11726_v49 }
 0x76d   : > { %v6480_v58 = vpop.f32.mrf.mxu2 }
 0x76e   : > { %6674 = vst [vmem:[%s9737_s24 + $0x40] sm:$0xff] %v6642_v27  ;;  %v6481_v3 = vadd.f32 %v6480_v58, %v6392_v1  ;;  %v6409_v1 = vpop.f32.mrf.mxu1 }
 0x770   : > { %v6547_v62 = vadd.f32 %v6481_v3, %v11487_v12  ;;  %v6320_v5 = vpop.f32.mrf.mxu0  ;;  %v6402_v3 = vadd.f32 %v11740_v19, %v11737_v61 }
 0x772   : > { %v6579_v8 = vmax.f32 %v6547_v62, 0.0  ;;  %6522 = vmatmul.bf16.gmra.mxu2 %v8547_v22  ;;  %6354 = vmatmul.bf16.gmra.mxu0 %v8563_v57 }
 0x774   : > { %v6643_v9 = vadd.f32 %v6611_v51, %v6579_v8 }
 0x775   : > { %v6483_v44 = vpop.f32.mrf.mxu2 }
 0x776   : > { %6675 = vst [vmem:[%s9737_s24 + $0x48] sm:$0xff] %v6643_v9  ;;  %v6484_v38 = vadd.f32 %v6483_v44, %v6395_v11  ;;  %v6411_v51 = vpop.f32.mrf.mxu1  ;;  %v6615_v9 = vld [vmem:[%s9737_s24 + $0x68] sm:$0xff]  ;;  %v6405_v44 = vadd.f32 %v6404_v6, %v6315_v29 }
 0x778   : > { %v6548_v12 = vadd.f32 %v6484_v38, %v11496_v56  ;;  %v8559_v56 = vor.u32 %v9102_v28, %v8558_v50  ;;  %v6322_v8 = vpop.f32.mrf.mxu0  ;;  %v6617_v28 = vld [vmem:[%s9737_s24 + $0x78] sm:$0xff] }
 0x77a   : > { %v6580_v17 = vmax.f32 %v6548_v12, 0.0  ;;  %v6407_v12 = vadd.f32 %v6406_v45, %v6317_v7 }
 0x77c   : > { %v6644_v37 = vadd.f32 %v6612_v60, %v6580_v17 }
 0x77d   : > { %v6485_v42 = vpop.f32.mrf.mxu2 }
 0x77e   : > { %6676 = vst [vmem:[%s9737_s24 + $0x50] sm:$0xff] %v6644_v37  ;;  %v6486_v63 = vadd.f32 %v6485_v42, %v6397_v10  ;;  %v6414_v57 = vpop.f32.mrf.mxu1  ;;  %v6410_v10 = vadd.f32 %v6409_v1, %v6320_v5  ;;  %v6619_v1 = vld [vmem:[%s9737_s24 + $0x88] sm:$0xff] }
 0x780   : > { %v6549_v39 = vadd.f32 %v6486_v63, %v11503_v32  ;;  %v9105_v32 = vld [vmem:[#allocation2 + $0x1d8] sm:$0xf0]  ;;  %v6325_v19 = vpop.f32.mrf.mxu0  ;;  %v6618_v63 = vld [vmem:[%s9737_s24 + $0x80] sm:$0xff] }
 0x781   : > { %v8571_v31 = vor.u32 %v9105_v32, %v8570_v33 }
 0x782   : > { %v6581_v40 = vmax.f32 %v6549_v39, 0.0  ;;  %6527 = vmatmul.bf16.gmra.mxu2 %v8559_v56  ;;  %v6412_v39 = vadd.f32 %v6411_v51, %v6322_v8 }
 0x784   : > { %v6645_v13 = vadd.f32 %v6613_v54, %v6581_v40 }
 0x785   : > { %v6488_v27 = vpop.f32.mrf.mxu2 }
 0x786   : > { %6677 = vst [vmem:[%s9737_s24 + $0x58] sm:$0xff] %v6645_v13  ;;  %v6489_v41 = vadd.f32 %v6488_v27, %v6400_v0  ;;  %v6416_v50 = vpop.f32.mrf.mxu1  ;;  %v6415_v27 = vadd.f32 %v6414_v57, %v6325_v19  ;;  %v6622_v57 = vld [vmem:[%s9737_s24 + $0xa0] sm:$0xff] }
 0x788   : > { %v6550_v14 = vadd.f32 %v6489_v41, %v11510_v48  ;;  %v6327_v6 = vpop.f32.mrf.mxu0 }
 0x78a   : > { %v6582_v58 = vmax.f32 %v6550_v14, 0.0 }
 0x78c   : > { %v6646_v62 = vadd.f32 %v6614_v34, %v6582_v58 }
 0x78d   : > { %v6490_v22 = vpop.f32.mrf.mxu2 }
 0x78e   : > { %6678 = vst [vmem:[%s9737_s24 + $0x60] sm:$0xff] %v6646_v62  ;;  %v6491_v49 = vadd.f32 %v6490_v22, %v6402_v3  ;;  %v6620_v3 = vld [vmem:[%s9737_s24 + $0x90] sm:$0xff]  ;;  %v6417_v62 = vadd.f32 %v6416_v50, %v6327_v6 }
 0x790   : > { %v6551_v11 = vadd.f32 %v6491_v49, %v11517_v18  ;;  %v6330_v56 = vpop.f32.mrf.mxu0 }
 0x792   : > { %v6583_v48 = vmax.f32 %v6551_v11, 0.0  ;;  %6532 = vmatmul.bf16.gmra.mxu2 %v8571_v31 }
 0x794   : > { %v6647_v38 = vadd.f32 %v6615_v9, %v6583_v48  ;;  %v6621_v48 = vld [vmem:[%s9737_s24 + $0x98] sm:$0xff] }
 0x795   : > { %v6493_v2 = vpop.f32.mrf.mxu2 }
 0x796   : > { %6679 = vst [vmem:[%s9737_s24 + $0x68] sm:$0xff] %v6647_v38  ;;  %v6494_v61 = vadd.f32 %v6493_v2, %v6405_v44 }
 0x798   : > { %v6552_v15 = vadd.f32 %v6494_v61, %v11524_v46 }
 0x79a   : > { %v6584_v53 = vmax.f32 %v6552_v15, 0.0 }
 0x79c   : > { %v6648_v20 = vadd.f32 %v6616_v4, %v6584_v53 }
 0x79d   : > { %v6495_v18 = vpop.f32.mrf.mxu2 }
 0x79e   : > { %6680 = vst [vmem:[%s9737_s24 + $0x70] sm:$0xff] %v6648_v20  ;;  %v6496_v17 = vadd.f32 %v6495_v18, %v6407_v12 }
 0x7a0   : > { %v6553_v29 = vadd.f32 %v6496_v17, %v11531_v26  ;;  %v6419_v26 = vpop.f32.mrf.mxu1  ;;  %v6623_v17 = vld [vmem:[%s9737_s24 + $0xa8] sm:$0xff] }
 0x7a1   : > { %v6420_v9 = vadd.f32 %v6419_v26, %v6330_v56  ;;  %v6625_v26 = vld [vmem:[%s9737_s24 + $0xb8] sm:$0xff] }
 0x7a2   : > { %v6585_v60 = vmax.f32 %v6553_v29, 0.0 }
 0x7a4   : > { %v6649_v37 = vadd.f32 %v6617_v28, %v6585_v60 }
 0x7a5   : > { %v6498_v46 = vpop.f32.mrf.mxu2 }
 0x7a6   : > { %6681 = vst [vmem:[%s9737_s24 + $0x78] sm:$0xff] %v6649_v37  ;;  %v6499_v42 = vadd.f32 %v6498_v46, %v6410_v10  ;;  %v6624_v46 = vld [vmem:[%s9737_s24 + $0xb0] sm:$0xff] }
 0x7a8   : > { %v6554_v7 = vadd.f32 %v6499_v42, %v11538_v36  ;;  %v6332_v36 = vpop.f32.mrf.mxu0  ;;  %v6421_v34 = vpop.f32.mrf.mxu1 }
 0x7a9   : > { %v6422_v53 = vadd.f32 %v6421_v34, %v6332_v36  ;;  %v6626_v36 = vld [vmem:[%s9737_s24 + $0xc0] sm:$0xff] }
 0x7aa   : > { %v6586_v45 = vmax.f32 %v6554_v7, 0.0 }
 0x7ac   : > { %v6650_v40 = vadd.f32 %v6618_v63, %v6586_v45 }
 0x7ad   : > { %v6500_v54 = vpop.f32.mrf.mxu2 }
 0x7ae   : > { %6682 = vst [vmem:[%s9737_s24 + $0x80] sm:$0xff] %v6650_v40  ;;  %v6501_v0 = vadd.f32 %v6500_v54, %v6412_v39 }
 0x7b0   : > { %v6555_v5 = vadd.f32 %v6501_v0, %v11545_v23  ;;  %v6335_v49 = vpop.f32.mrf.mxu0  ;;  %v6424_v51 = vpop.f32.mrf.mxu1 }
 0x7b1   : > { %v6425_v6 = vadd.f32 %v6424_v51, %v6335_v49 }
 0x7b2   : > { %v6587_v13 = vmax.f32 %v6555_v5, 0.0 }
 0x7b4   : > { %v6651_v41 = vadd.f32 %v6619_v1, %v6587_v13  ;;  %v12162_v1 = vld [vmem:[#allocation61_spill] sm:$0xff] }
 0x7b5   : > { %v6503_v14 = vpop.f32.mrf.mxu2 }
 0x7b6   : > { %6683 = vst [vmem:[%s9737_s24 + $0x88] sm:$0xff] %v6651_v41  ;;  %v6504_v58 = vadd.f32 %v6503_v14, %v6415_v27 }
 0x7b8   : > { %v6556_v33 = vadd.f32 %v6504_v58, %v11552_v43  ;;  %v6337_v61 = vpop.f32.mrf.mxu0  ;;  %v6426_v15 = vpop.f32.mrf.mxu1 }
 0x7b9   : > { %v6427_v42 = vadd.f32 %v6426_v15, %v6337_v61 }
 0x7ba   : > { %v6588_v32 = vmax.f32 %v6556_v33, 0.0 }
 0x7bc   : > { %v6652_v22 = vadd.f32 %v6620_v3, %v6588_v32  ;;  %v12163_v32 = vld [vmem:[#allocation71_spill] sm:$0xff] }
 0x7bd   : > { %v6505_v8 = vpop.f32.mrf.mxu2 }
 0x7be   : > { %6684 = vst [vmem:[%s9737_s24 + $0x90] sm:$0xff] %v6652_v22  ;;  %v6506_v23 = vadd.f32 %v6505_v8, %v6417_v62 }
 0x7c0   : > { %v6557_v31 = vadd.f32 %v6506_v23, %v11559_v30  ;;  %v6340_v29 = vpop.f32.mrf.mxu0  ;;  %v6627_v23 = vld [vmem:[%s9737_s24 + $0xc8] sm:$0xff] }
 0x7c2   : > { %v6589_v11 = vmax.f32 %v6557_v31, 0.0 }
 0x7c4   : > { %v6653_v44 = vadd.f32 %v6621_v48, %v6589_v11  ;;  %v12164_v48 = vld [vmem:[#allocation42_spill] sm:$0xff] }
 0x7c5   : > { %v6508_v43 = vpop.f32.mrf.mxu2 }
 0x7c6   : > { %6685 = vst [vmem:[%s9737_s24 + $0x98] sm:$0xff] %v6653_v44  ;;  %v6509_v38 = vadd.f32 %v6508_v43, %v6420_v9 }
 0x7c8   : > { %v6558_v2 = vadd.f32 %v6509_v38, %v11566_v55  ;;  %v6429_v55 = vpop.f32.mrf.mxu1  ;;  %v6628_v38 = vld [vmem:[%s9737_s24 + $0xd0] sm:$0xff] }
 0x7c9   : > { %v6430_v54 = vadd.f32 %v6429_v55, %v6340_v29 }
 0x7ca   : > { %v6590_v19 = vmax.f32 %v6558_v2, 0.0 }
 0x7cc   : > { %v6654_v4 = vadd.f32 %v6622_v57, %v6590_v19 }
 0x7cd   : > { %v6510_v30 = vpop.f32.mrf.mxu2 }
 0x7ce   : > { %6686 = vst [vmem:[%s9737_s24 + $0xa0] sm:$0xff] %v6654_v4  ;;  %v6511_v12 = vadd.f32 %v6510_v30, %v6422_v53 }
 0x7d0   : > { %v6559_v20 = vadd.f32 %v6511_v12, %v11573_v24  ;;  %v6342_v24 = vpop.f32.mrf.mxu0  ;;  %v6431_v56 = vpop.f32.mrf.mxu1  ;;  %v6629_v12 = vld [vmem:[%s9737_s24 + $0xd8] sm:$0xff] }
 0x7d1   : > { %v6432_v58 = vadd.f32 %v6431_v56, %v6342_v24 }
 0x7d2   : > { %v6591_v18 = vmax.f32 %v6559_v20, 0.0 }
 0x7d4   : > { %v6655_v60 = vadd.f32 %v6623_v17, %v6591_v18 }
 0x7d5   : > { %v6513_v50 = vpop.f32.mrf.mxu2 }
 0x7d6   : > { %6687 = vst [vmem:[%s9737_s24 + $0xa8] sm:$0xff] %v6655_v60  ;;  %v6514_v28 = vadd.f32 %v6513_v50, %v6425_v6  ;;  %v6630_v50 = vld [vmem:[%s9737_s24 + $0xe0] sm:$0xff] }
 0x7d8   : > { %v6560_v10 = vadd.f32 %v6514_v28, %v11580_v25  ;;  %v6345_v13 = vpop.f32.mrf.mxu0  ;;  %v6434_v41 = vpop.f32.mrf.mxu1 }
 0x7d9   : > { %v6435_v49 = vadd.f32 %v6434_v41, %v6345_v13  ;;  %v6633_v41 = vld [vmem:[%s9737_s24 + $0xf8] sm:$0xff] }
 0x7da   : > { %v6592_v37 = vmax.f32 %v6560_v10, 0.0 }
 0x7dc   : > { %v6656_v7 = vadd.f32 %v6624_v46, %v6592_v37 }
 0x7dd   : > { %v6515_v45 = vpop.f32.mrf.mxu2 }
 0x7de   : > { %6688 = vst [vmem:[%s9737_s24 + $0xb0] sm:$0xff] %v6656_v7  ;;  %v6516_v63 = vadd.f32 %v6515_v45, %v6427_v42 }
 0x7e0   : > { %v6561_v39 = vadd.f32 %v6516_v63, %v11587_v59  ;;  %v6347_v62 = vpop.f32.mrf.mxu0  ;;  %v6436_v8 = vpop.f32.mrf.mxu1  ;;  %v6631_v63 = vld [vmem:[%s9737_s24 + $0xe8] sm:$0xff] }
 0x7e1   : > { %v6437_v61 = vadd.f32 %v6436_v8, %v6347_v62 }
 0x7e2   : > { %v6593_v40 = vmax.f32 %v6561_v39, 0.0 }
 0x7e4   : > { %v6657_v0 = vadd.f32 %v6625_v26, %v6593_v40 }
 0x7e5   : > { %v6518_v5 = vpop.f32.mrf.mxu2 }
 0x7e6   : > { %6689 = vst [vmem:[%s9737_s24 + $0xb8] sm:$0xff] %v6657_v0  ;;  %v6519_v25 = vadd.f32 %v6518_v5, %v6430_v54  ;;  %v6632_v5 = vld [vmem:[%s9737_s24 + $0xf0] sm:$0xff] }
 0x7e8   : > { %v6562_v27 = vadd.f32 %v6519_v25, %v12162_v1  ;;  %v6350_v43 = vpop.f32.mrf.mxu0  ;;  %v6439_v2 = vpop.f32.mrf.mxu1 }
 0x7e9   : > { %v6440_v4 = vadd.f32 %v6439_v2, %v6350_v43 }
 0x7ea   : > { %v6594_v14 = vmax.f32 %v6562_v27, 0.0 }
 0x7ec   : > { %v6658_v34 = vadd.f32 %v6626_v36, %v6594_v14 }
 0x7ed   : > { %v6520_v33 = vpop.f32.mrf.mxu2 }
 0x7ee   : > { %6690 = vst [vmem:[%s9737_s24 + $0xc0] sm:$0xff] %v6658_v34  ;;  %v6521_v59 = vadd.f32 %v6520_v33, %v6432_v58 }
 0x7f0   : > { %v6563_v3 = vadd.f32 %v6521_v59, %v12163_v32  ;;  %v6352_v18 = vpop.f32.mrf.mxu0  ;;  %v6441_v17 = vpop.f32.mrf.mxu1 }
 0x7f1   : > { %v6442_v28 = vadd.f32 %v6441_v17, %v6352_v18 }
 0x7f2   : > { %v6595_v22 = vmax.f32 %v6563_v3, 0.0 }
 0x7f4   : > { %v6659_v31 = vadd.f32 %v6627_v23, %v6595_v22 }
 0x7f5   : > { %v6523_v51 = vpop.f32.mrf.mxu2 }
 0x7f6   : > { %6691 = vst [vmem:[%s9737_s24 + $0xc8] sm:$0xff] %v6659_v31  ;;  %v6524_v11 = vadd.f32 %v6523_v51, %v6435_v49 }
 0x7f8   : > { %v6564_v9 = vadd.f32 %v6524_v11, %v12164_v48  ;;  %v6355_v46 = vpop.f32.mrf.mxu0  ;;  %v6444_v42 = vpop.f32.mrf.mxu1 }
 0x7f9   : > { %v6445_v45 = vadd.f32 %v6444_v42, %v6355_v46 }
 0x7fa   : > { %v6596_v44 = vmax.f32 %v6564_v9, 0.0 }
 0x7fc   : > { %v6660_v19 = vadd.f32 %v6628_v38, %v6596_v44 }
 0x7fd   : > { %v6525_v15 = vpop.f32.mrf.mxu2 }
 0x7fe   : > { %6692 = vst [vmem:[%s9737_s24 + $0xd0] sm:$0xff] %v6660_v19  ;;  %v6526_v57 = vadd.f32 %v6525_v15, %v6437_v61 }
 0x800   : > { %v6565_v53 = vadd.f32 %v6526_v57, %v11637_v35  ;;  %v6357_v26 = vpop.f32.mrf.mxu0  ;;  %v6446_v54 = vpop.f32.mrf.mxu1 }
 0x802   : > { %v6597_v30 = vmax.f32 %v6565_v53, 0.0 }
 0x804   : > { %v6661_v20 = vadd.f32 %v6629_v12, %v6597_v30 }
 0x805   : > { %v6528_v29 = vpop.f32.mrf.mxu2 }
 0x806   : > { %6693 = vst [vmem:[%s9737_s24 + $0xd8] sm:$0xff] %v6661_v20  ;;  %v6529_v6 = vadd.f32 %v6528_v29, %v6440_v4 }
 0x808   : > { %v6566_v60 = vadd.f32 %v6529_v6, %v11656_v47 }
 0x80a   : > { %v6598_v55 = vmax.f32 %v6566_v60, 0.0 }
 0x80c   : > { %v6662_v10 = vadd.f32 %v6630_v50, %v6598_v55 }
 0x80d   : > { %v6530_v37 = vpop.f32.mrf.mxu2 }
 0x80e   : > { %6694 = vst [vmem:[%s9737_s24 + $0xe0] sm:$0xff] %v6662_v10  ;;  %v6531_v35 = vadd.f32 %v6530_v37, %v6442_v28 }
 0x810   : > { %v6567_v7 = vadd.f32 %v6531_v35, %v11676_v52  ;;  %v6447_v52 = vadd.f32 %v6446_v54, %v6357_v26 }
 0x812   : > { %v6599_v24 = vmax.f32 %v6567_v7, 0.0 }
 0x814   : > { %v6663_v56 = vadd.f32 %v6631_v63, %v6599_v24 }
 0x815   : > { %v6533_v47 = vpop.f32.mrf.mxu2 }
 0x816   : > { %6695 = vst [vmem:[%s9737_s24 + $0xe8] sm:$0xff] %v6663_v56  ;;  %v6534_v39 = vadd.f32 %v6533_v47, %v6445_v45 }
 0x818   : > { %v6568_v40 = vadd.f32 %v6534_v39, %v11694_v21 }
 0x81a   : > { %v6600_v0 = vmax.f32 %v6568_v40, 0.0 }
 0x81c   : > { %v6664_v25 = vadd.f32 %v6632_v5, %v6600_v0 }
 0x81d   : > { %v6535_v13 = vpop.f32.mrf.mxu2 }
 0x81e   : > { %6696 = vst [vmem:[%s9737_s24 + $0xf0] sm:$0xff] %v6664_v25  ;;  %v6536_v1 = vadd.f32 %v6535_v13, %v6447_v52 }
 0x820   : > { %v6569_v21 = vadd.f32 %v6536_v1, %v11704_v16 }
 0x822   : > { %v6601_v27 = vmax.f32 %v6569_v21, 0.0 }
 0x824   : > { %v6665_v14 = vadd.f32 %v6633_v41, %v6601_v27 }
 0x826   : > { %6697 = vst [vmem:[%s9737_s24 + $0xf8] sm:$0xff] %v6665_v14 }
 0x827   : > { %9433 = shalt.err (!%p9430_p10)
}
 0x828   : > { %s9495_s4 = smov 128   ;;  %s9496_s24 = smov 8  }
 0x829   : > { %9173 = dma.vmem_to_hbm [thread:$0]  (%p9635_p3), %s6712_s16, 4096, %s6714_s23, %s6699_s9, %s9495_s4, %s9495_s4, %s9496_s24  }
 0x82a PF: > { %s6728_s2 = sand.u32 1, %s9472_s27   ;;  %p12165_p12 = scmp.ge.s32.totalorder %s9484_s30, 2 }
 0x82b   : > { %s6729_s0 = scalar_lea.sflag [#allocation5], %s6728_s2 }
 0x82c   : > { %p9193_p13 = pnand %p12165_p12, %p9577_p6 }
 0x82e   : > { %p9194_p0 = pneg %p9193_p13 }
 0x830   : > { %9467 = dma.done.wait (%p9194_p0), %s6729_s0, 4096  }
 0x831   : > { %9469 = vsyncadd (%p9194_p0), %s6729_s0, 4294963200  ;;  %p23_p5 = scmp.ge.s32.totalorder %s9625_s13, 4   ;;  %s12166_s27 = smov %s9476_s28 }
 0x832   : > { %s12167_s28 = smov %s9480_s29  ;;  %s12168_s29 = smov %s9640_s17 }
 0x833   : > { %s12169_s30 = smov %s9625_s13  ;;  %25 = sbr.rel (!%p23_p5) target bundleno = 11 (0xb), region = 118 }
 0x838   :  { %6735 = vsyncpa [#allocation4], 1 }
 0x839   :  { %6737 = vsyncpa [#allocation4 + $0x1], 1 }
 0x83a   :  { %6738 = vsyncpa [#allocation7], 1 }
 0x83b   :  { %6740 = vsyncpa [#allocation7 + $0x1], 1 }
 0x83c   :  { %6741 = vsyncpa [#allocation10], 1 }
 0x83d   :  { %6742 = vsyncpa [#allocation5], 1 }
 0x83e   :  { %6744 = vsyncpa [#allocation5 + $0x1], 1 }

</bundles_post_ra>
